<compile_context>
chip_gen: v5e
topology: v5e:2x2
jax: 0.10.0
libtpu: 0.0.40
codegen_flags: <defaults>
</compile_context>

<pallas_src>
import jax
import jax.numpy as jnp
from jax import lax
from jax.experimental import pallas as pl
from jax.experimental.pallas import tpu as pltpu


def _round_up(x, m):
    return ((x + m - 1) // m) * m


# ------------------------- fused LSTM + head kernel -------------------------

def _make_fused_lstm_kernel(num_layers, t_chunk, b_blk, hp, h_real, in_feat,
                            lp, unroll):
    """Kernel specialized for (num_layers, t_chunk, b_blk, Hp, H, I, Lp)."""
    inv_h = 1.0 / float(h_real)

    def kernel(*refs):
        x_ref, len_ref = refs[0], refs[1]
        w_refs = refs[2:2 + 3 * num_layers]
        nh = 2 + 3 * num_layers
        ln_w_ref, ln_b_ref, w1_ref, b1_ref, w2_ref, b2_ref = refs[nh:nh + 6]
        out_ref = refs[nh + 6]
        scratch = refs[nh + 7:]
        if num_layers > 1:
            gx_scr, h_scr, c_scr, pool_scr, seq_scr = scratch
        else:
            gx_scr, h_scr, c_scr, pool_scr = scratch
            seq_scr = None

        tc = pl.program_id(1)
        n_tc = pl.num_programs(1)

        # New batch chunk (t == 0): zero the recurrent carries + pooled sum.
        @pl.when(tc == 0)
        def _init():
            h_scr[...] = jnp.zeros_like(h_scr)
            c_scr[...] = jnp.zeros_like(c_scr)
            pool_scr[...] = jnp.zeros_like(pool_scr)

        len_col = len_ref[...]                                 # (b_blk, 1) f32
        t_base = tc * t_chunk                                  # global step base

        for layer in range(num_layers):
            w_ih_ref, w_hh_ref, b_ref = w_refs[3 * layer:3 * layer + 3]
            is_last = layer == num_layers - 1

            # Hoisted input projection for this time chunk: ONE bf16 MXU
            # matmul over all t_chunk steps (bias folded in, f32 result).
            if layer == 0:
                src = x_ref[...].reshape(t_chunk * b_blk, in_feat)
            else:
                src = seq_scr[...]                             # bf16
            gx_scr[...] = jnp.dot(
                src, w_ih_ref[...],
                preferred_element_type=jnp.float32) + b_ref[...]

            w_hh = w_hh_ref[...]                               # (Hp, 4Hp) bf16

            def cell(t, h, c):
                row = pl.multiple_of(t * b_blk, b_blk)         # aligned slab
                gates = gx_scr[pl.ds(row, b_blk), :] + jnp.dot(
                    h.astype(jnp.bfloat16), w_hh,
                    preferred_element_type=jnp.float32)        # (b_blk, 4Hp)
                # Lane-aligned gate slices (hp is a multiple of 128).
                i_g = jax.nn.sigmoid(gates[:, 0 * hp:1 * hp])
                f_g = jax.nn.sigmoid(gates[:, 1 * hp:2 * hp])
                g_g = jnp.tanh(gates[:, 2 * hp:3 * hp])
                o_g = jax.nn.sigmoid(gates[:, 3 * hp:4 * hp])
                c = f_g * c + i_g * g_g
                h = o_g * jnp.tanh(c)
                return h, c

            if is_last:
                def body(t, carry):
                    h, c, pooled = carry
                    h, c = cell(t, h, c)
                    # Fused masked-mean accumulation: the last layer's full
                    # sequence is never materialized anywhere.
                    mask = ((t_base + t).astype(jnp.float32) < len_col
                            ).astype(jnp.float32)              # (b_blk, 1)
                    return h, c, pooled + h * mask

                h_n, c_n, pool_n = lax.fori_loop(
                    0, t_chunk, body,
                    (h_scr[layer], c_scr[layer], pool_scr[...]),
                    unroll=unroll)
                pool_scr[...] = pool_n
            else:
                def body(t, carry):
                    h, c = carry
                    h, c = cell(t, h, c)
                    row = pl.multiple_of(t * b_blk, b_blk)
                    seq_scr[pl.ds(row, b_blk), :] = h.astype(jnp.bfloat16)
                    return h, c

                h_n, c_n = lax.fori_loop(
                    0, t_chunk, body, (h_scr[layer], c_scr[layer]),
                    unroll=unroll)

            h_scr[layer] = h_n
            c_scr[layer] = c_n

        # ------- head (once per batch chunk, on the final time chunk) -------
        @pl.when(tc == n_tc - 1)
        def _head():
            mean = pool_scr[...] / len_col                     # (b_blk, Hp)
            # LayerNorm statistics over the REAL H lanes only (pad lanes = 0).
            lane = lax.broadcasted_iota(jnp.int32, (1, hp), 1)
            lane_mask = (lane < h_real).astype(jnp.float32)
            mu = jnp.sum(mean, axis=-1, keepdims=True) * inv_h
            diff = (mean - mu) * lane_mask
            var = jnp.sum(diff * diff, axis=-1, keepdims=True) * inv_h
            normed = diff * lax.rsqrt(var + 1e-5)              # torch LN eps
            normed = normed * ln_w_ref[...] + ln_b_ref[...]
            h1 = jnp.dot(normed.astype(jnp.bfloat16), w1_ref[...],
                         preferred_element_type=jnp.float32) + b1_ref[...]
            h1 = jnp.maximum(h1, 0.0)
            out_ref[...] = jnp.dot(h1.astype(jnp.bfloat16), w2_ref[...],
                                   preferred_element_type=jnp.float32
                                   ) + b2_ref[...]

    return kernel


# --------------------------------- wrapper -----------------------------------

def _pad_gate_cols(w, hp):
    """(rows, 4H) -> (rows, 4*Hp): zero-pad each gate's columns to Hp."""
    rows, four_h = w.shape
    h = four_h // 4
    w = w.reshape(rows, 4, h)
    w = jnp.pad(w, ((0, 0), (0, 0), (0, hp - h)))
    return w.reshape(rows, 4 * hp)


def _pad_rows(w, rows_p):
    return jnp.pad(w, ((0, rows_p - w.shape[0]), (0, 0)))


def _pad_cols(w, cols_p):
    return jnp.pad(w, ((0, 0), (0, cols_p - w.shape[1])))


def _nbytes(shape, dtype):
    n = 1
    for d in shape:
        n *= int(d)
    return n * jnp.dtype(dtype).itemsize


def _const_spec(shape):
    nd = len(shape)

    def imap(c, t):
        return (0,) * nd

    return pl.BlockSpec(shape, imap)


def fused_lstm_forward(params, x_bti, lengths, *, b_blk=None, t_chunk=None,
                       unroll=8):
    """x_bti: (B, T, I) batch_first; lengths: (B,) int -> (B, num_labels)."""
    lstm_params = params["lstm"]
    num_layers = len(lstm_params)
    B, T, I = x_bti.shape
    H = lstm_params[0][1].shape[0]                  # w_hh is (H, 4H)
    L = params["w2"].shape[1]

    Hp = _round_up(H, 128)                          # lane-aligned gate slices
    Lp = _round_up(L, 128)                          # lane-dense logits block

    # Batch tile: sweep parameter; defaults to filling MXU sublanes (<=128)
    # without exceeding the (16-padded) batch.  Multiple of 16 keeps the bf16
    # (t_chunk, b_blk, I) -> (t_chunk*b_blk, I) merge layout-preserving.
    if b_blk is None:
        b_blk = min(128, _round_up(B, 16))
    b_blk = max(16, _round_up(b_blk, 16))
    n_bc = pl.cdiv(B, b_blk)
    B_pad = n_bc * b_blk

    # Time tile: bounds gx/seq scratch (critical for v7x's 64 MiB VMEM).
    if t_chunk is None:
        t_chunk = min(T, 64)
    t_chunk = min(t_chunk, T)
    n_tc = pl.cdiv(T, t_chunk)
    T_pad = n_tc * t_chunk
    unroll = max(1, min(unroll, t_chunk))

    # ONE transpose + pad; the BlockSpec DMAs (t_chunk, b_blk, I) blocks, so
    # there are no further HBM passes over the input.
    x = jnp.transpose(x_bti, (1, 0, 2)).astype(jnp.bfloat16)     # (T, B, I)
    x = jnp.pad(x, ((0, T_pad - T), (0, B_pad - B), (0, 0)))

    lens = jnp.pad(lengths.astype(jnp.float32), (0, B_pad - B),
                   constant_values=1.0)                          # no /0 on pads
    lens = lens.reshape(B_pad, 1)

    in_specs = [
        pl.BlockSpec((t_chunk, b_blk, I), lambda c, t: (t, c, 0)),
        pl.BlockSpec((b_blk, 1), lambda c, t: (c, 0)),
    ]

    # Weights: per-gate column padding to Hp (padded lanes stay exactly 0
    # through the recurrence), bf16 for all matmul operands, f32 biases.
    flat_w = []
    for li, (w_ih, w_hh, b) in enumerate(lstm_params):
        wi = _pad_gate_cols(w_ih, Hp)
        if li > 0:
            wi = _pad_rows(wi, Hp)
        wh = _pad_rows(_pad_gate_cols(w_hh, Hp), Hp)
        bb = _pad_gate_cols(b, Hp)
        flat_w += [wi.astype(jnp.bfloat16), wh.astype(jnp.bfloat16),
                   bb.astype(jnp.float32)]

    head_w = [
        _pad_cols(params["ln_w"], Hp).astype(jnp.float32),
        _pad_cols(params["ln_b"], Hp).astype(jnp.float32),
        _pad_cols(_pad_rows(params["w1"], Hp), Hp).astype(jnp.bfloat16),
        _pad_cols(params["b1"], Hp).astype(jnp.float32),
        _pad_cols(_pad_rows(params["w2"], Hp), Lp).astype(jnp.bfloat16),
        _pad_cols(params["b2"], Lp).astype(jnp.float32),
    ]

    # NOTE(perf): constant index maps -> blocks are never re-fetched across
    # the grid, but Pallas still double-buffers them; for H >= 512 switch the
    # weights to single-buffered whole-array VMEM residency to reclaim VMEM.
    in_specs += [_const_spec(tuple(w.shape)) for w in flat_w]
    in_specs += [_const_spec(tuple(w.shape)) for w in head_w]

    scratch = [
        pltpu.VMEM((t_chunk * b_blk, 4 * Hp), jnp.float32),   # gates, cur layer
        pltpu.VMEM((num_layers, b_blk, Hp), jnp.float32),     # h carry
        pltpu.VMEM((num_layers, b_blk, Hp), jnp.float32),     # c carry
        pltpu.VMEM((b_blk, Hp), jnp.float32),                 # pooled sum
    ]
    if num_layers > 1:                                        # inter-layer seq
        scratch.append(pltpu.VMEM((t_chunk * b_blk, Hp), jnp.bfloat16))

    # Explicit VMEM budget: scratch + double-buffered pipelined blocks +
    # double-buffered weight blocks, with headroom, capped below physical.
    est = (_nbytes((t_chunk * b_blk, 4 * Hp), jnp.float32)
           + 2 * _nbytes((num_layers, b_blk, Hp), jnp.float32)
           + _nbytes((b_blk, Hp), jnp.float32)
           + (_nbytes((t_chunk * b_blk, Hp), jnp.bfloat16)
              if num_layers > 1 else 0)
           + 2 * _nbytes((t_chunk, b_blk, I), jnp.bfloat16)
           + 2 * _nbytes((b_blk, 1), jnp.float32)
           + 2 * _nbytes((b_blk, Lp), jnp.float32)
           + 2 * sum(_nbytes(w.shape, w.dtype) for w in flat_w + head_w))
    try:
        vmem_cap = int(pltpu.get_tpu_info().vmem_capacity_bytes)
    except Exception:
        vmem_cap = 64 * 2 ** 20                               # v7x lower bound
    vmem_limit = int(min(max(2 * est, 32 * 2 ** 20), vmem_cap - 4 * 2 ** 20))

    kernel = _make_fused_lstm_kernel(num_layers, t_chunk, b_blk, Hp, H, I, Lp,
                                     unroll)

    out = pl.pallas_call(
        kernel,
        out_shape=jax.ShapeDtypeStruct((B_pad, Lp), jnp.float32),
        grid_spec=pltpu.PrefetchScalarGridSpec(
            num_scalar_prefetch=0,
            grid=(n_bc, n_tc),
            in_specs=in_specs,
            out_specs=pl.BlockSpec((b_blk, Lp), lambda c, t: (c, 0)),
            scratch_shapes=scratch,
        ),
        compiler_params=pltpu.CompilerParams(
            # Batch chunks are independent; time chunks carry h/c/pooled.
            # TODO(synk): verify the batch axis actually spans both v7x
            # TensorCores; if not, switch it to pltpu.CORE_PARALLEL.
            dimension_semantics=("parallel", "arbitrary"),
            vmem_limit_bytes=vmem_limit,
        ),
    )(x, lens, *flat_w, *head_w)

    return out[:B, :L]


lstm_model_forward = jax.jit(fused_lstm_forward,
                             static_argnames=("b_blk", "t_chunk", "unroll"))


# ------------------------------- parameters ---------------------------------

def init_params(key, input_size, hidden_size, num_layers, num_labels):
    H = hidden_size
    k = 1.0 / jnp.sqrt(jnp.float32(H))
    params = {"lstm": []}
    for layer in range(num_layers):
        in_sz = input_size if layer == 0 else H
        key, k1, k2, k3, k4 = jax.random.split(key, 5)
        w_ih = jax.random.uniform(k1, (in_sz, 4 * H), jnp.float32, -k, k)
        w_hh = jax.random.uniform(k2, (H, 4 * H), jnp.float32, -k, k)
        b_ih = jax.random.uniform(k3, (1, 4 * H), jnp.float32, -k, k)
        b_hh = jax.random.uniform(k4, (1, 4 * H), jnp.float32, -k, k)
        params["lstm"].append((w_ih, w_hh, b_ih + b_hh))
    params["ln_w"] = jnp.ones((1, H), jnp.float32)
    params["ln_b"] = jnp.zeros((1, H), jnp.float32)
    key, k5, k6, k7, k8 = jax.random.split(key, 5)
    params["w1"] = jax.random.uniform(k5, (H, H), jnp.float32, -k, k)
    params["b1"] = jax.random.uniform(k6, (1, H), jnp.float32, -k, k)
    params["w2"] = jax.random.uniform(k7, (H, num_labels), jnp.float32, -k, k)
    params["b2"] = jax.random.uniform(k8, (1, num_labels), jnp.float32, -k, k)
    return params


# --------------------------- pure-JAX reference ------------------------------

def _reference_forward(params, x_bti, lengths):
    """Reference mirroring the kernel's numerics: bf16 matmul operands,
    f32 accumulation, f32 gates/state (same math as the PyTorch module)."""
    bf16, f32 = jnp.bfloat16, jnp.float32
    x = jnp.transpose(x_bti.astype(f32), (1, 0, 2))              # (T, B, I)
    T, B, _ = x.shape
    seq = x
    for (w_ih, w_hh, b) in params["lstm"]:
        H = w_hh.shape[0]
        wi, wh = w_ih.astype(bf16), w_hh.astype(bf16)
        h = jnp.zeros((B, H), f32)
        c = jnp.zeros((B, H), f32)
        outs = []
        for t in range(T):
            g = (jnp.dot(seq[t].astype(bf16), wi, preferred_element_type=f32)
                 + jnp.dot(h.astype(bf16), wh, preferred_element_type=f32)
                 + b)
            i_g = jax.nn.sigmoid(g[:, :H])
            f_g = jax.nn.sigmoid(g[:, H:2 * H])
            g_g = jnp.tanh(g[:, 2 * H:3 * H])
            o_g = jax.nn.sigmoid(g[:, 3 * H:])
            c = f_g * c + i_g * g_g
            h = o_g * jnp.tanh(c)
            outs.append(h)
        seq = jnp.stack(outs, axis=0)                            # (T, B, H)
    seq_bth = jnp.transpose(seq, (1, 0, 2))
    mask = (jnp.arange(T)[None, :] < lengths[:, None]).astype(f32)
    mean = (seq_bth * mask[:, :, None]).sum(1) / lengths.astype(f32)[:, None]
    mu = mean.mean(-1, keepdims=True)
    var = ((mean - mu) ** 2).mean(-1, keepdims=True)
    normed = (mean - mu) / jnp.sqrt(var + 1e-5)
    normed = normed * params["ln_w"] + params["ln_b"]
    h1 = jnp.dot(normed.astype(bf16), params["w1"].astype(bf16),
                 preferred_element_type=f32) + params["b1"]
    h1 = jnp.maximum(h1, 0.0)
    return jnp.dot(h1.astype(bf16), params["w2"].astype(bf16),
                   preferred_element_type=f32) + params["b2"]


# ----------------------------------- main ------------------------------------

if __name__ == "__main__":
    B, T, INPUT, HIDDEN, LAYERS, LABELS = 2, 8, 16, 32, 2, 8

    key = jax.random.PRNGKey(0)
    key, kx = jax.random.split(key)
    x = jax.random.normal(kx, (B, T, INPUT), jnp.float32)
    lengths = jnp.array([8, 5], jnp.int32)

    params = init_params(key, INPUT, HIDDEN, LAYERS, LABELS)

    out = lstm_model_forward(params, x, lengths)
    jax.block_until_ready(out)
    assert out.shape == (B, LABELS), out.shape

    ref = _reference_forward(params, x, lengths)
    err = jnp.max(jnp.abs(out - ref))
    assert jnp.allclose(out, ref, atol=5e-3, rtol=5e-3), f"max abs err {err}"

    print("KERNEL_OK")
</pallas_src>

<mosaic_0001>
module attributes {stable_mosaic.version = 11 : i64} {
  func.func @kernel(%arg0: i32, %arg1: i32, %arg2: memref<8x16x16xbf16, #tpu.memory_space<vmem>>, %arg3: memref<16x1xf32, #tpu.memory_space<vmem>>, %arg4: memref<16x512xbf16, #tpu.memory_space<vmem>>, %arg5: memref<128x512xbf16, #tpu.memory_space<vmem>>, %arg6: memref<1x512xf32, #tpu.memory_space<vmem>>, %arg7: memref<128x512xbf16, #tpu.memory_space<vmem>>, %arg8: memref<128x512xbf16, #tpu.memory_space<vmem>>, %arg9: memref<1x512xf32, #tpu.memory_space<vmem>>, %arg10: memref<1x128xf32, #tpu.memory_space<vmem>>, %arg11: memref<1x128xf32, #tpu.memory_space<vmem>>, %arg12: memref<128x128xbf16, #tpu.memory_space<vmem>>, %arg13: memref<1x128xf32, #tpu.memory_space<vmem>>, %arg14: memref<128x128xbf16, #tpu.memory_space<vmem>>, %arg15: memref<1x128xf32, #tpu.memory_space<vmem>>, %arg16: memref<16x128xf32, #tpu.memory_space<vmem>>, %arg17: memref<128x512xf32, #tpu.memory_space<vmem>>, %arg18: memref<2x16x128xf32, #tpu.memory_space<vmem>>, %arg19: memref<2x16x128xf32, #tpu.memory_space<vmem>>, %arg20: memref<16x128xf32, #tpu.memory_space<vmem>>, %arg21: memref<128x128xbf16, #tpu.memory_space<vmem>>) attributes {dimension_semantics = [#tpu.dimension_semantics<parallel>, #tpu.dimension_semantics<arbitrary>], iteration_bounds = array<i64: 1, 1>, scalar_prefetch = 0 : i64, scratch_operands = 5 : i64, tpu.core_type = #tpu.core_type<tc>, window_params = [{transform_indices = @transform_0, window_bounds = array<i64: 8, 16, 16>}, {transform_indices = @transform_1, window_bounds = array<i64: 16, 1>}, {pipeline_mode = #tpu.pipeline_mode<synchronous>, transform_indices = @transform_2, window_bounds = array<i64: 16, 512>}, {pipeline_mode = #tpu.pipeline_mode<synchronous>, transform_indices = @transform_3, window_bounds = array<i64: 128, 512>}, {pipeline_mode = #tpu.pipeline_mode<synchronous>, transform_indices = @transform_4, window_bounds = array<i64: 1, 512>}, {pipeline_mode = #tpu.pipeline_mode<synchronous>, transform_indices = @transform_5, window_bounds = array<i64: 128, 512>}, {pipeline_mode = #tpu.pipeline_mode<synchronous>, transform_indices = @transform_6, window_bounds = array<i64: 128, 512>}, {pipeline_mode = #tpu.pipeline_mode<synchronous>, transform_indices = @transform_7, window_bounds = array<i64: 1, 512>}, {pipeline_mode = #tpu.pipeline_mode<synchronous>, transform_indices = @transform_8, window_bounds = array<i64: 1, 128>}, {pipeline_mode = #tpu.pipeline_mode<synchronous>, transform_indices = @transform_9, window_bounds = array<i64: 1, 128>}, {pipeline_mode = #tpu.pipeline_mode<synchronous>, transform_indices = @transform_10, window_bounds = array<i64: 128, 128>}, {pipeline_mode = #tpu.pipeline_mode<synchronous>, transform_indices = @transform_11, window_bounds = array<i64: 1, 128>}, {pipeline_mode = #tpu.pipeline_mode<synchronous>, transform_indices = @transform_12, window_bounds = array<i64: 128, 128>}, {pipeline_mode = #tpu.pipeline_mode<synchronous>, transform_indices = @transform_13, window_bounds = array<i64: 1, 128>}, {transform_indices = @transform_14, window_bounds = array<i64: 16, 128>}]} {
    %c0_i32 = arith.constant 0 : i32
    %0 = arith.cmpi eq, %arg1, %c0_i32 : i32
    %1 = arith.extui %0 : i1 to i32
    %c0_i32_0 = arith.constant 0 : i32
    %2 = arith.cmpi ne, %1, %c0_i32_0 : i32
    scf.if %2 {
      %cst_175 = arith.constant 0.000000e+00 : f32
      %671 = vector.broadcast %cst_175 : f32 to vector<2x16x128xf32>
      %c0_176 = arith.constant 0 : index
      %c0_177 = arith.constant 0 : index
      %c0_178 = arith.constant 0 : index
      %672 = vector.load %arg18[%c0_176, %c0_177, %c0_178] : memref<2x16x128xf32, #tpu.memory_space<vmem>>, vector<2x16x128xf32>
      tpu.vector_store %arg18[%c0_176, %c0_177, %c0_178], %671 {strides = array<i32>} : memref<2x16x128xf32, #tpu.memory_space<vmem>>, vector<2x16x128xf32>,
      %cst_179 = arith.constant 0.000000e+00 : f32
      %673 = vector.broadcast %cst_179 : f32 to vector<2x16x128xf32>
      %c0_180 = arith.constant 0 : index
      %c0_181 = arith.constant 0 : index
      %c0_182 = arith.constant 0 : index
      %674 = vector.load %arg19[%c0_180, %c0_181, %c0_182] : memref<2x16x128xf32, #tpu.memory_space<vmem>>, vector<2x16x128xf32>
      tpu.vector_store %arg19[%c0_180, %c0_181, %c0_182], %673 {strides = array<i32>} : memref<2x16x128xf32, #tpu.memory_space<vmem>>, vector<2x16x128xf32>,
      %cst_183 = arith.constant 0.000000e+00 : f32
      %675 = vector.broadcast %cst_183 : f32 to vector<16x128xf32>
      %c0_184 = arith.constant 0 : index
      %c0_185 = arith.constant 0 : index
      %676 = vector.load %arg20[%c0_184, %c0_185] : memref<16x128xf32, #tpu.memory_space<vmem>>, vector<16x128xf32>
      tpu.vector_store %arg20[%c0_184, %c0_185], %675 {strides = array<i32>} : memref<16x128xf32, #tpu.memory_space<vmem>>, vector<16x128xf32>,
    } else {
    }
    %c0 = arith.constant 0 : index
    %c0_1 = arith.constant 0 : index
    %3 = vector.load %arg3[%c0, %c0_1] : memref<16x1xf32, #tpu.memory_space<vmem>>, vector<16x1xf32>
    %c8_i32 = arith.constant 8 : i32
    %4 = arith.muli %arg1, %c8_i32 : i32
    %c0_2 = arith.constant 0 : index
    %c0_3 = arith.constant 0 : index
    %c0_4 = arith.constant 0 : index
    %5 = vector.load %arg2[%c0_2, %c0_3, %c0_4] : memref<8x16x16xbf16, #tpu.memory_space<vmem>>, vector<8x16x16xbf16>
    %6 = vector.shape_cast %5 : vector<8x16x16xbf16> to vector<128x16xbf16>
    %c0_5 = arith.constant 0 : index
    %c0_6 = arith.constant 0 : index
    %7 = vector.load %arg4[%c0_5, %c0_6] : memref<16x512xbf16, #tpu.memory_space<vmem>>, vector<16x512xbf16>
    %cst = arith.constant dense<0.000000e+00> : vector<128x512xf32>
    %8 = tpu.matmul %6, %7, %cst {dimension_numbers = #tpu.dot_dimension_numbers<[1], [0], [0], [1], [0, 0, 1, 1], [], []>} : vector<128x16xbf16>, vector<16x512xbf16>, vector<128x512xf32> -> vector<128x512xf32>
    %c0_7 = arith.constant 0 : index
    %c0_8 = arith.constant 0 : index
    %9 = vector.load %arg6[%c0_7, %c0_8] : memref<1x512xf32, #tpu.memory_space<vmem>>, vector<1x512xf32>
    %10 = vector.broadcast %9 : vector<1x512xf32> to vector<128x512xf32>
    %11 = arith.addf %8, %10 : vector<128x512xf32>
    %c0_9 = arith.constant 0 : index
    %c0_10 = arith.constant 0 : index
    %12 = vector.load %arg17[%c0_9, %c0_10] : memref<128x512xf32, #tpu.memory_space<vmem>>, vector<128x512xf32>
    tpu.vector_store %arg17[%c0_9, %c0_10], %11 {strides = array<i32>} : memref<128x512xf32, #tpu.memory_space<vmem>>, vector<128x512xf32>,
    %c0_11 = arith.constant 0 : index
    %c0_12 = arith.constant 0 : index
    %13 = vector.load %arg5[%c0_11, %c0_12] : memref<128x512xbf16, #tpu.memory_space<vmem>>, vector<128x512xbf16>
    %c0_13 = arith.constant 0 : index
    %c0_14 = arith.constant 0 : index
    %c0_15 = arith.constant 0 : index
    %14 = vector.load %arg18[%c0_13, %c0_14, %c0_15] : memref<2x16x128xf32, #tpu.memory_space<vmem>>, vector<1x16x128xf32>
    %15 = vector.shape_cast %14 : vector<1x16x128xf32> to vector<16x128xf32>
    %c0_16 = arith.constant 0 : index
    %c0_17 = arith.constant 0 : index
    %c0_18 = arith.constant 0 : index
    %16 = vector.load %arg19[%c0_16, %c0_17, %c0_18] : memref<2x16x128xf32, #tpu.memory_space<vmem>>, vector<1x16x128xf32>
    %17 = vector.shape_cast %16 : vector<1x16x128xf32> to vector<16x128xf32>
    %c0_i32_19 = arith.constant 0 : i32
    %c16_i32 = arith.constant 16 : i32
    %18 = arith.muli %c0_i32_19, %c16_i32 : i32
    %19 = tpu.assume_multiple %18, 16 : i32
    %20 = arith.index_cast %19 : i32 to index
    %c0_20 = arith.constant 0 : index
    %21 = vector.load %arg17[%20, %c0_20] : memref<128x512xf32, #tpu.memory_space<vmem>>, vector<16x512xf32>
    %22 = arith.truncf %15 : vector<16x128xf32> to vector<16x128xbf16>
    %cst_21 = arith.constant dense<0.000000e+00> : vector<16x512xf32>
    %23 = tpu.matmul %22, %13, %cst_21 {dimension_numbers = #tpu.dot_dimension_numbers<[1], [0], [0], [1], [0, 0, 1, 1], [], []>} : vector<16x128xbf16>, vector<128x512xbf16>, vector<16x512xf32> -> vector<16x512xf32>
    %24 = arith.addf %21, %23 : vector<16x512xf32>
    %25 = vector.extract_strided_slice %24 {offsets = [0, 0], sizes = [16, 128], strides = [1, 1]} : vector<16x512xf32> to vector<16x128xf32>
    %26 = arith.negf %25 : vector<16x128xf32>
    %27 = math.exp %26 : vector<16x128xf32>
    %cst_22 = arith.constant 1.000000e+00 : f32
    %28 = vector.broadcast %cst_22 : f32 to vector<16x128xf32>
    %29 = arith.addf %28, %27 : vector<16x128xf32>
    %30 = arith.divf %28, %29 : vector<16x128xf32>
    %31 = vector.extract_strided_slice %24 {offsets = [0, 128], sizes = [16, 128], strides = [1, 1]} : vector<16x512xf32> to vector<16x128xf32>
    %32 = arith.negf %31 : vector<16x128xf32>
    %33 = math.exp %32 : vector<16x128xf32>
    %cst_23 = arith.constant 1.000000e+00 : f32
    %34 = vector.broadcast %cst_23 : f32 to vector<16x128xf32>
    %35 = arith.addf %34, %33 : vector<16x128xf32>
    %36 = arith.divf %34, %35 : vector<16x128xf32>
    %37 = vector.extract_strided_slice %24 {offsets = [0, 256], sizes = [16, 128], strides = [1, 1]} : vector<16x512xf32> to vector<16x128xf32>
    %38 = math.tanh %37 : vector<16x128xf32>
    %39 = vector.extract_strided_slice %24 {offsets = [0, 384], sizes = [16, 128], strides = [1, 1]} : vector<16x512xf32> to vector<16x128xf32>
    %40 = arith.negf %39 : vector<16x128xf32>
    %41 = math.exp %40 : vector<16x128xf32>
    %cst_24 = arith.constant 1.000000e+00 : f32
    %42 = vector.broadcast %cst_24 : f32 to vector<16x128xf32>
    %43 = arith.addf %42, %41 : vector<16x128xf32>
    %44 = arith.divf %42, %43 : vector<16x128xf32>
    %45 = arith.mulf %36, %17 : vector<16x128xf32>
    %46 = arith.mulf %30, %38 : vector<16x128xf32>
    %47 = arith.addf %45, %46 : vector<16x128xf32>
    %48 = math.tanh %47 : vector<16x128xf32>
    %49 = arith.mulf %44, %48 : vector<16x128xf32>
    %c16_i32_25 = arith.constant 16 : i32
    %50 = arith.muli %c0_i32_19, %c16_i32_25 : i32
    %51 = tpu.assume_multiple %50, 16 : i32
    %52 = arith.truncf %49 : vector<16x128xf32> to vector<16x128xbf16>
    %53 = arith.index_cast %51 : i32 to index
    %c0_26 = arith.constant 0 : index
    %54 = vector.load %arg21[%53, %c0_26] : memref<128x128xbf16, #tpu.memory_space<vmem>>, vector<16x128xbf16>
    tpu.vector_store %arg21[%53, %c0_26], %52 {strides = array<i32>} : memref<128x128xbf16, #tpu.memory_space<vmem>>, vector<16x128xbf16>,
    %c1_i32 = arith.constant 1 : i32
    %c16_i32_27 = arith.constant 16 : i32
    %55 = arith.muli %c1_i32, %c16_i32_27 : i32
    %56 = tpu.assume_multiple %55, 16 : i32
    %57 = arith.index_cast %56 : i32 to index
    %c0_28 = arith.constant 0 : index
    %58 = vector.load %arg17[%57, %c0_28] : memref<128x512xf32, #tpu.memory_space<vmem>>, vector<16x512xf32>
    %59 = arith.truncf %49 : vector<16x128xf32> to vector<16x128xbf16>
    %cst_29 = arith.constant dense<0.000000e+00> : vector<16x512xf32>
    %60 = tpu.matmul %59, %13, %cst_29 {dimension_numbers = #tpu.dot_dimension_numbers<[1], [0], [0], [1], [0, 0, 1, 1], [], []>} : vector<16x128xbf16>, vector<128x512xbf16>, vector<16x512xf32> -> vector<16x512xf32>
    %61 = arith.addf %58, %60 : vector<16x512xf32>
    %62 = vector.extract_strided_slice %61 {offsets = [0, 0], sizes = [16, 128], strides = [1, 1]} : vector<16x512xf32> to vector<16x128xf32>
    %63 = arith.negf %62 : vector<16x128xf32>
    %64 = math.exp %63 : vector<16x128xf32>
    %cst_30 = arith.constant 1.000000e+00 : f32
    %65 = vector.broadcast %cst_30 : f32 to vector<16x128xf32>
    %66 = arith.addf %65, %64 : vector<16x128xf32>
    %67 = arith.divf %65, %66 : vector<16x128xf32>
    %68 = vector.extract_strided_slice %61 {offsets = [0, 128], sizes = [16, 128], strides = [1, 1]} : vector<16x512xf32> to vector<16x128xf32>
    %69 = arith.negf %68 : vector<16x128xf32>
    %70 = math.exp %69 : vector<16x128xf32>
    %cst_31 = arith.constant 1.000000e+00 : f32
    %71 = vector.broadcast %cst_31 : f32 to vector<16x128xf32>
    %72 = arith.addf %71, %70 : vector<16x128xf32>
    %73 = arith.divf %71, %72 : vector<16x128xf32>
    %74 = vector.extract_strided_slice %61 {offsets = [0, 256], sizes = [16, 128], strides = [1, 1]} : vector<16x512xf32> to vector<16x128xf32>
    %75 = math.tanh %74 : vector<16x128xf32>
    %76 = vector.extract_strided_slice %61 {offsets = [0, 384], sizes = [16, 128], strides = [1, 1]} : vector<16x512xf32> to vector<16x128xf32>
    %77 = arith.negf %76 : vector<16x128xf32>
    %78 = math.exp %77 : vector<16x128xf32>
    %cst_32 = arith.constant 1.000000e+00 : f32
    %79 = vector.broadcast %cst_32 : f32 to vector<16x128xf32>
    %80 = arith.addf %79, %78 : vector<16x128xf32>
    %81 = arith.divf %79, %80 : vector<16x128xf32>
    %82 = arith.mulf %73, %47 : vector<16x128xf32>
    %83 = arith.mulf %67, %75 : vector<16x128xf32>
    %84 = arith.addf %82, %83 : vector<16x128xf32>
    %85 = math.tanh %84 : vector<16x128xf32>
    %86 = arith.mulf %81, %85 : vector<16x128xf32>
    %c16_i32_33 = arith.constant 16 : i32
    %87 = arith.muli %c1_i32, %c16_i32_33 : i32
    %88 = tpu.assume_multiple %87, 16 : i32
    %89 = arith.truncf %86 : vector<16x128xf32> to vector<16x128xbf16>
    %90 = arith.index_cast %88 : i32 to index
    %c0_34 = arith.constant 0 : index
    %91 = vector.load %arg21[%90, %c0_34] : memref<128x128xbf16, #tpu.memory_space<vmem>>, vector<16x128xbf16>
    tpu.vector_store %arg21[%90, %c0_34], %89 {strides = array<i32>} : memref<128x128xbf16, #tpu.memory_space<vmem>>, vector<16x128xbf16>,
    %c2_i32 = arith.constant 2 : i32
    %c16_i32_35 = arith.constant 16 : i32
    %92 = arith.muli %c2_i32, %c16_i32_35 : i32
    %93 = tpu.assume_multiple %92, 16 : i32
    %94 = arith.index_cast %93 : i32 to index
    %c0_36 = arith.constant 0 : index
    %95 = vector.load %arg17[%94, %c0_36] : memref<128x512xf32, #tpu.memory_space<vmem>>, vector<16x512xf32>
    %96 = arith.truncf %86 : vector<16x128xf32> to vector<16x128xbf16>
    %cst_37 = arith.constant dense<0.000000e+00> : vector<16x512xf32>
    %97 = tpu.matmul %96, %13, %cst_37 {dimension_numbers = #tpu.dot_dimension_numbers<[1], [0], [0], [1], [0, 0, 1, 1], [], []>} : vector<16x128xbf16>, vector<128x512xbf16>, vector<16x512xf32> -> vector<16x512xf32>
    %98 = arith.addf %95, %97 : vector<16x512xf32>
    %99 = vector.extract_strided_slice %98 {offsets = [0, 0], sizes = [16, 128], strides = [1, 1]} : vector<16x512xf32> to vector<16x128xf32>
    %100 = arith.negf %99 : vector<16x128xf32>
    %101 = math.exp %100 : vector<16x128xf32>
    %cst_38 = arith.constant 1.000000e+00 : f32
    %102 = vector.broadcast %cst_38 : f32 to vector<16x128xf32>
    %103 = arith.addf %102, %101 : vector<16x128xf32>
    %104 = arith.divf %102, %103 : vector<16x128xf32>
    %105 = vector.extract_strided_slice %98 {offsets = [0, 128], sizes = [16, 128], strides = [1, 1]} : vector<16x512xf32> to vector<16x128xf32>
    %106 = arith.negf %105 : vector<16x128xf32>
    %107 = math.exp %106 : vector<16x128xf32>
    %cst_39 = arith.constant 1.000000e+00 : f32
    %108 = vector.broadcast %cst_39 : f32 to vector<16x128xf32>
    %109 = arith.addf %108, %107 : vector<16x128xf32>
    %110 = arith.divf %108, %109 : vector<16x128xf32>
    %111 = vector.extract_strided_slice %98 {offsets = [0, 256], sizes = [16, 128], strides = [1, 1]} : vector<16x512xf32> to vector<16x128xf32>
    %112 = math.tanh %111 : vector<16x128xf32>
    %113 = vector.extract_strided_slice %98 {offsets = [0, 384], sizes = [16, 128], strides = [1, 1]} : vector<16x512xf32> to vector<16x128xf32>
    %114 = arith.negf %113 : vector<16x128xf32>
    %115 = math.exp %114 : vector<16x128xf32>
    %cst_40 = arith.constant 1.000000e+00 : f32
    %116 = vector.broadcast %cst_40 : f32 to vector<16x128xf32>
    %117 = arith.addf %116, %115 : vector<16x128xf32>
    %118 = arith.divf %116, %117 : vector<16x128xf32>
    %119 = arith.mulf %110, %84 : vector<16x128xf32>
    %120 = arith.mulf %104, %112 : vector<16x128xf32>
    %121 = arith.addf %119, %120 : vector<16x128xf32>
    %122 = math.tanh %121 : vector<16x128xf32>
    %123 = arith.mulf %118, %122 : vector<16x128xf32>
    %c16_i32_41 = arith.constant 16 : i32
    %124 = arith.muli %c2_i32, %c16_i32_41 : i32
    %125 = tpu.assume_multiple %124, 16 : i32
    %126 = arith.truncf %123 : vector<16x128xf32> to vector<16x128xbf16>
    %127 = arith.index_cast %125 : i32 to index
    %c0_42 = arith.constant 0 : index
    %128 = vector.load %arg21[%127, %c0_42] : memref<128x128xbf16, #tpu.memory_space<vmem>>, vector<16x128xbf16>
    tpu.vector_store %arg21[%127, %c0_42], %126 {strides = array<i32>} : memref<128x128xbf16, #tpu.memory_space<vmem>>, vector<16x128xbf16>,
    %c3_i32 = arith.constant 3 : i32
    %c16_i32_43 = arith.constant 16 : i32
    %129 = arith.muli %c3_i32, %c16_i32_43 : i32
    %130 = tpu.assume_multiple %129, 16 : i32
    %131 = arith.index_cast %130 : i32 to index
    %c0_44 = arith.constant 0 : index
    %132 = vector.load %arg17[%131, %c0_44] : memref<128x512xf32, #tpu.memory_space<vmem>>, vector<16x512xf32>
    %133 = arith.truncf %123 : vector<16x128xf32> to vector<16x128xbf16>
    %cst_45 = arith.constant dense<0.000000e+00> : vector<16x512xf32>
    %134 = tpu.matmul %133, %13, %cst_45 {dimension_numbers = #tpu.dot_dimension_numbers<[1], [0], [0], [1], [0, 0, 1, 1], [], []>} : vector<16x128xbf16>, vector<128x512xbf16>, vector<16x512xf32> -> vector<16x512xf32>
    %135 = arith.addf %132, %134 : vector<16x512xf32>
    %136 = vector.extract_strided_slice %135 {offsets = [0, 0], sizes = [16, 128], strides = [1, 1]} : vector<16x512xf32> to vector<16x128xf32>
    %137 = arith.negf %136 : vector<16x128xf32>
    %138 = math.exp %137 : vector<16x128xf32>
    %cst_46 = arith.constant 1.000000e+00 : f32
    %139 = vector.broadcast %cst_46 : f32 to vector<16x128xf32>
    %140 = arith.addf %139, %138 : vector<16x128xf32>
    %141 = arith.divf %139, %140 : vector<16x128xf32>
    %142 = vector.extract_strided_slice %135 {offsets = [0, 128], sizes = [16, 128], strides = [1, 1]} : vector<16x512xf32> to vector<16x128xf32>
    %143 = arith.negf %142 : vector<16x128xf32>
    %144 = math.exp %143 : vector<16x128xf32>
    %cst_47 = arith.constant 1.000000e+00 : f32
    %145 = vector.broadcast %cst_47 : f32 to vector<16x128xf32>
    %146 = arith.addf %145, %144 : vector<16x128xf32>
    %147 = arith.divf %145, %146 : vector<16x128xf32>
    %148 = vector.extract_strided_slice %135 {offsets = [0, 256], sizes = [16, 128], strides = [1, 1]} : vector<16x512xf32> to vector<16x128xf32>
    %149 = math.tanh %148 : vector<16x128xf32>
    %150 = vector.extract_strided_slice %135 {offsets = [0, 384], sizes = [16, 128], strides = [1, 1]} : vector<16x512xf32> to vector<16x128xf32>
    %151 = arith.negf %150 : vector<16x128xf32>
    %152 = math.exp %151 : vector<16x128xf32>
    %cst_48 = arith.constant 1.000000e+00 : f32
    %153 = vector.broadcast %cst_48 : f32 to vector<16x128xf32>
    %154 = arith.addf %153, %152 : vector<16x128xf32>
    %155 = arith.divf %153, %154 : vector<16x128xf32>
    %156 = arith.mulf %147, %121 : vector<16x128xf32>
    %157 = arith.mulf %141, %149 : vector<16x128xf32>
    %158 = arith.addf %156, %157 : vector<16x128xf32>
    %159 = math.tanh %158 : vector<16x128xf32>
    %160 = arith.mulf %155, %159 : vector<16x128xf32>
    %c16_i32_49 = arith.constant 16 : i32
    %161 = arith.muli %c3_i32, %c16_i32_49 : i32
    %162 = tpu.assume_multiple %161, 16 : i32
    %163 = arith.truncf %160 : vector<16x128xf32> to vector<16x128xbf16>
    %164 = arith.index_cast %162 : i32 to index
    %c0_50 = arith.constant 0 : index
    %165 = vector.load %arg21[%164, %c0_50] : memref<128x128xbf16, #tpu.memory_space<vmem>>, vector<16x128xbf16>
    tpu.vector_store %arg21[%164, %c0_50], %163 {strides = array<i32>} : memref<128x128xbf16, #tpu.memory_space<vmem>>, vector<16x128xbf16>,
    %c4_i32 = arith.constant 4 : i32
    %c16_i32_51 = arith.constant 16 : i32
    %166 = arith.muli %c4_i32, %c16_i32_51 : i32
    %167 = tpu.assume_multiple %166, 16 : i32
    %168 = arith.index_cast %167 : i32 to index
    %c0_52 = arith.constant 0 : index
    %169 = vector.load %arg17[%168, %c0_52] : memref<128x512xf32, #tpu.memory_space<vmem>>, vector<16x512xf32>
    %170 = arith.truncf %160 : vector<16x128xf32> to vector<16x128xbf16>
    %cst_53 = arith.constant dense<0.000000e+00> : vector<16x512xf32>
    %171 = tpu.matmul %170, %13, %cst_53 {dimension_numbers = #tpu.dot_dimension_numbers<[1], [0], [0], [1], [0, 0, 1, 1], [], []>} : vector<16x128xbf16>, vector<128x512xbf16>, vector<16x512xf32> -> vector<16x512xf32>
    %172 = arith.addf %169, %171 : vector<16x512xf32>
    %173 = vector.extract_strided_slice %172 {offsets = [0, 0], sizes = [16, 128], strides = [1, 1]} : vector<16x512xf32> to vector<16x128xf32>
    %174 = arith.negf %173 : vector<16x128xf32>
    %175 = math.exp %174 : vector<16x128xf32>
    %cst_54 = arith.constant 1.000000e+00 : f32
    %176 = vector.broadcast %cst_54 : f32 to vector<16x128xf32>
    %177 = arith.addf %176, %175 : vector<16x128xf32>
    %178 = arith.divf %176, %177 : vector<16x128xf32>
    %179 = vector.extract_strided_slice %172 {offsets = [0, 128], sizes = [16, 128], strides = [1, 1]} : vector<16x512xf32> to vector<16x128xf32>
    %180 = arith.negf %179 : vector<16x128xf32>
    %181 = math.exp %180 : vector<16x128xf32>
    %cst_55 = arith.constant 1.000000e+00 : f32
    %182 = vector.broadcast %cst_55 : f32 to vector<16x128xf32>
    %183 = arith.addf %182, %181 : vector<16x128xf32>
    %184 = arith.divf %182, %183 : vector<16x128xf32>
    %185 = vector.extract_strided_slice %172 {offsets = [0, 256], sizes = [16, 128], strides = [1, 1]} : vector<16x512xf32> to vector<16x128xf32>
    %186 = math.tanh %185 : vector<16x128xf32>
    %187 = vector.extract_strided_slice %172 {offsets = [0, 384], sizes = [16, 128], strides = [1, 1]} : vector<16x512xf32> to vector<16x128xf32>
    %188 = arith.negf %187 : vector<16x128xf32>
    %189 = math.exp %188 : vector<16x128xf32>
    %cst_56 = arith.constant 1.000000e+00 : f32
    %190 = vector.broadcast %cst_56 : f32 to vector<16x128xf32>
    %191 = arith.addf %190, %189 : vector<16x128xf32>
    %192 = arith.divf %190, %191 : vector<16x128xf32>
    %193 = arith.mulf %184, %158 : vector<16x128xf32>
    %194 = arith.mulf %178, %186 : vector<16x128xf32>
    %195 = arith.addf %193, %194 : vector<16x128xf32>
    %196 = math.tanh %195 : vector<16x128xf32>
    %197 = arith.mulf %192, %196 : vector<16x128xf32>
    %c16_i32_57 = arith.constant 16 : i32
    %198 = arith.muli %c4_i32, %c16_i32_57 : i32
    %199 = tpu.assume_multiple %198, 16 : i32
    %200 = arith.truncf %197 : vector<16x128xf32> to vector<16x128xbf16>
    %201 = arith.index_cast %199 : i32 to index
    %c0_58 = arith.constant 0 : index
    %202 = vector.load %arg21[%201, %c0_58] : memref<128x128xbf16, #tpu.memory_space<vmem>>, vector<16x128xbf16>
    tpu.vector_store %arg21[%201, %c0_58], %200 {strides = array<i32>} : memref<128x128xbf16, #tpu.memory_space<vmem>>, vector<16x128xbf16>,
    %c5_i32 = arith.constant 5 : i32
    %c16_i32_59 = arith.constant 16 : i32
    %203 = arith.muli %c5_i32, %c16_i32_59 : i32
    %204 = tpu.assume_multiple %203, 16 : i32
    %205 = arith.index_cast %204 : i32 to index
    %c0_60 = arith.constant 0 : index
    %206 = vector.load %arg17[%205, %c0_60] : memref<128x512xf32, #tpu.memory_space<vmem>>, vector<16x512xf32>
    %207 = arith.truncf %197 : vector<16x128xf32> to vector<16x128xbf16>
    %cst_61 = arith.constant dense<0.000000e+00> : vector<16x512xf32>
    %208 = tpu.matmul %207, %13, %cst_61 {dimension_numbers = #tpu.dot_dimension_numbers<[1], [0], [0], [1], [0, 0, 1, 1], [], []>} : vector<16x128xbf16>, vector<128x512xbf16>, vector<16x512xf32> -> vector<16x512xf32>
    %209 = arith.addf %206, %208 : vector<16x512xf32>
    %210 = vector.extract_strided_slice %209 {offsets = [0, 0], sizes = [16, 128], strides = [1, 1]} : vector<16x512xf32> to vector<16x128xf32>
    %211 = arith.negf %210 : vector<16x128xf32>
    %212 = math.exp %211 : vector<16x128xf32>
    %cst_62 = arith.constant 1.000000e+00 : f32
    %213 = vector.broadcast %cst_62 : f32 to vector<16x128xf32>
    %214 = arith.addf %213, %212 : vector<16x128xf32>
    %215 = arith.divf %213, %214 : vector<16x128xf32>
    %216 = vector.extract_strided_slice %209 {offsets = [0, 128], sizes = [16, 128], strides = [1, 1]} : vector<16x512xf32> to vector<16x128xf32>
    %217 = arith.negf %216 : vector<16x128xf32>
    %218 = math.exp %217 : vector<16x128xf32>
    %cst_63 = arith.constant 1.000000e+00 : f32
    %219 = vector.broadcast %cst_63 : f32 to vector<16x128xf32>
    %220 = arith.addf %219, %218 : vector<16x128xf32>
    %221 = arith.divf %219, %220 : vector<16x128xf32>
    %222 = vector.extract_strided_slice %209 {offsets = [0, 256], sizes = [16, 128], strides = [1, 1]} : vector<16x512xf32> to vector<16x128xf32>
    %223 = math.tanh %222 : vector<16x128xf32>
    %224 = vector.extract_strided_slice %209 {offsets = [0, 384], sizes = [16, 128], strides = [1, 1]} : vector<16x512xf32> to vector<16x128xf32>
    %225 = arith.negf %224 : vector<16x128xf32>
    %226 = math.exp %225 : vector<16x128xf32>
    %cst_64 = arith.constant 1.000000e+00 : f32
    %227 = vector.broadcast %cst_64 : f32 to vector<16x128xf32>
    %228 = arith.addf %227, %226 : vector<16x128xf32>
    %229 = arith.divf %227, %228 : vector<16x128xf32>
    %230 = arith.mulf %221, %195 : vector<16x128xf32>
    %231 = arith.mulf %215, %223 : vector<16x128xf32>
    %232 = arith.addf %230, %231 : vector<16x128xf32>
    %233 = math.tanh %232 : vector<16x128xf32>
    %234 = arith.mulf %229, %233 : vector<16x128xf32>
    %c16_i32_65 = arith.constant 16 : i32
    %235 = arith.muli %c5_i32, %c16_i32_65 : i32
    %236 = tpu.assume_multiple %235, 16 : i32
    %237 = arith.truncf %234 : vector<16x128xf32> to vector<16x128xbf16>
    %238 = arith.index_cast %236 : i32 to index
    %c0_66 = arith.constant 0 : index
    %239 = vector.load %arg21[%238, %c0_66] : memref<128x128xbf16, #tpu.memory_space<vmem>>, vector<16x128xbf16>
    tpu.vector_store %arg21[%238, %c0_66], %237 {strides = array<i32>} : memref<128x128xbf16, #tpu.memory_space<vmem>>, vector<16x128xbf16>,
    %c6_i32 = arith.constant 6 : i32
    %c16_i32_67 = arith.constant 16 : i32
    %240 = arith.muli %c6_i32, %c16_i32_67 : i32
    %241 = tpu.assume_multiple %240, 16 : i32
    %242 = arith.index_cast %241 : i32 to index
    %c0_68 = arith.constant 0 : index
    %243 = vector.load %arg17[%242, %c0_68] : memref<128x512xf32, #tpu.memory_space<vmem>>, vector<16x512xf32>
    %244 = arith.truncf %234 : vector<16x128xf32> to vector<16x128xbf16>
    %cst_69 = arith.constant dense<0.000000e+00> : vector<16x512xf32>
    %245 = tpu.matmul %244, %13, %cst_69 {dimension_numbers = #tpu.dot_dimension_numbers<[1], [0], [0], [1], [0, 0, 1, 1], [], []>} : vector<16x128xbf16>, vector<128x512xbf16>, vector<16x512xf32> -> vector<16x512xf32>
    %246 = arith.addf %243, %245 : vector<16x512xf32>
    %247 = vector.extract_strided_slice %246 {offsets = [0, 0], sizes = [16, 128], strides = [1, 1]} : vector<16x512xf32> to vector<16x128xf32>
    %248 = arith.negf %247 : vector<16x128xf32>
    %249 = math.exp %248 : vector<16x128xf32>
    %cst_70 = arith.constant 1.000000e+00 : f32
    %250 = vector.broadcast %cst_70 : f32 to vector<16x128xf32>
    %251 = arith.addf %250, %249 : vector<16x128xf32>
    %252 = arith.divf %250, %251 : vector<16x128xf32>
    %253 = vector.extract_strided_slice %246 {offsets = [0, 128], sizes = [16, 128], strides = [1, 1]} : vector<16x512xf32> to vector<16x128xf32>
    %254 = arith.negf %253 : vector<16x128xf32>
    %255 = math.exp %254 : vector<16x128xf32>
    %cst_71 = arith.constant 1.000000e+00 : f32
    %256 = vector.broadcast %cst_71 : f32 to vector<16x128xf32>
    %257 = arith.addf %256, %255 : vector<16x128xf32>
    %258 = arith.divf %256, %257 : vector<16x128xf32>
    %259 = vector.extract_strided_slice %246 {offsets = [0, 256], sizes = [16, 128], strides = [1, 1]} : vector<16x512xf32> to vector<16x128xf32>
    %260 = math.tanh %259 : vector<16x128xf32>
    %261 = vector.extract_strided_slice %246 {offsets = [0, 384], sizes = [16, 128], strides = [1, 1]} : vector<16x512xf32> to vector<16x128xf32>
    %262 = arith.negf %261 : vector<16x128xf32>
    %263 = math.exp %262 : vector<16x128xf32>
    %cst_72 = arith.constant 1.000000e+00 : f32
    %264 = vector.broadcast %cst_72 : f32 to vector<16x128xf32>
    %265 = arith.addf %264, %263 : vector<16x128xf32>
    %266 = arith.divf %264, %265 : vector<16x128xf32>
    %267 = arith.mulf %258, %232 : vector<16x128xf32>
    %268 = arith.mulf %252, %260 : vector<16x128xf32>
    %269 = arith.addf %267, %268 : vector<16x128xf32>
    %270 = math.tanh %269 : vector<16x128xf32>
    %271 = arith.mulf %266, %270 : vector<16x128xf32>
    %c16_i32_73 = arith.constant 16 : i32
    %272 = arith.muli %c6_i32, %c16_i32_73 : i32
    %273 = tpu.assume_multiple %272, 16 : i32
    %274 = arith.truncf %271 : vector<16x128xf32> to vector<16x128xbf16>
    %275 = arith.index_cast %273 : i32 to index
    %c0_74 = arith.constant 0 : index
    %276 = vector.load %arg21[%275, %c0_74] : memref<128x128xbf16, #tpu.memory_space<vmem>>, vector<16x128xbf16>
    tpu.vector_store %arg21[%275, %c0_74], %274 {strides = array<i32>} : memref<128x128xbf16, #tpu.memory_space<vmem>>, vector<16x128xbf16>,
    %c7_i32 = arith.constant 7 : i32
    %c16_i32_75 = arith.constant 16 : i32
    %277 = arith.muli %c7_i32, %c16_i32_75 : i32
    %278 = tpu.assume_multiple %277, 16 : i32
    %279 = arith.index_cast %278 : i32 to index
    %c0_76 = arith.constant 0 : index
    %280 = vector.load %arg17[%279, %c0_76] : memref<128x512xf32, #tpu.memory_space<vmem>>, vector<16x512xf32>
    %281 = arith.truncf %271 : vector<16x128xf32> to vector<16x128xbf16>
    %cst_77 = arith.constant dense<0.000000e+00> : vector<16x512xf32>
    %282 = tpu.matmul %281, %13, %cst_77 {dimension_numbers = #tpu.dot_dimension_numbers<[1], [0], [0], [1], [0, 0, 1, 1], [], []>} : vector<16x128xbf16>, vector<128x512xbf16>, vector<16x512xf32> -> vector<16x512xf32>
    %283 = arith.addf %280, %282 : vector<16x512xf32>
    %284 = vector.extract_strided_slice %283 {offsets = [0, 0], sizes = [16, 128], strides = [1, 1]} : vector<16x512xf32> to vector<16x128xf32>
    %285 = arith.negf %284 : vector<16x128xf32>
    %286 = math.exp %285 : vector<16x128xf32>
    %cst_78 = arith.constant 1.000000e+00 : f32
    %287 = vector.broadcast %cst_78 : f32 to vector<16x128xf32>
    %288 = arith.addf %287, %286 : vector<16x128xf32>
    %289 = arith.divf %287, %288 : vector<16x128xf32>
    %290 = vector.extract_strided_slice %283 {offsets = [0, 128], sizes = [16, 128], strides = [1, 1]} : vector<16x512xf32> to vector<16x128xf32>
    %291 = arith.negf %290 : vector<16x128xf32>
    %292 = math.exp %291 : vector<16x128xf32>
    %cst_79 = arith.constant 1.000000e+00 : f32
    %293 = vector.broadcast %cst_79 : f32 to vector<16x128xf32>
    %294 = arith.addf %293, %292 : vector<16x128xf32>
    %295 = arith.divf %293, %294 : vector<16x128xf32>
    %296 = vector.extract_strided_slice %283 {offsets = [0, 256], sizes = [16, 128], strides = [1, 1]} : vector<16x512xf32> to vector<16x128xf32>
    %297 = math.tanh %296 : vector<16x128xf32>
    %298 = vector.extract_strided_slice %283 {offsets = [0, 384], sizes = [16, 128], strides = [1, 1]} : vector<16x512xf32> to vector<16x128xf32>
    %299 = arith.negf %298 : vector<16x128xf32>
    %300 = math.exp %299 : vector<16x128xf32>
    %cst_80 = arith.constant 1.000000e+00 : f32
    %301 = vector.broadcast %cst_80 : f32 to vector<16x128xf32>
    %302 = arith.addf %301, %300 : vector<16x128xf32>
    %303 = arith.divf %301, %302 : vector<16x128xf32>
    %304 = arith.mulf %295, %269 : vector<16x128xf32>
    %305 = arith.mulf %289, %297 : vector<16x128xf32>
    %306 = arith.addf %304, %305 : vector<16x128xf32>
    %307 = math.tanh %306 : vector<16x128xf32>
    %308 = arith.mulf %303, %307 : vector<16x128xf32>
    %c16_i32_81 = arith.constant 16 : i32
    %309 = arith.muli %c7_i32, %c16_i32_81 : i32
    %310 = tpu.assume_multiple %309, 16 : i32
    %311 = arith.truncf %308 : vector<16x128xf32> to vector<16x128xbf16>
    %312 = arith.index_cast %310 : i32 to index
    %c0_82 = arith.constant 0 : index
    %313 = vector.load %arg21[%312, %c0_82] : memref<128x128xbf16, #tpu.memory_space<vmem>>, vector<16x128xbf16>
    tpu.vector_store %arg21[%312, %c0_82], %311 {strides = array<i32>} : memref<128x128xbf16, #tpu.memory_space<vmem>>, vector<16x128xbf16>,
    %c8_i32_83 = arith.constant 8 : i32
    %c0_84 = arith.constant 0 : index
    %c0_85 = arith.constant 0 : index
    %c0_86 = arith.constant 0 : index
    %314 = vector.load %arg18[%c0_84, %c0_85, %c0_86] : memref<2x16x128xf32, #tpu.memory_space<vmem>>, vector<1x16x128xf32>
    %315 = vector.shape_cast %314 : vector<1x16x128xf32> to vector<16x128xf32>
    %316 = vector.shape_cast %308 : vector<16x128xf32> to vector<1x16x128xf32>
    tpu.vector_store %arg18[%c0_84, %c0_85, %c0_86], %316 {strides = array<i32>} : memref<2x16x128xf32, #tpu.memory_space<vmem>>, vector<1x16x128xf32>,
    %c0_87 = arith.constant 0 : index
    %c0_88 = arith.constant 0 : index
    %c0_89 = arith.constant 0 : index
    %317 = vector.load %arg19[%c0_87, %c0_88, %c0_89] : memref<2x16x128xf32, #tpu.memory_space<vmem>>, vector<1x16x128xf32>
    %318 = vector.shape_cast %317 : vector<1x16x128xf32> to vector<16x128xf32>
    %319 = vector.shape_cast %306 : vector<16x128xf32> to vector<1x16x128xf32>
    tpu.vector_store %arg19[%c0_87, %c0_88, %c0_89], %319 {strides = array<i32>} : memref<2x16x128xf32, #tpu.memory_space<vmem>>, vector<1x16x128xf32>,
    %c0_90 = arith.constant 0 : index
    %c0_91 = arith.constant 0 : index
    %320 = vector.load %arg21[%c0_90, %c0_91] : memref<128x128xbf16, #tpu.memory_space<vmem>>, vector<128x128xbf16>
    %c0_92 = arith.constant 0 : index
    %c0_93 = arith.constant 0 : index
    %321 = vector.load %arg7[%c0_92, %c0_93] : memref<128x512xbf16, #tpu.memory_space<vmem>>, vector<128x512xbf16>
    %cst_94 = arith.constant dense<0.000000e+00> : vector<128x512xf32>
    %322 = tpu.matmul %320, %321, %cst_94 {dimension_numbers = #tpu.dot_dimension_numbers<[1], [0], [0], [1], [0, 0, 1, 1], [], []>} : vector<128x128xbf16>, vector<128x512xbf16>, vector<128x512xf32> -> vector<128x512xf32>
    %c0_95 = arith.constant 0 : index
    %c0_96 = arith.constant 0 : index
    %323 = vector.load %arg9[%c0_95, %c0_96] : memref<1x512xf32, #tpu.memory_space<vmem>>, vector<1x512xf32>
    %324 = vector.broadcast %323 : vector<1x512xf32> to vector<128x512xf32>
    %325 = arith.addf %322, %324 : vector<128x512xf32>
    %c0_97 = arith.constant 0 : index
    %c0_98 = arith.constant 0 : index
    %326 = vector.load %arg17[%c0_97, %c0_98] : memref<128x512xf32, #tpu.memory_space<vmem>>, vector<128x512xf32>
    tpu.vector_store %arg17[%c0_97, %c0_98], %325 {strides = array<i32>} : memref<128x512xf32, #tpu.memory_space<vmem>>, vector<128x512xf32>,
    %c0_99 = arith.constant 0 : index
    %c0_100 = arith.constant 0 : index
    %327 = vector.load %arg8[%c0_99, %c0_100] : memref<128x512xbf16, #tpu.memory_space<vmem>>, vector<128x512xbf16>
    %c1 = arith.constant 1 : index
    %c0_101 = arith.constant 0 : index
    %c0_102 = arith.constant 0 : index
    %328 = vector.load %arg18[%c1, %c0_101, %c0_102] : memref<2x16x128xf32, #tpu.memory_space<vmem>>, vector<1x16x128xf32>
    %329 = vector.shape_cast %328 : vector<1x16x128xf32> to vector<16x128xf32>
    %c1_103 = arith.constant 1 : index
    %c0_104 = arith.constant 0 : index
    %c0_105 = arith.constant 0 : index
    %330 = vector.load %arg19[%c1_103, %c0_104, %c0_105] : memref<2x16x128xf32, #tpu.memory_space<vmem>>, vector<1x16x128xf32>
    %331 = vector.shape_cast %330 : vector<1x16x128xf32> to vector<16x128xf32>
    %c0_106 = arith.constant 0 : index
    %c0_107 = arith.constant 0 : index
    %332 = vector.load %arg20[%c0_106, %c0_107] : memref<16x128xf32, #tpu.memory_space<vmem>>, vector<16x128xf32>
    %c0_i32_108 = arith.constant 0 : i32
    %c16_i32_109 = arith.constant 16 : i32
    %333 = arith.muli %c0_i32_108, %c16_i32_109 : i32
    %334 = tpu.assume_multiple %333, 16 : i32
    %335 = arith.index_cast %334 : i32 to index
    %c0_110 = arith.constant 0 : index
    %336 = vector.load %arg17[%335, %c0_110] : memref<128x512xf32, #tpu.memory_space<vmem>>, vector<16x512xf32>
    %337 = arith.truncf %329 : vector<16x128xf32> to vector<16x128xbf16>
    %cst_111 = arith.constant dense<0.000000e+00> : vector<16x512xf32>
    %338 = tpu.matmul %337, %327, %cst_111 {dimension_numbers = #tpu.dot_dimension_numbers<[1], [0], [0], [1], [0, 0, 1, 1], [], []>} : vector<16x128xbf16>, vector<128x512xbf16>, vector<16x512xf32> -> vector<16x512xf32>
    %339 = arith.addf %336, %338 : vector<16x512xf32>
    %340 = vector.extract_strided_slice %339 {offsets = [0, 0], sizes = [16, 128], strides = [1, 1]} : vector<16x512xf32> to vector<16x128xf32>
    %341 = arith.negf %340 : vector<16x128xf32>
    %342 = math.exp %341 : vector<16x128xf32>
    %cst_112 = arith.constant 1.000000e+00 : f32
    %343 = vector.broadcast %cst_112 : f32 to vector<16x128xf32>
    %344 = arith.addf %343, %342 : vector<16x128xf32>
    %345 = arith.divf %343, %344 : vector<16x128xf32>
    %346 = vector.extract_strided_slice %339 {offsets = [0, 128], sizes = [16, 128], strides = [1, 1]} : vector<16x512xf32> to vector<16x128xf32>
    %347 = arith.negf %346 : vector<16x128xf32>
    %348 = math.exp %347 : vector<16x128xf32>
    %cst_113 = arith.constant 1.000000e+00 : f32
    %349 = vector.broadcast %cst_113 : f32 to vector<16x128xf32>
    %350 = arith.addf %349, %348 : vector<16x128xf32>
    %351 = arith.divf %349, %350 : vector<16x128xf32>
    %352 = vector.extract_strided_slice %339 {offsets = [0, 256], sizes = [16, 128], strides = [1, 1]} : vector<16x512xf32> to vector<16x128xf32>
    %353 = math.tanh %352 : vector<16x128xf32>
    %354 = vector.extract_strided_slice %339 {offsets = [0, 384], sizes = [16, 128], strides = [1, 1]} : vector<16x512xf32> to vector<16x128xf32>
    %355 = arith.negf %354 : vector<16x128xf32>
    %356 = math.exp %355 : vector<16x128xf32>
    %cst_114 = arith.constant 1.000000e+00 : f32
    %357 = vector.broadcast %cst_114 : f32 to vector<16x128xf32>
    %358 = arith.addf %357, %356 : vector<16x128xf32>
    %359 = arith.divf %357, %358 : vector<16x128xf32>
    %360 = arith.mulf %351, %331 : vector<16x128xf32>
    %361 = arith.mulf %345, %353 : vector<16x128xf32>
    %362 = arith.addf %360, %361 : vector<16x128xf32>
    %363 = math.tanh %362 : vector<16x128xf32>
    %364 = arith.mulf %359, %363 : vector<16x128xf32>
    %365 = arith.addi %4, %c0_i32_108 : i32
    %366 = arith.sitofp %365 : i32 to f32
    %367 = vector.broadcast %366 : f32 to vector<16x1xf32>
    %368 = arith.cmpf olt, %367, %3 : vector<16x1xf32>
    %369 = arith.extui %368 : vector<16x1xi1> to vector<16x1xi32>
    %370 = arith.sitofp %369 : vector<16x1xi32> to vector<16x1xf32>
    %371 = vector.broadcast %370 : vector<16x1xf32> to vector<16x128xf32>
    %372 = arith.mulf %364, %371 : vector<16x128xf32>
    %373 = arith.addf %332, %372 : vector<16x128xf32>
    %c1_i32_115 = arith.constant 1 : i32
    %c16_i32_116 = arith.constant 16 : i32
    %374 = arith.muli %c1_i32_115, %c16_i32_116 : i32
    %375 = tpu.assume_multiple %374, 16 : i32
    %376 = arith.index_cast %375 : i32 to index
    %c0_117 = arith.constant 0 : index
    %377 = vector.load %arg17[%376, %c0_117] : memref<128x512xf32, #tpu.memory_space<vmem>>, vector<16x512xf32>
    %378 = arith.truncf %364 : vector<16x128xf32> to vector<16x128xbf16>
    %cst_118 = arith.constant dense<0.000000e+00> : vector<16x512xf32>
    %379 = tpu.matmul %378, %327, %cst_118 {dimension_numbers = #tpu.dot_dimension_numbers<[1], [0], [0], [1], [0, 0, 1, 1], [], []>} : vector<16x128xbf16>, vector<128x512xbf16>, vector<16x512xf32> -> vector<16x512xf32>
    %380 = arith.addf %377, %379 : vector<16x512xf32>
    %381 = vector.extract_strided_slice %380 {offsets = [0, 0], sizes = [16, 128], strides = [1, 1]} : vector<16x512xf32> to vector<16x128xf32>
    %382 = arith.negf %381 : vector<16x128xf32>
    %383 = math.exp %382 : vector<16x128xf32>
    %cst_119 = arith.constant 1.000000e+00 : f32
    %384 = vector.broadcast %cst_119 : f32 to vector<16x128xf32>
    %385 = arith.addf %384, %383 : vector<16x128xf32>
    %386 = arith.divf %384, %385 : vector<16x128xf32>
    %387 = vector.extract_strided_slice %380 {offsets = [0, 128], sizes = [16, 128], strides = [1, 1]} : vector<16x512xf32> to vector<16x128xf32>
    %388 = arith.negf %387 : vector<16x128xf32>
    %389 = math.exp %388 : vector<16x128xf32>
    %cst_120 = arith.constant 1.000000e+00 : f32
    %390 = vector.broadcast %cst_120 : f32 to vector<16x128xf32>
    %391 = arith.addf %390, %389 : vector<16x128xf32>
    %392 = arith.divf %390, %391 : vector<16x128xf32>
    %393 = vector.extract_strided_slice %380 {offsets = [0, 256], sizes = [16, 128], strides = [1, 1]} : vector<16x512xf32> to vector<16x128xf32>
    %394 = math.tanh %393 : vector<16x128xf32>
    %395 = vector.extract_strided_slice %380 {offsets = [0, 384], sizes = [16, 128], strides = [1, 1]} : vector<16x512xf32> to vector<16x128xf32>
    %396 = arith.negf %395 : vector<16x128xf32>
    %397 = math.exp %396 : vector<16x128xf32>
    %cst_121 = arith.constant 1.000000e+00 : f32
    %398 = vector.broadcast %cst_121 : f32 to vector<16x128xf32>
    %399 = arith.addf %398, %397 : vector<16x128xf32>
    %400 = arith.divf %398, %399 : vector<16x128xf32>
    %401 = arith.mulf %392, %362 : vector<16x128xf32>
    %402 = arith.mulf %386, %394 : vector<16x128xf32>
    %403 = arith.addf %401, %402 : vector<16x128xf32>
    %404 = math.tanh %403 : vector<16x128xf32>
    %405 = arith.mulf %400, %404 : vector<16x128xf32>
    %406 = arith.addi %4, %c1_i32_115 : i32
    %407 = arith.sitofp %406 : i32 to f32
    %408 = vector.broadcast %407 : f32 to vector<16x1xf32>
    %409 = arith.cmpf olt, %408, %3 : vector<16x1xf32>
    %410 = arith.extui %409 : vector<16x1xi1> to vector<16x1xi32>
    %411 = arith.sitofp %410 : vector<16x1xi32> to vector<16x1xf32>
    %412 = vector.broadcast %411 : vector<16x1xf32> to vector<16x128xf32>
    %413 = arith.mulf %405, %412 : vector<16x128xf32>
    %414 = arith.addf %373, %413 : vector<16x128xf32>
    %c2_i32_122 = arith.constant 2 : i32
    %c16_i32_123 = arith.constant 16 : i32
    %415 = arith.muli %c2_i32_122, %c16_i32_123 : i32
    %416 = tpu.assume_multiple %415, 16 : i32
    %417 = arith.index_cast %416 : i32 to index
    %c0_124 = arith.constant 0 : index
    %418 = vector.load %arg17[%417, %c0_124] : memref<128x512xf32, #tpu.memory_space<vmem>>, vector<16x512xf32>
    %419 = arith.truncf %405 : vector<16x128xf32> to vector<16x128xbf16>
    %cst_125 = arith.constant dense<0.000000e+00> : vector<16x512xf32>
    %420 = tpu.matmul %419, %327, %cst_125 {dimension_numbers = #tpu.dot_dimension_numbers<[1], [0], [0], [1], [0, 0, 1, 1], [], []>} : vector<16x128xbf16>, vector<128x512xbf16>, vector<16x512xf32> -> vector<16x512xf32>
    %421 = arith.addf %418, %420 : vector<16x512xf32>
    %422 = vector.extract_strided_slice %421 {offsets = [0, 0], sizes = [16, 128], strides = [1, 1]} : vector<16x512xf32> to vector<16x128xf32>
    %423 = arith.negf %422 : vector<16x128xf32>
    %424 = math.exp %423 : vector<16x128xf32>
    %cst_126 = arith.constant 1.000000e+00 : f32
    %425 = vector.broadcast %cst_126 : f32 to vector<16x128xf32>
    %426 = arith.addf %425, %424 : vector<16x128xf32>
    %427 = arith.divf %425, %426 : vector<16x128xf32>
    %428 = vector.extract_strided_slice %421 {offsets = [0, 128], sizes = [16, 128], strides = [1, 1]} : vector<16x512xf32> to vector<16x128xf32>
    %429 = arith.negf %428 : vector<16x128xf32>
    %430 = math.exp %429 : vector<16x128xf32>
    %cst_127 = arith.constant 1.000000e+00 : f32
    %431 = vector.broadcast %cst_127 : f32 to vector<16x128xf32>
    %432 = arith.addf %431, %430 : vector<16x128xf32>
    %433 = arith.divf %431, %432 : vector<16x128xf32>
    %434 = vector.extract_strided_slice %421 {offsets = [0, 256], sizes = [16, 128], strides = [1, 1]} : vector<16x512xf32> to vector<16x128xf32>
    %435 = math.tanh %434 : vector<16x128xf32>
    %436 = vector.extract_strided_slice %421 {offsets = [0, 384], sizes = [16, 128], strides = [1, 1]} : vector<16x512xf32> to vector<16x128xf32>
    %437 = arith.negf %436 : vector<16x128xf32>
    %438 = math.exp %437 : vector<16x128xf32>
    %cst_128 = arith.constant 1.000000e+00 : f32
    %439 = vector.broadcast %cst_128 : f32 to vector<16x128xf32>
    %440 = arith.addf %439, %438 : vector<16x128xf32>
    %441 = arith.divf %439, %440 : vector<16x128xf32>
    %442 = arith.mulf %433, %403 : vector<16x128xf32>
    %443 = arith.mulf %427, %435 : vector<16x128xf32>
    %444 = arith.addf %442, %443 : vector<16x128xf32>
    %445 = math.tanh %444 : vector<16x128xf32>
    %446 = arith.mulf %441, %445 : vector<16x128xf32>
    %447 = arith.addi %4, %c2_i32_122 : i32
    %448 = arith.sitofp %447 : i32 to f32
    %449 = vector.broadcast %448 : f32 to vector<16x1xf32>
    %450 = arith.cmpf olt, %449, %3 : vector<16x1xf32>
    %451 = arith.extui %450 : vector<16x1xi1> to vector<16x1xi32>
    %452 = arith.sitofp %451 : vector<16x1xi32> to vector<16x1xf32>
    %453 = vector.broadcast %452 : vector<16x1xf32> to vector<16x128xf32>
    %454 = arith.mulf %446, %453 : vector<16x128xf32>
    %455 = arith.addf %414, %454 : vector<16x128xf32>
    %c3_i32_129 = arith.constant 3 : i32
    %c16_i32_130 = arith.constant 16 : i32
    %456 = arith.muli %c3_i32_129, %c16_i32_130 : i32
    %457 = tpu.assume_multiple %456, 16 : i32
    %458 = arith.index_cast %457 : i32 to index
    %c0_131 = arith.constant 0 : index
    %459 = vector.load %arg17[%458, %c0_131] : memref<128x512xf32, #tpu.memory_space<vmem>>, vector<16x512xf32>
    %460 = arith.truncf %446 : vector<16x128xf32> to vector<16x128xbf16>
    %cst_132 = arith.constant dense<0.000000e+00> : vector<16x512xf32>
    %461 = tpu.matmul %460, %327, %cst_132 {dimension_numbers = #tpu.dot_dimension_numbers<[1], [0], [0], [1], [0, 0, 1, 1], [], []>} : vector<16x128xbf16>, vector<128x512xbf16>, vector<16x512xf32> -> vector<16x512xf32>
    %462 = arith.addf %459, %461 : vector<16x512xf32>
    %463 = vector.extract_strided_slice %462 {offsets = [0, 0], sizes = [16, 128], strides = [1, 1]} : vector<16x512xf32> to vector<16x128xf32>
    %464 = arith.negf %463 : vector<16x128xf32>
    %465 = math.exp %464 : vector<16x128xf32>
    %cst_133 = arith.constant 1.000000e+00 : f32
    %466 = vector.broadcast %cst_133 : f32 to vector<16x128xf32>
    %467 = arith.addf %466, %465 : vector<16x128xf32>
    %468 = arith.divf %466, %467 : vector<16x128xf32>
    %469 = vector.extract_strided_slice %462 {offsets = [0, 128], sizes = [16, 128], strides = [1, 1]} : vector<16x512xf32> to vector<16x128xf32>
    %470 = arith.negf %469 : vector<16x128xf32>
    %471 = math.exp %470 : vector<16x128xf32>
    %cst_134 = arith.constant 1.000000e+00 : f32
    %472 = vector.broadcast %cst_134 : f32 to vector<16x128xf32>
    %473 = arith.addf %472, %471 : vector<16x128xf32>
    %474 = arith.divf %472, %473 : vector<16x128xf32>
    %475 = vector.extract_strided_slice %462 {offsets = [0, 256], sizes = [16, 128], strides = [1, 1]} : vector<16x512xf32> to vector<16x128xf32>
    %476 = math.tanh %475 : vector<16x128xf32>
    %477 = vector.extract_strided_slice %462 {offsets = [0, 384], sizes = [16, 128], strides = [1, 1]} : vector<16x512xf32> to vector<16x128xf32>
    %478 = arith.negf %477 : vector<16x128xf32>
    %479 = math.exp %478 : vector<16x128xf32>
    %cst_135 = arith.constant 1.000000e+00 : f32
    %480 = vector.broadcast %cst_135 : f32 to vector<16x128xf32>
    %481 = arith.addf %480, %479 : vector<16x128xf32>
    %482 = arith.divf %480, %481 : vector<16x128xf32>
    %483 = arith.mulf %474, %444 : vector<16x128xf32>
    %484 = arith.mulf %468, %476 : vector<16x128xf32>
    %485 = arith.addf %483, %484 : vector<16x128xf32>
    %486 = math.tanh %485 : vector<16x128xf32>
    %487 = arith.mulf %482, %486 : vector<16x128xf32>
    %488 = arith.addi %4, %c3_i32_129 : i32
    %489 = arith.sitofp %488 : i32 to f32
    %490 = vector.broadcast %489 : f32 to vector<16x1xf32>
    %491 = arith.cmpf olt, %490, %3 : vector<16x1xf32>
    %492 = arith.extui %491 : vector<16x1xi1> to vector<16x1xi32>
    %493 = arith.sitofp %492 : vector<16x1xi32> to vector<16x1xf32>
    %494 = vector.broadcast %493 : vector<16x1xf32> to vector<16x128xf32>
    %495 = arith.mulf %487, %494 : vector<16x128xf32>
    %496 = arith.addf %455, %495 : vector<16x128xf32>
    %c4_i32_136 = arith.constant 4 : i32
    %c16_i32_137 = arith.constant 16 : i32
    %497 = arith.muli %c4_i32_136, %c16_i32_137 : i32
    %498 = tpu.assume_multiple %497, 16 : i32
    %499 = arith.index_cast %498 : i32 to index
    %c0_138 = arith.constant 0 : index
    %500 = vector.load %arg17[%499, %c0_138] : memref<128x512xf32, #tpu.memory_space<vmem>>, vector<16x512xf32>
    %501 = arith.truncf %487 : vector<16x128xf32> to vector<16x128xbf16>
    %cst_139 = arith.constant dense<0.000000e+00> : vector<16x512xf32>
    %502 = tpu.matmul %501, %327, %cst_139 {dimension_numbers = #tpu.dot_dimension_numbers<[1], [0], [0], [1], [0, 0, 1, 1], [], []>} : vector<16x128xbf16>, vector<128x512xbf16>, vector<16x512xf32> -> vector<16x512xf32>
    %503 = arith.addf %500, %502 : vector<16x512xf32>
    %504 = vector.extract_strided_slice %503 {offsets = [0, 0], sizes = [16, 128], strides = [1, 1]} : vector<16x512xf32> to vector<16x128xf32>
    %505 = arith.negf %504 : vector<16x128xf32>
    %506 = math.exp %505 : vector<16x128xf32>
    %cst_140 = arith.constant 1.000000e+00 : f32
    %507 = vector.broadcast %cst_140 : f32 to vector<16x128xf32>
    %508 = arith.addf %507, %506 : vector<16x128xf32>
    %509 = arith.divf %507, %508 : vector<16x128xf32>
    %510 = vector.extract_strided_slice %503 {offsets = [0, 128], sizes = [16, 128], strides = [1, 1]} : vector<16x512xf32> to vector<16x128xf32>
    %511 = arith.negf %510 : vector<16x128xf32>
    %512 = math.exp %511 : vector<16x128xf32>
    %cst_141 = arith.constant 1.000000e+00 : f32
    %513 = vector.broadcast %cst_141 : f32 to vector<16x128xf32>
    %514 = arith.addf %513, %512 : vector<16x128xf32>
    %515 = arith.divf %513, %514 : vector<16x128xf32>
    %516 = vector.extract_strided_slice %503 {offsets = [0, 256], sizes = [16, 128], strides = [1, 1]} : vector<16x512xf32> to vector<16x128xf32>
    %517 = math.tanh %516 : vector<16x128xf32>
    %518 = vector.extract_strided_slice %503 {offsets = [0, 384], sizes = [16, 128], strides = [1, 1]} : vector<16x512xf32> to vector<16x128xf32>
    %519 = arith.negf %518 : vector<16x128xf32>
    %520 = math.exp %519 : vector<16x128xf32>
    %cst_142 = arith.constant 1.000000e+00 : f32
    %521 = vector.broadcast %cst_142 : f32 to vector<16x128xf32>
    %522 = arith.addf %521, %520 : vector<16x128xf32>
    %523 = arith.divf %521, %522 : vector<16x128xf32>
    %524 = arith.mulf %515, %485 : vector<16x128xf32>
    %525 = arith.mulf %509, %517 : vector<16x128xf32>
    %526 = arith.addf %524, %525 : vector<16x128xf32>
    %527 = math.tanh %526 : vector<16x128xf32>
    %528 = arith.mulf %523, %527 : vector<16x128xf32>
    %529 = arith.addi %4, %c4_i32_136 : i32
    %530 = arith.sitofp %529 : i32 to f32
    %531 = vector.broadcast %530 : f32 to vector<16x1xf32>
    %532 = arith.cmpf olt, %531, %3 : vector<16x1xf32>
    %533 = arith.extui %532 : vector<16x1xi1> to vector<16x1xi32>
    %534 = arith.sitofp %533 : vector<16x1xi32> to vector<16x1xf32>
    %535 = vector.broadcast %534 : vector<16x1xf32> to vector<16x128xf32>
    %536 = arith.mulf %528, %535 : vector<16x128xf32>
    %537 = arith.addf %496, %536 : vector<16x128xf32>
    %c5_i32_143 = arith.constant 5 : i32
    %c16_i32_144 = arith.constant 16 : i32
    %538 = arith.muli %c5_i32_143, %c16_i32_144 : i32
    %539 = tpu.assume_multiple %538, 16 : i32
    %540 = arith.index_cast %539 : i32 to index
    %c0_145 = arith.constant 0 : index
    %541 = vector.load %arg17[%540, %c0_145] : memref<128x512xf32, #tpu.memory_space<vmem>>, vector<16x512xf32>
    %542 = arith.truncf %528 : vector<16x128xf32> to vector<16x128xbf16>
    %cst_146 = arith.constant dense<0.000000e+00> : vector<16x512xf32>
    %543 = tpu.matmul %542, %327, %cst_146 {dimension_numbers = #tpu.dot_dimension_numbers<[1], [0], [0], [1], [0, 0, 1, 1], [], []>} : vector<16x128xbf16>, vector<128x512xbf16>, vector<16x512xf32> -> vector<16x512xf32>
    %544 = arith.addf %541, %543 : vector<16x512xf32>
    %545 = vector.extract_strided_slice %544 {offsets = [0, 0], sizes = [16, 128], strides = [1, 1]} : vector<16x512xf32> to vector<16x128xf32>
    %546 = arith.negf %545 : vector<16x128xf32>
    %547 = math.exp %546 : vector<16x128xf32>
    %cst_147 = arith.constant 1.000000e+00 : f32
    %548 = vector.broadcast %cst_147 : f32 to vector<16x128xf32>
    %549 = arith.addf %548, %547 : vector<16x128xf32>
    %550 = arith.divf %548, %549 : vector<16x128xf32>
    %551 = vector.extract_strided_slice %544 {offsets = [0, 128], sizes = [16, 128], strides = [1, 1]} : vector<16x512xf32> to vector<16x128xf32>
    %552 = arith.negf %551 : vector<16x128xf32>
    %553 = math.exp %552 : vector<16x128xf32>
    %cst_148 = arith.constant 1.000000e+00 : f32
    %554 = vector.broadcast %cst_148 : f32 to vector<16x128xf32>
    %555 = arith.addf %554, %553 : vector<16x128xf32>
    %556 = arith.divf %554, %555 : vector<16x128xf32>
    %557 = vector.extract_strided_slice %544 {offsets = [0, 256], sizes = [16, 128], strides = [1, 1]} : vector<16x512xf32> to vector<16x128xf32>
    %558 = math.tanh %557 : vector<16x128xf32>
    %559 = vector.extract_strided_slice %544 {offsets = [0, 384], sizes = [16, 128], strides = [1, 1]} : vector<16x512xf32> to vector<16x128xf32>
    %560 = arith.negf %559 : vector<16x128xf32>
    %561 = math.exp %560 : vector<16x128xf32>
    %cst_149 = arith.constant 1.000000e+00 : f32
    %562 = vector.broadcast %cst_149 : f32 to vector<16x128xf32>
    %563 = arith.addf %562, %561 : vector<16x128xf32>
    %564 = arith.divf %562, %563 : vector<16x128xf32>
    %565 = arith.mulf %556, %526 : vector<16x128xf32>
    %566 = arith.mulf %550, %558 : vector<16x128xf32>
    %567 = arith.addf %565, %566 : vector<16x128xf32>
    %568 = math.tanh %567 : vector<16x128xf32>
    %569 = arith.mulf %564, %568 : vector<16x128xf32>
    %570 = arith.addi %4, %c5_i32_143 : i32
    %571 = arith.sitofp %570 : i32 to f32
    %572 = vector.broadcast %571 : f32 to vector<16x1xf32>
    %573 = arith.cmpf olt, %572, %3 : vector<16x1xf32>
    %574 = arith.extui %573 : vector<16x1xi1> to vector<16x1xi32>
    %575 = arith.sitofp %574 : vector<16x1xi32> to vector<16x1xf32>
    %576 = vector.broadcast %575 : vector<16x1xf32> to vector<16x128xf32>
    %577 = arith.mulf %569, %576 : vector<16x128xf32>
    %578 = arith.addf %537, %577 : vector<16x128xf32>
    %c6_i32_150 = arith.constant 6 : i32
    %c16_i32_151 = arith.constant 16 : i32
    %579 = arith.muli %c6_i32_150, %c16_i32_151 : i32
    %580 = tpu.assume_multiple %579, 16 : i32
    %581 = arith.index_cast %580 : i32 to index
    %c0_152 = arith.constant 0 : index
    %582 = vector.load %arg17[%581, %c0_152] : memref<128x512xf32, #tpu.memory_space<vmem>>, vector<16x512xf32>
    %583 = arith.truncf %569 : vector<16x128xf32> to vector<16x128xbf16>
    %cst_153 = arith.constant dense<0.000000e+00> : vector<16x512xf32>
    %584 = tpu.matmul %583, %327, %cst_153 {dimension_numbers = #tpu.dot_dimension_numbers<[1], [0], [0], [1], [0, 0, 1, 1], [], []>} : vector<16x128xbf16>, vector<128x512xbf16>, vector<16x512xf32> -> vector<16x512xf32>
    %585 = arith.addf %582, %584 : vector<16x512xf32>
    %586 = vector.extract_strided_slice %585 {offsets = [0, 0], sizes = [16, 128], strides = [1, 1]} : vector<16x512xf32> to vector<16x128xf32>
    %587 = arith.negf %586 : vector<16x128xf32>
    %588 = math.exp %587 : vector<16x128xf32>
    %cst_154 = arith.constant 1.000000e+00 : f32
    %589 = vector.broadcast %cst_154 : f32 to vector<16x128xf32>
    %590 = arith.addf %589, %588 : vector<16x128xf32>
    %591 = arith.divf %589, %590 : vector<16x128xf32>
    %592 = vector.extract_strided_slice %585 {offsets = [0, 128], sizes = [16, 128], strides = [1, 1]} : vector<16x512xf32> to vector<16x128xf32>
    %593 = arith.negf %592 : vector<16x128xf32>
    %594 = math.exp %593 : vector<16x128xf32>
    %cst_155 = arith.constant 1.000000e+00 : f32
    %595 = vector.broadcast %cst_155 : f32 to vector<16x128xf32>
    %596 = arith.addf %595, %594 : vector<16x128xf32>
    %597 = arith.divf %595, %596 : vector<16x128xf32>
    %598 = vector.extract_strided_slice %585 {offsets = [0, 256], sizes = [16, 128], strides = [1, 1]} : vector<16x512xf32> to vector<16x128xf32>
    %599 = math.tanh %598 : vector<16x128xf32>
    %600 = vector.extract_strided_slice %585 {offsets = [0, 384], sizes = [16, 128], strides = [1, 1]} : vector<16x512xf32> to vector<16x128xf32>
    %601 = arith.negf %600 : vector<16x128xf32>
    %602 = math.exp %601 : vector<16x128xf32>
    %cst_156 = arith.constant 1.000000e+00 : f32
    %603 = vector.broadcast %cst_156 : f32 to vector<16x128xf32>
    %604 = arith.addf %603, %602 : vector<16x128xf32>
    %605 = arith.divf %603, %604 : vector<16x128xf32>
    %606 = arith.mulf %597, %567 : vector<16x128xf32>
    %607 = arith.mulf %591, %599 : vector<16x128xf32>
    %608 = arith.addf %606, %607 : vector<16x128xf32>
    %609 = math.tanh %608 : vector<16x128xf32>
    %610 = arith.mulf %605, %609 : vector<16x128xf32>
    %611 = arith.addi %4, %c6_i32_150 : i32
    %612 = arith.sitofp %611 : i32 to f32
    %613 = vector.broadcast %612 : f32 to vector<16x1xf32>
    %614 = arith.cmpf olt, %613, %3 : vector<16x1xf32>
    %615 = arith.extui %614 : vector<16x1xi1> to vector<16x1xi32>
    %616 = arith.sitofp %615 : vector<16x1xi32> to vector<16x1xf32>
    %617 = vector.broadcast %616 : vector<16x1xf32> to vector<16x128xf32>
    %618 = arith.mulf %610, %617 : vector<16x128xf32>
    %619 = arith.addf %578, %618 : vector<16x128xf32>
    %c7_i32_157 = arith.constant 7 : i32
    %c16_i32_158 = arith.constant 16 : i32
    %620 = arith.muli %c7_i32_157, %c16_i32_158 : i32
    %621 = tpu.assume_multiple %620, 16 : i32
    %622 = arith.index_cast %621 : i32 to index
    %c0_159 = arith.constant 0 : index
    %623 = vector.load %arg17[%622, %c0_159] : memref<128x512xf32, #tpu.memory_space<vmem>>, vector<16x512xf32>
    %624 = arith.truncf %610 : vector<16x128xf32> to vector<16x128xbf16>
    %cst_160 = arith.constant dense<0.000000e+00> : vector<16x512xf32>
    %625 = tpu.matmul %624, %327, %cst_160 {dimension_numbers = #tpu.dot_dimension_numbers<[1], [0], [0], [1], [0, 0, 1, 1], [], []>} : vector<16x128xbf16>, vector<128x512xbf16>, vector<16x512xf32> -> vector<16x512xf32>
    %626 = arith.addf %623, %625 : vector<16x512xf32>
    %627 = vector.extract_strided_slice %626 {offsets = [0, 0], sizes = [16, 128], strides = [1, 1]} : vector<16x512xf32> to vector<16x128xf32>
    %628 = arith.negf %627 : vector<16x128xf32>
    %629 = math.exp %628 : vector<16x128xf32>
    %cst_161 = arith.constant 1.000000e+00 : f32
    %630 = vector.broadcast %cst_161 : f32 to vector<16x128xf32>
    %631 = arith.addf %630, %629 : vector<16x128xf32>
    %632 = arith.divf %630, %631 : vector<16x128xf32>
    %633 = vector.extract_strided_slice %626 {offsets = [0, 128], sizes = [16, 128], strides = [1, 1]} : vector<16x512xf32> to vector<16x128xf32>
    %634 = arith.negf %633 : vector<16x128xf32>
    %635 = math.exp %634 : vector<16x128xf32>
    %cst_162 = arith.constant 1.000000e+00 : f32
    %636 = vector.broadcast %cst_162 : f32 to vector<16x128xf32>
    %637 = arith.addf %636, %635 : vector<16x128xf32>
    %638 = arith.divf %636, %637 : vector<16x128xf32>
    %639 = vector.extract_strided_slice %626 {offsets = [0, 256], sizes = [16, 128], strides = [1, 1]} : vector<16x512xf32> to vector<16x128xf32>
    %640 = math.tanh %639 : vector<16x128xf32>
    %641 = vector.extract_strided_slice %626 {offsets = [0, 384], sizes = [16, 128], strides = [1, 1]} : vector<16x512xf32> to vector<16x128xf32>
    %642 = arith.negf %641 : vector<16x128xf32>
    %643 = math.exp %642 : vector<16x128xf32>
    %cst_163 = arith.constant 1.000000e+00 : f32
    %644 = vector.broadcast %cst_163 : f32 to vector<16x128xf32>
    %645 = arith.addf %644, %643 : vector<16x128xf32>
    %646 = arith.divf %644, %645 : vector<16x128xf32>
    %647 = arith.mulf %638, %608 : vector<16x128xf32>
    %648 = arith.mulf %632, %640 : vector<16x128xf32>
    %649 = arith.addf %647, %648 : vector<16x128xf32>
    %650 = math.tanh %649 : vector<16x128xf32>
    %651 = arith.mulf %646, %650 : vector<16x128xf32>
    %652 = arith.addi %4, %c7_i32_157 : i32
    %653 = arith.sitofp %652 : i32 to f32
    %654 = vector.broadcast %653 : f32 to vector<16x1xf32>
    %655 = arith.cmpf olt, %654, %3 : vector<16x1xf32>
    %656 = arith.extui %655 : vector<16x1xi1> to vector<16x1xi32>
    %657 = arith.sitofp %656 : vector<16x1xi32> to vector<16x1xf32>
    %658 = vector.broadcast %657 : vector<16x1xf32> to vector<16x128xf32>
    %659 = arith.mulf %651, %658 : vector<16x128xf32>
    %660 = arith.addf %619, %659 : vector<16x128xf32>
    %c8_i32_164 = arith.constant 8 : i32
    %c0_165 = arith.constant 0 : index
    %c0_166 = arith.constant 0 : index
    %661 = vector.load %arg20[%c0_165, %c0_166] : memref<16x128xf32, #tpu.memory_space<vmem>>, vector<16x128xf32>
    tpu.vector_store %arg20[%c0_165, %c0_166], %660 {strides = array<i32>} : memref<16x128xf32, #tpu.memory_space<vmem>>, vector<16x128xf32>,
    %c1_167 = arith.constant 1 : index
    %c0_168 = arith.constant 0 : index
    %c0_169 = arith.constant 0 : index
    %662 = vector.load %arg18[%c1_167, %c0_168, %c0_169] : memref<2x16x128xf32, #tpu.memory_space<vmem>>, vector<1x16x128xf32>
    %663 = vector.shape_cast %662 : vector<1x16x128xf32> to vector<16x128xf32>
    %664 = vector.shape_cast %651 : vector<16x128xf32> to vector<1x16x128xf32>
    tpu.vector_store %arg18[%c1_167, %c0_168, %c0_169], %664 {strides = array<i32>} : memref<2x16x128xf32, #tpu.memory_space<vmem>>, vector<1x16x128xf32>,
    %c1_170 = arith.constant 1 : index
    %c0_171 = arith.constant 0 : index
    %c0_172 = arith.constant 0 : index
    %665 = vector.load %arg19[%c1_170, %c0_171, %c0_172] : memref<2x16x128xf32, #tpu.memory_space<vmem>>, vector<1x16x128xf32>
    %666 = vector.shape_cast %665 : vector<1x16x128xf32> to vector<16x128xf32>
    %667 = vector.shape_cast %649 : vector<16x128xf32> to vector<1x16x128xf32>
    tpu.vector_store %arg19[%c1_170, %c0_171, %c0_172], %667 {strides = array<i32>} : memref<2x16x128xf32, #tpu.memory_space<vmem>>, vector<1x16x128xf32>,
    %c0_i32_173 = arith.constant 0 : i32
    %668 = arith.cmpi eq, %arg1, %c0_i32_173 : i32
    %669 = arith.extui %668 : i1 to i32
    %c0_i32_174 = arith.constant 0 : i32
    %670 = arith.cmpi ne, %669, %c0_i32_174 : i32
    scf.if %670 {
      %c0_175 = arith.constant 0 : index
      %c0_176 = arith.constant 0 : index
      %671 = vector.load %arg20[%c0_175, %c0_176] : memref<16x128xf32, #tpu.memory_space<vmem>>, vector<16x128xf32>
      %672 = vector.broadcast %3 : vector<16x1xf32> to vector<16x128xf32>
      %673 = arith.divf %671, %672 : vector<16x128xf32>
      %674 = tpu.iota {dimensions = array<i32: 1>} : vector<1x128xi32>
      %c32_i32 = arith.constant 32 : i32
      %675 = vector.broadcast %c32_i32 : i32 to vector<1x128xi32>
      %676 = arith.cmpi slt, %674, %675 : vector<1x128xi32>
      %677 = arith.extui %676 : vector<1x128xi1> to vector<1x128xi32>
      %678 = arith.sitofp %677 : vector<1x128xi32> to vector<1x128xf32>
      %cst_177 = arith.constant dense<0.000000e+00> : vector<16xf32>
      %679 = vector.multi_reduction <add>, %673, %cst_177 [1] : vector<16x128xf32> to vector<16xf32>
      %680 = vector.shape_cast %679 : vector<16xf32> to vector<16x1xf32>
      %cst_178 = arith.constant 3.125000e-02 : f32
      %681 = vector.broadcast %cst_178 : f32 to vector<16x1xf32>
      %682 = arith.mulf %680, %681 : vector<16x1xf32>
      %683 = vector.broadcast %682 : vector<16x1xf32> to vector<16x128xf32>
      %684 = arith.subf %673, %683 : vector<16x128xf32>
      %685 = vector.broadcast %678 : vector<1x128xf32> to vector<16x128xf32>
      %686 = arith.mulf %684, %685 : vector<16x128xf32>
      %687 = arith.mulf %686, %686 : vector<16x128xf32>
      %cst_179 = arith.constant dense<0.000000e+00> : vector<16xf32>
      %688 = vector.multi_reduction <add>, %687, %cst_179 [1] : vector<16x128xf32> to vector<16xf32>
      %689 = vector.shape_cast %688 : vector<16xf32> to vector<16x1xf32>
      %cst_180 = arith.constant 3.125000e-02 : f32
      %690 = vector.broadcast %cst_180 : f32 to vector<16x1xf32>
      %691 = arith.mulf %689, %690 : vector<16x1xf32>
      %cst_181 = arith.constant 9.99999974E-6 : f32
      %692 = vector.broadcast %cst_181 : f32 to vector<16x1xf32>
      %693 = arith.addf %691, %692 : vector<16x1xf32>
      %694 = math.rsqrt %693 : vector<16x1xf32>
      %695 = vector.broadcast %694 : vector<16x1xf32> to vector<16x128xf32>
      %696 = arith.mulf %686, %695 : vector<16x128xf32>
      %c0_182 = arith.constant 0 : index
      %c0_183 = arith.constant 0 : index
      %697 = vector.load %arg10[%c0_182, %c0_183] : memref<1x128xf32, #tpu.memory_space<vmem>>, vector<1x128xf32>
      %698 = vector.broadcast %697 : vector<1x128xf32> to vector<16x128xf32>
      %699 = arith.mulf %696, %698 : vector<16x128xf32>
      %c0_184 = arith.constant 0 : index
      %c0_185 = arith.constant 0 : index
      %700 = vector.load %arg11[%c0_184, %c0_185] : memref<1x128xf32, #tpu.memory_space<vmem>>, vector<1x128xf32>
      %701 = vector.broadcast %700 : vector<1x128xf32> to vector<16x128xf32>
      %702 = arith.addf %699, %701 : vector<16x128xf32>
      %703 = arith.truncf %702 : vector<16x128xf32> to vector<16x128xbf16>
      %c0_186 = arith.constant 0 : index
      %c0_187 = arith.constant 0 : index
      %704 = vector.load %arg12[%c0_186, %c0_187] : memref<128x128xbf16, #tpu.memory_space<vmem>>, vector<128x128xbf16>
      %cst_188 = arith.constant dense<0.000000e+00> : vector<16x128xf32>
      %705 = tpu.matmul %703, %704, %cst_188 {dimension_numbers = #tpu.dot_dimension_numbers<[1], [0], [0], [1], [0, 0, 1, 1], [], []>} : vector<16x128xbf16>, vector<128x128xbf16>, vector<16x128xf32> -> vector<16x128xf32>
      %c0_189 = arith.constant 0 : index
      %c0_190 = arith.constant 0 : index
      %706 = vector.load %arg13[%c0_189, %c0_190] : memref<1x128xf32, #tpu.memory_space<vmem>>, vector<1x128xf32>
      %707 = vector.broadcast %706 : vector<1x128xf32> to vector<16x128xf32>
      %708 = arith.addf %705, %707 : vector<16x128xf32>
      %cst_191 = arith.constant 0.000000e+00 : f32
      %709 = vector.broadcast %cst_191 : f32 to vector<16x128xf32>
      %710 = arith.maximumf %708, %709 : vector<16x128xf32>
      %711 = arith.truncf %710 : vector<16x128xf32> to vector<16x128xbf16>
      %c0_192 = arith.constant 0 : index
      %c0_193 = arith.constant 0 : index
      %712 = vector.load %arg14[%c0_192, %c0_193] : memref<128x128xbf16, #tpu.memory_space<vmem>>, vector<128x128xbf16>
      %cst_194 = arith.constant dense<0.000000e+00> : vector<16x128xf32>
      %713 = tpu.matmul %711, %712, %cst_194 {dimension_numbers = #tpu.dot_dimension_numbers<[1], [0], [0], [1], [0, 0, 1, 1], [], []>} : vector<16x128xbf16>, vector<128x128xbf16>, vector<16x128xf32> -> vector<16x128xf32>
      %c0_195 = arith.constant 0 : index
      %c0_196 = arith.constant 0 : index
      %714 = vector.load %arg15[%c0_195, %c0_196] : memref<1x128xf32, #tpu.memory_space<vmem>>, vector<1x128xf32>
      %715 = vector.broadcast %714 : vector<1x128xf32> to vector<16x128xf32>
      %716 = arith.addf %713, %715 : vector<16x128xf32>
      %c0_197 = arith.constant 0 : index
      %c0_198 = arith.constant 0 : index
      %717 = vector.load %arg16[%c0_197, %c0_198] : memref<16x128xf32, #tpu.memory_space<vmem>>, vector<16x128xf32>
      tpu.vector_store %arg16[%c0_197, %c0_198], %716 {strides = array<i32>} : memref<16x128xf32, #tpu.memory_space<vmem>>, vector<16x128xf32>,
    } else {
    }
    return
  }
  func.func @transform_0(%arg0: i32, %arg1: i32) -> (i32, i32, i32) {
    %c0_i32 = arith.constant 0 : i32
    %c0_i32_0 = arith.constant 0 : i32
    return %arg1, %arg0, %c0_i32 : i32, i32, i32
  }
  func.func @transform_1(%arg0: i32, %arg1: i32) -> (i32, i32) {
    %c0_i32 = arith.constant 0 : i32
    %c0_i32_0 = arith.constant 0 : i32
    return %arg0, %c0_i32 : i32, i32
  }
  func.func @transform_2(%arg0: i32, %arg1: i32) -> (i32, i32) {
    %c0_i32 = arith.constant 0 : i32
    %c0_i32_0 = arith.constant 0 : i32
    %c0_i32_1 = arith.constant 0 : i32
    return %c0_i32, %c0_i32_0 : i32, i32
  }
  func.func @transform_3(%arg0: i32, %arg1: i32) -> (i32, i32) {
    %c0_i32 = arith.constant 0 : i32
    %c0_i32_0 = arith.constant 0 : i32
    %c0_i32_1 = arith.constant 0 : i32
    return %c0_i32, %c0_i32_0 : i32, i32
  }
  func.func @transform_4(%arg0: i32, %arg1: i32) -> (i32, i32) {
    %c0_i32 = arith.constant 0 : i32
    %c0_i32_0 = arith.constant 0 : i32
    %c0_i32_1 = arith.constant 0 : i32
    return %c0_i32, %c0_i32_0 : i32, i32
  }
  func.func @transform_5(%arg0: i32, %arg1: i32) -> (i32, i32) {
    %c0_i32 = arith.constant 0 : i32
    %c0_i32_0 = arith.constant 0 : i32
    %c0_i32_1 = arith.constant 0 : i32
    return %c0_i32, %c0_i32_0 : i32, i32
  }
  func.func @transform_6(%arg0: i32, %arg1: i32) -> (i32, i32) {
    %c0_i32 = arith.constant 0 : i32
    %c0_i32_0 = arith.constant 0 : i32
    %c0_i32_1 = arith.constant 0 : i32
    return %c0_i32, %c0_i32_0 : i32, i32
  }
  func.func @transform_7(%arg0: i32, %arg1: i32) -> (i32, i32) {
    %c0_i32 = arith.constant 0 : i32
    %c0_i32_0 = arith.constant 0 : i32
    %c0_i32_1 = arith.constant 0 : i32
    return %c0_i32, %c0_i32_0 : i32, i32
  }
  func.func @transform_8(%arg0: i32, %arg1: i32) -> (i32, i32) {
    %c0_i32 = arith.constant 0 : i32
    %c0_i32_0 = arith.constant 0 : i32
    %c0_i32_1 = arith.constant 0 : i32
    return %c0_i32, %c0_i32_0 : i32, i32
  }
  func.func @transform_9(%arg0: i32, %arg1: i32) -> (i32, i32) {
    %c0_i32 = arith.constant 0 : i32
    %c0_i32_0 = arith.constant 0 : i32
    %c0_i32_1 = arith.constant 0 : i32
    return %c0_i32, %c0_i32_0 : i32, i32
  }
  func.func @transform_10(%arg0: i32, %arg1: i32) -> (i32, i32) {
    %c0_i32 = arith.constant 0 : i32
    %c0_i32_0 = arith.constant 0 : i32
    %c0_i32_1 = arith.constant 0 : i32
    return %c0_i32, %c0_i32_0 : i32, i32
  }
  func.func @transform_11(%arg0: i32, %arg1: i32) -> (i32, i32) {
    %c0_i32 = arith.constant 0 : i32
    %c0_i32_0 = arith.constant 0 : i32
    %c0_i32_1 = arith.constant 0 : i32
    return %c0_i32, %c0_i32_0 : i32, i32
  }
  func.func @transform_12(%arg0: i32, %arg1: i32) -> (i32, i32) {
    %c0_i32 = arith.constant 0 : i32
    %c0_i32_0 = arith.constant 0 : i32
    %c0_i32_1 = arith.constant 0 : i32
    return %c0_i32, %c0_i32_0 : i32, i32
  }
  func.func @transform_13(%arg0: i32, %arg1: i32) -> (i32, i32) {
    %c0_i32 = arith.constant 0 : i32
    %c0_i32_0 = arith.constant 0 : i32
    %c0_i32_1 = arith.constant 0 : i32
    return %c0_i32, %c0_i32_0 : i32, i32
  }
  func.func @transform_14(%arg0: i32, %arg1: i32) -> (i32, i32) {
    %c0_i32 = arith.constant 0 : i32
    %c0_i32_0 = arith.constant 0 : i32
    return %arg0, %c0_i32 : i32, i32
  }
}

</mosaic_0001>

<bundles_post_ra>
// kernel: fused_lstm_forward.1
= control target key start
LH: loop header
LB: loop body
LE: loop exit
PB: predicated region body
PF: predicated region fallthrough
CT: control target
= control target key end

     0   :  { %vm155_vm0 = vcmask 130048   ;;  %s9709_s2 = inlined_call_operand.vmem [shape: bf16[16,512], index: 2, kind: input, shape index: {}]   ;;  %s9710_s0 = inlined_call_operand.vmem [shape: bf16[8,16,16], index: 0, kind: input, shape index: {}]   ;;  %s9711_s3 = inlined_call_operand.vmem [shape: bf16[128,512], index: 3, kind: input, shape index: {}]   ;;  %s9712_s4 = inlined_call_operand.vmem [shape: f32[1,512], index: 4, kind: input, shape index: {}]   ;;  %s9713_s5 = inlined_call_operand.vmem [shape: bf16[128,512], index: 5, kind: input, shape index: {}]   ;;  %s9714_s6 = inlined_call_operand.vmem [shape: bf16[128,512], index: 6, kind: input, shape index: {}]   ;;  %s9715_s1 = inlined_call_operand.vmem [shape: f32[16,1], index: 1, kind: input, shape index: {}]   ;;  %s9716_s7 = inlined_call_operand.vmem [shape: f32[1,512], index: 7, kind: input, shape index: {}]   ;;  %s9717_s8 = inlined_call_operand.vmem [shape: f32[1,128], index: 8, kind: input, shape index: {}]   ;;  %s9718_s9 = inlined_call_operand.vmem [shape: f32[1,128], index: 9, kind: input, shape index: {}]   ;;  %s9719_s11 = inlined_call_operand.vmem [shape: f32[1,128], index: 11, kind: input, shape index: {}]   ;;  %s9720_s10 = inlined_call_operand.vmem [shape: bf16[128,128], index: 10, kind: input, shape index: {}]   ;;  %s9721_s12 = inlined_call_operand.vmem [shape: bf16[128,128], index: 12, kind: input, shape index: {}]   ;;  %s9722_s13 = inlined_call_operand.vmem [shape: f32[1,128], index: 13, kind: input, shape index: {}]   ;;  %s9723_s14 = inlined_call_operand.vmem [shape: f32[16,128], index: 14, kind: output, shape index: {}]  }
   0x1   :  { %v5156_v0 = vld [vmem:[%s9709_s2] sm:$0xf]  ;;  %v5821_v1 = vld [vmem:[%s9709_s2 + $0xc] sm:$0xf0]  ;;  %v5819_v2 = vld [vmem:[%s9709_s2 + $0x4] sm:$0xf] }
   0x2   :  { %v5157_v3 = vor.u32 %v5821_v1, %v5156_v0  ;;  %v5158_v4 = vld [vmem:[%s9709_s2 + $0x10] sm:$0xf0]  ;;  %v5811_v5 = vld [vmem:[%s9710_s0] sm:$0xff]  ;;  %v6655_v6 = vld [vmem:[%s9710_s0 + $0x38] sm:$0xff] }
   0x3   :  { %v5161_v7 = vor.u32 %v5819_v2, %v5158_v4  ;;  %v5820_v8 = vld [vmem:[%s9709_s2 + $0xc] sm:$0xf]  ;;  %v5166_v9 = vld [vmem:[%s9709_s2 + $0x18] sm:$0xf0]  ;;  %v5164_v10 = vld [vmem:[%s9709_s2 + $0x8] sm:$0xf] }
   0x4   :  { %187 = vmatpush.bf16.msra.mxu0 %v5157_v3  ;;  %5983 = vmatpush.bf16.msra.mxu2 %v5157_v3  ;;  %v5169_v11 = vor.u32 %v5820_v8, %v5166_v9  ;;  %v5822_v12 = vld [vmem:[%s9709_s2 + $0x14] sm:$0xf0]  ;;  %v5852_v13 = vld [vmem:[%s9711_s3 + $0xec] sm:$0xf]  ;;  %v5326_v15 = vld [vmem:[%s9711_s3 + $0xf8] sm:$0xf0] }
   0x5   :  { %236 = vmatpush.bf16.msra.mxu1 %v5161_v7  ;;  %5984 = vmatpush.bf16.msra.mxu3 %v5161_v7  ;;  %v5165_v14 = vor.u32 %v5822_v12, %v5164_v10  ;;  %v5324_v16 = vld [vmem:[%s9711_s3 + $0xe8] sm:$0xf]  ;;  %v5854_v17 = vld [vmem:[%s9711_s3 + $0xf4] sm:$0xf0]  ;;  %v6681_v18 = vor.u32 %v5852_v13, %v5326_v15  ;;  %v5316_v20 = vld [vmem:[%s9711_s3 + $0xe0] sm:$0xf] }
   0x6   :  { %v6683_v19 = vor.u32 %v5854_v17, %v5324_v16  ;;  %v5853_v21 = vld [vmem:[%s9711_s3 + $0xec] sm:$0xf0]  ;;  %v5851_v22 = vld [vmem:[%s9711_s3 + $0xe4] sm:$0xf]  ;;  %v5318_v24 = vld [vmem:[%s9711_s3 + $0xf0] sm:$0xf0] }
   0x7   :  { %5170 = vmatmul.msk.bf16.vlgmr.msra.gmra.mxu0 %vm155_vm0, %v5811_v5  ;;  %5177 = vmatmul.msk.bf16.vlgmr.msra.gmra.mxu2 %vm155_vm0, %v6655_v6  ;;  %v6697_v23 = vor.u32 %v5853_v21, %v5316_v20  ;;  %v6705_v25 = vor.u32 %v5851_v22, %v5318_v24  ;;  %v5848_v26 = vld [vmem:[%s9711_s3 + $0xcc] sm:$0xf]  ;;  %v5310_v27 = vld [vmem:[%s9711_s3 + $0xd8] sm:$0xf0]  ;;  %v5300_v28 = vld [vmem:[%s9711_s3 + $0xc0] sm:$0xf] }
   0x8   :  { %5178 = vmatmul.msk.bf16.vlgmr.msra.gmra.mxu1 %vm155_vm0, %v5811_v5  ;;  %5185 = vmatmul.msk.bf16.vlgmr.msra.gmra.mxu3 %vm155_vm0, %v6655_v6  ;;  %v6717_v29 = vor.u32 %v5848_v26, %v5310_v27  ;;  %v5849_v30 = vld [vmem:[%s9711_s3 + $0xcc] sm:$0xf0]  ;;  %v5847_v31 = vld [vmem:[%s9711_s3 + $0xc4] sm:$0xf]  ;;  %v5302_v32 = vld [vmem:[%s9711_s3 + $0xd0] sm:$0xf0] }
   0x9   :  { %334 = vmatpush.bf16.msrb.mxu3 %v5169_v11  ;;  %285 = vmatpush.bf16.msrb.mxu2 %v5165_v14  ;;  %v6730_v33 = vor.u32 %v5849_v30, %v5300_v28  ;;  %v5308_v34 = vld [vmem:[%s9711_s3 + $0xc8] sm:$0xf]  ;;  %v5850_v35 = vld [vmem:[%s9711_s3 + $0xd4] sm:$0xf0]  ;;  %v6739_v36 = vor.u32 %v5847_v31, %v5302_v32  ;;  %v5844_v39 = vld [vmem:[%s9711_s3 + $0xac] sm:$0xf] }
   0xa   :  { %648 = vmatpush.bf16.msrb.mxu0 %v6697_v23  ;;  %662 = vmatpush.bf16.msrb.mxu1 %v6705_v25  ;;  %v6741_v37 = vor.u32 %v5850_v35, %v5308_v34  ;;  %v5812_v38 = vld [vmem:[%s9710_s0 + $0x8] sm:$0xff]  ;;  %v5294_v40 = vld [vmem:[%s9711_s3 + $0xb8] sm:$0xf0]  ;;  %v5284_v41 = vld [vmem:[%s9711_s3 + $0xa0] sm:$0xf] }
   0xb   :  { %v6763_v42 = vor.u32 %v5844_v39, %v5294_v40  ;;  %v5845_v43 = vld [vmem:[%s9711_s3 + $0xac] sm:$0xf0]  ;;  %v5843_v44 = vld [vmem:[%s9711_s3 + $0xa4] sm:$0xf]  ;;  %v5286_v45 = vld [vmem:[%s9711_s3 + $0xb0] sm:$0xf0] }
   0xc   :  { %v6774_v46 = vor.u32 %v5845_v43, %v5284_v41  ;;  %v6776_v47 = vor.u32 %v5843_v44, %v5286_v45  ;;  %v5292_v48 = vld [vmem:[%s9711_s3 + $0xa8] sm:$0xf]  ;;  %v5846_v49 = vld [vmem:[%s9711_s3 + $0xb4] sm:$0xf0]  ;;  %v5813_v51 = vld [vmem:[%s9710_s0 + $0x10] sm:$0xff] }
   0xd   :  { %690 = vmatpush.bf16.msra.mxu3 %v6681_v18  ;;  %676 = vmatpush.bf16.msra.mxu2 %v6683_v19  ;;  %v6785_v50 = vor.u32 %v5846_v49, %v5292_v48  ;;  %v5840_v52 = vld [vmem:[%s9711_s3 + $0x8c] sm:$0xf]  ;;  %v5278_v53 = vld [vmem:[%s9711_s3 + $0x98] sm:$0xf0]  ;;  %v5268_v54 = vld [vmem:[%s9711_s3 + $0x80] sm:$0xf] }
   0xe   :  { %649 = vmatpush.bf16.msrb.mxu0 %v6730_v33  ;;  %663 = vmatpush.bf16.msrb.mxu1 %v6739_v36  ;;  %v6806_v55 = vor.u32 %v5840_v52, %v5278_v53  ;;  %v5841_v56 = vld [vmem:[%s9711_s3 + $0x8c] sm:$0xf0]  ;;  %v5839_v57 = vld [vmem:[%s9711_s3 + $0x84] sm:$0xf]  ;;  %v5270_v58 = vld [vmem:[%s9711_s3 + $0x90] sm:$0xf0] }
   0xf   :  { %v6817_v59 = vor.u32 %v5841_v56, %v5268_v54  ;;  %v6819_v60 = vor.u32 %v5839_v57, %v5270_v58  ;;  %v5276_v61 = vld [vmem:[%s9711_s3 + $0x88] sm:$0xf]  ;;  %v5842_v62 = vld [vmem:[%s9711_s3 + $0x94] sm:$0xf0]  ;;  %v5836_v1 = vld [vmem:[%s9711_s3 + $0x6c] sm:$0xf] }
  0x10   :  { %v6828_v63 = vor.u32 %v5842_v62, %v5276_v61  ;;  %v5814_v0 = vld [vmem:[%s9710_s0 + $0x18] sm:$0xff]  ;;  %v5252_v3 = vld [vmem:[%s9711_s3 + $0x60] sm:$0xf]  ;;  %v5835_v7 = vld [vmem:[%s9711_s3 + $0x64] sm:$0xf] }
  0x11   :  { %691 = vmatpush.bf16.msra.mxu3 %v6717_v29  ;;  %677 = vmatpush.bf16.msra.mxu2 %v6741_v37  ;;  %v5262_v2 = vld [vmem:[%s9711_s3 + $0x78] sm:$0xf0]  ;;  %v5254_v8 = vld [vmem:[%s9711_s3 + $0x70] sm:$0xf0]  ;;  %v5260_v11 = vld [vmem:[%s9711_s3 + $0x68] sm:$0xf] }
  0x12   :  { %650 = vmatpush.bf16.msrb.mxu0 %v6774_v46  ;;  %664 = vmatpush.bf16.msrb.mxu1 %v6776_v47  ;;  %v6849_v4 = vor.u32 %v5836_v1, %v5262_v2  ;;  %v6862_v10 = vor.u32 %v5835_v7, %v5254_v8  ;;  %v5838_v12 = vld [vmem:[%s9711_s3 + $0x74] sm:$0xf0]  ;;  %v5815_v14 = vld [vmem:[%s9710_s0 + $0x20] sm:$0xff]  ;;  %v5832_v15 = vld [vmem:[%s9711_s3 + $0x4c] sm:$0xf]  ;;  %v9724_v7 = vmov 0.0|0.0  }
  0x13   :  { %v6871_v13 = vor.u32 %v5838_v12, %v5260_v11  ;;  %v5246_v16 = vld [vmem:[%s9711_s3 + $0x58] sm:$0xf0]  ;;  %v5236_v17 = vld [vmem:[%s9711_s3 + $0x40] sm:$0xf]  ;;  %v5833_v21 = vld [vmem:[%s9711_s3 + $0x4c] sm:$0xf0] }
  0x14   :  { %v6892_v20 = vor.u32 %v5832_v15, %v5246_v16  ;;  %v5831_v22 = vld [vmem:[%s9711_s3 + $0x44] sm:$0xf]  ;;  %v5238_v24 = vld [vmem:[%s9711_s3 + $0x50] sm:$0xf0]  ;;  %v6903_v26 = vor.u32 %v5833_v21, %v5236_v17  ;;  %v5220_v28 = vld [vmem:[%s9711_s3 + $0x20] sm:$0xf] }
  0x15   :  { %692 = vmatpush.bf16.msra.mxu3 %v6763_v42  ;;  %678 = vmatpush.bf16.msra.mxu2 %v6785_v50  ;;  %v6905_v27 = vor.u32 %v5831_v22, %v5238_v24  ;;  %v5829_v30 = vld [vmem:[%s9711_s3 + $0x2c] sm:$0xf0]  ;;  %v5827_v31 = vld [vmem:[%s9711_s3 + $0x24] sm:$0xf]  ;;  %v5222_v32 = vld [vmem:[%s9711_s3 + $0x30] sm:$0xf0] }
  0x16   :  { %651 = vmatpush.bf16.msrb.mxu0 %v6817_v59  ;;  %665 = vmatpush.bf16.msrb.mxu1 %v6819_v60  ;;  %v5244_v34 = vld [vmem:[%s9711_s3 + $0x48] sm:$0xf]  ;;  %v5834_v35 = vld [vmem:[%s9711_s3 + $0x54] sm:$0xf0]  ;;  %v6930_v39 = vor.u32 %v5827_v31, %v5222_v32  ;;  %v5204_v41 = vld [vmem:[%s9711_s3] sm:$0xf] }
  0x17   :  { %5171 = vmatmul.msk.bf16.gmra.mxu0 %vm155_vm0, %v5812_v38  ;;  %5186 = vmatmul.msk.bf16.vlgmr.msrb.gmra.mxu2 %vm155_vm0, %v5811_v5  ;;  %v6932_v40 = vor.u32 %v5834_v35, %v5244_v34  ;;  %v5825_v43 = vld [vmem:[%s9711_s3 + $0xc] sm:$0xf0]  ;;  %v5823_v44 = vld [vmem:[%s9711_s3 + $0x4] sm:$0xf]  ;;  %v5206_v45 = vld [vmem:[%s9711_s3 + $0x10] sm:$0xf0] }
  0x18   :  { %5179 = vmatmul.msk.bf16.gmra.mxu1 %vm155_vm0, %v5812_v38  ;;  %5194 = vmatmul.msk.bf16.vlgmr.msrb.gmra.mxu3 %vm155_vm0, %v5811_v5  ;;  %v5837_v5 = vld [vmem:[%s9711_s3 + $0x6c] sm:$0xf0]  ;;  %v6949_v48 = vor.u32 %v5825_v43, %v5204_v41  ;;  %v6951_v49 = vor.u32 %v5823_v44, %v5206_v45  ;;  %v5828_v52 = vld [vmem:[%s9711_s3 + $0x2c] sm:$0xf]  ;;  %v5230_v53 = vld [vmem:[%s9711_s3 + $0x38] sm:$0xf0] }
  0x19   :  { %693 = vmatpush.bf16.msra.mxu3 %v6806_v55  ;;  %679 = vmatpush.bf16.msra.mxu2 %v6828_v63  ;;  %v6860_v9 = vor.u32 %v5837_v5, %v5252_v3  ;;  %v5228_v54 = vld [vmem:[%s9711_s3 + $0x28] sm:$0xf]  ;;  %v6973_v56 = vor.u32 %v5828_v52, %v5230_v53  ;;  %v5830_v57 = vld [vmem:[%s9711_s3 + $0x34] sm:$0xf0]  ;;  %v5817_v61 = vld [vmem:[%s9710_s0 + $0x30] sm:$0xff] }
  0x1a   :  { %666 = vmatpush.bf16.msrb.mxu1 %v6862_v10  ;;  %v6980_v58 = vor.u32 %v5830_v57, %v5228_v54  ;;  %v5824_v62 = vld [vmem:[%s9711_s3 + $0xc] sm:$0xf]  ;;  %v5212_v2 = vld [vmem:[%s9711_s3 + $0x8] sm:$0xf]  ;;  %v5826_v3 = vld [vmem:[%s9711_s3 + $0x14] sm:$0xf0] }
  0x1b   :  { %652 = vmatpush.bf16.msrb.mxu0 %v6860_v9  ;;  %v7017_v5 = vor.u32 %v5826_v3, %v5212_v2 }
  0x1d   :  { %694 = vmatpush.bf16.msra.mxu3 %v6849_v4  ;;  %680 = vmatpush.bf16.msra.mxu2 %v6871_v13 }
  0x1e   :  { %667 = vmatpush.bf16.msrb.mxu1 %v6905_v27 }
  0x1f   :  { %653 = vmatpush.bf16.msrb.mxu0 %v6903_v26 }
  0x21   :  { %695 = vmatpush.bf16.msra.mxu3 %v6892_v20  ;;  %681 = vmatpush.bf16.msra.mxu2 %v6932_v40 }
  0x22   :  { %668 = vmatpush.bf16.msrb.mxu1 %v6930_v39 }
  0x25   :  { %696 = vmatpush.bf16.msra.mxu3 %v6973_v56  ;;  %682 = vmatpush.bf16.msra.mxu2 %v6980_v58 }
  0x26   :  { %669 = vmatpush.bf16.msrb.mxu1 %v6951_v49 }
  0x27   :  { %5172 = vmatmul.msk.bf16.gmra.mxu0 %vm155_vm0, %v5813_v51  ;;  %5187 = vmatmul.msk.bf16.gmra.mxu2 %vm155_vm0, %v5812_v38 }
  0x28   :  { %5180 = vmatmul.msk.bf16.gmra.mxu1 %vm155_vm0, %v5813_v51  ;;  %5195 = vmatmul.msk.bf16.gmra.mxu3 %vm155_vm0, %v5812_v38  ;;  %v6928_v38 = vor.u32 %v5829_v30, %v5220_v28 }
  0x29   :  { %683 = vmatpush.bf16.msra.mxu2 %v7017_v5 }
  0x2a   :  { %654 = vmatpush.bf16.msrb.mxu0 %v6928_v38  ;;  %873 = vmatpush.bf16.msra.mxu1 %v6705_v25 }
  0x2d   :  { %887 = vmatpush.bf16.msrb.mxu2 %v6683_v19 }
  0x2e   :  { %655 = vmatpush.bf16.msrb.mxu0 %v6949_v48  ;;  %874 = vmatpush.bf16.msra.mxu1 %v6739_v36 }
  0x31   :  { %888 = vmatpush.bf16.msrb.mxu2 %v6741_v37 }
  0x32   :  { %859 = vmatpush.bf16.msra.mxu0 %v6697_v23  ;;  %875 = vmatpush.bf16.msra.mxu1 %v6776_v47 }
  0x35   :  { %889 = vmatpush.bf16.msrb.mxu2 %v6785_v50 }
  0x36   :  { %860 = vmatpush.bf16.msra.mxu0 %v6730_v33  ;;  %876 = vmatpush.bf16.msra.mxu1 %v6819_v60 }
  0x37   :  { %5173 = vmatmul.msk.bf16.gmra.mxu0 %vm155_vm0, %v5814_v0  ;;  %5188 = vmatmul.msk.bf16.gmra.mxu2 %vm155_vm0, %v5813_v51 }
  0x38   :  { %5181 = vmatmul.msk.bf16.gmra.mxu1 %vm155_vm0, %v5814_v0  ;;  %5196 = vmatmul.msk.bf16.gmra.mxu3 %vm155_vm0, %v5813_v51  ;;  %v5816_v51 = vld [vmem:[%s9710_s0 + $0x28] sm:$0xff] }
  0x39   :  { %890 = vmatpush.bf16.msrb.mxu2 %v6828_v63 }
  0x3a   :  { %861 = vmatpush.bf16.msra.mxu0 %v6774_v46  ;;  %877 = vmatpush.bf16.msra.mxu1 %v6862_v10 }
  0x3d   :  { %891 = vmatpush.bf16.msrb.mxu2 %v6871_v13 }
  0x3e   :  { %862 = vmatpush.bf16.msra.mxu0 %v6817_v59  ;;  %878 = vmatpush.bf16.msra.mxu1 %v6905_v27 }
  0x41   :  { %892 = vmatpush.bf16.msrb.mxu2 %v6932_v40 }
  0x42   :  { %863 = vmatpush.bf16.msra.mxu0 %v6860_v9  ;;  %879 = vmatpush.bf16.msra.mxu1 %v6930_v39 }
  0x45   :  { %893 = vmatpush.bf16.msrb.mxu2 %v6980_v58 }
  0x46   :  { %864 = vmatpush.bf16.msra.mxu0 %v6903_v26  ;;  %880 = vmatpush.bf16.msra.mxu1 %v6951_v49 }
  0x47   :  { %5174 = vmatmul.msk.bf16.gmra.mxu0 %vm155_vm0, %v5815_v14  ;;  %5189 = vmatmul.msk.bf16.gmra.mxu2 %vm155_vm0, %v5814_v0 }
  0x48   :  { %5182 = vmatmul.msk.bf16.gmra.mxu1 %vm155_vm0, %v5815_v14  ;;  %5197 = vmatmul.msk.bf16.gmra.mxu3 %vm155_vm0, %v5814_v0  ;;  %v5214_v0 = vld [vmem:[%s9711_s3 + $0x18] sm:$0xf0] }
  0x49   :  { %v7003_v1 = vor.u32 %v5824_v62, %v5214_v0  ;;  %894 = vmatpush.bf16.msrb.mxu2 %v7017_v5 }
  0x4a   :  { %865 = vmatpush.bf16.msra.mxu0 %v6928_v38 }
  0x4b   :  { %697 = vmatpush.bf16.msra.mxu3 %v7003_v1 }
  0x4e   :  { %866 = vmatpush.bf16.msra.mxu0 %v6949_v48 }
  0x4f   :  { %901 = vmatpush.bf16.msrb.mxu3 %v6681_v18 }
  0x53   :  { %902 = vmatpush.bf16.msrb.mxu3 %v6717_v29 }
  0x57   :  { %5175 = vmatmul.msk.bf16.gmra.mxu0 %vm155_vm0, %v5816_v51  ;;  %5190 = vmatmul.msk.bf16.gmra.mxu2 %vm155_vm0, %v5815_v14 }
  0x58   :  { %5183 = vmatmul.msk.bf16.gmra.mxu1 %vm155_vm0, %v5816_v51  ;;  %5198 = vmatmul.msk.bf16.gmra.mxu3 %vm155_vm0, %v5815_v14 }
  0x59   :  { %903 = vmatpush.bf16.msrb.mxu3 %v6763_v42 }
  0x5d   :  { %904 = vmatpush.bf16.msrb.mxu3 %v6806_v55 }
  0x61   :  { %905 = vmatpush.bf16.msrb.mxu3 %v6849_v4 }
  0x65   :  { %906 = vmatpush.bf16.msrb.mxu3 %v6892_v20 }
  0x67   :  { %5176 = vmatmul.msk.bf16.gmra.mxu0 %vm155_vm0, %v5817_v61  ;;  %5191 = vmatmul.msk.bf16.gmra.mxu2 %vm155_vm0, %v5816_v51 }
  0x68   :  { %5184 = vmatmul.msk.bf16.gmra.mxu1 %vm155_vm0, %v5817_v61  ;;  %5199 = vmatmul.msk.bf16.gmra.mxu3 %vm155_vm0, %v5816_v51 }
  0x69   :  { %907 = vmatpush.bf16.msrb.mxu3 %v6973_v56 }
  0x6d   :  { %908 = vmatpush.bf16.msrb.mxu3 %v7003_v1 }
  0x77   :  { %5192 = vmatmul.msk.bf16.gmra.mxu2 %vm155_vm0, %v5817_v61  ;;  %656 = vmatmul.bf16.vlgmr.msrb.gmra.mxu0 %v9724_v7 }
  0x78   :  { %5200 = vmatmul.msk.bf16.gmra.mxu3 %vm155_vm0, %v5817_v61  ;;  %670 = vmatmul.bf16.vlgmr.msrb.gmra.mxu1 %v9724_v7 }
  0x79   :  { %1071 = vmatpush.bf16.msrb.mxu0 %v6697_v23  ;;  %1085 = vmatpush.bf16.msrb.mxu1 %v6705_v25 }
  0x7d   :  { %1072 = vmatpush.bf16.msrb.mxu0 %v6730_v33  ;;  %1086 = vmatpush.bf16.msrb.mxu1 %v6739_v36 }
  0x81   :  { %1073 = vmatpush.bf16.msrb.mxu0 %v6774_v46  ;;  %1087 = vmatpush.bf16.msrb.mxu1 %v6776_v47 }
  0x84   :  { %v7042_v8 = vpop.f32.mrf.mxu0 }
  0x85   :  { %v7044_v11 = vpop.f32.mrf.mxu1  ;;  %1074 = vmatpush.bf16.msrb.mxu0 %v6817_v59  ;;  %1088 = vmatpush.bf16.msrb.mxu1 %v6819_v60 }
  0x87   :  { %5193 = vmatmul.msk.bf16.gmra.mxu2 %vm155_vm0, %v6655_v6 }
  0x88   :  { %5201 = vmatmul.msk.bf16.gmra.mxu3 %vm155_vm0, %v6655_v6 }
  0x89   :  { %1075 = vmatpush.bf16.msrb.mxu0 %v6860_v9  ;;  %1089 = vmatpush.bf16.msrb.mxu1 %v6862_v10 }
  0x8a   :  { %v7056_v12 = vpop.f32.mrf.mxu2 }
  0x8b   :  { %9787 = vst [vmem:[#allocation7_spill] sm:$0xff] %v7056_v12  ;;  %v7060_v14 = vpop.f32.mrf.mxu3 }
  0x8c   :  { %9788 = vst [vmem:[#allocation8_spill] sm:$0xff] %v7060_v14  ;;  %v7062_v15 = vpop.f32.mrf.mxu0 }
  0x8d   :  { %v7064_v16 = vpop.f32.mrf.mxu1  ;;  %1076 = vmatpush.bf16.msrb.mxu0 %v6903_v26  ;;  %1090 = vmatpush.bf16.msrb.mxu1 %v6905_v27 }
  0x91   :  { %1077 = vmatpush.bf16.msrb.mxu0 %v6928_v38  ;;  %1091 = vmatpush.bf16.msrb.mxu1 %v6930_v39 }
  0x92   :  { %v7070_v6 = vpop.f32.mrf.mxu2 }
  0x93   :  { %9789 = vst [vmem:[#allocation9_spill] sm:$0xff] %v7070_v6  ;;  %v7073_v17 = vpop.f32.mrf.mxu3 }
  0x94   :  { %9790 = vst [vmem:[#allocation10_spill] sm:$0xff] %v7073_v17  ;;  %v7075_v21 = vpop.f32.mrf.mxu0 }
  0x95   :  { %v7077_v22 = vpop.f32.mrf.mxu1  ;;  %1078 = vmatpush.bf16.msrb.mxu0 %v6949_v48  ;;  %1092 = vmatpush.bf16.msrb.mxu1 %v6951_v49 }
  0x96   :  { %9791 = vst [vmem:[#allocation11_spill] sm:$0xff] %v7077_v22 }
  0x97   :  { %684 = vmatmul.bf16.vlgmr.msra.gmra.mxu2 %v9724_v7 }
  0x98   :  { %698 = vmatmul.bf16.vlgmr.msra.gmra.mxu3 %v9724_v7  ;;  %1099 = vmatpush.bf16.msra.mxu2 %v6683_v19 }
  0x99   :  { %1113 = vmatpush.bf16.msra.mxu3 %v6681_v18 }
  0x9a   :  { %v7085_v24 = vpop.f32.mrf.mxu2 }
  0x9b   :  { %v7087_v28 = vpop.f32.mrf.mxu3 }
  0x9c   :  { %v7089_v30 = vpop.f32.mrf.mxu0  ;;  %1100 = vmatpush.bf16.msra.mxu2 %v6741_v37 }
  0x9d   :  { %9792 = vst [vmem:[#allocation12_spill] sm:$0xff] %v7089_v30  ;;  %v7092_v31 = vpop.f32.mrf.mxu1  ;;  %1114 = vmatpush.bf16.msra.mxu3 %v6717_v29 }
  0x9e   :  { %9793 = vst [vmem:[#allocation13_spill] sm:$0xff] %v7092_v31 }
  0xa0   :  { %1101 = vmatpush.bf16.msra.mxu2 %v6785_v50 }
  0xa1   :  { %1115 = vmatpush.bf16.msra.mxu3 %v6763_v42 }
  0xa2   :  { %v7097_v32 = vpop.f32.mrf.mxu2 }
  0xa3   :  { %v7099_v34 = vpop.f32.mrf.mxu3 }
  0xa4   :  { %v7101_v35 = vpop.f32.mrf.mxu0  ;;  %1102 = vmatpush.bf16.msra.mxu2 %v6828_v63 }
  0xa5   :  { %9794 = vst [vmem:[#allocation14_spill] sm:$0xff] %v7101_v35  ;;  %v7104_v41 = vpop.f32.mrf.mxu1  ;;  %1116 = vmatpush.bf16.msra.mxu3 %v6806_v55 }
  0xa6   :  { %9795 = vst [vmem:[#allocation15_spill] sm:$0xff] %v7104_v41 }
  0xa8   :  { %1103 = vmatpush.bf16.msra.mxu2 %v6871_v13 }
  0xa9   :  { %1117 = vmatpush.bf16.msra.mxu3 %v6849_v4 }
  0xaa   :  { %v7109_v43 = vpop.f32.mrf.mxu2 }
  0xab   :  { %9796 = vst [vmem:[#allocation16_spill] sm:$0xff] %v7109_v43  ;;  %v7111_v44 = vpop.f32.mrf.mxu3 }
  0xac   :  { %9797 = vst [vmem:[#allocation17_spill] sm:$0xff] %v7111_v44  ;;  %v7113_v45 = vpop.f32.mrf.mxu0  ;;  %1104 = vmatpush.bf16.msra.mxu2 %v6932_v40 }
  0xad   :  { %9798 = vst [vmem:[#allocation18_spill] sm:$0xff] %v7113_v45  ;;  %v7116_v51 = vpop.f32.mrf.mxu1  ;;  %1118 = vmatpush.bf16.msra.mxu3 %v6892_v20 }
  0xae   :  { %9799 = vst [vmem:[#allocation19_spill] sm:$0xff] %v7116_v51 }
  0xb0   :  { %1105 = vmatpush.bf16.msra.mxu2 %v6980_v58 }
  0xb1   :  { %1119 = vmatpush.bf16.msra.mxu3 %v6973_v56 }
  0xb2   :  { %v7121_v52 = vpop.f32.mrf.mxu2 }
  0xb3   :  { %9800 = vst [vmem:[#allocation20_spill] sm:$0xff] %v7121_v52  ;;  %v7123_v53 = vpop.f32.mrf.mxu3 }
  0xb4   :  { %9801 = vst [vmem:[#allocation21_spill] sm:$0xff] %v7123_v53  ;;  %v7125_v54 = vpop.f32.mrf.mxu0  ;;  %1106 = vmatpush.bf16.msra.mxu2 %v7017_v5 }
  0xb5   :  { %9802 = vst [vmem:[#allocation22_spill] sm:$0xff] %v7125_v54  ;;  %v7128_v57 = vpop.f32.mrf.mxu1  ;;  %1120 = vmatpush.bf16.msra.mxu3 %v7003_v1 }
  0xb6   :  { %9803 = vst [vmem:[#allocation23_spill] sm:$0xff] %v7128_v57 }
  0xba   :  { %v7131_v61 = vpop.f32.mrf.mxu2 }
  0xbb   :  { %9804 = vst [vmem:[#allocation24_spill] sm:$0xff] %v7131_v61  ;;  %v7133_v62 = vpop.f32.mrf.mxu3 }
  0xbc   :  { %9805 = vst [vmem:[#allocation25_spill] sm:$0xff] %v7133_v62  ;;  %v7135_v0 = vpop.f32.mrf.mxu0 }
  0xbd   :  { %9806 = vst [vmem:[#allocation26_spill] sm:$0xff] %v7135_v0  ;;  %v7137_v2 = vpop.f32.mrf.mxu1 }
  0xbe   :  { %9807 = vst [vmem:[#allocation27_spill] sm:$0xff] %v7137_v2 }
  0xc2   :  { %v7139_v3 = vpop.f32.mrf.mxu2 }
  0xc3   :  { %9808 = vst [vmem:[#allocation28_spill] sm:$0xff] %v7139_v3  ;;  %v7141_v7 = vpop.f32.mrf.mxu3 }
  0xc4   :  { %9809 = vst [vmem:[#allocation29_spill] sm:$0xff] %v7141_v7  ;;  %v7143_v17 = vpop.f32.mrf.mxu0 }
  0xc5   :  { %9810 = vst [vmem:[#allocation30_spill] sm:$0xff] %v7143_v17  ;;  %v7145_v6 = vpop.f32.mrf.mxu1 }
  0xc6   :  { %9811 = vst [vmem:[#allocation31_spill] sm:$0xff] %v7145_v6 }
  0xca   :  { %v7147_v14 = vpop.f32.mrf.mxu2 }
  0xcb   :  { %9812 = vst [vmem:[#allocation32_spill] sm:$0xff] %v7147_v14  ;;  %v7149_v12 = vpop.f32.mrf.mxu3 }
  0xcc   :  { %9813 = vst [vmem:[#allocation33_spill] sm:$0xff] %v7149_v12  ;;  %v7151_v57 = vpop.f32.mrf.mxu0 }
  0xcd   :  { %9814 = vst [vmem:[#allocation34_spill] sm:$0xff] %v7151_v57  ;;  %v7153_v54 = vpop.f32.mrf.mxu1 }
  0xce   :  { %9815 = vst [vmem:[#allocation35_spill] sm:$0xff] %v7153_v54 }
  0xd2   :  { %v7155_v61 = vpop.f32.mrf.mxu2 }
  0xd3   :  { %9816 = vst [vmem:[#allocation36_spill] sm:$0xff] %v7155_v61  ;;  %v7157_v0 = vpop.f32.mrf.mxu3 }
  0xd4   :  { %9817 = vst [vmem:[#allocation37_spill] sm:$0xff] %v7157_v0  ;;  %v7159_v2 = vpop.f32.mrf.mxu0 }
  0xd5   :  { %9818 = vst [vmem:[#allocation38_spill] sm:$0xff] %v7159_v2  ;;  %v7161_v3 = vpop.f32.mrf.mxu1 }
  0xd6   :  { %9819 = vst [vmem:[#allocation39_spill] sm:$0xff] %v7161_v3 }
  0xda   :  { %v7163_v7 = vpop.f32.mrf.mxu2 }
  0xdb   :  { %9820 = vst [vmem:[#allocation40_spill] sm:$0xff] %v7163_v7  ;;  %v7165_v17 = vpop.f32.mrf.mxu3 }
  0xdc   :  { %9821 = vst [vmem:[#allocation41_spill] sm:$0xff] %v7165_v17  ;;  %v7167_v6 = vpop.f32.mrf.mxu0 }
  0xdd   :  { %9822 = vst [vmem:[#allocation42_spill] sm:$0xff] %v7167_v6  ;;  %v7169_v14 = vpop.f32.mrf.mxu1 }
  0xde   :  { %9823 = vst [vmem:[#allocation43_spill] sm:$0xff] %v7169_v14  ;;  %v85_v14 = vld [vmem:[%s9712_s4] sm:$0xf] }
  0xdf   :  { %v7190_v6 = vperm.slane %v85_v14, 0 }
  0xe1   :  { %9832 = vst [vmem:[#allocation52_spill] sm:$0xff] %v7190_v6 }
  0xe2   :  { %v7171_v12 = vpop.f32.mrf.mxu2 }
  0xe3   :  { %9824 = vst [vmem:[#allocation44_spill] sm:$0xff] %v7171_v12  ;;  %v7173_v57 = vpop.f32.mrf.mxu3  ;;  %v7192_v12 = vperm.slane %v85_v14, 1 }
  0xe4   :  { %9825 = vst [vmem:[#allocation45_spill] sm:$0xff] %v7173_v57  ;;  %v7175_v54 = vpop.f32.mrf.mxu0 }
  0xe5   :  { %9826 = vst [vmem:[#allocation46_spill] sm:$0xff] %v7175_v54  ;;  %v7177_v61 = vpop.f32.mrf.mxu1 }
  0xe6   :  { %9827 = vst [vmem:[#allocation47_spill] sm:$0xff] %v7177_v61  ;;  %v190_v61 = vadd.f32 %v7042_v8, %v7190_v6 }
  0xe7   :  { %9833 = vst [vmem:[#allocation53_spill] sm:$0xff] %v7192_v12 }
  0xea   :  { %v7179_v0 = vpop.f32.mrf.mxu2 }
  0xeb   :  { %9828 = vst [vmem:[#allocation48_spill] sm:$0xff] %v7179_v0  ;;  %v7181_v2 = vpop.f32.mrf.mxu3 }
  0xec   :  { %9829 = vst [vmem:[#allocation49_spill] sm:$0xff] %v7181_v2  ;;  %v7183_v3 = vpop.f32.mrf.mxu0 }
  0xed   :  { %9830 = vst [vmem:[#allocation50_spill] sm:$0xff] %v7183_v3  ;;  %v7185_v7 = vpop.f32.mrf.mxu1  ;;  %v239_v3 = vadd.f32 %v7044_v11, %v7192_v12  ;;  %v241_v11 = vadd.f32 %v7064_v16, %v7192_v12 }
  0xee   :  { %9831 = vst [vmem:[#allocation51_spill] sm:$0xff] %v7185_v7 }
  0xf2   :  { %v7194_v57 = vpop.f32.mrf.mxu2 }
  0xf3   :  { %9834 = vst [vmem:[#allocation54_spill] sm:$0xff] %v7194_v57  ;;  %v7198_v54 = vpop.f32.mrf.mxu3 }
  0xf4   :  { %9835 = vst [vmem:[#allocation55_spill] sm:$0xff] %v7198_v54  ;;  %v657_v0 = vpop.f32.mrf.mxu0  ;;  %v192_v54 = vadd.f32 %v7062_v15, %v7190_v6 }
  0xf5   :  { %v704_v7 = vadd.f32 %v657_v0, %v190_v61  ;;  %v671_v2 = vpop.f32.mrf.mxu1 }
  0xf6   :  { %v705_v17 = vadd.f32 %v671_v2, %v239_v3 }
  0xf7   :  { %v5330_v51 = vmul.f32 -1.442695, %v704_v7 }
  0xf8   :  { %v5332_v45 = vmul.f32 -1.442695, %v705_v17 }
  0xf9   :  { %6035 = vpow2.f32 %v5330_v51 }
  0xfa   :  { %6037 = vpow2.f32 %v5332_v45  ;;  %v7202_v62 = vpop.f32.mrf.mxu2 }
  0xfb   :  { %9836 = vst [vmem:[#allocation56_spill] sm:$0xff] %v7202_v62  ;;  %v7204_v41 = vpop.f32.mrf.mxu3 }
  0xfc   :  { %9837 = vst [vmem:[#allocation57_spill] sm:$0xff] %v7204_v41  ;;  %v659_v35 = vpop.f32.mrf.mxu0 }
  0xfd   :  { %v673_v52 = vpop.f32.mrf.mxu1  ;;  %v708_v0 = vadd.f32 %v659_v35, %v192_v54 }
  0xfe   :  { %v709_v45 = vadd.f32 %v673_v52, %v241_v11 }
  0xff   :  { %v6036_v57 = vpop.eup %6035  ;;  %v5331_v2 = vmul.f32 -1.442695, %v708_v0 }
 0x100   :  { %v6038_v8 = vpop.eup %6037  ;;  %v718_v17 = vadd.f32 1.0, %v6036_v57  ;;  %v5333_v3 = vmul.f32 -1.442695, %v709_v45 }
 0x101   :  { %v756_v61 = vadd.f32 1.0, %v6038_v8 }
 0x102   :  { %v7210_v7 = vpop.f32.mrf.mxu2  ;;  %vm725_vm5 = vweird.f32 %v718_v17 }
 0x103   :  { %9838 = vst [vmem:[#allocation58_spill] sm:$0xff] %v7210_v7  ;;  %v7212_v51 = vpop.f32.mrf.mxu3  ;;  %6039 = vrcp.f32 %v756_v61  ;;  %vm763_vm2 = vweird.f32 %v756_v61 }
 0x104   :  { %9839 = vst [vmem:[#allocation59_spill] sm:$0xff] %v7212_v51  ;;  %6041 = vrcp.f32 %v718_v17 }
 0x105   :  { %6043 = vpow2.f32 %v5331_v2 }
 0x106   :  { %6045 = vpow2.f32 %v5333_v3  ;;  %v7228_v3 = vperm.slane %v85_v14, 3 }
 0x108   :  { %9845 = vst [vmem:[#allocation65_spill] sm:$0xff] %v7228_v3 }
 0x109   :  { %v6040_v15 = vpop.eup %6039 }
 0x10a   :  { %v7214_v62 = vpop.f32.mrf.mxu2  ;;  %v6042_v16 = vpop.eup %6041  ;;  %v759_v8 = vmul.f32 %v6040_v15, %v756_v61  ;;  %vm764_vm1 = vweird.f32 %v6040_v15 }
 0x10b   :  { %9840 = vst [vmem:[#allocation60_spill] sm:$0xff] %v7214_v62  ;;  %v7216_v41 = vpop.f32.mrf.mxu3  ;;  %v6044_v35 = vpop.eup %6043  ;;  %v721_v54 = vmul.f32 %v6042_v16, %v718_v17  ;;  %v7226_v62 = vperm.slane %v85_v14, 2  ;;  %vm726_vm3 = vweird.f32 %v6042_v16  ;;  %vm7238_vm4 = vmor %vm763_vm2, %vm764_vm1 }
 0x10c   :  { %9841 = vst [vmem:[#allocation61_spill] sm:$0xff] %v7216_v41  ;;  %v6046_v7 = vpop.eup %6045  ;;  %v760_v57 = vsub.f32 1.0, %v759_v8  ;;  %v7220_v11 = vadd.f32 1.0, %v6044_v35  ;;  %v337_v35 = vadd.f32 %v7087_v28, %v7228_v3  ;;  %v729_v28 = vand.u32 2147483647, %v718_v17  ;;  %vm727_vm6 = vmor %vm725_vm5, %vm726_vm3 }
 0x10d   :  { %v722_v45 = vsub.f32 1.0, %v721_v54  ;;  %v7224_v2 = vadd.f32 1.0, %v6046_v7  ;;  %9844 = vst [vmem:[#allocation64_spill] sm:$0xff] %v7226_v62  ;;  %v288_v8 = vadd.f32 %v7085_v24, %v7226_v62  ;;  %v769_v7 = vand.u32 2147483648, %v756_v61 }
 0x10e   :  { %v761_v41 = vmul.f32 %v6040_v15, %v760_v57  ;;  %6047 = vrcp.f32 %v7220_v11  ;;  %v767_v57 = vand.u32 2147483647, %v756_v61  ;;  %vm730_vm8 = vcmp.eq.f32.partialorder %v729_v28, 8.507059e+37 }
 0x10f   :  { %6049 = vrcp.f32 %v7224_v2  ;;  %v723_v51 = vmul.f32 %v6042_v16, %v722_v45  ;;  %v731_v45 = vand.u32 2147483648, %v718_v17  ;;  %v339_v17 = vadd.f32 %v7099_v34, %v7228_v3 }
 0x110   :  { %v762_v54 = vadd.f32 %v6040_v15, %v761_v41  ;;  %vm768_vm7 = vcmp.eq.f32.partialorder %v767_v57, 8.507059e+37  ;;  %v290_v22 = vadd.f32 %v7097_v32, %v7226_v62  ;;  %v784_v32 = vand.u32 2147483648, %v7224_v2 }
 0x111   :  { %v724_v43 = vadd.f32 %v6042_v16, %v723_v51  ;;  %v770_v51 = vor.u32 1.1754944e-38, %v769_v7  ;;  %vm740_vm11 = vweird.f32 %v7220_v11  ;;  %vm778_vm12 = vweird.f32 %v7224_v2 }
 0x112   :  { %v7218_v52 = vpop.f32.mrf.mxu2  ;;  %v766_v41 = vsel %vm7238_vm4, %v6040_v15, %v762_v54 }
 0x113   :  { %9842 = vst [vmem:[#allocation62_spill] sm:$0xff] %v7218_v52  ;;  %v7222_v0 = vpop.f32.mrf.mxu3  ;;  %v728_v61 = vsel %vm727_vm6, %v6042_v16, %v724_v43 }
 0x114   :  { %9843 = vst [vmem:[#allocation63_spill] sm:$0xff] %v7222_v0  ;;  %v7236_v31 = vpop.eup %6047 }
 0x115   :  { %v7242_v24 = vpop.eup %6049  ;;  %vm741_vm9 = vweird.f32 %v7236_v31 }
 0x116   :  { %vm779_vm10 = vweird.f32 %v7242_v24  ;;  %vm7266_vm13 = vmor %vm740_vm11, %vm741_vm9 }
 0x117   :  { %vm780_vm14 = vmor %vm778_vm12, %vm779_vm10 }
 0x11a   :  { %v685_v52 = vpop.f32.mrf.mxu2 }
 0x11b   :  { %v706_v0 = vadd.f32 %v685_v52, %v288_v8  ;;  %v699_v14 = vpop.f32.mrf.mxu3  ;;  %v736_v8 = vmul.f32 %v7236_v31, %v7220_v11 }
 0x11c   :  { %v707_v53 = vadd.f32 %v699_v14, %v337_v35  ;;  %v774_v35 = vmul.f32 %v7242_v24, %v7224_v2  ;;  %v771_v14 = vsel %vm768_vm7, %v770_v51, %v766_v41 }
 0x11d   :  { %6051 = vtanh.f32 %v706_v0  ;;  %v732_v0 = vor.u32 1.1754944e-38, %v731_v45  ;;  %v828_v54 = vmul.f32 0.0, %v771_v14  ;;  %v737_v16 = vsub.f32 1.0, %v736_v8 }
 0x11e   :  { %v5334_v52 = vmul.f32 -1.442695, %v707_v53  ;;  %v775_v57 = vsub.f32 1.0, %v774_v35  ;;  %v782_v14 = vand.u32 2147483647, %v7224_v2 }
 0x11f   :  { %v733_v15 = vsel %vm730_vm8, %v732_v0, %v728_v61  ;;  %v738_v28 = vmul.f32 %v7236_v31, %v737_v16  ;;  %v744_v0 = vand.u32 2147483647, %v7220_v11 }
 0x120   :  { %6053 = vpow2.f32 %v5334_v52  ;;  %v776_v34 = vmul.f32 %v7242_v24, %v775_v57  ;;  %vm783_vm0 = vcmp.eq.f32.partialorder %v782_v14, 8.507059e+37 }
 0x121   :  { %v739_v61 = vadd.f32 %v7236_v31, %v738_v28  ;;  %vm745_vm15 = vcmp.eq.f32.partialorder %v744_v0, 8.507059e+37 }
 0x122   :  { %v687_v52 = vpop.f32.mrf.mxu2  ;;  %v777_v8 = vadd.f32 %v7242_v24, %v776_v34 }
 0x123   :  { %v6052_v30 = vpop.eup %6051  ;;  %v701_v53 = vpop.f32.mrf.mxu3  ;;  %v710_v51 = vadd.f32 %v687_v52, %v290_v22  ;;  %v746_v22 = vand.u32 2147483648, %v7220_v11 }
 0x124   :  { %v830_v7 = vmul.f32 %v6052_v30, %v733_v15  ;;  %v711_v43 = vadd.f32 %v701_v53, %v339_v17  ;;  %v743_v15 = vsel %vm7266_vm13, %v7236_v31, %v739_v61  ;;  %v781_v53 = vsel %vm780_vm14, %v7242_v24, %v777_v8 }
 0x125   :  { %v747_v57 = vor.u32 1.1754944e-38, %v746_v22 }
 0x126   :  { %v6054_v44 = vpop.eup %6053  ;;  %v7254_v12 = vadd.f32 %v830_v7, %v828_v54  ;;  %v5335_v45 = vmul.f32 -1.442695, %v711_v43  ;;  %v785_v43 = vor.u32 1.1754944e-38, %v784_v32 }
 0x127   :  { %v796_v41 = vadd.f32 1.0, %v6054_v44  ;;  %v748_v52 = vsel %vm745_vm15, %v747_v57, %v743_v15 }
 0x128   :  { %v786_v2 = vsel %vm783_vm0, %v785_v43, %v781_v53 }
 0x129   :  { %6055 = vrcp.f32 %v796_v41  ;;  %v809_v34 = vand.u32 2147483648, %v796_v41  ;;  %v829_v28 = vmul.f32 0.0, %v786_v2  ;;  %vm803_vm2 = vweird.f32 %v796_v41 }
 0x12a   :  { %6057 = vpow2.f32 %v5335_v45  ;;  %v807_v31 = vand.u32 2147483647, %v796_v41 }
 0x12b   :  { %6059 = vtanh.f32 %v710_v51  ;;  %v810_v22 = vor.u32 1.1754944e-38, %v809_v34 }
 0x12c   :  { %vm808_vm4 = vcmp.eq.f32.partialorder %v807_v31, 8.507059e+37  ;;  %v9851_v31 = vld [vmem:[#allocation11_spill] sm:$0xff] }
 0x12f   :  { %v6056_v44 = vpop.eup %6055 }
 0x130   :  { %v6058_v17 = vpop.eup %6057  ;;  %v799_v30 = vmul.f32 %v6056_v44, %v796_v41  ;;  %vm804_vm1 = vweird.f32 %v6056_v44 }
 0x131   :  { %v797_v54 = vadd.f32 1.0, %v6058_v17  ;;  %v6060_v7 = vpop.eup %6059  ;;  %vm805_vm3 = vmor %vm803_vm2, %vm804_vm1 }
 0x132   :  { %v800_v16 = vsub.f32 1.0, %v799_v30  ;;  %v831_v45 = vmul.f32 %v6060_v7, %v748_v52 }
 0x133   :  { %6061 = vrcp.f32 %v797_v54  ;;  %v824_v0 = vand.u32 2147483648, %v797_v54  ;;  %v822_v30 = vand.u32 2147483647, %v797_v54  ;;  %vm818_vm6 = vweird.f32 %v797_v54 }
 0x134   :  { %v801_v11 = vmul.f32 %v6056_v44, %v800_v16  ;;  %6063 = vtanh.f32 %v7254_v12  ;;  %v7277_v24 = vadd.f32 %v831_v45, %v829_v28  ;;  %v9850_v28 = vld [vmem:[#allocation53_spill] sm:$0xff] }
 0x135   :  { %v825_v7 = vor.u32 1.1754944e-38, %v824_v0  ;;  %vm823_vm8 = vcmp.eq.f32.partialorder %v822_v30, 8.507059e+37 }
 0x136   :  { %v802_v51 = vadd.f32 %v6056_v44, %v801_v11  ;;  %6065 = vtanh.f32 %v7277_v24 }
 0x138   :  { %v806_v32 = vsel %vm805_vm3, %v6056_v44, %v802_v51 }
 0x139   :  { %v6062_v61 = vpop.eup %6061  ;;  %v811_v14 = vsel %vm808_vm4, %v810_v22, %v806_v32 }
 0x13a   :  { %v814_v8 = vmul.f32 %v6062_v61, %v797_v54  ;;  %vm819_vm5 = vweird.f32 %v6062_v61  ;;  %v6064_v15 = vpop.eup %6063  ;;  %v195_v54 = vadd.f32 %v7075_v21, %v7190_v6 }
 0x13b   :  { %v836_v53 = vmul.f32 %v6064_v15, %v811_v14  ;;  %vm820_vm7 = vmor %vm818_vm6, %vm819_vm5  ;;  %v9853_v15 = vld [vmem:[#allocation12_spill] sm:$0xff] }
 0x13c   :  { %v815_v35 = vsub.f32 1.0, %v814_v8  ;;  %v6066_v16 = vpop.eup %6065 }
 0x13d   :  { %v838_v11 = vpack.c.bf16 %v836_v53, %v836_v53 }
 0x13e   :  { %v816_v17 = vmul.f32 %v6062_v61, %v815_v35 }
 0x13f   :  { %v855_v45 = vunpack.c.l.b16 %v838_v11 }
 0x140   :  { %v817_v41 = vadd.f32 %v6062_v61, %v816_v17  ;;  %v9852_v17 = vld [vmem:[#allocation17_spill] sm:$0xff] }
 0x141   :  { %v342_v30 = vadd.f32 %v9852_v17, %v7228_v3 }
 0x142   :  { %v821_v43 = vsel %vm820_vm7, %v6062_v61, %v817_v41  ;;  %v244_v61 = vadd.f32 %v9851_v31, %v9850_v28  ;;  %v197_v41 = vadd.f32 %v9853_v15, %v7190_v6 }
 0x143   :  { %v826_v44 = vsel %vm823_vm8, %v825_v7, %v821_v43 }
 0x144   :  { %v837_v57 = vmul.f32 %v6066_v16, %v826_v44 }
 0x146   :  { %v839_v52 = vpack.c.bf16 %v837_v57, %v837_v57  ;;  %v5946_v2 = vpack.c.bf16 %v837_v57, %v836_v53  ;;  %v9854_v53 = vld [vmem:[#allocation13_spill] sm:$0xff] }
 0x147   :  { %v246_v21 = vadd.f32 %v9854_v53, %v9850_v28 }
 0x148   :  { %5947 = vst [vmem:[#allocation6 + $0x30] sm:$0xff] %v5946_v2   ;;  %v856_v51 = vunpack.c.l.b16 %v839_v52 }
 0x14a   :  { %v857_v34 = vpack.c.b16 %v856_v51, %v855_v45 }
 0x14c   :  { %867 = vmatmul.bf16.vlgmr.msra.gmra.mxu0 %v857_v34  ;;  %881 = vmatmul.bf16.vlgmr.msra.gmra.mxu1 %v857_v34 }
 0x14d   :  { %895 = vmatmul.bf16.vlgmr.msrb.gmra.mxu2 %v857_v34  ;;  %909 = vmatmul.bf16.vlgmr.msrb.gmra.mxu3 %v857_v34 }
 0x14e   :  { %1283 = vmatpush.bf16.msra.mxu0 %v6697_v23  ;;  %1297 = vmatpush.bf16.msra.mxu1 %v6705_v25 }
 0x14f   :  { %1311 = vmatpush.bf16.msrb.mxu2 %v6683_v19  ;;  %1325 = vmatpush.bf16.msrb.mxu3 %v6681_v18 }
 0x152   :  { %1284 = vmatpush.bf16.msra.mxu0 %v6730_v33  ;;  %1298 = vmatpush.bf16.msra.mxu1 %v6739_v36 }
 0x153   :  { %1312 = vmatpush.bf16.msrb.mxu2 %v6741_v37  ;;  %1326 = vmatpush.bf16.msrb.mxu3 %v6717_v29 }
 0x156   :  { %1285 = vmatpush.bf16.msra.mxu0 %v6774_v46  ;;  %1299 = vmatpush.bf16.msra.mxu1 %v6776_v47 }
 0x157   :  { %1313 = vmatpush.bf16.msrb.mxu2 %v6785_v50  ;;  %1327 = vmatpush.bf16.msrb.mxu3 %v6763_v42 }
 0x15a   :  { %1286 = vmatpush.bf16.msra.mxu0 %v6817_v59  ;;  %1300 = vmatpush.bf16.msra.mxu1 %v6819_v60 }
 0x15b   :  { %1314 = vmatpush.bf16.msrb.mxu2 %v6828_v63  ;;  %1328 = vmatpush.bf16.msrb.mxu3 %v6806_v55 }
 0x15e   :  { %1287 = vmatpush.bf16.msra.mxu0 %v6860_v9  ;;  %1301 = vmatpush.bf16.msra.mxu1 %v6862_v10 }
 0x15f   :  { %1315 = vmatpush.bf16.msrb.mxu2 %v6871_v13  ;;  %1329 = vmatpush.bf16.msrb.mxu3 %v6849_v4 }
 0x162   :  { %1288 = vmatpush.bf16.msra.mxu0 %v6903_v26  ;;  %1302 = vmatpush.bf16.msra.mxu1 %v6905_v27 }
 0x163   :  { %1316 = vmatpush.bf16.msrb.mxu2 %v6932_v40  ;;  %1330 = vmatpush.bf16.msrb.mxu3 %v6892_v20 }
 0x166   :  { %1289 = vmatpush.bf16.msra.mxu0 %v6928_v38  ;;  %1303 = vmatpush.bf16.msra.mxu1 %v6930_v39 }
 0x167   :  { %1317 = vmatpush.bf16.msrb.mxu2 %v6980_v58  ;;  %1331 = vmatpush.bf16.msrb.mxu3 %v6973_v56 }
 0x16a   :  { %1290 = vmatpush.bf16.msra.mxu0 %v6949_v48  ;;  %1304 = vmatpush.bf16.msra.mxu1 %v6951_v49 }
 0x16b   :  { %1318 = vmatpush.bf16.msrb.mxu2 %v7017_v5  ;;  %1332 = vmatpush.bf16.msrb.mxu3 %v7003_v1 }
 0x1c9   :  { %v868_v8 = vpop.f32.mrf.mxu0  ;;  %v882_v32 = vpop.f32.mrf.mxu1 }
 0x1ca   :  { %v915_v22 = vadd.f32 %v868_v8, %v195_v54  ;;  %v916_v35 = vadd.f32 %v882_v32, %v244_v61  ;;  %v9855_v8 = vld [vmem:[#allocation21_spill] sm:$0xff] }
 0x1cb   :  { %v344_v32 = vadd.f32 %v9855_v8, %v7228_v3 }
 0x1cc   :  { %v5336_v0 = vmul.f32 -1.442695, %v915_v22  ;;  %v5338_v14 = vmul.f32 -1.442695, %v916_v35  ;;  %v9856_v35 = vld [vmem:[#allocation16_spill] sm:$0xff] }
 0x1ce   :  { %6067 = vpow2.f32 %v5336_v0  ;;  %v293_v0 = vadd.f32 %v9856_v35, %v7226_v62 }
 0x1cf   :  { %6069 = vpow2.f32 %v5338_v14 }
 0x1d0   :  { %v910_v7 = vpop.f32.mrf.mxu3  ;;  %v896_v61 = vpop.f32.mrf.mxu2 }
 0x1d1   :  { %v918_v43 = vadd.f32 %v910_v7, %v342_v30  ;;  %v870_v16 = vpop.f32.mrf.mxu0  ;;  %v884_v44 = vpop.f32.mrf.mxu1  ;;  %v917_v15 = vadd.f32 %v896_v61, %v293_v0 }
 0x1d2   :  { %v919_v57 = vadd.f32 %v870_v16, %v197_v41  ;;  %v920_v11 = vadd.f32 %v884_v44, %v246_v21 }
 0x1d3   :  { %v5340_v52 = vmul.f32 -1.442695, %v918_v43 }
 0x1d4   :  { %v6068_v2 = vpop.eup %6067  ;;  %v5337_v45 = vmul.f32 -1.442695, %v919_v57  ;;  %v5339_v54 = vmul.f32 -1.442695, %v920_v11  ;;  %v9857_v11 = vld [vmem:[#allocation20_spill] sm:$0xff] }
 0x1d5   :  { %v6070_v51 = vpop.eup %6069  ;;  %v929_v34 = vadd.f32 1.0, %v6068_v2  ;;  %6071 = vpow2.f32 %v5340_v52  ;;  %v295_v52 = vadd.f32 %v9857_v11, %v7226_v62 }
 0x1d6   :  { %v967_v31 = vadd.f32 1.0, %v6070_v51  ;;  %6073 = vpow2.f32 %v5337_v45 }
 0x1d7   :  { %6075 = vrcp.f32 %v929_v34  ;;  %v940_v61 = vand.u32 2147483647, %v929_v34  ;;  %v942_v8 = vand.u32 2147483648, %v929_v34  ;;  %vm936_vm11 = vweird.f32 %v929_v34 }
 0x1d8   :  { %6077 = vrcp.f32 %v967_v31  ;;  %v912_v22 = vpop.f32.mrf.mxu3  ;;  %v898_v51 = vpop.f32.mrf.mxu2  ;;  %v978_v0 = vand.u32 2147483647, %v967_v31  ;;  %vm974_vm12 = vweird.f32 %v967_v31 }
 0x1d9   :  { %6079 = vpow2.f32 %v5339_v54  ;;  %v922_v14 = vadd.f32 %v912_v22, %v344_v32  ;;  %v980_v32 = vand.u32 2147483648, %v967_v31  ;;  %vm941_vm14 = vcmp.eq.f32.partialorder %v940_v61, 8.507059e+37 }
 0x1da   :  { %vm979_vm0 = vcmp.eq.f32.partialorder %v978_v0, 8.507059e+37 }
 0x1db   :  { %v6072_v17 = vpop.eup %6071  ;;  %v5341_v7 = vmul.f32 -1.442695, %v922_v14  ;;  %v921_v14 = vadd.f32 %v898_v51, %v295_v52 }
 0x1dc   :  { %v6074_v30 = vpop.eup %6073  ;;  %v7326_v41 = vadd.f32 1.0, %v6072_v17 }
 0x1dd   :  { %v6076_v53 = vpop.eup %6075  ;;  %v7328_v21 = vadd.f32 1.0, %v6074_v30 }
 0x1de   :  { %v6078_v43 = vpop.eup %6077  ;;  %v932_v16 = vmul.f32 %v6076_v53, %v929_v34  ;;  %6081 = vrcp.f32 %v7326_v41  ;;  %vm937_vm9 = vweird.f32 %v6076_v53 }
 0x1df   :  { %v6080_v44 = vpop.eup %6079  ;;  %v970_v57 = vmul.f32 %v6078_v43, %v967_v31  ;;  %6083 = vrcp.f32 %v7328_v21  ;;  %vm975_vm10 = vweird.f32 %v6078_v43  ;;  %vm938_vm13 = vmor %vm936_vm11, %vm937_vm9  ;;  %vm951_vm2 = vweird.f32 %v7328_v21 }
 0x1e0   :  { %v933_v2 = vsub.f32 1.0, %v932_v16  ;;  %6085 = vtanh.f32 %v917_v15  ;;  %v7334_v45 = vadd.f32 1.0, %v6080_v44  ;;  %v943_v16 = vor.u32 1.1754944e-38, %v942_v8  ;;  %vm976_vm15 = vmor %vm974_vm12, %vm975_vm10 }
 0x1e1   :  { %v971_v54 = vsub.f32 1.0, %v970_v57  ;;  %6087 = vpow2.f32 %v5341_v7  ;;  %v981_v57 = vor.u32 1.1754944e-38, %v980_v32  ;;  %vm1014_vm10 = vweird.f32 %v7326_v41 }
 0x1e2   :  { %v934_v22 = vmul.f32 %v6076_v53, %v933_v2  ;;  %6089 = vrcp.f32 %v7334_v45  ;;  %vm989_vm6 = vweird.f32 %v7334_v45 }
 0x1e3   :  { %v972_v35 = vmul.f32 %v6078_v43, %v971_v54  ;;  %6091 = vtanh.f32 %v921_v14 }
 0x1e4   :  { %v7337_v17 = vpop.eup %6081  ;;  %v935_v30 = vadd.f32 %v6076_v53, %v934_v22 }
 0x1e5   :  { %v6084_v15 = vpop.eup %6083  ;;  %v973_v44 = vadd.f32 %v6078_v43, %v972_v35  ;;  %v1010_v2 = vmul.f32 %v7337_v17, %v7326_v41  ;;  %vm1015_vm9 = vweird.f32 %v7337_v17 }
 0x1e6   :  { %v6086_v7 = vpop.eup %6085  ;;  %v939_v11 = vsel %vm938_vm13, %v6076_v53, %v935_v30  ;;  %v947_v54 = vmul.f32 %v6084_v15, %v7328_v21  ;;  %v955_v53 = vand.u32 2147483647, %v7328_v21  ;;  %v957_v30 = vand.u32 2147483648, %v7328_v21  ;;  %vm1016_vm11 = vmor %vm1014_vm10, %vm1015_vm9 }
 0x1e7   :  { %v6088_v52 = vpop.eup %6087  ;;  %v944_v51 = vsel %vm941_vm14, %v943_v16, %v939_v11  ;;  %v977_v62 = vsel %vm976_vm15, %v6078_v43, %v973_v44  ;;  %v1011_v3 = vsub.f32 1.0, %v1010_v2  ;;  %vm952_vm1 = vweird.f32 %v6084_v15 }
 0x1e8   :  { %v6090_v34 = vpop.eup %6089  ;;  %v982_v31 = vsel %vm979_vm0, %v981_v57, %v977_v62  ;;  %v1041_v22 = vmul.f32 %v6086_v7, %v944_v51  ;;  %v948_v61 = vsub.f32 1.0, %v947_v54  ;;  %v1008_v8 = vadd.f32 1.0, %v6088_v52  ;;  %vm953_vm4 = vmor %vm951_vm2, %vm952_vm1 }
 0x1e9   :  { %v1039_v35 = vmul.f32 %v982_v31, %v7254_v12  ;;  %v985_v32 = vmul.f32 %v6090_v34, %v7334_v45  ;;  %v995_v62 = vand.u32 2147483648, %v7334_v45  ;;  %v993_v12 = vand.u32 2147483647, %v7334_v45  ;;  %v6092_v16 = vpop.eup %6091 }
 0x1ea   :  { %v949_v28 = vmul.f32 %v6084_v15, %v948_v61  ;;  %6093 = vrcp.f32 %v1008_v8  ;;  %vm990_vm3 = vweird.f32 %v6090_v34  ;;  %v958_v7 = vor.u32 1.1754944e-38, %v957_v30 }
 0x1eb   :  { %v7346_v43 = vadd.f32 %v1041_v22, %v1039_v35  ;;  %v986_v0 = vsub.f32 1.0, %v985_v32  ;;  %v1012_v57 = vmul.f32 %v7337_v17, %v1011_v3  ;;  %vm956_vm5 = vcmp.eq.f32.partialorder %v955_v53, 8.507059e+37  ;;  %vm991_vm7 = vmor %vm989_vm6, %vm990_vm3 }
 0x1ec   :  { %v950_v14 = vadd.f32 %v6084_v15, %v949_v28  ;;  %v996_v28 = vor.u32 1.1754944e-38, %v995_v62  ;;  %vm994_vm8 = vcmp.eq.f32.partialorder %v993_v12, 8.507059e+37  ;;  %v1018_v35 = vand.u32 2147483647, %v7326_v41 }
 0x1ed   :  { %v987_v44 = vmul.f32 %v6090_v34, %v986_v0  ;;  %6095 = vtanh.f32 %v7346_v43  ;;  %v1013_v3 = vadd.f32 %v7337_v17, %v1012_v57  ;;  %v1035_v62 = vand.u32 2147483648, %v1008_v8 }
 0x1ee   :  { %v954_v11 = vsel %vm953_vm4, %v6084_v15, %v950_v14  ;;  %v1020_v15 = vand.u32 2147483648, %v7326_v41  ;;  %vm1029_vm13 = vweird.f32 %v1008_v8  ;;  %vm1019_vm14 = vcmp.eq.f32.partialorder %v1018_v35, 8.507059e+37 }
 0x1ef   :  { %v959_v2 = vsel %vm956_vm5, %v958_v7, %v954_v11  ;;  %v988_v54 = vadd.f32 %v6090_v34, %v987_v44  ;;  %v1017_v53 = vsel %vm1016_vm11, %v7337_v17, %v1013_v3  ;;  %v1036_v44 = vor.u32 1.1754944e-38, %v1035_v62 }
 0x1f0   :  { %v6094_v52 = vpop.eup %6093  ;;  %v1042_v51 = vmul.f32 %v6092_v16, %v959_v2  ;;  %v1021_v0 = vor.u32 1.1754944e-38, %v1020_v15 }
 0x1f1   :  { %v992_v21 = vsel %vm991_vm7, %v6090_v34, %v988_v54  ;;  %v1025_v31 = vmul.f32 %v6094_v52, %v1008_v8  ;;  %vm1030_vm12 = vweird.f32 %v6094_v52 }
 0x1f2   :  { %v997_v22 = vsel %vm994_vm8, %v996_v28, %v992_v21  ;;  %v1022_v12 = vsel %vm1019_vm14, %v1021_v0, %v1017_v53  ;;  %vm1031_vm15 = vmor %vm1029_vm13, %vm1030_vm12  ;;  %v9862_v0 = vld [vmem:[#allocation25_spill] sm:$0xff] }
 0x1f3   :  { %v1040_v45 = vmul.f32 %v997_v22, %v7277_v24  ;;  %v1026_v61 = vsub.f32 1.0, %v1025_v31  ;;  %v6096_v30 = vpop.eup %6095  ;;  %v1033_v24 = vand.u32 2147483647, %v1008_v8  ;;  %v9858_v8 = vld [vmem:[#allocation14_spill] sm:$0xff]  ;;  %v9859_v31 = vld [vmem:[#allocation53_spill] sm:$0xff]  ;;  %v9860_v22 = vld [vmem:[#allocation15_spill] sm:$0xff] }
 0x1f4   :  { %v1047_v41 = vmul.f32 %v6096_v30, %v1022_v12  ;;  %v249_v3 = vadd.f32 %v9860_v22, %v9859_v31  ;;  %v9861_v30 = vld [vmem:[#allocation65_spill] sm:$0xff]  ;;  %v9864_v12 = vld [vmem:[#allocation19_spill] sm:$0xff] }
 0x1f5   :  { %v7360_v32 = vadd.f32 %v1042_v51, %v1040_v45  ;;  %v1027_v34 = vmul.f32 %v6094_v52, %v1026_v61  ;;  %vm1034_vm0 = vcmp.eq.f32.partialorder %v1033_v24, 8.507059e+37  ;;  %v347_v62 = vadd.f32 %v9862_v0, %v9861_v30 }
 0x1f6   :  { %v1049_v17 = vpack.c.bf16 %v1047_v41, %v1047_v41 }
 0x1f7   :  { %6097 = vtanh.f32 %v7360_v32  ;;  %v1028_v14 = vadd.f32 %v6094_v52, %v1027_v34 }
 0x1f8   :  { %v1067_v28 = vunpack.c.l.b16 %v1049_v17 }
 0x1f9   :  { %v1032_v16 = vsel %vm1031_vm15, %v6094_v52, %v1028_v14  ;;  %v200_v52 = vadd.f32 %v9858_v8, %v7190_v6  ;;  %v9863_v14 = vld [vmem:[#allocation18_spill] sm:$0xff] }
 0x1fa   :  { %v1037_v57 = vsel %vm1034_vm0, %v1036_v44, %v1032_v16  ;;  %v202_v24 = vadd.f32 %v9863_v14, %v7190_v6  ;;  %v251_v16 = vadd.f32 %v9864_v12, %v9859_v31 }
 0x1fd   :  { %v6098_v7 = vpop.eup %6097 }
 0x1fe   :  { %v1048_v11 = vmul.f32 %v6098_v7, %v1037_v57 }
 0x200   :  { %v1050_v2 = vpack.c.bf16 %v1048_v11, %v1048_v11  ;;  %v5951_v54 = vpack.c.bf16 %v1048_v11, %v1047_v41 }
 0x202   :  { %5952 = vst [vmem:[#allocation6] sm:$0xff] %v5951_v54   ;;  %v1068_v21 = vunpack.c.l.b16 %v1050_v2 }
 0x204   :  { %v1069_v51 = vpack.c.b16 %v1068_v21, %v1067_v28 }
 0x206   :  { %1079 = vmatmul.bf16.vlgmr.msrb.gmra.mxu0 %v1069_v51  ;;  %1093 = vmatmul.bf16.vlgmr.msrb.gmra.mxu1 %v1069_v51 }
 0x207   :  { %1107 = vmatmul.bf16.vlgmr.msra.gmra.mxu2 %v1069_v51  ;;  %1121 = vmatmul.bf16.vlgmr.msra.gmra.mxu3 %v1069_v51 }
 0x208   :  { %1495 = vmatpush.bf16.msrb.mxu0 %v6697_v23  ;;  %1509 = vmatpush.bf16.msrb.mxu1 %v6705_v25 }
 0x209   :  { %1523 = vmatpush.bf16.msra.mxu2 %v6683_v19  ;;  %1537 = vmatpush.bf16.msra.mxu3 %v6681_v18 }
 0x20c   :  { %1496 = vmatpush.bf16.msrb.mxu0 %v6730_v33  ;;  %1510 = vmatpush.bf16.msrb.mxu1 %v6739_v36 }
 0x20d   :  { %1524 = vmatpush.bf16.msra.mxu2 %v6741_v37  ;;  %1538 = vmatpush.bf16.msra.mxu3 %v6717_v29 }
 0x210   :  { %1497 = vmatpush.bf16.msrb.mxu0 %v6774_v46  ;;  %1511 = vmatpush.bf16.msrb.mxu1 %v6776_v47 }
 0x211   :  { %1525 = vmatpush.bf16.msra.mxu2 %v6785_v50  ;;  %1539 = vmatpush.bf16.msra.mxu3 %v6763_v42 }
 0x214   :  { %1498 = vmatpush.bf16.msrb.mxu0 %v6817_v59  ;;  %1512 = vmatpush.bf16.msrb.mxu1 %v6819_v60 }
 0x215   :  { %1526 = vmatpush.bf16.msra.mxu2 %v6828_v63  ;;  %1540 = vmatpush.bf16.msra.mxu3 %v6806_v55 }
 0x218   :  { %1499 = vmatpush.bf16.msrb.mxu0 %v6860_v9  ;;  %1513 = vmatpush.bf16.msrb.mxu1 %v6862_v10 }
 0x219   :  { %1527 = vmatpush.bf16.msra.mxu2 %v6871_v13  ;;  %1541 = vmatpush.bf16.msra.mxu3 %v6849_v4 }
 0x21c   :  { %1500 = vmatpush.bf16.msrb.mxu0 %v6903_v26  ;;  %1514 = vmatpush.bf16.msrb.mxu1 %v6905_v27 }
 0x21d   :  { %1528 = vmatpush.bf16.msra.mxu2 %v6932_v40  ;;  %1542 = vmatpush.bf16.msra.mxu3 %v6892_v20 }
 0x220   :  { %1501 = vmatpush.bf16.msrb.mxu0 %v6928_v38  ;;  %1515 = vmatpush.bf16.msrb.mxu1 %v6930_v39 }
 0x221   :  { %1529 = vmatpush.bf16.msra.mxu2 %v6980_v58  ;;  %1543 = vmatpush.bf16.msra.mxu3 %v6973_v56 }
 0x224   :  { %1502 = vmatpush.bf16.msrb.mxu0 %v6949_v48  ;;  %1516 = vmatpush.bf16.msrb.mxu1 %v6951_v49 }
 0x225   :  { %1530 = vmatpush.bf16.msra.mxu2 %v7017_v5  ;;  %1544 = vmatpush.bf16.msra.mxu3 %v7003_v1 }
 0x283   :  { %v1080_v15 = vpop.f32.mrf.mxu0  ;;  %v1094_v45 = vpop.f32.mrf.mxu1 }
 0x284   :  { %v1127_v61 = vadd.f32 %v1080_v15, %v200_v52  ;;  %v1128_v35 = vadd.f32 %v1094_v45, %v249_v3  ;;  %v9865_v3 = vld [vmem:[#allocation29_spill] sm:$0xff] }
 0x285   :  { %v349_v15 = vadd.f32 %v9865_v3, %v9861_v30 }
 0x286   :  { %v5342_v34 = vmul.f32 -1.442695, %v1127_v61  ;;  %v5344_v53 = vmul.f32 -1.442695, %v1128_v35  ;;  %v9866_v61 = vld [vmem:[#allocation64_spill] sm:$0xff] }
 0x287   :  { %v9867_v35 = vld [vmem:[#allocation24_spill] sm:$0xff] }
 0x288   :  { %6099 = vpow2.f32 %v5342_v34  ;;  %v298_v34 = vadd.f32 %v9867_v35, %v9866_v61 }
 0x289   :  { %6101 = vpow2.f32 %v5344_v53 }
 0x28a   :  { %v1122_v41 = vpop.f32.mrf.mxu3  ;;  %v1108_v22 = vpop.f32.mrf.mxu2 }
 0x28b   :  { %v1130_v44 = vadd.f32 %v1122_v41, %v347_v62  ;;  %v1082_v7 = vpop.f32.mrf.mxu0  ;;  %v1096_v57 = vpop.f32.mrf.mxu1  ;;  %v1129_v14 = vadd.f32 %v1108_v22, %v298_v34 }
 0x28c   :  { %v1131_v11 = vadd.f32 %v1082_v7, %v202_v24  ;;  %v1132_v17 = vadd.f32 %v1096_v57, %v251_v16 }
 0x28d   :  { %v5346_v2 = vmul.f32 -1.442695, %v1130_v44 }
 0x28e   :  { %v6100_v54 = vpop.eup %6099  ;;  %v5343_v28 = vmul.f32 -1.442695, %v1131_v11  ;;  %v5345_v8 = vmul.f32 -1.442695, %v1132_v17  ;;  %v9868_v17 = vld [vmem:[#allocation28_spill] sm:$0xff] }
 0x28f   :  { %v6102_v21 = vpop.eup %6101  ;;  %v1141_v51 = vadd.f32 1.0, %v6100_v54  ;;  %6103 = vpow2.f32 %v5346_v2  ;;  %v300_v2 = vadd.f32 %v9868_v17, %v9866_v61 }
 0x290   :  { %v1179_v52 = vadd.f32 1.0, %v6102_v21  ;;  %6105 = vpow2.f32 %v5343_v28 }
 0x291   :  { %6107 = vrcp.f32 %v1141_v51  ;;  %v1152_v22 = vand.u32 2147483647, %v1141_v51  ;;  %v1154_v3 = vand.u32 2147483648, %v1141_v51  ;;  %vm1148_vm3 = vweird.f32 %v1141_v51 }
 0x292   :  { %6109 = vrcp.f32 %v1179_v52  ;;  %v1124_v45 = vpop.f32.mrf.mxu3  ;;  %v1110_v21 = vpop.f32.mrf.mxu2  ;;  %v1190_v34 = vand.u32 2147483647, %v1179_v52  ;;  %vm1186_vm4 = vweird.f32 %v1179_v52 }
 0x293   :  { %6111 = vpow2.f32 %v5345_v8  ;;  %v1134_v53 = vadd.f32 %v1124_v45, %v349_v15  ;;  %v1192_v15 = vand.u32 2147483648, %v1179_v52  ;;  %vm1153_vm6 = vcmp.eq.f32.partialorder %v1152_v22, 8.507059e+37 }
 0x294   :  { %vm1191_vm8 = vcmp.eq.f32.partialorder %v1190_v34, 8.507059e+37 }
 0x295   :  { %v6104_v0 = vpop.eup %6103  ;;  %v5347_v41 = vmul.f32 -1.442695, %v1134_v53  ;;  %v1133_v53 = vadd.f32 %v1110_v21, %v300_v2 }
 0x296   :  { %v6106_v62 = vpop.eup %6105  ;;  %v7410_v24 = vadd.f32 1.0, %v6104_v0 }
 0x297   :  { %v6108_v12 = vpop.eup %6107  ;;  %v7412_v16 = vadd.f32 1.0, %v6106_v62 }
 0x298   :  { %v6110_v44 = vpop.eup %6109  ;;  %v1144_v7 = vmul.f32 %v6108_v12, %v1141_v51  ;;  %6113 = vrcp.f32 %v7410_v24  ;;  %vm1149_vm1 = vweird.f32 %v6108_v12 }
 0x299   :  { %v6112_v57 = vpop.eup %6111  ;;  %v1182_v11 = vmul.f32 %v6110_v44, %v1179_v52  ;;  %6115 = vrcp.f32 %v7412_v16  ;;  %vm1187_vm2 = vweird.f32 %v6110_v44  ;;  %vm1150_vm5 = vmor %vm1148_vm3, %vm1149_vm1  ;;  %vm1163_vm10 = vweird.f32 %v7412_v16 }
 0x29a   :  { %v1145_v54 = vsub.f32 1.0, %v1144_v7  ;;  %6117 = vtanh.f32 %v1129_v14  ;;  %v7418_v28 = vadd.f32 1.0, %v6112_v57  ;;  %v1155_v7 = vor.u32 1.1754944e-38, %v1154_v3  ;;  %vm1188_vm7 = vmor %vm1186_vm4, %vm1187_vm2 }
 0x29b   :  { %v1183_v8 = vsub.f32 1.0, %v1182_v11  ;;  %6119 = vpow2.f32 %v5347_v41  ;;  %v1193_v11 = vor.u32 1.1754944e-38, %v1192_v15  ;;  %vm1226_vm2 = vweird.f32 %v7410_v24 }
 0x29c   :  { %v1146_v45 = vmul.f32 %v6108_v12, %v1145_v54  ;;  %6121 = vrcp.f32 %v7418_v28  ;;  %vm1201_vm14 = vweird.f32 %v7418_v28 }
 0x29d   :  { %v1184_v35 = vmul.f32 %v6110_v44, %v1183_v8  ;;  %6123 = vtanh.f32 %v1133_v53 }
 0x29e   :  { %v7421_v0 = vpop.eup %6113  ;;  %v1147_v62 = vadd.f32 %v6108_v12, %v1146_v45 }
 0x29f   :  { %v6116_v14 = vpop.eup %6115  ;;  %v1185_v57 = vadd.f32 %v6110_v44, %v1184_v35  ;;  %v1222_v54 = vmul.f32 %v7421_v0, %v7410_v24  ;;  %vm1227_vm1 = vweird.f32 %v7421_v0 }
 0x2a0   :  { %v6118_v41 = vpop.eup %6117  ;;  %v1151_v17 = vsel %vm1150_vm5, %v6108_v12, %v1147_v62  ;;  %v1159_v8 = vmul.f32 %v6116_v14, %v7412_v16  ;;  %v1167_v12 = vand.u32 2147483647, %v7412_v16  ;;  %v1169_v62 = vand.u32 2147483648, %v7412_v16  ;;  %vm1228_vm3 = vmor %vm1226_vm2, %vm1227_vm1 }
 0x2a1   :  { %v6120_v2 = vpop.eup %6119  ;;  %v1156_v21 = vsel %vm1153_vm6, %v1155_v7, %v1151_v17  ;;  %v1189_v61 = vsel %vm1188_vm7, %v6110_v44, %v1185_v57  ;;  %v1223_v30 = vsub.f32 1.0, %v1222_v54  ;;  %vm1164_vm9 = vweird.f32 %v6116_v14 }
 0x2a2   :  { %v6122_v51 = vpop.eup %6121  ;;  %v1194_v52 = vsel %vm1191_vm8, %v1193_v11, %v1189_v61  ;;  %v1253_v45 = vmul.f32 %v6118_v41, %v1156_v21  ;;  %v1160_v22 = vsub.f32 1.0, %v1159_v8  ;;  %v1220_v3 = vadd.f32 1.0, %v6120_v2  ;;  %vm1165_vm12 = vmor %vm1163_vm10, %vm1164_vm9 }
 0x2a3   :  { %v1251_v35 = vmul.f32 %v1194_v52, %v7346_v43  ;;  %v1197_v15 = vmul.f32 %v6122_v51, %v7418_v28  ;;  %v1207_v61 = vand.u32 2147483648, %v7418_v28  ;;  %v1205_v43 = vand.u32 2147483647, %v7418_v28  ;;  %v6124_v7 = vpop.eup %6123 }
 0x2a4   :  { %v1161_v31 = vmul.f32 %v6116_v14, %v1160_v22  ;;  %6125 = vrcp.f32 %v1220_v3  ;;  %vm1202_vm11 = vweird.f32 %v6122_v51  ;;  %v1170_v41 = vor.u32 1.1754944e-38, %v1169_v62 }
 0x2a5   :  { %v7430_v44 = vadd.f32 %v1253_v45, %v1251_v35  ;;  %v1198_v34 = vsub.f32 1.0, %v1197_v15  ;;  %v1224_v11 = vmul.f32 %v7421_v0, %v1223_v30  ;;  %vm1168_vm13 = vcmp.eq.f32.partialorder %v1167_v12, 8.507059e+37  ;;  %vm1203_vm15 = vmor %vm1201_vm14, %vm1202_vm11 }
 0x2a6   :  { %v1162_v53 = vadd.f32 %v6116_v14, %v1161_v31  ;;  %v1208_v31 = vor.u32 1.1754944e-38, %v1207_v61  ;;  %vm1206_vm0 = vcmp.eq.f32.partialorder %v1205_v43, 8.507059e+37  ;;  %v1230_v35 = vand.u32 2147483647, %v7410_v24 }
 0x2a7   :  { %v1199_v57 = vmul.f32 %v6122_v51, %v1198_v34  ;;  %6127 = vtanh.f32 %v7430_v44  ;;  %v1225_v30 = vadd.f32 %v7421_v0, %v1224_v11  ;;  %v1247_v61 = vand.u32 2147483648, %v1220_v3 }
 0x2a8   :  { %v1166_v17 = vsel %vm1165_vm12, %v6116_v14, %v1162_v53  ;;  %v1232_v14 = vand.u32 2147483648, %v7410_v24  ;;  %vm1241_vm5 = vweird.f32 %v1220_v3  ;;  %vm1231_vm6 = vcmp.eq.f32.partialorder %v1230_v35, 8.507059e+37 }
 0x2a9   :  { %v1171_v54 = vsel %vm1168_vm13, %v1170_v41, %v1166_v17  ;;  %v1200_v8 = vadd.f32 %v6122_v51, %v1199_v57  ;;  %v1229_v12 = vsel %vm1228_vm3, %v7421_v0, %v1225_v30  ;;  %v1248_v57 = vor.u32 1.1754944e-38, %v1247_v61 }
 0x2aa   :  { %v6126_v2 = vpop.eup %6125  ;;  %v1254_v21 = vmul.f32 %v6124_v7, %v1171_v54  ;;  %v1233_v34 = vor.u32 1.1754944e-38, %v1232_v14 }
 0x2ab   :  { %v1204_v16 = vsel %vm1203_vm15, %v6122_v51, %v1200_v8  ;;  %v1237_v52 = vmul.f32 %v6126_v2, %v1220_v3  ;;  %vm1242_vm4 = vweird.f32 %v6126_v2 }
 0x2ac   :  { %v1209_v45 = vsel %vm1206_vm0, %v1208_v31, %v1204_v16  ;;  %v1234_v43 = vsel %vm1231_vm6, %v1233_v34, %v1229_v12  ;;  %vm1243_vm7 = vmor %vm1241_vm5, %vm1242_vm4  ;;  %v9873_v34 = vld [vmem:[#allocation33_spill] sm:$0xff] }
 0x2ad   :  { %v1252_v28 = vmul.f32 %v1209_v45, %v7360_v32  ;;  %v1238_v22 = vsub.f32 1.0, %v1237_v52  ;;  %v6128_v62 = vpop.eup %6127  ;;  %v1245_v32 = vand.u32 2147483647, %v1220_v3  ;;  %v9869_v3 = vld [vmem:[#allocation22_spill] sm:$0xff]  ;;  %v9870_v52 = vld [vmem:[#allocation53_spill] sm:$0xff]  ;;  %v9871_v45 = vld [vmem:[#allocation23_spill] sm:$0xff] }
 0x2ae   :  { %v1259_v24 = vmul.f32 %v6128_v62, %v1234_v43  ;;  %v254_v30 = vadd.f32 %v9871_v45, %v9870_v52  ;;  %v9872_v62 = vld [vmem:[#allocation65_spill] sm:$0xff]  ;;  %v9875_v43 = vld [vmem:[#allocation27_spill] sm:$0xff] }
 0x2af   :  { %v7444_v15 = vadd.f32 %v1254_v21, %v1252_v28  ;;  %v1239_v51 = vmul.f32 %v6126_v2, %v1238_v22  ;;  %vm1246_vm8 = vcmp.eq.f32.partialorder %v1245_v32, 8.507059e+37  ;;  %v352_v61 = vadd.f32 %v9873_v34, %v9872_v62 }
 0x2b0   :  { %v1261_v0 = vpack.c.bf16 %v1259_v24, %v1259_v24 }
 0x2b1   :  { %6129 = vtanh.f32 %v7444_v15  ;;  %v1240_v53 = vadd.f32 %v6126_v2, %v1239_v51 }
 0x2b2   :  { %v1279_v31 = vunpack.c.l.b16 %v1261_v0 }
 0x2b3   :  { %v1244_v7 = vsel %vm1243_vm7, %v6126_v2, %v1240_v53  ;;  %v205_v2 = vadd.f32 %v9869_v3, %v7190_v6  ;;  %v9874_v53 = vld [vmem:[#allocation26_spill] sm:$0xff] }
 0x2b4   :  { %v1249_v11 = vsel %vm1246_vm8, %v1248_v57, %v1244_v7  ;;  %v207_v32 = vadd.f32 %v9874_v53, %v7190_v6  ;;  %v256_v7 = vadd.f32 %v9875_v43, %v9870_v52 }
 0x2b7   :  { %v6130_v41 = vpop.eup %6129 }
 0x2b8   :  { %v1260_v17 = vmul.f32 %v6130_v41, %v1249_v11 }
 0x2ba   :  { %v1262_v54 = vpack.c.bf16 %v1260_v17, %v1260_v17  ;;  %v5956_v8 = vpack.c.bf16 %v1260_v17, %v1259_v24 }
 0x2bc   :  { %5957 = vst [vmem:[#allocation6 + $0x18] sm:$0xff] %v5956_v8   ;;  %v1280_v16 = vunpack.c.l.b16 %v1262_v54 }
 0x2be   :  { %v1281_v21 = vpack.c.b16 %v1280_v16, %v1279_v31 }
 0x2c0   :  { %1291 = vmatmul.bf16.vlgmr.msra.gmra.mxu0 %v1281_v21  ;;  %1305 = vmatmul.bf16.vlgmr.msra.gmra.mxu1 %v1281_v21 }
 0x2c1   :  { %1319 = vmatmul.bf16.vlgmr.msrb.gmra.mxu2 %v1281_v21  ;;  %1333 = vmatmul.bf16.vlgmr.msrb.gmra.mxu3 %v1281_v21 }
 0x2c2   :  { %1707 = vmatpush.bf16.msra.mxu0 %v6697_v23  ;;  %1721 = vmatpush.bf16.msra.mxu1 %v6705_v25 }
 0x2c3   :  { %1735 = vmatpush.bf16.msrb.mxu2 %v6683_v19  ;;  %1749 = vmatpush.bf16.msrb.mxu3 %v6681_v18 }
 0x2c6   :  { %1708 = vmatpush.bf16.msra.mxu0 %v6730_v33  ;;  %1722 = vmatpush.bf16.msra.mxu1 %v6739_v36 }
 0x2c7   :  { %1736 = vmatpush.bf16.msrb.mxu2 %v6741_v37  ;;  %1750 = vmatpush.bf16.msrb.mxu3 %v6717_v29 }
 0x2ca   :  { %1709 = vmatpush.bf16.msra.mxu0 %v6774_v46  ;;  %1723 = vmatpush.bf16.msra.mxu1 %v6776_v47 }
 0x2cb   :  { %1737 = vmatpush.bf16.msrb.mxu2 %v6785_v50  ;;  %1751 = vmatpush.bf16.msrb.mxu3 %v6763_v42 }
 0x2ce   :  { %1710 = vmatpush.bf16.msra.mxu0 %v6817_v59  ;;  %1724 = vmatpush.bf16.msra.mxu1 %v6819_v60 }
 0x2cf   :  { %1738 = vmatpush.bf16.msrb.mxu2 %v6828_v63  ;;  %1752 = vmatpush.bf16.msrb.mxu3 %v6806_v55 }
 0x2d2   :  { %1711 = vmatpush.bf16.msra.mxu0 %v6860_v9  ;;  %1725 = vmatpush.bf16.msra.mxu1 %v6862_v10 }
 0x2d3   :  { %1739 = vmatpush.bf16.msrb.mxu2 %v6871_v13  ;;  %1753 = vmatpush.bf16.msrb.mxu3 %v6849_v4 }
 0x2d6   :  { %1712 = vmatpush.bf16.msra.mxu0 %v6903_v26  ;;  %1726 = vmatpush.bf16.msra.mxu1 %v6905_v27 }
 0x2d7   :  { %1740 = vmatpush.bf16.msrb.mxu2 %v6932_v40  ;;  %1754 = vmatpush.bf16.msrb.mxu3 %v6892_v20 }
 0x2da   :  { %1713 = vmatpush.bf16.msra.mxu0 %v6928_v38  ;;  %1727 = vmatpush.bf16.msra.mxu1 %v6930_v39 }
 0x2db   :  { %1741 = vmatpush.bf16.msrb.mxu2 %v6980_v58  ;;  %1755 = vmatpush.bf16.msrb.mxu3 %v6973_v56 }
 0x2de   :  { %1714 = vmatpush.bf16.msra.mxu0 %v6949_v48  ;;  %1728 = vmatpush.bf16.msra.mxu1 %v6951_v49 }
 0x2df   :  { %1742 = vmatpush.bf16.msrb.mxu2 %v7017_v5  ;;  %1756 = vmatpush.bf16.msrb.mxu3 %v7003_v1 }
 0x33d   :  { %v1292_v14 = vpop.f32.mrf.mxu0  ;;  %v1306_v28 = vpop.f32.mrf.mxu1 }
 0x33e   :  { %v1339_v22 = vadd.f32 %v1292_v14, %v205_v2  ;;  %v1340_v35 = vadd.f32 %v1306_v28, %v254_v30  ;;  %v9876_v30 = vld [vmem:[#allocation37_spill] sm:$0xff] }
 0x33f   :  { %v354_v14 = vadd.f32 %v9876_v30, %v9872_v62 }
 0x340   :  { %v5348_v51 = vmul.f32 -1.442695, %v1339_v22  ;;  %v5350_v12 = vmul.f32 -1.442695, %v1340_v35  ;;  %v9877_v22 = vld [vmem:[#allocation64_spill] sm:$0xff] }
 0x341   :  { %v9878_v35 = vld [vmem:[#allocation32_spill] sm:$0xff] }
 0x342   :  { %6131 = vpow2.f32 %v5348_v51  ;;  %v303_v51 = vadd.f32 %v9878_v35, %v9877_v22 }
 0x343   :  { %6133 = vpow2.f32 %v5350_v12 }
 0x344   :  { %v1334_v24 = vpop.f32.mrf.mxu3  ;;  %v1320_v45 = vpop.f32.mrf.mxu2 }
 0x345   :  { %v1342_v57 = vadd.f32 %v1334_v24, %v352_v61  ;;  %v1294_v41 = vpop.f32.mrf.mxu0  ;;  %v1308_v11 = vpop.f32.mrf.mxu1  ;;  %v1341_v53 = vadd.f32 %v1320_v45, %v303_v51 }
 0x346   :  { %v1343_v17 = vadd.f32 %v1294_v41, %v207_v32  ;;  %v1344_v0 = vadd.f32 %v1308_v11, %v256_v7 }
 0x347   :  { %v5352_v54 = vmul.f32 -1.442695, %v1342_v57 }
 0x348   :  { %v6132_v8 = vpop.eup %6131  ;;  %v5349_v31 = vmul.f32 -1.442695, %v1343_v17  ;;  %v5351_v3 = vmul.f32 -1.442695, %v1344_v0  ;;  %v9879_v0 = vld [vmem:[#allocation36_spill] sm:$0xff] }
 0x349   :  { %v6134_v16 = vpop.eup %6133  ;;  %v1353_v21 = vadd.f32 1.0, %v6132_v8  ;;  %6135 = vpow2.f32 %v5352_v54  ;;  %v305_v54 = vadd.f32 %v9879_v0, %v9877_v22 }
 0x34a   :  { %v1391_v2 = vadd.f32 1.0, %v6134_v16  ;;  %6137 = vpow2.f32 %v5349_v31 }
 0x34b   :  { %6139 = vrcp.f32 %v1353_v21  ;;  %v1364_v45 = vand.u32 2147483647, %v1353_v21  ;;  %v1366_v30 = vand.u32 2147483648, %v1353_v21  ;;  %vm1360_vm11 = vweird.f32 %v1353_v21 }
 0x34c   :  { %6141 = vrcp.f32 %v1391_v2  ;;  %v1336_v28 = vpop.f32.mrf.mxu3  ;;  %v1322_v16 = vpop.f32.mrf.mxu2  ;;  %v1402_v51 = vand.u32 2147483647, %v1391_v2  ;;  %vm1398_vm12 = vweird.f32 %v1391_v2 }
 0x34d   :  { %6143 = vpow2.f32 %v5351_v3  ;;  %v1346_v12 = vadd.f32 %v1336_v28, %v354_v14  ;;  %v1404_v14 = vand.u32 2147483648, %v1391_v2  ;;  %vm1365_vm14 = vcmp.eq.f32.partialorder %v1364_v45, 8.507059e+37 }
 0x34e   :  { %vm1403_vm0 = vcmp.eq.f32.partialorder %v1402_v51, 8.507059e+37 }
 0x34f   :  { %v6136_v34 = vpop.eup %6135  ;;  %v5353_v24 = vmul.f32 -1.442695, %v1346_v12  ;;  %v1345_v12 = vadd.f32 %v1322_v16, %v305_v54 }
 0x350   :  { %v6138_v61 = vpop.eup %6137  ;;  %v7494_v32 = vadd.f32 1.0, %v6136_v34 }
 0x351   :  { %v6140_v43 = vpop.eup %6139  ;;  %v7496_v7 = vadd.f32 1.0, %v6138_v61 }
 0x352   :  { %v6142_v57 = vpop.eup %6141  ;;  %v1356_v41 = vmul.f32 %v6140_v43, %v1353_v21  ;;  %6145 = vrcp.f32 %v7494_v32  ;;  %vm1361_vm9 = vweird.f32 %v6140_v43 }
 0x353   :  { %v6144_v11 = vpop.eup %6143  ;;  %v1394_v17 = vmul.f32 %v6142_v57, %v1391_v2  ;;  %6147 = vrcp.f32 %v7496_v7  ;;  %vm1399_vm10 = vweird.f32 %v6142_v57  ;;  %vm1362_vm13 = vmor %vm1360_vm11, %vm1361_vm9  ;;  %vm1375_vm2 = vweird.f32 %v7496_v7 }
 0x354   :  { %v1357_v8 = vsub.f32 1.0, %v1356_v41  ;;  %6149 = vtanh.f32 %v1341_v53  ;;  %v7502_v31 = vadd.f32 1.0, %v6144_v11  ;;  %v1367_v41 = vor.u32 1.1754944e-38, %v1366_v30  ;;  %vm1400_vm15 = vmor %vm1398_vm12, %vm1399_vm10 }
 0x355   :  { %v1395_v3 = vsub.f32 1.0, %v1394_v17  ;;  %6151 = vpow2.f32 %v5353_v24  ;;  %v1405_v17 = vor.u32 1.1754944e-38, %v1404_v14  ;;  %vm1438_vm10 = vweird.f32 %v7494_v32 }
 0x356   :  { %v1358_v28 = vmul.f32 %v6140_v43, %v1357_v8  ;;  %6153 = vrcp.f32 %v7502_v31  ;;  %vm1413_vm6 = vweird.f32 %v7502_v31 }
 0x357   :  { %v1396_v35 = vmul.f32 %v6142_v57, %v1395_v3  ;;  %6155 = vtanh.f32 %v1345_v12 }
 0x358   :  { %v7505_v34 = vpop.eup %6145  ;;  %v1359_v61 = vadd.f32 %v6140_v43, %v1358_v28 }
 0x359   :  { %v6148_v53 = vpop.eup %6147  ;;  %v1397_v11 = vadd.f32 %v6142_v57, %v1396_v35  ;;  %v1434_v8 = vmul.f32 %v7505_v34, %v7494_v32  ;;  %vm1439_vm9 = vweird.f32 %v7505_v34 }
 0x35a   :  { %v6150_v24 = vpop.eup %6149  ;;  %v1363_v0 = vsel %vm1362_vm13, %v6140_v43, %v1359_v61  ;;  %v1371_v3 = vmul.f32 %v6148_v53, %v7496_v7  ;;  %v1379_v43 = vand.u32 2147483647, %v7496_v7  ;;  %v1381_v61 = vand.u32 2147483648, %v7496_v7  ;;  %vm1440_vm11 = vmor %vm1438_vm10, %vm1439_vm9 }
 0x35b   :  { %v6152_v54 = vpop.eup %6151  ;;  %v1368_v16 = vsel %vm1365_vm14, %v1367_v41, %v1363_v0  ;;  %v1401_v22 = vsel %vm1400_vm15, %v6142_v57, %v1397_v11  ;;  %v1435_v62 = vsub.f32 1.0, %v1434_v8  ;;  %vm1376_vm1 = vweird.f32 %v6148_v53 }
 0x35c   :  { %v6154_v21 = vpop.eup %6153  ;;  %v1406_v2 = vsel %vm1403_vm0, %v1405_v17, %v1401_v22  ;;  %v1465_v28 = vmul.f32 %v6150_v24, %v1368_v16  ;;  %v1372_v45 = vsub.f32 1.0, %v1371_v3  ;;  %v1432_v30 = vadd.f32 1.0, %v6152_v54  ;;  %vm1377_vm4 = vmor %vm1375_vm2, %vm1376_vm1 }
 0x35d   :  { %v1463_v35 = vmul.f32 %v1406_v2, %v7430_v44  ;;  %v1409_v14 = vmul.f32 %v6154_v21, %v7502_v31  ;;  %v1419_v22 = vand.u32 2147483648, %v7502_v31  ;;  %v1417_v44 = vand.u32 2147483647, %v7502_v31  ;;  %v6156_v41 = vpop.eup %6155 }
 0x35e   :  { %v1373_v52 = vmul.f32 %v6148_v53, %v1372_v45  ;;  %6157 = vrcp.f32 %v1432_v30  ;;  %vm1414_vm3 = vweird.f32 %v6154_v21  ;;  %v1382_v24 = vor.u32 1.1754944e-38, %v1381_v61 }
 0x35f   :  { %v7514_v57 = vadd.f32 %v1465_v28, %v1463_v35  ;;  %v1410_v51 = vsub.f32 1.0, %v1409_v14  ;;  %v1436_v17 = vmul.f32 %v7505_v34, %v1435_v62  ;;  %vm1380_vm5 = vcmp.eq.f32.partialorder %v1379_v43, 8.507059e+37  ;;  %vm1415_vm7 = vmor %vm1413_vm6, %vm1414_vm3 }
 0x360   :  { %v1374_v12 = vadd.f32 %v6148_v53, %v1373_v52  ;;  %v1420_v52 = vor.u32 1.1754944e-38, %v1419_v22  ;;  %vm1418_vm8 = vcmp.eq.f32.partialorder %v1417_v44, 8.507059e+37  ;;  %v1442_v35 = vand.u32 2147483647, %v7494_v32 }
 0x361   :  { %v1411_v11 = vmul.f32 %v6154_v21, %v1410_v51  ;;  %6159 = vtanh.f32 %v7514_v57  ;;  %v1437_v62 = vadd.f32 %v7505_v34, %v1436_v17  ;;  %v1459_v22 = vand.u32 2147483648, %v1432_v30 }
 0x362   :  { %v1378_v0 = vsel %vm1377_vm4, %v6148_v53, %v1374_v12  ;;  %v1444_v53 = vand.u32 2147483648, %v7494_v32  ;;  %vm1453_vm13 = vweird.f32 %v1432_v30  ;;  %vm1443_vm14 = vcmp.eq.f32.partialorder %v1442_v35, 8.507059e+37 }
 0x363   :  { %v1383_v8 = vsel %vm1380_vm5, %v1382_v24, %v1378_v0  ;;  %v1412_v3 = vadd.f32 %v6154_v21, %v1411_v11  ;;  %v1441_v43 = vsel %vm1440_vm11, %v7505_v34, %v1437_v62  ;;  %v1460_v11 = vor.u32 1.1754944e-38, %v1459_v22 }
 0x364   :  { %v6158_v54 = vpop.eup %6157  ;;  %v1466_v16 = vmul.f32 %v6156_v41, %v1383_v8  ;;  %v1445_v51 = vor.u32 1.1754944e-38, %v1444_v53 }
 0x365   :  { %v1416_v7 = vsel %vm1415_vm7, %v6154_v21, %v1412_v3  ;;  %v1449_v2 = vmul.f32 %v6158_v54, %v1432_v30  ;;  %vm1454_vm12 = vweird.f32 %v6158_v54 }
 0x366   :  { %v1421_v28 = vsel %vm1418_vm8, %v1420_v52, %v1416_v7  ;;  %v1446_v44 = vsel %vm1443_vm14, %v1445_v51, %v1441_v43  ;;  %vm1455_vm15 = vmor %vm1453_vm13, %vm1454_vm12  ;;  %v9884_v51 = vld [vmem:[#allocation41_spill] sm:$0xff] }
 0x367   :  { %v1464_v31 = vmul.f32 %v1421_v28, %v7444_v15  ;;  %v1450_v45 = vsub.f32 1.0, %v1449_v2  ;;  %v6160_v61 = vpop.eup %6159  ;;  %v1457_v15 = vand.u32 2147483647, %v1432_v30  ;;  %v9880_v30 = vld [vmem:[#allocation30_spill] sm:$0xff]  ;;  %v9881_v2 = vld [vmem:[#allocation53_spill] sm:$0xff]  ;;  %v9882_v28 = vld [vmem:[#allocation31_spill] sm:$0xff] }
 0x368   :  { %v1471_v32 = vmul.f32 %v6160_v61, %v1446_v44  ;;  %v259_v62 = vadd.f32 %v9882_v28, %v9881_v2  ;;  %v9883_v61 = vld [vmem:[#allocation65_spill] sm:$0xff]  ;;  %v9886_v44 = vld [vmem:[#allocation35_spill] sm:$0xff] }
 0x369   :  { %v7528_v14 = vadd.f32 %v1466_v16, %v1464_v31  ;;  %v1451_v21 = vmul.f32 %v6158_v54, %v1450_v45  ;;  %vm1458_vm0 = vcmp.eq.f32.partialorder %v1457_v15, 8.507059e+37  ;;  %v357_v22 = vadd.f32 %v9884_v51, %v9883_v61 }
 0x36a   :  { %v1473_v34 = vpack.c.bf16 %v1471_v32, %v1471_v32 }
 0x36b   :  { %6161 = vtanh.f32 %v7528_v14  ;;  %v1452_v12 = vadd.f32 %v6158_v54, %v1451_v21 }
 0x36c   :  { %v1491_v52 = vunpack.c.l.b16 %v1473_v34 }
 0x36d   :  { %v1456_v41 = vsel %vm1455_vm15, %v6158_v54, %v1452_v12  ;;  %v210_v54 = vadd.f32 %v9880_v30, %v7190_v6  ;;  %v9885_v12 = vld [vmem:[#allocation34_spill] sm:$0xff] }
 0x36e   :  { %v1461_v17 = vsel %vm1458_vm0, %v1460_v11, %v1456_v41  ;;  %v212_v15 = vadd.f32 %v9885_v12, %v7190_v6  ;;  %v261_v41 = vadd.f32 %v9886_v44, %v9881_v2 }
 0x371   :  { %v6162_v24 = vpop.eup %6161 }
 0x372   :  { %v1472_v0 = vmul.f32 %v6162_v24, %v1461_v17 }
 0x374   :  { %v1474_v8 = vpack.c.bf16 %v1472_v0, %v1472_v0  ;;  %v5961_v3 = vpack.c.bf16 %v1472_v0, %v1471_v32 }
 0x376   :  { %5962 = vst [vmem:[#allocation6 + $0x10] sm:$0xff] %v5961_v3   ;;  %v1492_v7 = vunpack.c.l.b16 %v1474_v8 }
 0x378   :  { %v1493_v16 = vpack.c.b16 %v1492_v7, %v1491_v52 }
 0x37a   :  { %1503 = vmatmul.bf16.vlgmr.msrb.gmra.mxu0 %v1493_v16  ;;  %1517 = vmatmul.bf16.vlgmr.msrb.gmra.mxu1 %v1493_v16 }
 0x37b   :  { %1531 = vmatmul.bf16.vlgmr.msra.gmra.mxu2 %v1493_v16  ;;  %1545 = vmatmul.bf16.vlgmr.msra.gmra.mxu3 %v1493_v16 }
 0x37c   :  { %1919 = vmatpush.bf16.msrb.mxu0 %v6697_v23  ;;  %1933 = vmatpush.bf16.msrb.mxu1 %v6705_v25 }
 0x37d   :  { %1947 = vmatpush.bf16.msra.mxu2 %v6683_v19  ;;  %1961 = vmatpush.bf16.msra.mxu3 %v6681_v18 }
 0x380   :  { %1920 = vmatpush.bf16.msrb.mxu0 %v6730_v33  ;;  %1934 = vmatpush.bf16.msrb.mxu1 %v6739_v36 }
 0x381   :  { %1948 = vmatpush.bf16.msra.mxu2 %v6741_v37  ;;  %1962 = vmatpush.bf16.msra.mxu3 %v6717_v29 }
 0x384   :  { %1921 = vmatpush.bf16.msrb.mxu0 %v6774_v46  ;;  %1935 = vmatpush.bf16.msrb.mxu1 %v6776_v47 }
 0x385   :  { %1949 = vmatpush.bf16.msra.mxu2 %v6785_v50  ;;  %1963 = vmatpush.bf16.msra.mxu3 %v6763_v42 }
 0x388   :  { %1922 = vmatpush.bf16.msrb.mxu0 %v6817_v59  ;;  %1936 = vmatpush.bf16.msrb.mxu1 %v6819_v60 }
 0x389   :  { %1950 = vmatpush.bf16.msra.mxu2 %v6828_v63  ;;  %1964 = vmatpush.bf16.msra.mxu3 %v6806_v55 }
 0x38c   :  { %1923 = vmatpush.bf16.msrb.mxu0 %v6860_v9  ;;  %1937 = vmatpush.bf16.msrb.mxu1 %v6862_v10 }
 0x38d   :  { %1951 = vmatpush.bf16.msra.mxu2 %v6871_v13  ;;  %1965 = vmatpush.bf16.msra.mxu3 %v6849_v4 }
 0x390   :  { %1924 = vmatpush.bf16.msrb.mxu0 %v6903_v26  ;;  %1938 = vmatpush.bf16.msrb.mxu1 %v6905_v27 }
 0x391   :  { %1952 = vmatpush.bf16.msra.mxu2 %v6932_v40  ;;  %1966 = vmatpush.bf16.msra.mxu3 %v6892_v20 }
 0x394   :  { %1925 = vmatpush.bf16.msrb.mxu0 %v6928_v38  ;;  %1939 = vmatpush.bf16.msrb.mxu1 %v6930_v39 }
 0x395   :  { %1953 = vmatpush.bf16.msra.mxu2 %v6980_v58  ;;  %1967 = vmatpush.bf16.msra.mxu3 %v6973_v56 }
 0x398   :  { %1926 = vmatpush.bf16.msrb.mxu0 %v6949_v48  ;;  %1940 = vmatpush.bf16.msrb.mxu1 %v6951_v49 }
 0x399   :  { %1954 = vmatpush.bf16.msra.mxu2 %v7017_v5  ;;  %1968 = vmatpush.bf16.msra.mxu3 %v7003_v1 }
 0x3f7   :  { %v1504_v53 = vpop.f32.mrf.mxu0  ;;  %v1518_v31 = vpop.f32.mrf.mxu1 }
 0x3f8   :  { %v1551_v45 = vadd.f32 %v1504_v53, %v210_v54  ;;  %v1552_v35 = vadd.f32 %v1518_v31, %v259_v62  ;;  %v9887_v53 = vld [vmem:[#allocation45_spill] sm:$0xff] }
 0x3f9   :  { %v359_v31 = vadd.f32 %v9887_v53, %v9883_v61 }
 0x3fa   :  { %v5354_v21 = vmul.f32 -1.442695, %v1551_v45  ;;  %v5356_v43 = vmul.f32 -1.442695, %v1552_v35  ;;  %v9888_v35 = vld [vmem:[#allocation64_spill] sm:$0xff] }
 0x3fc   :  { %6163 = vpow2.f32 %v5354_v21  ;;  %v9889_v21 = vld [vmem:[#allocation40_spill] sm:$0xff] }
 0x3fd   :  { %6165 = vpow2.f32 %v5356_v43  ;;  %v308_v43 = vadd.f32 %v9889_v21, %v9888_v35  ;;  %v9890_v21 = vld [vmem:[#allocation44_spill] sm:$0xff] }
 0x3fe   :  { %v1546_v32 = vpop.f32.mrf.mxu3  ;;  %v1532_v28 = vpop.f32.mrf.mxu2 }
 0x3ff   :  { %v1554_v11 = vadd.f32 %v1546_v32, %v357_v22  ;;  %v1506_v24 = vpop.f32.mrf.mxu0  ;;  %v1520_v17 = vpop.f32.mrf.mxu1  ;;  %v1553_v44 = vadd.f32 %v1532_v28, %v308_v43  ;;  %v310_v43 = vadd.f32 %v9890_v21, %v9888_v35 }
 0x400   :  { %v1555_v0 = vadd.f32 %v1506_v24, %v212_v15  ;;  %v1556_v34 = vadd.f32 %v1520_v17, %v261_v41 }
 0x401   :  { %v5358_v8 = vmul.f32 -1.442695, %v1554_v11 }
 0x402   :  { %v6164_v3 = vpop.eup %6163  ;;  %v5355_v52 = vmul.f32 -1.442695, %v1555_v0  ;;  %v5357_v30 = vmul.f32 -1.442695, %v1556_v34 }
 0x403   :  { %v6166_v7 = vpop.eup %6165  ;;  %v1565_v16 = vadd.f32 1.0, %v6164_v3  ;;  %6167 = vpow2.f32 %v5358_v8 }
 0x404   :  { %v1603_v54 = vadd.f32 1.0, %v6166_v7  ;;  %6169 = vpow2.f32 %v5355_v52 }
 0x405   :  { %6171 = vrcp.f32 %v1565_v16  ;;  %v1576_v52 = vand.u32 2147483647, %v1565_v16  ;;  %v1578_v7 = vand.u32 2147483648, %v1565_v16  ;;  %vm1572_vm3 = vweird.f32 %v1565_v16 }
 0x406   :  { %6173 = vrcp.f32 %v1603_v54  ;;  %v1548_v62 = vpop.f32.mrf.mxu3  ;;  %v1614_v53 = vand.u32 2147483647, %v1603_v54  ;;  %vm1610_vm4 = vweird.f32 %v1603_v54 }
 0x407   :  { %6175 = vpow2.f32 %v5357_v30  ;;  %v1558_v12 = vadd.f32 %v1548_v62, %v359_v31  ;;  %v1616_v30 = vand.u32 2147483648, %v1603_v54  ;;  %v1534_v31 = vpop.f32.mrf.mxu2  ;;  %vm1577_vm6 = vcmp.eq.f32.partialorder %v1576_v52, 8.507059e+37 }
 0x408   :  { %vm1615_vm8 = vcmp.eq.f32.partialorder %v1614_v53, 8.507059e+37 }
 0x409   :  { %v6168_v45 = vpop.eup %6167  ;;  %v5359_v8 = vmul.f32 -1.442695, %v1558_v12  ;;  %v1579_v12 = vor.u32 1.1754944e-38, %v1578_v7 }
 0x40a   :  { %v6170_v51 = vpop.eup %6169  ;;  %v7578_v22 = vadd.f32 1.0, %v6168_v45 }
 0x40b   :  { %v6172_v15 = vpop.eup %6171  ;;  %v7580_v41 = vadd.f32 1.0, %v6170_v51 }
 0x40c   :  { %v6174_v32 = vpop.eup %6173  ;;  %v1568_v11 = vmul.f32 %v6172_v15, %v1565_v16  ;;  %6177 = vrcp.f32 %v7578_v22  ;;  %vm1573_vm1 = vweird.f32 %v6172_v15 }
 0x40d   :  { %v6176_v24 = vpop.eup %6175  ;;  %v1606_v17 = vmul.f32 %v6174_v32, %v1603_v54  ;;  %6179 = vrcp.f32 %v7580_v41  ;;  %vm1611_vm2 = vweird.f32 %v6174_v32  ;;  %vm1574_vm5 = vmor %vm1572_vm3, %vm1573_vm1  ;;  %v1591_v21 = vand.u32 2147483647, %v7580_v41 }
 0x40e   :  { %v1569_v0 = vsub.f32 1.0, %v1568_v11  ;;  %v7584_v34 = vadd.f32 1.0, %v6176_v24  ;;  %6181 = vtanh.f32 %v1553_v44  ;;  %vm1612_vm7 = vmor %vm1610_vm4, %vm1611_vm2  ;;  %v1617_v24 = vor.u32 1.1754944e-38, %v1616_v30 }
 0x40f   :  { %v1607_v3 = vsub.f32 1.0, %v1606_v17  ;;  %vm1587_vm10 = vweird.f32 %v7580_v41  ;;  %vm1592_vm14 = vcmp.eq.f32.partialorder %v1591_v21, 8.507059e+37  ;;  %vm1650_vm2 = vweird.f32 %v7578_v22 }
 0x410   :  { %v1570_v28 = vmul.f32 %v6172_v15, %v1569_v0  ;;  %6183 = vrcp.f32 %v7584_v34  ;;  %vm1625_vm12 = vweird.f32 %v7584_v34 }
 0x411   :  { %v1608_v62 = vmul.f32 %v6174_v32, %v1607_v3  ;;  %6185 = vpow2.f32 %v5359_v8  ;;  %v1557_v3 = vadd.f32 %v1534_v31, %v310_v43  ;;  %v1593_v31 = vand.u32 2147483648, %v7580_v41 }
 0x412   :  { %v7587_v45 = vpop.eup %6177  ;;  %v1571_v51 = vadd.f32 %v6172_v15, %v1570_v28 }
 0x413   :  { %v1609_v44 = vadd.f32 %v6174_v32, %v1608_v62  ;;  %v6180_v11 = vpop.eup %6179  ;;  %v1646_v0 = vmul.f32 %v7587_v45, %v7578_v22  ;;  %6187 = vtanh.f32 %v1557_v3  ;;  %vm1651_vm1 = vweird.f32 %v7587_v45 }
 0x414   :  { %v1575_v17 = vsel %vm1574_vm5, %v6172_v15, %v1571_v51  ;;  %v6182_v61 = vpop.eup %6181  ;;  %v1583_v16 = vmul.f32 %v6180_v11, %v7580_v41  ;;  %vm1588_vm9 = vweird.f32 %v6180_v11  ;;  %v1629_v51 = vand.u32 2147483647, %v7584_v34  ;;  %vm1652_vm3 = vmor %vm1650_vm2, %vm1651_vm1 }
 0x415   :  { %v1580_v2 = vsel %vm1577_vm6, %v1579_v12, %v1575_v17  ;;  %v1613_v6 = vsel %vm1612_vm7, %v6174_v32, %v1609_v44  ;;  %v1647_v15 = vsub.f32 1.0, %v1646_v0  ;;  %vm1589_vm13 = vmor %vm1587_vm10, %vm1588_vm9  ;;  %v1594_v12 = vor.u32 1.1754944e-38, %v1593_v31 }
 0x416   :  { %v6184_v8 = vpop.eup %6183  ;;  %v1618_v54 = vsel %vm1615_vm8, %v1617_v24, %v1613_v6  ;;  %v1677_v28 = vmul.f32 %v6182_v61, %v1580_v2  ;;  %v1584_v7 = vsub.f32 1.0, %v1583_v16  ;;  %v1631_v6 = vand.u32 2147483648, %v7584_v34 }
 0x417   :  { %v1675_v52 = vmul.f32 %v1618_v54, %v7514_v57  ;;  %v1621_v62 = vmul.f32 %v6184_v8, %v7584_v34  ;;  %v6186_v30 = vpop.eup %6185  ;;  %vm1626_vm11 = vweird.f32 %v6184_v8  ;;  %v1648_v44 = vmul.f32 %v7587_v45, %v1647_v15 }
 0x418   :  { %v1585_v53 = vmul.f32 %v6180_v11, %v1584_v7  ;;  %v1644_v57 = vadd.f32 1.0, %v6186_v30  ;;  %vm1627_vm15 = vmor %vm1625_vm12, %vm1626_vm11  ;;  %v1632_v3 = vor.u32 1.1754944e-38, %v1631_v6  ;;  %vm1630_vm0 = vcmp.eq.f32.partialorder %v1629_v51, 8.507059e+37 }
 0x419   :  { %v7598_v43 = vadd.f32 %v1677_v28, %v1675_v52  ;;  %v1622_v32 = vsub.f32 1.0, %v1621_v62  ;;  %v6188_v0 = vpop.eup %6187  ;;  %v1649_v34 = vadd.f32 %v7587_v45, %v1648_v44  ;;  %v1654_v62 = vand.u32 2147483647, %v7578_v22 }
 0x41a   :  { %v1586_v61 = vadd.f32 %v6180_v11, %v1585_v53  ;;  %6189 = vrcp.f32 %v1644_v57  ;;  %v1671_v53 = vand.u32 2147483648, %v1644_v57  ;;  %v1669_v6 = vand.u32 2147483647, %v1644_v57 }
 0x41b   :  { %v1623_v2 = vmul.f32 %v6184_v8, %v1622_v32  ;;  %6191 = vtanh.f32 %v7598_v43  ;;  %v1653_v15 = vsel %vm1652_vm3, %v7587_v45, %v1649_v34  ;;  %vm1655_vm4 = vcmp.eq.f32.partialorder %v1654_v62, 8.507059e+37  ;;  %v9899_v34 = vld [vmem:[#allocation55_spill] sm:$0xff] }
 0x41c   :  { %v1590_v24 = vsel %vm1589_vm13, %v6180_v11, %v1586_v61  ;;  %v1656_v11 = vand.u32 2147483648, %v7578_v22  ;;  %vm1665_vm6 = vweird.f32 %v1644_v57  ;;  %v1672_v51 = vor.u32 1.1754944e-38, %v1671_v53 }
 0x41d   :  { %v1624_v17 = vadd.f32 %v6184_v8, %v1623_v2  ;;  %v1595_v41 = vsel %vm1592_vm14, %v1594_v12, %v1590_v24  ;;  %vm1670_vm8 = vcmp.eq.f32.partialorder %v1669_v6, 8.507059e+37 }
 0x41e   :  { %v1678_v54 = vmul.f32 %v6188_v0, %v1595_v41  ;;  %v1657_v32 = vor.u32 1.1754944e-38, %v1656_v11  ;;  %v9900_v11 = vld [vmem:[#allocation48_spill] sm:$0xff] }
 0x41f   :  { %v1628_v16 = vsel %vm1627_vm15, %v6184_v8, %v1624_v17  ;;  %v313_v62 = vadd.f32 %v9900_v11, %v9888_v35 }
 0x420   :  { %v1633_v28 = vsel %vm1630_vm0, %v1632_v3, %v1628_v16  ;;  %v6190_v7 = vpop.eup %6189  ;;  %v1658_v2 = vsel %vm1655_vm4, %v1657_v32, %v1653_v15 }
 0x421   :  { %v1676_v52 = vmul.f32 %v1633_v28, %v7528_v14  ;;  %v1661_v8 = vmul.f32 %v6190_v7, %v1644_v57  ;;  %v6192_v31 = vpop.eup %6191  ;;  %vm1666_vm5 = vweird.f32 %v6190_v7 }
 0x422   :  { %v1683_v22 = vmul.f32 %v6192_v31, %v1658_v2  ;;  %vm1667_vm7 = vmor %vm1665_vm6, %vm1666_vm5 }
 0x423   :  { %v7612_v30 = vadd.f32 %v1678_v54, %v1676_v52  ;;  %v1662_v21 = vsub.f32 1.0, %v1661_v8 }
 0x424   :  { %v1685_v17 = vpack.c.bf16 %v1683_v22, %v1683_v22 }
 0x425   :  { %6193 = vtanh.f32 %v7612_v30  ;;  %v1663_v14 = vmul.f32 %v6190_v7, %v1662_v21 }
 0x426   :  { %v1703_v41 = vunpack.c.l.b16 %v1685_v17 }
 0x427   :  { %v1664_v61 = vadd.f32 %v6190_v7, %v1663_v14 }
 0x429   :  { %v1668_v44 = vsel %vm1667_vm7, %v6190_v7, %v1664_v61 }
 0x42a   :  { %v1673_v45 = vsel %vm1670_vm8, %v1672_v51, %v1668_v44 }
 0x42b   :  { %v6194_v12 = vpop.eup %6193 }
 0x42c   :  { %v1684_v24 = vmul.f32 %v6194_v12, %v1673_v45 }
 0x42e   :  { %v1686_v0 = vpack.c.bf16 %v1684_v24, %v1684_v24  ;;  %v5966_v3 = vpack.c.bf16 %v1684_v24, %v1683_v22 }
 0x430   :  { %5967 = vst [vmem:[#allocation6 + $0x8] sm:$0xff] %v5966_v3   ;;  %v1704_v16 = vunpack.c.l.b16 %v1686_v0 }
 0x432   :  { %v1705_v54 = vpack.c.b16 %v1704_v16, %v1703_v41 }
 0x434   :  { %1715 = vmatmul.bf16.vlgmr.msra.gmra.mxu0 %v1705_v54  ;;  %1729 = vmatmul.bf16.vlgmr.msra.gmra.mxu1 %v1705_v54 }
 0x435   :  { %1743 = vmatmul.bf16.vlgmr.msrb.gmra.mxu2 %v1705_v54  ;;  %1757 = vmatmul.bf16.vlgmr.msrb.gmra.mxu3 %v1705_v54 }
 0x436   :  { %2131 = vmatpush.bf16.msra.mxu0 %v6697_v23  ;;  %2145 = vmatpush.bf16.msra.mxu1 %v6705_v25  ;;  %v9893_v25 = vld [vmem:[#allocation53_spill] sm:$0xff] }
 0x437   :  { %2159 = vmatpush.bf16.msrb.mxu2 %v6683_v19  ;;  %2173 = vmatpush.bf16.msrb.mxu3 %v6681_v18  ;;  %v9891_v18 = vld [vmem:[#allocation52_spill] sm:$0xff]  ;;  %v9892_v19 = vld [vmem:[#allocation38_spill] sm:$0xff] }
 0x438   :  { %v215_v23 = vadd.f32 %v9892_v19, %v9891_v18  ;;  %v9901_v19 = vld [vmem:[#allocation54_spill] sm:$0xff] }
 0x43a   :  { %2132 = vmatpush.bf16.msra.mxu0 %v6730_v33  ;;  %2146 = vmatpush.bf16.msra.mxu1 %v6739_v36 }
 0x43b   :  { %2160 = vmatpush.bf16.msrb.mxu2 %v6741_v37  ;;  %2174 = vmatpush.bf16.msrb.mxu3 %v6717_v29  ;;  %v9894_v29 = vld [vmem:[#allocation39_spill] sm:$0xff] }
 0x43c   :  { %v264_v33 = vadd.f32 %v9894_v29, %v9893_v25 }
 0x43e   :  { %2133 = vmatpush.bf16.msra.mxu0 %v6774_v46  ;;  %2147 = vmatpush.bf16.msra.mxu1 %v6776_v47 }
 0x43f   :  { %2161 = vmatpush.bf16.msrb.mxu2 %v6785_v50  ;;  %2175 = vmatpush.bf16.msrb.mxu3 %v6763_v42 }
 0x442   :  { %2134 = vmatpush.bf16.msra.mxu0 %v6817_v59  ;;  %2148 = vmatpush.bf16.msra.mxu1 %v6819_v60  ;;  %v9896_v59 = vld [vmem:[#allocation49_spill] sm:$0xff] }
 0x443   :  { %2162 = vmatpush.bf16.msrb.mxu2 %v6828_v63  ;;  %2176 = vmatpush.bf16.msrb.mxu3 %v6806_v55  ;;  %v9895_v55 = vld [vmem:[#allocation65_spill] sm:$0xff]  ;;  %v9897_v63 = vld [vmem:[#allocation42_spill] sm:$0xff] }
 0x444   :  { %v362_v60 = vadd.f32 %v9896_v59, %v9895_v55  ;;  %v364_v52 = vadd.f32 %v9899_v34, %v9895_v55 }
 0x446   :  { %2135 = vmatpush.bf16.msra.mxu0 %v6860_v9  ;;  %2149 = vmatpush.bf16.msra.mxu1 %v6862_v10  ;;  %v9898_v9 = vld [vmem:[#allocation43_spill] sm:$0xff] }
 0x447   :  { %2163 = vmatpush.bf16.msrb.mxu2 %v6871_v13  ;;  %2177 = vmatpush.bf16.msrb.mxu3 %v6849_v4  ;;  %v217_v4 = vadd.f32 %v9897_v63, %v9891_v18  ;;  %v266_v10 = vadd.f32 %v9898_v9, %v9893_v25 }
 0x44a   :  { %2136 = vmatpush.bf16.msra.mxu0 %v6903_v26  ;;  %2150 = vmatpush.bf16.msra.mxu1 %v6905_v27 }
 0x44b   :  { %2164 = vmatpush.bf16.msrb.mxu2 %v6932_v40  ;;  %2178 = vmatpush.bf16.msrb.mxu3 %v6892_v20 }
 0x44e   :  { %2137 = vmatpush.bf16.msra.mxu0 %v6928_v38  ;;  %2151 = vmatpush.bf16.msra.mxu1 %v6930_v39 }
 0x44f   :  { %2165 = vmatpush.bf16.msrb.mxu2 %v6980_v58  ;;  %2179 = vmatpush.bf16.msrb.mxu3 %v6973_v56 }
 0x452   :  { %2138 = vmatpush.bf16.msra.mxu0 %v6949_v48  ;;  %2152 = vmatpush.bf16.msra.mxu1 %v6951_v49 }
 0x453   :  { %2166 = vmatpush.bf16.msrb.mxu2 %v7017_v5  ;;  %2180 = vmatpush.bf16.msrb.mxu3 %v7003_v1 }
 0x4b1   :  { %v1716_v36 = vpop.f32.mrf.mxu0  ;;  %v1730_v37 = vpop.f32.mrf.mxu1 }
 0x4b2   :  { %v1763_v42 = vadd.f32 %v1716_v36, %v215_v23  ;;  %v1764_v46 = vadd.f32 %v1730_v37, %v264_v33  ;;  %v315_v23 = vadd.f32 %v9901_v19, %v9888_v35 }
 0x4b4   :  { %v5360_v47 = vmul.f32 -1.442695, %v1763_v42  ;;  %v5362_v50 = vmul.f32 -1.442695, %v1764_v46 }
 0x4b6   :  { %6195 = vpow2.f32 %v5360_v47 }
 0x4b7   :  { %6197 = vpow2.f32 %v5362_v50 }
 0x4b8   :  { %v1758_v13 = vpop.f32.mrf.mxu3  ;;  %v1744_v57 = vpop.f32.mrf.mxu2 }
 0x4b9   :  { %v1766_v20 = vadd.f32 %v1758_v13, %v362_v60  ;;  %v1718_v26 = vpop.f32.mrf.mxu0  ;;  %v1732_v27 = vpop.f32.mrf.mxu1  ;;  %v1765_v32 = vadd.f32 %v1744_v57, %v313_v62 }
 0x4ba   :  { %v1767_v38 = vadd.f32 %v1718_v26, %v217_v4  ;;  %v1768_v39 = vadd.f32 %v1732_v27, %v266_v10 }
 0x4bb   :  { %v5364_v40 = vmul.f32 -1.442695, %v1766_v20 }
 0x4bc   :  { %v6196_v48 = vpop.eup %6195  ;;  %v5361_v49 = vmul.f32 -1.442695, %v1767_v38  ;;  %v5363_v1 = vmul.f32 -1.442695, %v1768_v39 }
 0x4bd   :  { %v6198_v56 = vpop.eup %6197  ;;  %v1777_v58 = vadd.f32 1.0, %v6196_v48  ;;  %6199 = vpow2.f32 %v5364_v40 }
 0x4be   :  { %v1815_v5 = vadd.f32 1.0, %v6198_v56  ;;  %6201 = vpow2.f32 %v5361_v49 }
 0x4bf   :  { %6203 = vrcp.f32 %v1777_v58  ;;  %v1788_v45 = vand.u32 2147483647, %v1777_v58  ;;  %v1790_v24 = vand.u32 2147483648, %v1777_v58  ;;  %vm1784_vm11 = vweird.f32 %v1777_v58 }
 0x4c0   :  { %6205 = vrcp.f32 %v1815_v5  ;;  %v1760_v28 = vpop.f32.mrf.mxu3  ;;  %v1828_v17 = vand.u32 2147483648, %v1815_v5  ;;  %v1826_v41 = vand.u32 2147483647, %v1815_v5  ;;  %v1746_v16 = vpop.f32.mrf.mxu2  ;;  %vm1822_vm12 = vweird.f32 %v1815_v5 }
 0x4c1   :  { %6207 = vpow2.f32 %v5363_v1  ;;  %v1770_v21 = vadd.f32 %v1760_v28, %v364_v52  ;;  %vm1789_vm14 = vcmp.eq.f32.partialorder %v1788_v45, 8.507059e+37  ;;  %v1791_v33 = vor.u32 1.1754944e-38, %v1790_v24 }
 0x4c2   :  { %v1829_v42 = vor.u32 1.1754944e-38, %v1828_v17  ;;  %v1769_v50 = vadd.f32 %v1746_v16, %v315_v23  ;;  %vm1827_vm0 = vcmp.eq.f32.partialorder %v1826_v41, 8.507059e+37 }
 0x4c3   :  { %v6200_v7 = vpop.eup %6199  ;;  %v5365_v12 = vmul.f32 -1.442695, %v1770_v21 }
 0x4c4   :  { %v6202_v8 = vpop.eup %6201  ;;  %v7662_v15 = vadd.f32 1.0, %v6200_v7 }
 0x4c5   :  { %v6204_v31 = vpop.eup %6203  ;;  %v7664_v53 = vadd.f32 1.0, %v6202_v8 }
 0x4c6   :  { %v6206_v14 = vpop.eup %6205  ;;  %v1780_v6 = vmul.f32 %v6204_v31, %v1777_v58  ;;  %6209 = vrcp.f32 %v7662_v15  ;;  %vm1785_vm9 = vweird.f32 %v6204_v31 }
 0x4c7   :  { %v6208_v2 = vpop.eup %6207  ;;  %v1818_v61 = vmul.f32 %v6206_v14, %v1815_v5  ;;  %6211 = vrcp.f32 %v7664_v53  ;;  %vm1823_vm10 = vweird.f32 %v6206_v14  ;;  %vm1786_vm13 = vmor %vm1784_vm11, %vm1785_vm9  ;;  %v1803_v40 = vand.u32 2147483647, %v7664_v53 }
 0x4c8   :  { %v1781_v22 = vsub.f32 1.0, %v1780_v6  ;;  %v7668_v51 = vadd.f32 1.0, %v6208_v2  ;;  %6213 = vtanh.f32 %v1765_v32  ;;  %vm1824_vm15 = vmor %vm1822_vm12, %vm1823_vm10  ;;  %v1805_v48 = vand.u32 2147483648, %v7664_v53 }
 0x4c9   :  { %v1819_v44 = vsub.f32 1.0, %v1818_v61  ;;  %vm1799_vm2 = vweird.f32 %v7664_v53  ;;  %vm1804_vm6 = vcmp.eq.f32.partialorder %v1803_v40, 8.507059e+37  ;;  %v1868_v61 = vand.u32 2147483648, %v7662_v15  ;;  %v9905_v40 = vld [vmem:[#allocation50_spill] sm:$0xff] }
 0x4ca   :  { %v1782_v0 = vmul.f32 %v6204_v31, %v1781_v22  ;;  %6215 = vrcp.f32 %v7668_v51  ;;  %v1843_v1 = vand.u32 2147483648, %v7668_v51  ;;  %v1841_v28 = vand.u32 2147483647, %v7668_v51 }
 0x4cb   :  { %v1820_v3 = vmul.f32 %v6206_v14, %v1819_v44  ;;  %6217 = vpow2.f32 %v5365_v12  ;;  %vm1837_vm4 = vweird.f32 %v7668_v51  ;;  %v1806_v34 = vor.u32 1.1754944e-38, %v1805_v48 }
 0x4cc   :  { %v7671_v54 = vpop.eup %6209  ;;  %v1783_v29 = vadd.f32 %v6204_v31, %v1782_v0  ;;  %6219 = vtanh.f32 %v1769_v50  ;;  %v1844_v8 = vor.u32 1.1754944e-38, %v1843_v1  ;;  %vm1842_vm8 = vcmp.eq.f32.partialorder %v1841_v28, 8.507059e+37 }
 0x4cd   :  { %v1821_v36 = vadd.f32 %v6206_v14, %v1820_v3  ;;  %v6212_v37 = vpop.eup %6211  ;;  %v1858_v47 = vmul.f32 %v7671_v54, %v7662_v15  ;;  %vm1863_vm9 = vweird.f32 %v7671_v54  ;;  %vm1862_vm10 = vweird.f32 %v7662_v15 }
 0x4ce   :  { %v1787_v46 = vsel %vm1786_vm13, %v6204_v31, %v1783_v29  ;;  %v6214_v59 = vpop.eup %6213  ;;  %v1795_v4 = vmul.f32 %v6212_v37, %v7664_v53  ;;  %vm1800_vm1 = vweird.f32 %v6212_v37  ;;  %v1866_v22 = vand.u32 2147483647, %v7662_v15  ;;  %vm1864_vm11 = vmor %vm1862_vm10, %vm1863_vm9 }
 0x4cf   :  { %v1792_v60 = vsel %vm1789_vm14, %v1791_v33, %v1787_v46  ;;  %v1825_v63 = vsel %vm1824_vm15, %v6206_v14, %v1821_v36  ;;  %v1859_v39 = vsub.f32 1.0, %v1858_v47  ;;  %vm1801_vm5 = vmor %vm1799_vm2, %vm1800_vm1  ;;  %v1869_v17 = vor.u32 1.1754944e-38, %v1868_v61  ;;  %v9908_v61 = vld [vmem:[#allocation59_spill] sm:$0xff] }
 0x4d0   :  { %v6216_v9 = vpop.eup %6215  ;;  %v1830_v10 = vsel %vm1827_vm0, %v1829_v42, %v1825_v63  ;;  %v1889_v13 = vmul.f32 %v6214_v59, %v1792_v60  ;;  %v1796_v26 = vsub.f32 1.0, %v1795_v4  ;;  %vm1867_vm12 = vcmp.eq.f32.partialorder %v1866_v22, 8.507059e+37  ;;  %v9902_v59 = vld [vmem:[#allocation46_spill] sm:$0xff]  ;;  %v9903_v63 = vld [vmem:[#allocation47_spill] sm:$0xff] }
 0x4d1   :  { %v1887_v20 = vmul.f32 %v1830_v10, %v7598_v43  ;;  %v1833_v27 = vmul.f32 %v6216_v9, %v7668_v51  ;;  %v6218_v38 = vpop.eup %6217  ;;  %vm1838_vm3 = vweird.f32 %v6216_v9  ;;  %v1860_v52 = vmul.f32 %v7671_v54, %v1859_v39 }
 0x4d2   :  { %v1797_v58 = vmul.f32 %v6212_v37, %v1796_v26  ;;  %v1856_v43 = vadd.f32 1.0, %v6218_v38  ;;  %v6220_v62 = vpop.eup %6219  ;;  %vm1839_vm7 = vmor %vm1837_vm4, %vm1838_vm3  ;;  %v220_v60 = vadd.f32 %v9902_v59, %v9891_v18  ;;  %v269_v4 = vadd.f32 %v9903_v63, %v9893_v25  ;;  %v9904_v38 = vld [vmem:[#allocation57_spill] sm:$0xff] }
 0x4d3   :  { %v7682_v49 = vadd.f32 %v1889_v13, %v1887_v20  ;;  %v1834_v56 = vsub.f32 1.0, %v1833_v27  ;;  %v1861_v14 = vadd.f32 %v7671_v54, %v1860_v52  ;;  %v367_v39 = vadd.f32 %v9904_v38, %v9895_v55 }
 0x4d4   :  { %v1798_v57 = vadd.f32 %v6212_v37, %v1797_v58  ;;  %6221 = vrcp.f32 %v1856_v43  ;;  %v1883_v0 = vand.u32 2147483648, %v1856_v43  ;;  %v1881_v3 = vand.u32 2147483647, %v1856_v43 }
 0x4d5   :  { %v1835_v5 = vmul.f32 %v6216_v9, %v1834_v56  ;;  %6223 = vtanh.f32 %v7682_v49  ;;  %v1865_v44 = vsel %vm1864_vm11, %v7671_v54, %v1861_v14  ;;  %vm1877_vm14 = vweird.f32 %v1856_v43  ;;  %v9906_v56 = vld [vmem:[#allocation51_spill] sm:$0xff] }
 0x4d6   :  { %v1802_v7 = vsel %vm1801_vm5, %v6212_v37, %v1798_v57  ;;  %v1870_v41 = vsel %vm1867_vm12, %v1869_v17, %v1865_v44  ;;  %v1884_v19 = vor.u32 1.1754944e-38, %v1883_v0  ;;  %vm1882_vm0 = vcmp.eq.f32.partialorder %v1881_v3, 8.507059e+37  ;;  %v5524_v44 = vld [vmem:[%s9713_s5 + $0xe0] sm:$0xf]  ;;  %v5526_v3 = vld [vmem:[%s9713_s5 + $0xf0] sm:$0xf0] }
 0x4d7   :  { %v1836_v11 = vadd.f32 %v6216_v9, %v1835_v5  ;;  %v1807_v21 = vsel %vm1804_vm6, %v1806_v34, %v1802_v7  ;;  %v222_v48 = vadd.f32 %v9905_v40, %v9891_v18  ;;  %v271_v58 = vadd.f32 %v9906_v56, %v9893_v25  ;;  %v5534_v40 = vld [vmem:[%s9713_s5 + $0xf8] sm:$0xf0]  ;;  %v5428_v56 = vld [vmem:[%s9713_s5 + $0x20] sm:$0xf] }
 0x4d8   :  { %v1890_v32 = vmul.f32 %v6220_v62, %v1807_v21  ;;  %v369_v22 = vadd.f32 %v9908_v61, %v9895_v55 }
 0x4d9   :  { %v1840_v31 = vsel %vm1839_vm7, %v6216_v9, %v1836_v11 }
 0x4da   :  { %v1845_v53 = vsel %vm1842_vm8, %v1844_v8, %v1840_v31  ;;  %v6222_v2 = vpop.eup %6221 }
 0x4db   :  { %v1888_v6 = vmul.f32 %v1845_v53, %v7612_v30  ;;  %v1873_v12 = vmul.f32 %v6222_v2, %v1856_v43  ;;  %v6224_v24 = vpop.eup %6223  ;;  %vm1878_vm13 = vweird.f32 %v6222_v2  ;;  %v9907_v53 = vld [vmem:[#allocation56_spill] sm:$0xff] }
 0x4dc   :  { %v1895_v15 = vmul.f32 %v6224_v24, %v1870_v41  ;;  %vm1879_vm15 = vmor %vm1877_vm14, %vm1878_vm13  ;;  %v318_v14 = vadd.f32 %v9907_v53, %v9888_v35  ;;  %v5532_v41 = vld [vmem:[%s9713_s5 + $0xe8] sm:$0xf] }
 0x4dd   :  { %v7696_v51 = vadd.f32 %v1890_v32, %v1888_v6  ;;  %v1874_v45 = vsub.f32 1.0, %v1873_v12 }
 0x4de   :  { %v1897_v36 = vpack.c.bf16 %v1895_v15, %v1895_v15 }
 0x4df   :  { %6225 = vtanh.f32 %v7696_v51  ;;  %v1875_v30 = vmul.f32 %v6222_v2, %v1874_v45  ;;  %v5893_v45 = vld [vmem:[%s9713_s5 + $0xec] sm:$0xf0] }
 0x4e0   :  { %v1915_v46 = vunpack.c.l.b16 %v1897_v36  ;;  %v5525_v0 = vor.u32 %v5893_v45, %v5524_v44 }
 0x4e1   :  { %v1876_v16 = vadd.f32 %v6222_v2, %v1875_v30  ;;  %v5891_v30 = vld [vmem:[%s9713_s5 + $0xe4] sm:$0xf] }
 0x4e3   :  { %v1880_v29 = vsel %vm1879_vm15, %v6222_v2, %v1876_v16 }
 0x4e4   :  { %v1885_v54 = vsel %vm1882_vm0, %v1884_v19, %v1880_v29  ;;  %v5894_v29 = vld [vmem:[%s9713_s5 + $0xf4] sm:$0xf0] }
 0x4e5   :  { %v6226_v23 = vpop.eup %6225 }
 0x4e6   :  { %v1896_v33 = vmul.f32 %v6226_v23, %v1885_v54  ;;  %v5529_v23 = vor.u32 %v5891_v30, %v5526_v3  ;;  %v5492_v3 = vld [vmem:[%s9713_s5 + $0xa0] sm:$0xf] }
 0x4e8   :  { %v1898_v37 = vpack.c.bf16 %v1896_v33, %v1896_v33  ;;  %v5971_v42 = vpack.c.bf16 %v1896_v33, %v1895_v15 }
 0x4ea   :  { %5972 = vst [vmem:[#allocation6 + $0x20] sm:$0xff] %v5971_v42   ;;  %v1916_v47 = vunpack.c.l.b16 %v1898_v37  ;;  %v5533_v37 = vor.u32 %v5894_v29, %v5532_v41  ;;  %v5494_v29 = vld [vmem:[%s9713_s5 + $0xb0] sm:$0xf0] }
 0x4ec   :  { %v1917_v50 = vpack.c.b16 %v1916_v47, %v1915_v46  ;;  %v9909_v46 = vld [vmem:[#allocation58_spill] sm:$0xff] }
 0x4ed   :  { %v320_v47 = vadd.f32 %v9909_v46, %v9888_v35 }
 0x4ee   :  { %1927 = vmatmul.bf16.vlgmr.msrb.gmra.mxu0 %v1917_v50  ;;  %1941 = vmatmul.bf16.vlgmr.msrb.gmra.mxu1 %v1917_v50 }
 0x4ef   :  { %1955 = vmatmul.bf16.vlgmr.msra.gmra.mxu2 %v1917_v50  ;;  %1969 = vmatmul.bf16.vlgmr.msra.gmra.mxu3 %v1917_v50 }
 0x4f0   :  { %2596 = vmatpush.bf16.msrb.mxu0 %v5525_v0  ;;  %2645 = vmatpush.bf16.msrb.mxu1 %v5529_v23  ;;  %v5883_v23 = vld [vmem:[%s9713_s5 + $0xa4] sm:$0xf] }
 0x4f1   :  { %2694 = vmatpush.bf16.msra.mxu2 %v5533_v37 }
 0x56b   :  { %v1928_v9 = vpop.f32.mrf.mxu0  ;;  %v1942_v10 = vpop.f32.mrf.mxu1 }
 0x56c   :  { %v1975_v13 = vadd.f32 %v1928_v9, %v220_v60  ;;  %v1976_v20 = vadd.f32 %v1942_v10, %v269_v4 }
 0x56e   :  { %v5366_v26 = vmul.f32 -1.442695, %v1975_v13  ;;  %v5368_v27 = vmul.f32 -1.442695, %v1976_v20 }
 0x570   :  { %6227 = vpow2.f32 %v5366_v26 }
 0x571   :  { %6229 = vpow2.f32 %v5368_v27 }
 0x572   :  { %v1970_v1 = vpop.f32.mrf.mxu3  ;;  %v1956_v32 = vpop.f32.mrf.mxu2 }
 0x573   :  { %v1978_v43 = vadd.f32 %v1970_v1, %v367_v39  ;;  %v1930_v5 = vpop.f32.mrf.mxu0  ;;  %v1944_v57 = vpop.f32.mrf.mxu1  ;;  %v1977_v17 = vadd.f32 %v1956_v32, %v318_v14  ;;  %v5892_v39 = vld [vmem:[%s9713_s5 + $0xec] sm:$0xf]  ;;  %v5889_v1 = vld [vmem:[%s9713_s5 + $0xcc] sm:$0xf0]  ;;  %v5890_v32 = vld [vmem:[%s9713_s5 + $0xd4] sm:$0xf0] }
 0x574   :  { %v1979_v28 = vadd.f32 %v1930_v5, %v222_v48  ;;  %v1980_v34 = vadd.f32 %v1944_v57, %v271_v58  ;;  %v5508_v58 = vld [vmem:[%s9713_s5 + $0xc0] sm:$0xf] }
 0x575   :  { %v5370_v52 = vmul.f32 -1.442695, %v1978_v43  ;;  %v5509_v0 = vor.u32 %v5889_v1, %v5508_v58  ;;  %v5879_v58 = vld [vmem:[%s9713_s5 + $0x84] sm:$0xf]  ;;  %v5478_v1 = vld [vmem:[%s9713_s5 + $0x90] sm:$0xf0] }
 0x576   :  { %v6228_v7 = vpop.eup %6227  ;;  %v5367_v11 = vmul.f32 -1.442695, %v1979_v28  ;;  %v5369_v21 = vmul.f32 -1.442695, %v1980_v34  ;;  %v5887_v28 = vld [vmem:[%s9713_s5 + $0xc4] sm:$0xf] }
 0x577   :  { %v6230_v62 = vpop.eup %6229  ;;  %v7710_v8 = vadd.f32 1.0, %v6228_v7  ;;  %6231 = vpow2.f32 %v5370_v52  ;;  %v5510_v34 = vld [vmem:[%s9713_s5 + $0xd0] sm:$0xf0]  ;;  %2597 = vmatpush.bf16.msrb.mxu0 %v5509_v0  ;;  %v5481_v0 = vor.u32 %v5879_v58, %v5478_v1  ;;  %v5869_v58 = vld [vmem:[%s9713_s5 + $0x2c] sm:$0xf0] }
 0x578   :  { %v7712_v31 = vadd.f32 1.0, %v6230_v62  ;;  %6233 = vpow2.f32 %v5367_v11  ;;  %v5537_v62 = vor.u32 %v5892_v39, %v5534_v40  ;;  %v5513_v30 = vor.u32 %v5887_v28, %v5510_v34  ;;  %v5660_v1 = vld [vmem:[%s9714_s6 + $0xe8] sm:$0xf] }
 0x579   :  { %6235 = vrcp.f32 %v7710_v8  ;;  %v2000_v6 = vand.u32 2147483647, %v7710_v8  ;;  %v2002_v12 = vand.u32 2147483648, %v7710_v8  ;;  %vm1996_vm3 = vweird.f32 %v7710_v8 }
 0x57a   :  { %6237 = vrcp.f32 %v7712_v31  ;;  %v1972_v2 = vpop.f32.mrf.mxu3  ;;  %v2040_v33 = vand.u32 2147483648, %v7712_v31  ;;  %v2038_v59 = vand.u32 2147483647, %v7712_v31  ;;  %v1958_v20 = vpop.f32.mrf.mxu2  ;;  %vm2034_vm2 = vweird.f32 %v7712_v31  ;;  %2743 = vmatpush.bf16.msra.mxu3 %v5537_v62  ;;  %2646 = vmatpush.bf16.msrb.mxu1 %v5513_v30 }
 0x57b   :  { %6239 = vpow2.f32 %v5369_v21  ;;  %v1982_v19 = vadd.f32 %v1972_v2, %v369_v22  ;;  %vm7757_vm1 = vcmp.eq.f32.partialorder %v2000_v6, 8.507059e+37  ;;  %v2003_v9 = vor.u32 1.1754944e-38, %v2002_v12  ;;  %v5516_v21 = vld [vmem:[%s9713_s5 + $0xc8] sm:$0xf]  ;;  %v5888_v12 = vld [vmem:[%s9713_s5 + $0xcc] sm:$0xf] }
 0x57c   :  { %v2041_v38 = vor.u32 1.1754944e-38, %v2040_v33  ;;  %vm7774_vm5 = vcmp.eq.f32.partialorder %v2038_v59, 8.507059e+37  ;;  %v1981_v57 = vadd.f32 %v1958_v20, %v320_v47  ;;  %v5517_v46 = vor.u32 %v5890_v32, %v5516_v21  ;;  %v5886_v47 = vld [vmem:[%s9713_s5 + $0xb4] sm:$0xf0]  ;;  %v5502_v59 = vld [vmem:[%s9713_s5 + $0xb8] sm:$0xf0] }
 0x57d   :  { %v6232_v24 = vpop.eup %6231  ;;  %v5371_v26 = vmul.f32 -1.442695, %v1982_v19  ;;  %v5881_v20 = vld [vmem:[%s9713_s5 + $0x8c] sm:$0xf0] }
 0x57e   :  { %v6234_v16 = vpop.eup %6233  ;;  %v7737_v15 = vadd.f32 1.0, %v6232_v24  ;;  %2695 = vmatpush.bf16.msra.mxu2 %v5517_v46 }
 0x57f   :  { %v7742_v54 = vpop.eup %6235  ;;  %v7745_v36 = vadd.f32 1.0, %v6234_v16 }
 0x580   :  { %v7747_v42 = vpop.eup %6237  ;;  %v1992_v50 = vmul.f32 %v7742_v54, %v7710_v8  ;;  %6241 = vrcp.f32 %v7737_v15  ;;  %vm1997_vm4 = vweird.f32 %v7742_v54  ;;  %v2078_v5 = vand.u32 2147483647, %v7737_v15  ;;  %v5518_v8 = vld [vmem:[%s9713_s5 + $0xd8] sm:$0xf0] }
 0x581   :  { %v6240_v60 = vpop.eup %6239  ;;  %v2030_v63 = vmul.f32 %v7747_v42, %v7712_v31  ;;  %6243 = vtanh.f32 %v1977_v17  ;;  %vm2035_vm6 = vweird.f32 %v7747_v42  ;;  %v2015_v11 = vand.u32 2147483647, %v7745_v36  ;;  %vm7808_vm7 = vmor %vm1996_vm3, %vm1997_vm4  ;;  %v5885_v31 = vld [vmem:[%s9713_s5 + $0xac] sm:$0xf0] }
 0x582   :  { %v1993_v10 = vsub.f32 1.0, %v1992_v50  ;;  %6245 = vrcp.f32 %v7745_v36  ;;  %v7762_v13 = vadd.f32 1.0, %v6240_v60  ;;  %v2017_v22 = vand.u32 2147483648, %v7745_v36  ;;  %vm7831_vm8 = vmor %vm2034_vm2, %vm2035_vm6  ;;  %v5884_v50 = vld [vmem:[%s9713_s5 + $0xac] sm:$0xf] }
 0x583   :  { %v2031_v27 = vsub.f32 1.0, %v2030_v63  ;;  %vm2011_vm9 = vweird.f32 %v7745_v36  ;;  %vm7889_vm11 = vcmp.eq.f32.partialorder %v2015_v11, 8.507059e+37  ;;  %v5505_v28 = vor.u32 %v5884_v50, %v5502_v59  ;;  %v5882_v11 = vld [vmem:[%s9713_s5 + $0x94] sm:$0xf0]  ;;  %v5871_v50 = vld [vmem:[%s9713_s5 + $0x44] sm:$0xf] }
 0x584   :  { %v1994_v48 = vmul.f32 %v7742_v54, %v1993_v10  ;;  %6247 = vrcp.f32 %v7762_v13  ;;  %v2055_v61 = vand.u32 2147483648, %v7762_v13  ;;  %v2053_v17 = vand.u32 2147483647, %v7762_v13  ;;  %v5476_v10 = vld [vmem:[%s9713_s5 + $0x80] sm:$0xf] }
 0x585   :  { %v2032_v43 = vmul.f32 %v7747_v42, %v2031_v27  ;;  %6249 = vpow2.f32 %v5371_v26  ;;  %v5521_v27 = vor.u32 %v5888_v12, %v5518_v8  ;;  %v5477_v34 = vor.u32 %v5881_v20, %v5476_v10  ;;  %v5875_v8 = vld [vmem:[%s9713_s5 + $0x64] sm:$0xf]  ;;  %v5446_v59 = vld [vmem:[%s9713_s5 + $0x50] sm:$0xf0]  ;;  %v5874_v10 = vld [vmem:[%s9713_s5 + $0x54] sm:$0xf0] }
 0x586   :  { %v7794_v52 = vpop.eup %6241  ;;  %v1995_v7 = vadd.f32 %v7742_v54, %v1994_v48  ;;  %6251 = vtanh.f32 %v1981_v57  ;;  %v2018_v14 = vor.u32 1.1754944e-38, %v2017_v22  ;;  %vm2049_vm14 = vweird.f32 %v7762_v13  ;;  %v5877_v22 = vld [vmem:[%s9713_s5 + $0x6c] sm:$0xf0] }
 0x587   :  { %v6244_v53 = vpop.eup %6243  ;;  %v2033_v6 = vadd.f32 %v7747_v42, %v2032_v43  ;;  %v7815_v2 = vmul.f32 %v7794_v52, %v7737_v15  ;;  %2744 = vmatpush.bf16.msra.mxu3 %v5521_v27  ;;  %vm2054_vm0 = vcmp.eq.f32.partialorder %v2053_v17, 8.507059e+37  ;;  %v5873_v17 = vld [vmem:[%s9713_s5 + $0x4c] sm:$0xf0]  ;;  %vm2074_vm2 = vweird.f32 %v7737_v15 }
 0x588   :  { %v7825_v44 = vpop.eup %6245  ;;  %v1999_v24 = vsel %vm7808_vm7, %v7742_v54, %v1995_v7  ;;  %v5500_v54 = vld [vmem:[%s9713_s5 + $0xa8] sm:$0xf]  ;;  %vm8020_vm4 = vcmp.eq.f32.partialorder %v2078_v5, 8.507059e+37 }
 0x589   :  { %v2004_v41 = vsel %vm7757_vm1, %v2003_v9, %v1999_v24  ;;  %v2037_v16 = vsel %vm7831_vm8, %v7747_v42, %v2033_v6  ;;  %v2007_v19 = vmul.f32 %v7825_v44, %v7745_v36  ;;  %v2071_v63 = vsub.f32 1.0, %v7815_v2  ;;  %v5484_v7 = vld [vmem:[%s9713_s5 + $0x88] sm:$0xf]  ;;  %v5880_v6 = vld [vmem:[%s9713_s5 + $0x8c] sm:$0xf] }
 0x58a   :  { %v7861_v33 = vpop.eup %6247  ;;  %v2042_v37 = vsel %vm7774_vm5, %v2041_v38, %v2037_v16  ;;  %v2101_v42 = vmul.f32 %v6244_v53, %v2004_v41  ;;  %vm2012_vm10 = vweird.f32 %v7825_v44  ;;  %v5497_v38 = vor.u32 %v5883_v23, %v5494_v29  ;;  %v5486_v2 = vld [vmem:[%s9713_s5 + $0x98] sm:$0xf0]  ;;  %v5460_v36 = vld [vmem:[%s9713_s5 + $0x60] sm:$0xf]  ;;  %v5878_v41 = vld [vmem:[%s9713_s5 + $0x74] sm:$0xf0] }
 0x58b   :  { %v2099_v60 = vmul.f32 %v2042_v37, %v7682_v49  ;;  %v2008_v4 = vsub.f32 1.0, %v2007_v19  ;;  %v2045_v9 = vmul.f32 %v7861_v33, %v7762_v13  ;;  %v6250_v26 = vpop.eup %6249  ;;  %v5493_v49 = vor.u32 %v5885_v31, %v5492_v3  ;;  %vm7914_vm13 = vmor %vm2011_vm9, %vm2012_vm10  ;;  %v5462_v3 = vld [vmem:[%s9713_s5 + $0x70] sm:$0xf0]  ;;  %v5468_v31 = vld [vmem:[%s9713_s5 + $0x68] sm:$0xf]  ;;  %2745 = vmatpush.bf16.msra.mxu3 %v5505_v28 }
 0x58c   :  { %v7899_v43 = vadd.f32 1.0, %v6250_v26  ;;  %v5501_v57 = vor.u32 %v5886_v47, %v5500_v54  ;;  %v6252_v62 = vpop.eup %6251  ;;  %vm2050_vm12 = vweird.f32 %v7861_v33  ;;  %2647 = vmatpush.bf16.msrb.mxu1 %v5497_v38  ;;  %v2072_v12 = vmul.f32 %v7794_v52, %v2071_v63  ;;  %v5876_v29 = vld [vmem:[%s9713_s5 + $0x6c] sm:$0xf]  ;;  %v5444_v13 = vld [vmem:[%s9713_s5 + $0x40] sm:$0xf] }
 0x58d   :  { %v7886_v39 = vadd.f32 %v2101_v42, %v2099_v60  ;;  %v2046_v40 = vsub.f32 1.0, %v2045_v9  ;;  %v2009_v48 = vmul.f32 %v7825_v44, %v2008_v4  ;;  %2598 = vmatpush.bf16.msrb.mxu0 %v5493_v49  ;;  %v5485_v30 = vor.u32 %v5882_v11, %v5484_v7  ;;  %vm7951_vm15 = vmor %vm2049_vm14, %vm2050_vm12  ;;  %v5470_v42 = vld [vmem:[%s9713_s5 + $0x78] sm:$0xf0]  ;;  %v5452_v9 = vld [vmem:[%s9713_s5 + $0x48] sm:$0xf] }
 0x58e   :  { %6253 = vrcp.f32 %v7899_v43  ;;  %2696 = vmatpush.bf16.msra.mxu2 %v5501_v57  ;;  %v2056_v16 = vor.u32 1.1754944e-38, %v2055_v61  ;;  %v5489_v23 = vor.u32 %v5880_v6, %v5486_v2  ;;  %v5461_v61 = vor.u32 %v5877_v22, %v5460_v36  ;;  %v5872_v49 = vld [vmem:[%s9713_s5 + $0x4c] sm:$0xf]  ;;  %v5430_v7 = vld [vmem:[%s9713_s5 + $0x30] sm:$0xf0] }
 0x58f   :  { %v2047_v21 = vmul.f32 %v7861_v33, %v2046_v40  ;;  %v2010_v32 = vadd.f32 %v7825_v44, %v2009_v48  ;;  %6255 = vtanh.f32 %v7886_v39  ;;  %v5469_v47 = vor.u32 %v5878_v41, %v5468_v31  ;;  %v5454_v48 = vld [vmem:[%s9713_s5 + $0x58] sm:$0xf0]  ;;  %v5436_v5 = vld [vmem:[%s9713_s5 + $0x28] sm:$0xf]  ;;  %v5868_v2 = vld [vmem:[%s9713_s5 + $0x2c] sm:$0xf] }
 0x590   :  { %2648 = vmatpush.bf16.msrb.mxu1 %v5481_v0  ;;  %v2073_v60 = vadd.f32 %v7794_v52, %v2072_v12  ;;  %vm2075_vm1 = vweird.f32 %v7794_v52  ;;  %v2080_v63 = vand.u32 2147483648, %v7737_v15  ;;  %2746 = vmatpush.bf16.msra.mxu3 %v5489_v23  ;;  %v5473_v26 = vor.u32 %v5876_v29, %v5470_v42  ;;  %v5438_v22 = vld [vmem:[%s9713_s5 + $0x38] sm:$0xf0] }
 0x591   :  { %v2014_v45 = vsel %vm7914_vm13, %v7825_v44, %v2010_v32  ;;  %v2048_v24 = vadd.f32 %v7861_v33, %v2047_v21  ;;  %2599 = vmatpush.bf16.msrb.mxu0 %v5477_v34  ;;  %v5445_v27 = vor.u32 %v5873_v17, %v5444_v13  ;;  %v5449_v40 = vor.u32 %v5871_v50, %v5446_v59  ;;  %vm8014_vm3 = vmor %vm2074_vm2, %vm2075_vm1  ;;  %v5867_v34 = vld [vmem:[%s9713_s5 + $0x24] sm:$0xf]  ;;  %v5870_v21 = vld [vmem:[%s9713_s5 + $0x34] sm:$0xf0] }
 0x592   :  { %v2019_v19 = vsel %vm7889_vm11, %v2018_v14, %v2014_v45  ;;  %2697 = vmatpush.bf16.msra.mxu2 %v5485_v30  ;;  %v5453_v28 = vor.u32 %v5874_v10, %v5452_v9  ;;  %v2077_v11 = vsel %vm8014_vm3, %v7794_v52, %v2073_v60  ;;  %v2093_v53 = vand.u32 2147483647, %v7899_v43  ;;  %v5865_v45 = vld [vmem:[%s9713_s5 + $0xc] sm:$0xf0]  ;;  %v5863_v30 = vld [vmem:[%s9713_s5 + $0x4] sm:$0xf] }
 0x593   :  { %v2052_v54 = vsel %vm7951_vm15, %v7861_v33, %v2048_v24  ;;  %v2102_v37 = vmul.f32 %v6252_v62, %v2019_v19  ;;  %v5465_v33 = vor.u32 %v5875_v8, %v5462_v3  ;;  %v2081_v62 = vor.u32 1.1754944e-38, %v2080_v63  ;;  %v5412_v8 = vld [vmem:[%s9713_s5] sm:$0xf]  ;;  %v5414_v3 = vld [vmem:[%s9713_s5 + $0x10] sm:$0xf0] }
 0x594   :  { %v2057_v46 = vsel %vm2054_vm0, %v2056_v16, %v2052_v54  ;;  %v7993_v20 = vpop.eup %6253  ;;  %v2095_v14 = vand.u32 2147483648, %v7899_v43  ;;  %2747 = vmatpush.bf16.msra.mxu3 %v5473_v26  ;;  %v5457_v52 = vor.u32 %v5872_v49, %v5454_v48  ;;  %v5429_v6 = vor.u32 %v5869_v58, %v5428_v56  ;;  %v5420_v44 = vld [vmem:[%s9713_s5 + $0x8] sm:$0xf]  ;;  %v5866_v16 = vld [vmem:[%s9713_s5 + $0x14] sm:$0xf0]  ;;  %v5855_v9 = vld [vmem:[#allocation6 + $0x30] sm:$0xff] }
 0x595   :  { %v2100_v4 = vmul.f32 %v2057_v46, %v7696_v51  ;;  %2600 = vmatpush.bf16.msrb.mxu0 %v5461_v61  ;;  %v2085_v38 = vmul.f32 %v7993_v20, %v7899_v43  ;;  %2649 = vmatpush.bf16.msrb.mxu1 %v5465_v33  ;;  %v6256_v32 = vpop.eup %6255  ;;  %vm2090_vm5 = vweird.f32 %v7993_v20  ;;  %v5433_v36 = vor.u32 %v5867_v34, %v5430_v7  ;;  %v5864_v61 = vld [vmem:[%s9713_s5 + $0xc] sm:$0xf]  ;;  %v5422_v42 = vld [vmem:[%s9713_s5 + $0x18] sm:$0xf0]  ;;  %v5856_v10 = vld [vmem:[#allocation6] sm:$0xff] }
 0x596   :  { %2698 = vmatpush.bf16.msra.mxu2 %v5469_v47  ;;  %v2082_v24 = vsel %vm8020_vm4, %v2081_v62, %v2077_v11  ;;  %v5437_v0 = vor.u32 %v5870_v21, %v5436_v5  ;;  %vm2089_vm6 = vweird.f32 %v7899_v43  ;;  %v2096_v19 = vor.u32 1.1754944e-38, %v2095_v14  ;;  %v5925_v26 = vld [vmem:[%s9714_s6 + $0xec] sm:$0xf0]  ;;  %v5857_v48 = vld [vmem:[#allocation6 + $0x18] sm:$0xff]  ;;  %v5924_v56 = vld [vmem:[%s9714_s6 + $0xec] sm:$0xf] }
 0x597   :  { %v7999_v51 = vadd.f32 %v2102_v37, %v2100_v4  ;;  %v2086_v15 = vsub.f32 1.0, %v2085_v38  ;;  %v2107_v41 = vmul.f32 %v6256_v32, %v2082_v24  ;;  %vm2091_vm7 = vmor %vm2089_vm6, %vm2090_vm5  ;;  %v5441_v23 = vor.u32 %v5868_v2, %v5438_v22  ;;  %v5654_v38 = vld [vmem:[%s9714_s6 + $0xf0] sm:$0xf0]  ;;  %v5662_v58 = vld [vmem:[%s9714_s6 + $0xf8] sm:$0xf0] }
 0x598   :  { %2748 = vmatpush.bf16.msra.mxu3 %v5457_v52  ;;  %v5413_v29 = vor.u32 %v5865_v45, %v5412_v8  ;;  %vm2094_vm8 = vcmp.eq.f32.partialorder %v2093_v53, 8.507059e+37  ;;  %v5417_v37 = vor.u32 %v5863_v30, %v5414_v3  ;;  %v5421_v17 = vor.u32 %v5866_v16, %v5420_v44  ;;  %v5636_v34 = vld [vmem:[%s9714_s6 + $0xc0] sm:$0xf]  ;;  %v5921_v7 = vld [vmem:[%s9714_s6 + $0xcc] sm:$0xf0]  ;;  %v5859_v30 = vld [vmem:[#allocation6 + $0x8] sm:$0xff] }
 0x599   :  { %6257 = vtanh.f32 %v7999_v51  ;;  %2601 = vmatpush.bf16.msrb.mxu0 %v5445_v27  ;;  %v2087_v12 = vmul.f32 %v7993_v20, %v2086_v15  ;;  %2650 = vmatpush.bf16.msrb.mxu1 %v5449_v40  ;;  %v2109_v33 = vpack.c.bf16 %v2107_v41, %v2107_v41  ;;  %v5425_v47 = vor.u32 %v5864_v61, %v5422_v42  ;;  %v5923_v27 = vld [vmem:[%s9714_s6 + $0xe4] sm:$0xf]  ;;  %v5638_v5 = vld [vmem:[%s9714_s6 + $0xd0] sm:$0xf0]  ;;  %v5920_v53 = vld [vmem:[%s9714_s6 + $0xcc] sm:$0xf] }
 0x59a   :  { %2699 = vmatpush.bf16.msra.mxu2 %v5453_v28  ;;  %v8095_v40 = vor.u32 %v5923_v27, %v5654_v38  ;;  %v8108_v57 = vor.u32 %v5924_v56, %v5662_v58  ;;  %v5926_v28 = vld [vmem:[%s9714_s6 + $0xf4] sm:$0xf0]  ;;  %v8121_v62 = vor.u32 %v5921_v7, %v5636_v34  ;;  %v5919_v15 = vld [vmem:[%s9714_s6 + $0xc4] sm:$0xf]  ;;  %v5858_v32 = vld [vmem:[#allocation6 + $0x10] sm:$0xff] }
 0x59b   :  { %v2088_v31 = vadd.f32 %v7993_v20, %v2087_v12  ;;  %v2127_v60 = vunpack.c.l.b16 %v2109_v33  ;;  %v8119_v11 = vor.u32 %v5926_v28, %v5660_v1  ;;  %v8130_v21 = vor.u32 %v5919_v15, %v5638_v5  ;;  %v5646_v14 = vld [vmem:[%s9714_s6 + $0xd8] sm:$0xf0]  ;;  %v5644_v52 = vld [vmem:[%s9714_s6 + $0xc8] sm:$0xf]  ;;  %v5922_v2 = vld [vmem:[%s9714_s6 + $0xd4] sm:$0xf0] }
 0x59c   :  { %2749 = vmatpush.bf16.msra.mxu3 %v5441_v23  ;;  %v5620_v12 = vld [vmem:[%s9714_s6 + $0xa0] sm:$0xf]  ;;  %v8155_v22 = vor.u32 %v5922_v2, %v5644_v52  ;;  %v5915_v45 = vld [vmem:[%s9714_s6 + $0xa4] sm:$0xf]  ;;  %v5622_v24 = vld [vmem:[%s9714_s6 + $0xb0] sm:$0xf0] }
 0x59d   :  { %2602 = vmatpush.bf16.msrb.mxu0 %v5429_v6  ;;  %v2092_v43 = vsel %vm2091_vm7, %v7993_v20, %v2088_v31  ;;  %2651 = vmatpush.bf16.msrb.mxu1 %v5433_v36  ;;  %v5652_v20 = vld [vmem:[%s9714_s6 + $0xe0] sm:$0xf]  ;;  %v8144_v6 = vor.u32 %v5920_v53, %v5646_v14  ;;  %v5917_v36 = vld [vmem:[%s9714_s6 + $0xac] sm:$0xf0]  ;;  %v5916_v3 = vld [vmem:[%s9714_s6 + $0xac] sm:$0xf] }
 0x59e   :  { %v2097_v13 = vsel %vm2094_vm8, %v2096_v19, %v2092_v43  ;;  %2700 = vmatpush.bf16.msra.mxu2 %v5437_v0  ;;  %v8090_v49 = vor.u32 %v5925_v26, %v5652_v20  ;;  %v8157_v8 = vor.u32 %v5917_v36, %v5620_v12  ;;  %v8166_v0 = vor.u32 %v5915_v45, %v5622_v24  ;;  %v5630_v31 = vld [vmem:[%s9714_s6 + $0xb8] sm:$0xf0]  ;;  %v5918_v16 = vld [vmem:[%s9714_s6 + $0xb4] sm:$0xf0]  ;;  %v5860_v23 = vld [vmem:[#allocation6 + $0x20] sm:$0xff] }
 0x59f   :  { %v6258_v54 = vpop.eup %6257  ;;  %v8180_v44 = vor.u32 %v5916_v3, %v5630_v31  ;;  %v5913_v43 = vld [vmem:[%s9714_s6 + $0x8c] sm:$0xf0]  ;;  %v5606_v42 = vld [vmem:[%s9714_s6 + $0x90] sm:$0xf0]  ;;  %v9932_v58 = vld [vmem:[#allocation10_spill] sm:$0xff] }
 0x5a0   :  { %v2108_v46 = vmul.f32 %v6258_v54, %v2097_v13  ;;  %2750 = vmatpush.bf16.msra.mxu3 %v5425_v47  ;;  %v5604_v54 = vld [vmem:[%s9714_s6 + $0x80] sm:$0xf]  ;;  %v5912_v13 = vld [vmem:[%s9714_s6 + $0x8c] sm:$0xf]  ;;  %v9930_v27 = vld [vmem:[#allocation61_spill] sm:$0xff]  ;;  %v276_v1 = vadd.f32 %v9932_v58, %v9893_v25 }
 0x5a1   :  { %2603 = vmatpush.bf16.msrb.mxu0 %v5413_v29  ;;  %2652 = vmatpush.bf16.msrb.mxu1 %v5417_v37  ;;  %v5911_v37 = vld [vmem:[%s9714_s6 + $0x84] sm:$0xf]  ;;  %v8198_v61 = vor.u32 %v5913_v43, %v5604_v54  ;;  %v372_v38 = vadd.f32 %v9930_v27, %v9895_v55 }
 0x5a2   :  { %v2110_v50 = vpack.c.bf16 %v2108_v46, %v2108_v46  ;;  %v5976_v59 = vpack.c.bf16 %v2108_v46, %v2107_v41  ;;  %2701 = vmatpush.bf16.msra.mxu2 %v5421_v17  ;;  %v5628_v41 = vld [vmem:[%s9714_s6 + $0xa8] sm:$0xf]  ;;  %v5614_v17 = vld [vmem:[%s9714_s6 + $0x98] sm:$0xf0]  ;;  %v8209_v46 = vor.u32 %v5911_v37, %v5606_v42  ;;  %v9928_v47 = vld [vmem:[#allocation7_spill] sm:$0xff] }
 0x5a3   :  { %v8185_v19 = vor.u32 %v5918_v16, %v5628_v41  ;;  %v8211_v33 = vor.u32 %v5912_v13, %v5614_v17  ;;  %v9934_v31 = vld [vmem:[#allocation63_spill] sm:$0xff]  ;;  %v9935_v42 = vld [vmem:[#allocation62_spill] sm:$0xff] }
 0x5a4   :  { %5977 = vst [vmem:[#allocation6 + $0x28] sm:$0xff] %v5976_v59   ;;  %v2128_v63 = vunpack.c.l.b16 %v2110_v50  ;;  %v225_v50 = vadd.f32 %v9928_v47, %v9891_v18  ;;  %v9929_v59 = vld [vmem:[#allocation8_spill] sm:$0xff]  ;;  %v374_v41 = vadd.f32 %v9934_v31, %v9895_v55  ;;  %v325_v13 = vadd.f32 %v9935_v42, %v9888_v35 }
 0x5a6   :  { %v2129_v4 = vpack.c.b16 %v2128_v63, %v2127_v60  ;;  %v274_v60 = vadd.f32 %v9929_v59, %v9893_v25 }
 0x5a8   :  { %2139 = vmatmul.bf16.vlgmr.msra.gmra.mxu0 %v2129_v4  ;;  %2153 = vmatmul.bf16.vlgmr.msra.gmra.mxu1 %v2129_v4 }
 0x5a9   :  { %2167 = vmatmul.bf16.vlgmr.msrb.gmra.mxu2 %v2129_v4  ;;  %2181 = vmatmul.bf16.vlgmr.msrb.gmra.mxu3 %v2129_v4 }
 0x5aa   :  { %3065 = vmatpush.bf16.msra.mxu0 %v8090_v49  ;;  %3079 = vmatpush.bf16.msra.mxu1 %v8095_v40 }
 0x5ab   :  { %3107 = vmatpush.bf16.msrb.mxu3 %v8108_v57  ;;  %3093 = vmatpush.bf16.msrb.mxu2 %v8119_v11  ;;  %v5861_v29 = vld [vmem:[#allocation6 + $0x28] sm:$0xff] }
 0x5ae   :  { %3066 = vmatpush.bf16.msra.mxu0 %v8121_v62  ;;  %3080 = vmatpush.bf16.msra.mxu1 %v8130_v21 }
 0x5af   :  { %3108 = vmatpush.bf16.msrb.mxu3 %v8144_v6  ;;  %3094 = vmatpush.bf16.msrb.mxu2 %v8155_v22 }
 0x5b2   :  { %3067 = vmatpush.bf16.msra.mxu0 %v8157_v8  ;;  %3081 = vmatpush.bf16.msra.mxu1 %v8166_v0 }
 0x5b3   :  { %3109 = vmatpush.bf16.msrb.mxu3 %v8180_v44  ;;  %3095 = vmatpush.bf16.msrb.mxu2 %v8185_v19 }
 0x5b6   :  { %3068 = vmatpush.bf16.msra.mxu0 %v8198_v61  ;;  %3082 = vmatpush.bf16.msra.mxu1 %v8209_v46 }
 0x5b7   :  { %3110 = vmatpush.bf16.msrb.mxu3 %v8211_v33 }
 0x5b8   :  { %2604 = vmatmul.bf16.vlgmr.msrb.gmra.mxu0 %v5855_v9  ;;  %2653 = vmatmul.bf16.vlgmr.msrb.gmra.mxu1 %v5855_v9 }
 0x5b9   :  { %2702 = vmatmul.bf16.vlgmr.msra.gmra.mxu2 %v5855_v9  ;;  %2751 = vmatmul.bf16.vlgmr.msra.gmra.mxu3 %v5855_v9 }
 0x5c8   :  { %2609 = vmatmul.bf16.gmra.mxu0 %v5856_v10  ;;  %2658 = vmatmul.bf16.gmra.mxu1 %v5856_v10 }
 0x5c9   :  { %2707 = vmatmul.bf16.gmra.mxu2 %v5856_v10  ;;  %2756 = vmatmul.bf16.gmra.mxu3 %v5856_v10 }
 0x5d8   :  { %2614 = vmatmul.bf16.gmra.mxu0 %v5857_v48  ;;  %2663 = vmatmul.bf16.gmra.mxu1 %v5857_v48 }
 0x5d9   :  { %2712 = vmatmul.bf16.gmra.mxu2 %v5857_v48  ;;  %2761 = vmatmul.bf16.gmra.mxu3 %v5857_v48  ;;  %v9931_v48 = vld [vmem:[#allocation9_spill] sm:$0xff] }
 0x5da   :  { %v227_v56 = vadd.f32 %v9931_v48, %v9891_v18  ;;  %v9933_v18 = vld [vmem:[#allocation60_spill] sm:$0xff] }
 0x5e8   :  { %2619 = vmatmul.bf16.gmra.mxu0 %v5858_v32  ;;  %2668 = vmatmul.bf16.gmra.mxu1 %v5858_v32 }
 0x5e9   :  { %2717 = vmatmul.bf16.gmra.mxu2 %v5858_v32  ;;  %2766 = vmatmul.bf16.gmra.mxu3 %v5858_v32 }
 0x5f8   :  { %2624 = vmatmul.bf16.gmra.mxu0 %v5859_v30  ;;  %2673 = vmatmul.bf16.gmra.mxu1 %v5859_v30 }
 0x5f9   :  { %2722 = vmatmul.bf16.gmra.mxu2 %v5859_v30  ;;  %2771 = vmatmul.bf16.gmra.mxu3 %v5859_v30  ;;  %v323_v30 = vadd.f32 %v9933_v18, %v9888_v35  ;;  %v5907_v18 = vld [vmem:[%s9714_s6 + $0x64] sm:$0xf] }
 0x608   :  { %2629 = vmatmul.bf16.gmra.mxu0 %v5860_v23  ;;  %2678 = vmatmul.bf16.gmra.mxu1 %v5860_v23 }
 0x609   :  { %2727 = vmatmul.bf16.gmra.mxu2 %v5860_v23  ;;  %2776 = vmatmul.bf16.gmra.mxu3 %v5860_v23 }
 0x618   :  { %2634 = vmatmul.bf16.gmra.mxu0 %v5861_v29  ;;  %2683 = vmatmul.bf16.gmra.mxu1 %v5861_v29 }
 0x619   :  { %2732 = vmatmul.bf16.gmra.mxu2 %v5861_v29  ;;  %2781 = vmatmul.bf16.gmra.mxu3 %v5861_v29 }
 0x625   :  { %v2140_v63 = vpop.f32.mrf.mxu0  ;;  %v2154_v4 = vpop.f32.mrf.mxu1 }
 0x626   :  { %v2187_v9 = vadd.f32 %v2140_v63, %v225_v50  ;;  %v2188_v10 = vadd.f32 %v2154_v4, %v274_v60 }
 0x628   :  { %v5372_v20 = vmul.f32 -1.442695, %v2187_v9  ;;  %v5374_v26 = vmul.f32 -1.442695, %v2188_v10 }
 0x62a   :  { %6259 = vpow2.f32 %v5372_v20 }
 0x62b   :  { %6261 = vpow2.f32 %v5374_v26 }
 0x62c   :  { %v2182_v28 = vpop.f32.mrf.mxu3  ;;  %v2168_v5 = vpop.f32.mrf.mxu2 }
 0x62d   :  { %v2190_v34 = vadd.f32 %v2182_v28, %v372_v38  ;;  %v2142_v7 = vpop.f32.mrf.mxu0  ;;  %v2156_v15 = vpop.f32.mrf.mxu1  ;;  %v2189_v25 = vadd.f32 %v2168_v5, %v323_v30 }
 0x62e   :  { %v2191_v32 = vadd.f32 %v2142_v7, %v227_v56  ;;  %v2192_v53 = vadd.f32 %v2156_v15, %v276_v1 }
 0x62f   :  { %v5376_v14 = vmul.f32 -1.442695, %v2190_v34  ;;  %v5612_v34 = vld [vmem:[%s9714_s6 + $0x88] sm:$0xf] }
 0x630   :  { %v6260_v52 = vpop.eup %6259  ;;  %v5373_v2 = vmul.f32 -1.442695, %v2191_v32  ;;  %v5375_v45 = vmul.f32 -1.442695, %v2192_v53  ;;  %v5914_v53 = vld [vmem:[%s9714_s6 + $0x94] sm:$0xf0] }
 0x631   :  { %v6262_v12 = vpop.eup %6261  ;;  %v2201_v36 = vadd.f32 1.0, %v6260_v52  ;;  %6263 = vpow2.f32 %v5376_v14  ;;  %v5588_v14 = vld [vmem:[%s9714_s6 + $0x60] sm:$0xf] }
 0x632   :  { %v2239_v24 = vadd.f32 1.0, %v6262_v12  ;;  %6265 = vpow2.f32 %v5373_v2 }
 0x633   :  { %6267 = vrcp.f32 %v2201_v36  ;;  %v2212_v17 = vand.u32 2147483647, %v2201_v36  ;;  %v2214_v60 = vand.u32 2147483648, %v2201_v36  ;;  %vm2208_vm10 = vweird.f32 %v2201_v36 }
 0x634   :  { %6269 = vrcp.f32 %v2239_v24  ;;  %v2184_v3 = vpop.f32.mrf.mxu3  ;;  %v2170_v54 = vpop.f32.mrf.mxu2  ;;  %v2252_v4 = vand.u32 2147483648, %v2239_v24  ;;  %v2250_v9 = vand.u32 2147483647, %v2239_v24  ;;  %vm2246_vm9 = vweird.f32 %v2239_v24 }
 0x635   :  { %6271 = vpow2.f32 %v5375_v45  ;;  %v2194_v43 = vadd.f32 %v2184_v3, %v374_v41  ;;  %v2193_v10 = vadd.f32 %v2170_v54, %v325_v13  ;;  %vm8240_vm11 = vcmp.eq.f32.partialorder %v2212_v17, 8.507059e+37  ;;  %v5909_v45 = vld [vmem:[%s9714_s6 + $0x6c] sm:$0xf0]  ;;  %v5590_v41 = vld [vmem:[%s9714_s6 + $0x70] sm:$0xf0] }
 0x636   :  { %6273 = vtanh.f32 %v2189_v25  ;;  %v2215_v28 = vor.u32 1.1754944e-38, %v2214_v60  ;;  %v2253_v15 = vor.u32 1.1754944e-38, %v2252_v4  ;;  %vm8251_vm14 = vcmp.eq.f32.partialorder %v2250_v9, 8.507059e+37 }
 0x637   :  { %v6264_v16 = vpop.eup %6263  ;;  %v5377_v35 = vmul.f32 -1.442695, %v2194_v43  ;;  %v8279_v3 = vor.u32 %v5914_v53, %v5612_v34  ;;  %v8281_v31 = vor.u32 %v5909_v45, %v5588_v14  ;;  %v5908_v43 = vld [vmem:[%s9714_s6 + $0x6c] sm:$0xf]  ;;  %v5596_v34 = vld [vmem:[%s9714_s6 + $0x68] sm:$0xf] }
 0x638   :  { %v6266_v23 = vpop.eup %6265  ;;  %v8230_v29 = vadd.f32 1.0, %v6264_v16  ;;  %v5572_v53 = vld [vmem:[%s9714_s6 + $0x40] sm:$0xf]  ;;  %v5550_v14 = vld [vmem:[%s9714_s6 + $0x18] sm:$0xf0] }
 0x639   :  { %v6268_v37 = vpop.eup %6267  ;;  %v8234_v47 = vadd.f32 1.0, %v6266_v23  ;;  %3096 = vmatpush.bf16.msrb.mxu2 %v8279_v3  ;;  %3069 = vmatpush.bf16.msra.mxu0 %v8281_v31 }
 0x63a   :  { %v6270_v50 = vpop.eup %6269  ;;  %v2204_v59 = vmul.f32 %v6268_v37, %v2201_v36  ;;  %6275 = vrcp.f32 %v8230_v29  ;;  %vm2209_vm12 = vweird.f32 %v6268_v37  ;;  %v2292_v56 = vand.u32 2147483648, %v8230_v29 }
 0x63b   :  { %v6272_v55 = vpop.eup %6271  ;;  %v2242_v63 = vmul.f32 %v6270_v50, %v2239_v24  ;;  %6277 = vrcp.f32 %v8234_v47  ;;  %vm2247_vm13 = vweird.f32 %v6270_v50  ;;  %vm2210_vm15 = vmor %vm2208_vm10, %vm2209_vm12  ;;  %vm2286_vm0 = vweird.f32 %v8230_v29 }
 0x63c   :  { %v2205_v20 = vsub.f32 1.0, %v2204_v59  ;;  %v8238_v26 = vadd.f32 1.0, %v6272_v55  ;;  %v6274_v58 = vpop.eup %6273  ;;  %v2290_v12 = vand.u32 2147483647, %v8230_v29  ;;  %vm2248_vm1 = vmor %vm2246_vm9, %vm2247_vm13  ;;  %v8277_v25 = vor.u32 1.1754944e-38, %v2292_v56 }
 0x63d   :  { %v2243_v27 = vsub.f32 1.0, %v2242_v63  ;;  %v8303_v59 = vor.u32 %v5907_v18, %v5590_v41  ;;  %vm2223_vm5 = vweird.f32 %v8234_v47  ;;  %v5904_v41 = vld [vmem:[%s9714_s6 + $0x4c] sm:$0xf] }
 0x63e   :  { %v2206_v48 = vmul.f32 %v6268_v37, %v2205_v20  ;;  %6279 = vrcp.f32 %v8238_v26  ;;  %vm8310_vm3 = vcmp.eq.f32.partialorder %v2290_v12, 8.507059e+37  ;;  %vm2261_vm10 = vweird.f32 %v8238_v26  ;;  %v5540_v20 = vld [vmem:[%s9714_s6] sm:$0xf] }
 0x63f   :  { %v2244_v1 = vmul.f32 %v6270_v50, %v2243_v27  ;;  %6281 = vtanh.f32 %v2193_v10  ;;  %v2265_v27 = vand.u32 2147483647, %v8238_v26  ;;  %3083 = vmatpush.bf16.msra.mxu1 %v8303_v59 }
 0x640   :  { %v8249_v7 = vpop.eup %6275  ;;  %v2207_v5 = vadd.f32 %v6268_v37, %v2206_v48  ;;  %6283 = vpow2.f32 %v5377_v35  ;;  %v2229_v35 = vand.u32 2147483648, %v8234_v47 }
 0x641   :  { %v2245_v52 = vadd.f32 %v6270_v50, %v2244_v1  ;;  %v2282_v2 = vmul.f32 %v8249_v7, %v8230_v29  ;;  %v8273_v30 = vpop.eup %6277  ;;  %vm2287_vm2 = vweird.f32 %v8249_v7  ;;  %v2267_v1 = vand.u32 2147483648, %v8238_v26 }
 0x642   :  { %v2211_v36 = vsel %vm2210_vm15, %v6268_v37, %v2207_v5  ;;  %v2219_v24 = vmul.f32 %v8273_v30, %v8234_v47  ;;  %v5598_v37 = vld [vmem:[%s9714_s6 + $0x78] sm:$0xf0]  ;;  %vm2224_vm4 = vweird.f32 %v8273_v30  ;;  %vm8337_vm6 = vmor %vm2286_vm0, %vm2287_vm2  ;;  %v2230_v29 = vor.u32 1.1754944e-38, %v2229_v35 }
 0x643   :  { %v2216_v16 = vsel %vm8240_vm11, %v2215_v28, %v2211_v36  ;;  %v2249_v23 = vsel %vm2248_vm1, %v6270_v50, %v2245_v52  ;;  %v2283_v54 = vsub.f32 1.0, %v2282_v2  ;;  %v2227_v50 = vand.u32 2147483647, %v8234_v47  ;;  %vm8347_vm8 = vmor %vm2223_vm5, %vm2224_vm4  ;;  %v5905_v52 = vld [vmem:[%s9714_s6 + $0x4c] sm:$0xf0] }
 0x644   :  { %v8296_v42 = vpop.eup %6279  ;;  %v2254_v13 = vsel %vm8251_vm14, %v2253_v15, %v2249_v23  ;;  %v2313_v17 = vmul.f32 %v6274_v58, %v2216_v16  ;;  %v2220_v4 = vsub.f32 1.0, %v2219_v24  ;;  %v5910_v15 = vld [vmem:[%s9714_s6 + $0x74] sm:$0xf0]  ;;  %v5903_v2 = vld [vmem:[%s9714_s6 + $0x44] sm:$0xf]  ;;  %v2268_v16 = vor.u32 1.1754944e-38, %v2267_v1 }
 0x645   :  { %v6282_v60 = vpop.eup %6281  ;;  %v2311_v55 = vmul.f32 %v2254_v13, %v7886_v39  ;;  %v2284_v63 = vmul.f32 %v8249_v7, %v2283_v54  ;;  %v2257_v9 = vmul.f32 %v8296_v42, %v8238_v26  ;;  %v8317_v39 = vor.u32 %v5908_v43, %v5598_v37  ;;  %v5574_v36 = vld [vmem:[%s9714_s6 + $0x50] sm:$0xf0]  ;;  %v5582_v26 = vld [vmem:[%s9714_s6 + $0x58] sm:$0xf0]  ;;  %v5580_v54 = vld [vmem:[%s9714_s6 + $0x48] sm:$0xf] }
 0x646   :  { %v6284_v10 = vpop.eup %6283  ;;  %v2221_v56 = vmul.f32 %v8273_v30, %v2220_v4  ;;  %vm2262_vm7 = vweird.f32 %v8296_v42  ;;  %vm2228_vm9 = vcmp.eq.f32.partialorder %v2227_v50, 8.507059e+37  ;;  %v8363_v18 = vor.u32 %v5910_v15, %v5596_v34  ;;  %v5556_v13 = vld [vmem:[%s9714_s6 + $0x20] sm:$0xf]  ;;  %v5900_v4 = vld [vmem:[%s9714_s6 + $0x2c] sm:$0xf] }
 0x647   :  { %v2315_v38 = vadd.f32 %v2313_v17, %v2311_v55  ;;  %v2258_v48 = vsub.f32 1.0, %v2257_v9  ;;  %v2285_v58 = vadd.f32 %v8249_v7, %v2284_v63  ;;  %v8324_v28 = vadd.f32 1.0, %v6284_v10  ;;  %3111 = vmatpush.bf16.msrb.mxu3 %v8317_v39  ;;  %vm2263_vm11 = vmor %vm2261_vm10, %vm2262_vm7  ;;  %v5901_v17 = vld [vmem:[%s9714_s6 + $0x2c] sm:$0xf0]  ;;  %v5558_v63 = vld [vmem:[%s9714_s6 + $0x30] sm:$0xf0] }
 0x648   :  { %v2222_v32 = vadd.f32 %v8273_v30, %v2221_v56  ;;  %vm2266_vm12 = vcmp.eq.f32.partialorder %v2265_v27, 8.507059e+37  ;;  %3097 = vmatpush.bf16.msrb.mxu2 %v8363_v18  ;;  %v8384_v37 = vor.u32 %v5905_v52, %v5572_v53  ;;  %v8395_v55 = vor.u32 %v5903_v2, %v5574_v36  ;;  %v5566_v27 = vld [vmem:[%s9714_s6 + $0x38] sm:$0xf0]  ;;  %v5897_v1 = vld [vmem:[%s9714_s6 + $0xc] sm:$0xf0] }
 0x649   :  { %6285 = vtanh.f32 %v2315_v38  ;;  %v2259_v47 = vmul.f32 %v8296_v42, %v2258_v48  ;;  %v5564_v38 = vld [vmem:[%s9714_s6 + $0x28] sm:$0xf]  ;;  %v5902_v48 = vld [vmem:[%s9714_s6 + $0x34] sm:$0xf0]  ;;  %v5895_v34 = vld [vmem:[%s9714_s6 + $0x4] sm:$0xf]  ;;  %vm2301_vm14 = vweird.f32 %v8324_v28 }
 0x64a   :  { %6287 = vrcp.f32 %v8324_v28  ;;  %v2226_v12 = vsel %vm8347_vm8, %v8273_v30, %v2222_v32  ;;  %v2289_v30 = vsel %vm8337_vm6, %v8249_v7, %v2285_v58  ;;  %v5906_v7 = vld [vmem:[%s9714_s6 + $0x54] sm:$0xf0]  ;;  %3070 = vmatpush.bf16.msra.mxu0 %v8384_v37  ;;  %3084 = vmatpush.bf16.msra.mxu1 %v8395_v55  ;;  %v5542_v32 = vld [vmem:[%s9714_s6 + $0x10] sm:$0xf0]  ;;  %v5896_v53 = vld [vmem:[%s9714_s6 + $0xc] sm:$0xf]  ;;  %v8452_v52 = vor.u32 %v5902_v48, %v5564_v38 }
 0x64b   :  { %v2260_v45 = vadd.f32 %v8296_v42, %v2259_v47  ;;  %v2231_v23 = vsel %vm2228_vm9, %v2230_v29, %v2226_v12  ;;  %v2294_v10 = vsel %vm8310_vm3, %v8277_v25, %v2289_v30  ;;  %v8426_v25 = vor.u32 %v5901_v17, %v5556_v13  ;;  %v5898_v36 = vld [vmem:[%s9714_s6 + $0x14] sm:$0xf0] }
 0x64c   :  { %v2314_v43 = vmul.f32 %v6282_v60, %v2231_v23  ;;  %v5899_v60 = vld [vmem:[%s9714_s6 + $0x24] sm:$0xf]  ;;  %v8450_v29 = vor.u32 %v5900_v4, %v5566_v27  ;;  %v8455_v12 = vor.u32 %v5897_v1, %v5540_v20  ;;  %v8468_v30 = vor.u32 %v5896_v53, %v5550_v14  ;;  %v8493_v4 = vpop.f32.mrf.mxu2 }
 0x64d   :  { %v2264_v24 = vsel %vm2263_vm11, %v8296_v42, %v2260_v45  ;;  %v8397_v42 = vor.u32 %v5904_v41, %v5582_v26  ;;  %v8438_v47 = vor.u32 %v5899_v60, %v5558_v63  ;;  %v5548_v45 = vld [vmem:[%s9714_s6 + $0x8] sm:$0xf]  ;;  %v2307_v41 = vand.u32 2147483648, %v8324_v28  ;;  %v8484_v60 = vpop.f32.mrf.mxu1 }
 0x64e   :  { %v2269_v50 = vsel %vm2266_vm12, %v2268_v16, %v2264_v24  ;;  %3071 = vmatpush.bf16.msra.mxu0 %v8426_v25  ;;  %9946 = vst [vmem:[#allocation11_spill] sm:$0xff] %v8455_v12  ;;  %v8466_v26 = vor.u32 %v5895_v34, %v5542_v32  ;;  %v2305_v23 = vand.u32 2147483647, %v8324_v28  ;;  %v9953_v34 = vmov 0.0|0.0  }
 0x64f   :  { %v6286_v9 = vpop.eup %6285  ;;  %v2312_v35 = vmul.f32 %v2269_v50, %v7999_v51  ;;  %3112 = vmatpush.bf16.msrb.mxu3 %v8397_v42  ;;  %v8424_v51 = vor.u32 %v5906_v7, %v5580_v54  ;;  %3085 = vmatpush.bf16.msra.mxu1 %v8438_v47  ;;  %9948 = vst [vmem:[#allocation12_spill] sm:$0xff] %v8468_v30  ;;  %v8482_v50 = vpop.f32.mrf.mxu0 }
 0x650   :  { %v6288_v56 = vpop.eup %6287  ;;  %v2319_v58 = vmul.f32 %v6286_v9, %v2294_v10  ;;  %9947 = vst [vmem:[#allocation17_spill] sm:$0xff] %v8466_v26  ;;  %v8472_v54 = vor.u32 %v5898_v36, %v5548_v45  ;;  %vm2306_vm0 = vcmp.eq.f32.partialorder %v2305_v23, 8.507059e+37  ;;  %v8495_v9 = vpop.f32.mrf.mxu3  ;;  %v8566_v45 = vld [vmem:[%s9715_s1] sm:$0xff]  ;;  %v8571_v36 = vld [vmem:[%s9715_s1 + $0x8] sm:$0xff] }
 0x651   :  { %v2316_v15 = vadd.f32 %v2314_v43, %v2312_v35  ;;  %v2297_v5 = vmul.f32 %v6288_v56, %v8324_v28  ;;  %3098 = vmatpush.bf16.msrb.mxu2 %v8424_v51  ;;  %vm2302_vm13 = vweird.f32 %v6288_v56  ;;  %v2308_v43 = vor.u32 1.1754944e-38, %v2307_v41  ;;  %9960 = vst [vmem:[#allocation24_spill] sm:$0xff] %v8566_v45 }
 0x652   :  { %9949 = vst [vmem:[#allocation13_spill] sm:$0xff] %v8472_v54  ;;  %3072 = vmatpush.bf16.msra.mxu0 %v8455_v12  ;;  %vm2303_vm15 = vmor %vm2301_vm14, %vm2302_vm13  ;;  %v6560_v41 = vmov 0   ;;  %vm5672_vm1 = vcmp.gt.f32.partialorder %v8566_v45, 0.0  ;;  %vm5673_vm2 = vcmp.gt.f32.partialorder %v8571_v36, 0.0  ;;  %vm5682_vm11 = vcmp.gt.f32.partialorder %v8566_v45, 1.0 }
 0x653   :  { %6289 = vtanh.f32 %v2316_v15  ;;  %v2298_v2 = vsub.f32 1.0, %v2297_v5  ;;  %3113 = vmatpush.bf16.msrb.mxu3 %v8450_v29  ;;  %3086 = vmatpush.bf16.msra.mxu1 %v8466_v26  ;;  %9961 = vst [vmem:[#allocation28_spill] sm:$0xff] %v8571_v36  ;;  %vm5683_vm12 = vcmp.gt.f32.partialorder %v8571_v36, 1.0 }
 0x654   :  { %v8511_v38 = vpop.f32.mrf.mxu2  ;;  %5989 = vset.pattern.permute.xlu1 %v6560_v41  ;;  %6000 = vset.pattern.permute.xlu2 %v6560_v41 }
 0x655   :  { %v2299_v16 = vmul.f32 %v6288_v56, %v2298_v2  ;;  %3099 = vmatpush.bf16.msrb.mxu2 %v8452_v52  ;;  %v8501_v35 = vpop.f32.mrf.mxu1  ;;  %5988 = vset.pattern.permute.xlu0 %v6560_v41 }
 0x656   :  { %3286 = vmatpush.bf16.msrb.mxu0 %v8090_v49  ;;  %4844 = vperm.xlu0 %5988, %v8566_v45  }
 0x657   :  { %v2300_v24 = vadd.f32 %v6288_v56, %v2299_v16  ;;  %3114 = vmatpush.bf16.msrb.mxu3 %v8468_v30  ;;  %3300 = vmatpush.bf16.msrb.mxu1 %v8095_v40  ;;  %v8499_v10 = vpop.f32.mrf.mxu0  ;;  %v9743_v16 = vmov 0.0  }
 0x658   :  { %v8513_v48 = vpop.f32.mrf.mxu3  ;;  %v5674_v23 = vsel %vm5672_vm1, 1.0, %v9743_v16 }
 0x659   :  { %v6290_v7 = vpop.eup %6289  ;;  %v2304_v13 = vsel %vm2303_vm15, %v6288_v56, %v2300_v24  ;;  %3100 = vmatpush.bf16.msrb.mxu2 %v8472_v54  ;;  %v5675_v24 = vsel %vm5673_vm2, 1.0, %v9743_v16 }
 0x65a   :  { %v2309_v17 = vsel %vm2306_vm0, %v2308_v43, %v2304_v13  ;;  %3287 = vmatpush.bf16.msrb.mxu0 %v8121_v62  ;;  %v5990_v43 = vpack.i.bf16 %v5675_v24, %v5674_v23 }
 0x65b   :  { %3328 = vmatpush.bf16.msra.mxu3 %v8108_v57  ;;  %v2320_v28 = vmul.f32 %v6290_v7, %v2309_v17  ;;  %3301 = vmatpush.bf16.msrb.mxu1 %v8130_v21 }
 0x65c   :  { %v8527_v20 = vpop.f32.mrf.mxu2  ;;  %5991 = vperm.xlu1 %5989, %v5990_v43  }
 0x65d   :  { %3314 = vmatpush.bf16.msra.mxu2 %v8119_v11  ;;  %v5981_v63 = vpack.c.bf16 %v2320_v28, %v2319_v58  ;;  %v8519_v58 = vpop.f32.mrf.mxu1  ;;  %9951 = vst [vmem:[#allocation16_spill] sm:$0xff] %v8527_v20 }
 0x65e   :  { %3288 = vmatpush.bf16.msrb.mxu0 %v8157_v8  ;;  %9950 = vst [vmem:[#allocation21_spill] sm:$0xff] %v8519_v58  ;;  %4849 = vperm.xlu0 %5988, %v8571_v36  }
 0x65f   :  { %3329 = vmatpush.bf16.msra.mxu3 %v8144_v6  ;;  %5982 = vst [vmem:[#allocation6 + $0x38] sm:$0xff] %v5981_v63   ;;  %3302 = vmatpush.bf16.msrb.mxu1 %v8166_v0  ;;  %v8517_v56 = vpop.f32.mrf.mxu0 }
 0x660   :  { %v8529_v1 = vpop.f32.mrf.mxu3 }
 0x661   :  { %3315 = vmatpush.bf16.msra.mxu2 %v8155_v22  ;;  %9952 = vst [vmem:[#allocation20_spill] sm:$0xff] %v8529_v1 }
 0x662   :  { %3289 = vmatpush.bf16.msrb.mxu0 %v8198_v61 }
 0x663   :  { %3330 = vmatpush.bf16.msra.mxu3 %v8180_v44  ;;  %3303 = vmatpush.bf16.msrb.mxu1 %v8209_v46 }
 0x664   :  { %v8551_v32 = vpop.f32.mrf.mxu2 }
 0x665   :  { %3316 = vmatpush.bf16.msra.mxu2 %v8185_v19  ;;  %v8539_v5 = vpop.f32.mrf.mxu1  ;;  %9956 = vst [vmem:[#allocation25_spill] sm:$0xff] %v8551_v32 }
 0x666   :  { %v5862_v27 = vld [vmem:[#allocation6 + $0x38] sm:$0xff]  ;;  %3290 = vmatpush.bf16.msrb.mxu0 %v8281_v31  ;;  %9955 = vst [vmem:[#allocation15_spill] sm:$0xff] %v8539_v5 }
 0x667   :  { %3331 = vmatpush.bf16.msra.mxu3 %v8211_v33  ;;  %2639 = vmatmul.bf16.gmra.mxu0 %v5862_v27  ;;  %v8537_v15 = vpop.f32.mrf.mxu0 }
 0x668   :  { %2688 = vmatmul.bf16.gmra.mxu1 %v5862_v27  ;;  %2737 = vmatmul.bf16.gmra.mxu2 %v5862_v27  ;;  %9954 = vst [vmem:[#allocation14_spill] sm:$0xff] %v8537_v15  ;;  %v8553_v53 = vpop.f32.mrf.mxu3 }
 0x669   :  { %3317 = vmatpush.bf16.msra.mxu2 %v8279_v3  ;;  %2786 = vmatmul.bf16.gmra.mxu3 %v5862_v27  ;;  %9957 = vst [vmem:[#allocation18_spill] sm:$0xff] %v8553_v53 }
 0x66a   :  { %3304 = vmatpush.bf16.msrb.mxu1 %v8303_v59  ;;  %3291 = vmatpush.bf16.msrb.mxu0 %v8384_v37 }
 0x66b   :  { %3332 = vmatpush.bf16.msra.mxu3 %v8317_v39 }
 0x66c   :  { %v8581_v7 = vpop.f32.mrf.mxu2 }
 0x66d   :  { %3318 = vmatpush.bf16.msra.mxu2 %v8363_v18  ;;  %v8559_v2 = vpop.f32.mrf.mxu1  ;;  %9962 = vst [vmem:[#allocation22_spill] sm:$0xff] %v8581_v7 }
 0x66e   :  { %3305 = vmatpush.bf16.msrb.mxu1 %v8395_v55  ;;  %3292 = vmatpush.bf16.msrb.mxu0 %v8426_v25  ;;  %9959 = vst [vmem:[#allocation29_spill] sm:$0xff] %v8559_v2 }
 0x66f   :  { %3333 = vmatpush.bf16.msra.mxu3 %v8397_v42  ;;  %v8557_v14 = vpop.f32.mrf.mxu0 }
 0x670   :  { %9958 = vst [vmem:[#allocation19_spill] sm:$0xff] %v8557_v14  ;;  %v8583_v13 = vpop.f32.mrf.mxu3 }
 0x671   :  { %3319 = vmatpush.bf16.msra.mxu2 %v8424_v51  ;;  %9963 = vst [vmem:[#allocation23_spill] sm:$0xff] %v8583_v13 }
 0x672   :  { %3306 = vmatpush.bf16.msrb.mxu1 %v8438_v47  ;;  %3293 = vmatpush.bf16.msrb.mxu0 %v8455_v12 }
 0x673   :  { %3334 = vmatpush.bf16.msra.mxu3 %v8450_v29 }
 0x674   :  { %v8601_v63 = vpop.f32.mrf.mxu2 }
 0x675   :  { %3320 = vmatpush.bf16.msra.mxu2 %v8452_v52  ;;  %v8592_v28 = vpop.f32.mrf.mxu1  ;;  %9966 = vst [vmem:[#allocation27_spill] sm:$0xff] %v8601_v63 }
 0x676   :  { %3307 = vmatpush.bf16.msrb.mxu1 %v8466_v26  ;;  %9965 = vst [vmem:[#allocation26_spill] sm:$0xff] %v8592_v28 }
 0x677   :  { %3335 = vmatpush.bf16.msra.mxu3 %v8468_v30  ;;  %3073 = vmatmul.bf16.vlgmr.msra.gmra.mxu0 %v9953_v34  ;;  %v8590_v17 = vpop.f32.mrf.mxu0 }
 0x678   :  { %3087 = vmatmul.bf16.vlgmr.msra.gmra.mxu1 %v9953_v34  ;;  %3101 = vmatmul.bf16.vlgmr.msrb.gmra.mxu2 %v9953_v34  ;;  %9964 = vst [vmem:[#allocation33_spill] sm:$0xff] %v8590_v17  ;;  %v8603_v27 = vpop.f32.mrf.mxu3 }
 0x679   :  { %3321 = vmatpush.bf16.msra.mxu2 %v8472_v54  ;;  %3115 = vmatmul.bf16.vlgmr.msrb.gmra.mxu3 %v9953_v34  ;;  %9967 = vst [vmem:[#allocation37_spill] sm:$0xff] %v8603_v27 }
 0x67a   :  { %3508 = vmatpush.bf16.msra.mxu0 %v8090_v49  ;;  %3522 = vmatpush.bf16.msra.mxu1 %v8095_v40 }
 0x67b   :  { %3550 = vmatpush.bf16.msrb.mxu3 %v8108_v57 }
 0x67c   :  { %v8615_v23 = vpop.f32.mrf.mxu2 }
 0x67d   :  { %3536 = vmatpush.bf16.msrb.mxu2 %v8119_v11  ;;  %v8610_v41 = vpop.f32.mrf.mxu1  ;;  %9970 = vst [vmem:[#allocation30_spill] sm:$0xff] %v8615_v23 }
 0x67e   :  { %3509 = vmatpush.bf16.msra.mxu0 %v8121_v62  ;;  %3523 = vmatpush.bf16.msra.mxu1 %v8130_v21  ;;  %9969 = vst [vmem:[#allocation36_spill] sm:$0xff] %v8610_v41 }
 0x67f   :  { %3551 = vmatpush.bf16.msrb.mxu3 %v8144_v6  ;;  %v8608_v34 = vpop.f32.mrf.mxu0 }
 0x680   :  { %9968 = vst [vmem:[#allocation32_spill] sm:$0xff] %v8608_v34  ;;  %v8617_v24 = vpop.f32.mrf.mxu3 }
 0x681   :  { %3537 = vmatpush.bf16.msrb.mxu2 %v8155_v22  ;;  %9971 = vst [vmem:[#allocation31_spill] sm:$0xff] %v8617_v24 }
 0x682   :  { %3510 = vmatpush.bf16.msra.mxu0 %v8157_v8  ;;  %3524 = vmatpush.bf16.msra.mxu1 %v8166_v0 }
 0x683   :  { %3552 = vmatpush.bf16.msrb.mxu3 %v8180_v44 }
 0x684   :  { %v8623_v63 = vpop.f32.mrf.mxu2 }
 0x685   :  { %3538 = vmatpush.bf16.msrb.mxu2 %v8185_v19  ;;  %v8621_v16 = vpop.f32.mrf.mxu1  ;;  %9974 = vst [vmem:[#allocation35_spill] sm:$0xff] %v8623_v63 }
 0x686   :  { %3511 = vmatpush.bf16.msra.mxu0 %v8198_v61  ;;  %3525 = vmatpush.bf16.msra.mxu1 %v8209_v46  ;;  %9973 = vst [vmem:[#allocation34_spill] sm:$0xff] %v8621_v16 }
 0x687   :  { %3553 = vmatpush.bf16.msrb.mxu3 %v8211_v33  ;;  %v8619_v43 = vpop.f32.mrf.mxu0 }
 0x688   :  { %9972 = vst [vmem:[#allocation41_spill] sm:$0xff] %v8619_v43  ;;  %v8625_v27 = vpop.f32.mrf.mxu3 }
 0x689   :  { %3539 = vmatpush.bf16.msrb.mxu2 %v8279_v3  ;;  %9975 = vst [vmem:[#allocation45_spill] sm:$0xff] %v8625_v27 }
 0x68a   :  { %3512 = vmatpush.bf16.msra.mxu0 %v8281_v31  ;;  %3526 = vmatpush.bf16.msra.mxu1 %v8303_v59 }
 0x68b   :  { %3554 = vmatpush.bf16.msrb.mxu3 %v8317_v39 }
 0x68c   :  { %v8631_v7 = vpop.f32.mrf.mxu2 }
 0x68d   :  { %3540 = vmatpush.bf16.msrb.mxu2 %v8363_v18  ;;  %v8629_v41 = vpop.f32.mrf.mxu1  ;;  %9978 = vst [vmem:[#allocation44_spill] sm:$0xff] %v8631_v7 }
 0x68e   :  { %3513 = vmatpush.bf16.msra.mxu0 %v8384_v37  ;;  %3527 = vmatpush.bf16.msra.mxu1 %v8395_v55  ;;  %9977 = vst [vmem:[#allocation40_spill] sm:$0xff] %v8629_v41 }
 0x68f   :  { %3555 = vmatpush.bf16.msrb.mxu3 %v8397_v42  ;;  %v8627_v34 = vpop.f32.mrf.mxu0 }
 0x690   :  { %9976 = vst [vmem:[#allocation64_spill] sm:$0xff] %v8627_v34  ;;  %v8633_v28 = vpop.f32.mrf.mxu3 }
 0x691   :  { %3541 = vmatpush.bf16.msrb.mxu2 %v8424_v51  ;;  %9979 = vst [vmem:[#allocation52_spill] sm:$0xff] %v8633_v28 }
 0x692   :  { %3514 = vmatpush.bf16.msra.mxu0 %v8426_v25  ;;  %3528 = vmatpush.bf16.msra.mxu1 %v8438_v47 }
 0x693   :  { %3556 = vmatpush.bf16.msrb.mxu3 %v8450_v29 }
 0x694   :  { %v8639_v24 = vpop.f32.mrf.mxu2 }
 0x695   :  { %3542 = vmatpush.bf16.msrb.mxu2 %v8452_v52  ;;  %v8637_v23 = vpop.f32.mrf.mxu1  ;;  %9982 = vst [vmem:[#allocation39_spill] sm:$0xff] %v8639_v24 }
 0x696   :  { %3515 = vmatpush.bf16.msra.mxu0 %v8455_v12  ;;  %3529 = vmatpush.bf16.msra.mxu1 %v8466_v26  ;;  %9981 = vst [vmem:[#allocation53_spill] sm:$0xff] %v8637_v23 }
 0x697   :  { %3557 = vmatpush.bf16.msrb.mxu3 %v8468_v30  ;;  %v8635_v17 = vpop.f32.mrf.mxu0 }
 0x698   :  { %9980 = vst [vmem:[#allocation38_spill] sm:$0xff] %v8635_v17  ;;  %v8641_v43 = vpop.f32.mrf.mxu3 }
 0x699   :  { %3543 = vmatpush.bf16.msrb.mxu2 %v8472_v54  ;;  %9983 = vst [vmem:[#allocation65_spill] sm:$0xff] %v8641_v43 }
 0x69c   :  { %v8647_v27 = vpop.f32.mrf.mxu2 }
 0x69d   :  { %v8645_v63 = vpop.f32.mrf.mxu1  ;;  %9986 = vst [vmem:[#allocation43_spill] sm:$0xff] %v8647_v27 }
 0x69e   :  { %9985 = vst [vmem:[#allocation42_spill] sm:$0xff] %v8645_v63 }
 0x69f   :  { %v8643_v16 = vpop.f32.mrf.mxu0 }
 0x6a0   :  { %9984 = vst [vmem:[#allocation49_spill] sm:$0xff] %v8643_v16  ;;  %v8649_v34 = vpop.f32.mrf.mxu3 }
 0x6a1   :  { %9987 = vst [vmem:[#allocation55_spill] sm:$0xff] %v8649_v34 }
 0x6a4   :  { %v8655_v28 = vpop.f32.mrf.mxu2 }
 0x6a5   :  { %v8653_v7 = vpop.f32.mrf.mxu1  ;;  %9990 = vst [vmem:[#allocation46_spill] sm:$0xff] %v8655_v28 }
 0x6a6   :  { %9989 = vst [vmem:[#allocation54_spill] sm:$0xff] %v8653_v7 }
 0x6a7   :  { %v8651_v41 = vpop.f32.mrf.mxu0 }
 0x6a8   :  { %9988 = vst [vmem:[#allocation48_spill] sm:$0xff] %v8651_v41  ;;  %v8657_v17 = vpop.f32.mrf.mxu3 }
 0x6a9   :  { %9991 = vst [vmem:[#allocation47_spill] sm:$0xff] %v8657_v17 }
 0x6ac   :  { %v8663_v43 = vpop.f32.mrf.mxu2 }
 0x6ad   :  { %v8661_v24 = vpop.f32.mrf.mxu1  ;;  %9994 = vst [vmem:[#allocation51_spill] sm:$0xff] %v8663_v43  ;;  %v2378_v43 = vld [vmem:[%s9716_s7] sm:$0xf] }
 0x6ae   :  { %9993 = vst [vmem:[#allocation50_spill] sm:$0xff] %v8661_v24  ;;  %v8700_v2 = vperm.slane %v2378_v43, 3 }
 0x6af   :  { %v8659_v23 = vpop.f32.mrf.mxu0 }
 0x6b0   :  { %9992 = vst [vmem:[#allocation57_spill] sm:$0xff] %v8659_v23  ;;  %v8665_v16 = vpop.f32.mrf.mxu3  ;;  %v2753_v32 = vadd.f32 %v8495_v9, %v8700_v2 }
 0x6b1   :  { %9995 = vst [vmem:[#allocation56_spill] sm:$0xff] %v8665_v16 }
 0x6b2   :  { %10009 = vst [vmem:[#allocation69_spill] sm:$0xff] %v8700_v2 }
 0x6b4   :  { %v8671_v34 = vpop.f32.mrf.mxu2 }
 0x6b5   :  { %v8669_v27 = vpop.f32.mrf.mxu1  ;;  %9998 = vst [vmem:[#allocation7_spill] sm:$0xff] %v8671_v34  ;;  %v8692_v34 = vperm.slane %v2378_v43, 1 }
 0x6b6   :  { %9997 = vst [vmem:[#allocation58_spill] sm:$0xff] %v8669_v27  ;;  %v8690_v27 = vperm.slane %v2378_v43, 0 }
 0x6b7   :  { %v8667_v63 = vpop.f32.mrf.mxu0  ;;  %10007 = vst [vmem:[#allocation67_spill] sm:$0xff] %v8692_v34 }
 0x6b8   :  { %9996 = vst [vmem:[#allocation59_spill] sm:$0xff] %v8667_v63  ;;  %v8673_v41 = vpop.f32.mrf.mxu3 }
 0x6b9   :  { %9999 = vst [vmem:[#allocation8_spill] sm:$0xff] %v8673_v41 }
 0x6ba   :  { %10006 = vst [vmem:[#allocation66_spill] sm:$0xff] %v8690_v27 }
 0x6e4   :  { %v8675_v7 = vpop.f32.mrf.mxu0 }
 0x6e5   :  { %10000 = vst [vmem:[#allocation61_spill] sm:$0xff] %v8675_v7  ;;  %v8677_v28 = vpop.f32.mrf.mxu1  ;;  %v2606_v7 = vadd.f32 %v8482_v50, %v8690_v27  ;;  %v2608_v50 = vadd.f32 %v8499_v10, %v8690_v27 }
 0x6e6   :  { %10001 = vst [vmem:[#allocation9_spill] sm:$0xff] %v8677_v28 }
 0x6eb   :  { %v8679_v17 = vpop.f32.mrf.mxu2 }
 0x6ec   :  { %10002 = vst [vmem:[#allocation10_spill] sm:$0xff] %v8679_v17  ;;  %v8681_v23 = vpop.f32.mrf.mxu3  ;;  %v8686_v16 = vpop.f32.mrf.mxu0  ;;  %v2655_v17 = vadd.f32 %v8484_v60, %v8692_v34  ;;  %v2657_v60 = vadd.f32 %v8501_v35, %v8692_v34 }
 0x6ed   :  { %10003 = vst [vmem:[#allocation60_spill] sm:$0xff] %v8681_v23  ;;  %v8688_v63 = vpop.f32.mrf.mxu1 }
 0x6ee   :  { %10004 = vst [vmem:[#allocation63_spill] sm:$0xff] %v8686_v16 }
 0x6ef   :  { %10005 = vst [vmem:[#allocation62_spill] sm:$0xff] %v8688_v63 }
 0x6f3   :  { %v8702_v16 = vpop.f32.mrf.mxu2 }
 0x6f4   :  { %v8698_v28 = vpop.f32.mrf.mxu3  ;;  %v3074_v23 = vpop.f32.mrf.mxu0  ;;  %10010 = vst [vmem:[#allocation70_spill] sm:$0xff] %v8702_v16 }
 0x6f5   :  { %10008 = vst [vmem:[#allocation68_spill] sm:$0xff] %v8698_v28  ;;  %v3088_v41 = vpop.f32.mrf.mxu1  ;;  %v3121_v24 = vadd.f32 %v3074_v23, %v2606_v7 }
 0x6f6   :  { %v3122_v13 = vadd.f32 %v3088_v41, %v2655_v17 }
 0x6f7   :  { %v5666_v63 = vmul.f32 -1.442695, %v3121_v24 }
 0x6f8   :  { %v5668_v14 = vmul.f32 -1.442695, %v3122_v13  ;;  %v8710_v13 = vperm.slane %v2378_v43, 2 }
 0x6f9   :  { %6291 = vpow2.f32 %v5666_v63 }
 0x6fa   :  { %6293 = vpow2.f32 %v5668_v14  ;;  %10011 = vst [vmem:[#allocation71_spill] sm:$0xff] %v8710_v13  ;;  %v2704_v35 = vadd.f32 %v8493_v4, %v8710_v13 }
 0x6fb   :  { %v3102_v14 = vpop.f32.mrf.mxu2 }
 0x6fc   :  { %v3116_v28 = vpop.f32.mrf.mxu3  ;;  %v3076_v17 = vpop.f32.mrf.mxu0  ;;  %v3123_v43 = vadd.f32 %v3102_v14, %v2704_v35 }
 0x6fd   :  { %v3124_v7 = vadd.f32 %v3116_v28, %v2753_v32  ;;  %v3090_v41 = vpop.f32.mrf.mxu1  ;;  %v3125_v23 = vadd.f32 %v3076_v17, %v2608_v50  ;;  %v2755_v32 = vadd.f32 %v8513_v48, %v8700_v2  ;;  %v2706_v48 = vadd.f32 %v8511_v38, %v8710_v13 }
 0x6fe   :  { %v3126_v53 = vadd.f32 %v3090_v41, %v2657_v60 }
 0x6ff   :  { %v5670_v16 = vmul.f32 -1.442695, %v3124_v7  ;;  %v6292_v24 = vpop.eup %6291  ;;  %v5667_v63 = vmul.f32 -1.442695, %v3125_v23 }
 0x700   :  { %v6294_v20 = vpop.eup %6293  ;;  %v3135_v9 = vadd.f32 1.0, %v6292_v24  ;;  %v5669_v5 = vmul.f32 -1.442695, %v3126_v53 }
 0x701   :  { %6295 = vpow2.f32 %v5670_v16  ;;  %v3173_v10 = vadd.f32 1.0, %v6294_v20 }
 0x702   :  { %6297 = vpow2.f32 %v5667_v63  ;;  %v3146_v63 = vand.u32 2147483647, %v3135_v9  ;;  %v3148_v35 = vand.u32 2147483648, %v3135_v9  ;;  %vm3142_vm6 = vweird.f32 %v3135_v9 }
 0x703   :  { %6299 = vrcp.f32 %v3135_v9  ;;  %vm3180_vm5 = vweird.f32 %v3173_v10 }
 0x704   :  { %6301 = vrcp.f32 %v3173_v10  ;;  %v3118_v28 = vpop.f32.mrf.mxu3  ;;  %vm3147_vm8 = vcmp.eq.f32.partialorder %v3146_v63, 8.507059e+37 }
 0x705   :  { %6303 = vpow2.f32 %v5669_v5  ;;  %v3128_v50 = vadd.f32 %v3118_v28, %v2755_v32  ;;  %v3104_v5 = vpop.f32.mrf.mxu2 }
 0x706   :  { %6305 = vtanh.f32 %v3123_v43  ;;  %v3127_v38 = vadd.f32 %v3104_v5, %v2706_v48 }
 0x707   :  { %v6296_v60 = vpop.eup %6295  ;;  %v5671_v20 = vmul.f32 -1.442695, %v3128_v50  ;;  %v3186_v50 = vand.u32 2147483648, %v3173_v10 }
 0x708   :  { %v6298_v7 = vpop.eup %6297  ;;  %v8716_v17 = vadd.f32 1.0, %v6296_v60  ;;  %v3184_v60 = vand.u32 2147483647, %v3173_v10 }
 0x709   :  { %v6300_v16 = vpop.eup %6299  ;;  %v8718_v53 = vadd.f32 1.0, %v6298_v7  ;;  %v3187_v1 = vor.u32 1.1754944e-38, %v3186_v50 }
 0x70a   :  { %v6302_v41 = vpop.eup %6301  ;;  %v3138_v23 = vmul.f32 %v6300_v16, %v3135_v9  ;;  %vm3143_vm3 = vweird.f32 %v6300_v16  ;;  %vm3185_vm10 = vcmp.eq.f32.partialorder %v3184_v60, 8.507059e+37 }
 0x70b   :  { %v6304_v4 = vpop.eup %6303  ;;  %v3176_v24 = vmul.f32 %v6302_v41, %v3173_v10  ;;  %6307 = vrcp.f32 %v8718_v53  ;;  %vm3181_vm4 = vweird.f32 %v6302_v41  ;;  %vm3144_vm7 = vmor %vm3142_vm6, %vm3143_vm3  ;;  %v3161_v10 = vand.u32 2147483647, %v8718_v53 }
 0x70c   :  { %v3139_v14 = vsub.f32 1.0, %v3138_v23  ;;  %6309 = vrcp.f32 %v8716_v17  ;;  %v8724_v32 = vadd.f32 1.0, %v6304_v4  ;;  %v6306_v13 = vpop.eup %6305  ;;  %v3149_v4 = vor.u32 1.1754944e-38, %v3148_v35  ;;  %vm3182_vm9 = vmor %vm3180_vm5, %vm3181_vm4 }
 0x70d   :  { %v3177_v28 = vsub.f32 1.0, %v3176_v24  ;;  %6311 = vpow2.f32 %v5671_v20  ;;  %v3163_v9 = vand.u32 2147483648, %v8718_v53  ;;  %vm3157_vm14 = vweird.f32 %v8718_v53 }
 0x70e   :  { %v3140_v43 = vmul.f32 %v6300_v16, %v3139_v14  ;;  %6313 = vrcp.f32 %v8724_v32  ;;  %vm3162_vm1 = vcmp.eq.f32.partialorder %v3161_v10, 8.507059e+37  ;;  %vm3195_vm2 = vweird.f32 %v8724_v32 }
 0x70f   :  { %v3178_v7 = vmul.f32 %v6302_v41, %v3177_v28  ;;  %6315 = vtanh.f32 %v3127_v38  ;;  %v3201_v38 = vand.u32 2147483648, %v8724_v32  ;;  %vm3220_vm6 = vweird.f32 %v8716_v17 }
 0x710   :  { %v3141_v15 = vadd.f32 %v6300_v16, %v3140_v43 }
 0x711   :  { %v6308_v23 = vpop.eup %6307  ;;  %v3179_v24 = vadd.f32 %v6302_v41, %v3178_v7 }
 0x712   :  { %v8727_v2 = vpop.eup %6309  ;;  %v3145_v20 = vsel %vm3144_vm7, %v6300_v16, %v3141_v15  ;;  %v3153_v14 = vmul.f32 %v6308_v23, %v8718_v53  ;;  %vm3158_vm13 = vweird.f32 %v6308_v23 }
 0x713   :  { %v6312_v48 = vpop.eup %6311  ;;  %v3150_v5 = vsel %vm3147_vm8, %v3149_v4, %v3145_v20  ;;  %v3183_v28 = vsel %vm3182_vm9, %v6302_v41, %v3179_v24  ;;  %v3216_v16 = vmul.f32 %v8727_v2, %v8716_v17  ;;  %v10012_v24 = vmov 0.0   ;;  %vm3159_vm15 = vmor %vm3157_vm14, %vm3158_vm13 }
 0x714   :  { %v6314_v50 = vpop.eup %6313  ;;  %v3188_v43 = vsel %vm3185_vm10, %v3187_v1, %v3183_v28  ;;  %v3247_v63 = vmul.f32 %v6306_v13, %v3150_v5  ;;  %v3154_v35 = vsub.f32 1.0, %v3153_v14  ;;  %v8732_v7 = vadd.f32 1.0, %v6312_v48 }
 0x715   :  { %v3245_v58 = vmul.f32 0.0, %v3188_v43  ;;  %v3191_v15 = vmul.f32 %v6314_v50, %v8724_v32  ;;  %v6316_v13 = vpop.eup %6315  ;;  %v5684_v20 = vsel %vm5682_vm11, 1.0, %v10012_v24  ;;  %v5685_v14 = vsel %vm5683_vm12, 1.0, %v10012_v24 }
 0x716   :  { %v3155_v41 = vmul.f32 %v6308_v23, %v3154_v35  ;;  %6317 = vrcp.f32 %v8732_v7  ;;  %v3164_v5 = vor.u32 1.1754944e-38, %v3163_v9  ;;  %vm3196_vm0 = vweird.f32 %v6314_v50 }
 0x717   :  { %v8740_v60 = vadd.f32 %v3247_v63, %v3245_v58  ;;  %v3192_v1 = vsub.f32 1.0, %v3191_v15  ;;  %v3199_v28 = vand.u32 2147483647, %v8724_v32  ;;  %v3217_v43 = vsub.f32 1.0, %v3216_v16  ;;  %vm3197_vm3 = vmor %vm3195_vm2, %vm3196_vm0 }
 0x718   :  { %v3156_v4 = vadd.f32 %v6308_v23, %v3155_v41  ;;  %v5995_v63 = vpack.i.bf16 %v5685_v14, %v5684_v20  ;;  %v3202_v41 = vor.u32 1.1754944e-38, %v3201_v38  ;;  %vm3221_vm5 = vweird.f32 %v8727_v2 }
 0x719   :  { %v3193_v48 = vmul.f32 %v6314_v50, %v3192_v1  ;;  %vm3200_vm4 = vcmp.eq.f32.partialorder %v3199_v28, 8.507059e+37  ;;  %v3218_v45 = vmul.f32 %v8727_v2, %v3217_v43  ;;  %6319 = vtanh.f32 %v8740_v60  ;;  %vm3222_vm8 = vmor %vm3220_vm6, %vm3221_vm5 }
 0x71a   :  { %v3160_v58 = vsel %vm3159_vm15, %v6308_v23, %v3156_v4  ;;  %5996 = vperm.xlu1 %5989, %v5995_v63   ;;  %v3224_v4 = vand.u32 2147483647, %v8716_v17  ;;  %vm3235_vm9 = vweird.f32 %v8732_v7 }
 0x71b   :  { %v3165_v53 = vsel %vm3162_vm1, %v3164_v5, %v3160_v58  ;;  %v3194_v35 = vadd.f32 %v6314_v50, %v3193_v48  ;;  %v3219_v38 = vadd.f32 %v8727_v2, %v3218_v45 }
 0x71c   :  { %v6318_v15 = vpop.eup %6317  ;;  %v3248_v1 = vmul.f32 %v6316_v13, %v3165_v53  ;;  %v3241_v13 = vand.u32 2147483648, %v8732_v7  ;;  %vm3225_vm11 = vcmp.eq.f32.partialorder %v3224_v4, 8.507059e+37  ;;  %v10017_v4 = vld [vmem:[#allocation15_spill] sm:$0xff] }
 0x71d   :  { %v3198_v36 = vsel %vm3197_vm3, %v6314_v50, %v3194_v35  ;;  %v3231_v9 = vmul.f32 %v6318_v15, %v8732_v7  ;;  %vm3236_vm7 = vweird.f32 %v6318_v15  ;;  %v3223_v45 = vsel %vm3222_vm8, %v8727_v2, %v3219_v38  ;;  %v10015_v38 = vld [vmem:[#allocation20_spill] sm:$0xff] }
 0x71e   :  { %v3203_v24 = vsel %vm3200_vm4, %v3202_v41, %v3198_v36  ;;  %v3226_v36 = vand.u32 2147483648, %v8716_v17  ;;  %vm3237_vm10 = vmor %vm3235_vm9, %vm3236_vm7  ;;  %v3242_v5 = vor.u32 1.1754944e-38, %v3241_v13  ;;  %v2611_v2 = vadd.f32 %v8517_v56, %v8690_v27 }
 0x71f   :  { %v3246_v16 = vmul.f32 0.0, %v3203_v24  ;;  %v3232_v23 = vsub.f32 1.0, %v3231_v9  ;;  %v3239_v24 = vand.u32 2147483647, %v8732_v7  ;;  %v6320_v14 = vpop.eup %6319  ;;  %v10013_v7 = vld [vmem:[#allocation21_spill] sm:$0xff]  ;;  %v2662_v56 = vadd.f32 %v10017_v4, %v8692_v34 }
 0x720   :  { %v3227_v48 = vor.u32 1.1754944e-38, %v3226_v36  ;;  %v2660_v35 = vadd.f32 %v10013_v7, %v8692_v34  ;;  %v10026_v34 = vld [vmem:[#allocation24_spill] sm:$0xff] }
 0x721   :  { %v8751_v10 = vadd.f32 %v3248_v1, %v3246_v16  ;;  %v3233_v32 = vmul.f32 %v6318_v15, %v3232_v23  ;;  %vm3240_vm12 = vcmp.eq.f32.partialorder %v3239_v24, 8.507059e+37  ;;  %vm5692_vm7 = vcmp.gt.f32.partialorder %v10026_v34, 2.0 }
 0x722   :  { %v3228_v43 = vsel %vm3225_vm11, %v3227_v48, %v3223_v45 }
 0x723   :  { %6321 = vtanh.f32 %v8751_v10  ;;  %v3234_v50 = vadd.f32 %v6318_v15, %v3233_v32  ;;  %v8763_v63 = vmul.f32 %v6320_v14, %v3228_v43  ;;  %v10014_v32 = vld [vmem:[#allocation69_spill] sm:$0xff] }
 0x724   :  { %v2758_v36 = vadd.f32 %v10015_v38, %v10014_v32 }
 0x725   :  { %v3238_v20 = vsel %vm3237_vm10, %v6318_v15, %v3234_v50  ;;  %v10016_v50 = vld [vmem:[#allocation14_spill] sm:$0xff] }
 0x726   :  { %v3243_v58 = vsel %vm3240_vm12, %v3242_v5, %v3238_v20  ;;  %v2613_v13 = vadd.f32 %v10016_v50, %v8690_v27 }
 0x729   :  { %v6322_v28 = vpop.eup %6321 }
 0x72a   :  { %v8765_v53 = vmul.f32 %v6322_v28, %v3243_v58 }
 0x72c   :  { %v3285_v17 = vpack.c.bf16 %v8765_v53, %v8763_v63 }
 0x72e   :  { %3294 = vmatmul.bf16.vlgmr.msrb.gmra.mxu0 %v3285_v17  ;;  %3308 = vmatmul.bf16.vlgmr.msrb.gmra.mxu1 %v3285_v17 }
 0x72f   :  { %3322 = vmatmul.bf16.vlgmr.msra.gmra.mxu2 %v3285_v17  ;;  %3336 = vmatmul.bf16.vlgmr.msra.gmra.mxu3 %v3285_v17 }
 0x730   :  { %3730 = vmatpush.bf16.msrb.mxu0 %v8090_v49  ;;  %3744 = vmatpush.bf16.msrb.mxu1 %v8095_v40 }
 0x731   :  { %3758 = vmatpush.bf16.msra.mxu2 %v8119_v11  ;;  %3772 = vmatpush.bf16.msra.mxu3 %v8108_v57 }
 0x734   :  { %3731 = vmatpush.bf16.msrb.mxu0 %v8121_v62  ;;  %3745 = vmatpush.bf16.msrb.mxu1 %v8130_v21 }
 0x735   :  { %3759 = vmatpush.bf16.msra.mxu2 %v8155_v22  ;;  %3773 = vmatpush.bf16.msra.mxu3 %v8144_v6 }
 0x738   :  { %3732 = vmatpush.bf16.msrb.mxu0 %v8157_v8  ;;  %3746 = vmatpush.bf16.msrb.mxu1 %v8166_v0 }
 0x739   :  { %3760 = vmatpush.bf16.msra.mxu2 %v8185_v19  ;;  %3774 = vmatpush.bf16.msra.mxu3 %v8180_v44 }
 0x73c   :  { %3733 = vmatpush.bf16.msrb.mxu0 %v8198_v61  ;;  %3747 = vmatpush.bf16.msrb.mxu1 %v8209_v46 }
 0x73d   :  { %3761 = vmatpush.bf16.msra.mxu2 %v8279_v3  ;;  %3775 = vmatpush.bf16.msra.mxu3 %v8211_v33 }
 0x740   :  { %3734 = vmatpush.bf16.msrb.mxu0 %v8281_v31  ;;  %3748 = vmatpush.bf16.msrb.mxu1 %v8303_v59 }
 0x741   :  { %3762 = vmatpush.bf16.msra.mxu2 %v8363_v18  ;;  %3776 = vmatpush.bf16.msra.mxu3 %v8317_v39 }
 0x744   :  { %3735 = vmatpush.bf16.msrb.mxu0 %v8384_v37  ;;  %3749 = vmatpush.bf16.msrb.mxu1 %v8395_v55 }
 0x745   :  { %3763 = vmatpush.bf16.msra.mxu2 %v8424_v51  ;;  %3777 = vmatpush.bf16.msra.mxu3 %v8397_v42 }
 0x748   :  { %3736 = vmatpush.bf16.msrb.mxu0 %v8426_v25  ;;  %3750 = vmatpush.bf16.msrb.mxu1 %v8438_v47 }
 0x749   :  { %3764 = vmatpush.bf16.msra.mxu2 %v8452_v52  ;;  %3778 = vmatpush.bf16.msra.mxu3 %v8450_v29 }
 0x74c   :  { %3737 = vmatpush.bf16.msrb.mxu0 %v8455_v12  ;;  %3751 = vmatpush.bf16.msrb.mxu1 %v8466_v26 }
 0x74d   :  { %3765 = vmatpush.bf16.msra.mxu2 %v8472_v54  ;;  %3779 = vmatpush.bf16.msra.mxu3 %v8468_v30 }
 0x7ab   :  { %v3295_v15 = vpop.f32.mrf.mxu0  ;;  %v3309_v41 = vpop.f32.mrf.mxu1 }
 0x7ac   :  { %v3342_v1 = vadd.f32 %v3295_v15, %v2611_v2  ;;  %v3343_v9 = vadd.f32 %v3309_v41, %v2660_v35  ;;  %v10018_v41 = vld [vmem:[#allocation71_spill] sm:$0xff] }
 0x7ae   :  { %v5676_v16 = vmul.f32 -1.442695, %v3342_v1  ;;  %v5678_v23 = vmul.f32 -1.442695, %v3343_v9  ;;  %v10019_v1 = vld [vmem:[#allocation16_spill] sm:$0xff] }
 0x7af   :  { %v2709_v9 = vadd.f32 %v10019_v1, %v10018_v41 }
 0x7b0   :  { %6323 = vpow2.f32 %v5676_v16  ;;  %v10020_v16 = vld [vmem:[#allocation18_spill] sm:$0xff] }
 0x7b1   :  { %6325 = vpow2.f32 %v5678_v23  ;;  %v2760_v23 = vadd.f32 %v10020_v16, %v10014_v32 }
 0x7b2   :  { %v3337_v24 = vpop.f32.mrf.mxu3  ;;  %v3323_v28 = vpop.f32.mrf.mxu2 }
 0x7b3   :  { %v3345_v45 = vadd.f32 %v3337_v24, %v2758_v36  ;;  %v3297_v20 = vpop.f32.mrf.mxu0  ;;  %v3311_v14 = vpop.f32.mrf.mxu1  ;;  %v3344_v36 = vadd.f32 %v3323_v28, %v2709_v9 }
 0x7b4   :  { %v3346_v48 = vadd.f32 %v3297_v20, %v2613_v13  ;;  %v3347_v5 = vadd.f32 %v3311_v14, %v2662_v56 }
 0x7b5   :  { %v5680_v43 = vmul.f32 -1.442695, %v3345_v45 }
 0x7b6   :  { %v6324_v58 = vpop.eup %6323  ;;  %v5677_v17 = vmul.f32 -1.442695, %v3346_v48  ;;  %v5679_v35 = vmul.f32 -1.442695, %v3347_v5  ;;  %v10021_v5 = vld [vmem:[#allocation25_spill] sm:$0xff] }
 0x7b7   :  { %v6326_v2 = vpop.eup %6325  ;;  %v3356_v7 = vadd.f32 1.0, %v6324_v58  ;;  %6327 = vpow2.f32 %v5680_v43  ;;  %v2711_v43 = vadd.f32 %v10021_v5, %v10018_v41  ;;  %v10027_v5 = vld [vmem:[#allocation28_spill] sm:$0xff] }
 0x7b8   :  { %v3394_v15 = vadd.f32 1.0, %v6326_v2  ;;  %6329 = vpow2.f32 %v5677_v17  ;;  %vm5693_vm8 = vcmp.gt.f32.partialorder %v10027_v5, 2.0 }
 0x7b9   :  { %6331 = vrcp.f32 %v3356_v7  ;;  %v3367_v17 = vand.u32 2147483647, %v3356_v7  ;;  %v3369_v1 = vand.u32 2147483648, %v3356_v7  ;;  %vm3363_vm13 = vweird.f32 %v3356_v7 }
 0x7ba   :  { %6333 = vrcp.f32 %v3394_v15  ;;  %v3339_v38 = vpop.f32.mrf.mxu3  ;;  %v3325_v20 = vpop.f32.mrf.mxu2  ;;  %v3405_v16 = vand.u32 2147483647, %v3394_v15  ;;  %vm3401_vm14 = vweird.f32 %v3394_v15 }
 0x7bb   :  { %6335 = vpow2.f32 %v5679_v35  ;;  %v3349_v50 = vadd.f32 %v3339_v38, %v2760_v23  ;;  %v3407_v35 = vand.u32 2147483648, %v3394_v15  ;;  %v3348_v38 = vadd.f32 %v3325_v20, %v2711_v43 }
 0x7bc   :  { %6337 = vtanh.f32 %v3344_v36  ;;  %vm8826_vm1 = vcmp.eq.f32.partialorder %v3367_v17, 8.507059e+37  ;;  %vm8832_vm2 = vcmp.eq.f32.partialorder %v3405_v16, 8.507059e+37 }
 0x7bd   :  { %v6328_v13 = vpop.eup %6327  ;;  %v5681_v14 = vmul.f32 -1.442695, %v3349_v50 }
 0x7be   :  { %v6330_v4 = vpop.eup %6329  ;;  %v8815_v56 = vadd.f32 1.0, %v6328_v13 }
 0x7bf   :  { %v6332_v24 = vpop.eup %6331  ;;  %v8817_v45 = vadd.f32 1.0, %v6330_v4 }
 0x7c0   :  { %v6334_v48 = vpop.eup %6333  ;;  %v3359_v58 = vmul.f32 %v6332_v24, %v3356_v7  ;;  %6339 = vrcp.f32 %v8815_v56  ;;  %vm3364_vm15 = vweird.f32 %v6332_v24  ;;  %vm3441_vm6 = vweird.f32 %v8815_v56 }
 0x7c1   :  { %v6336_v28 = vpop.eup %6335  ;;  %v3397_v2 = vmul.f32 %v6334_v48, %v3394_v15  ;;  %6341 = vrcp.f32 %v8817_v45  ;;  %vm3402_vm0 = vweird.f32 %v6334_v48  ;;  %vm3365_vm3 = vmor %vm3363_vm13, %vm3364_vm15  ;;  %vm3378_vm4 = vweird.f32 %v8817_v45 }
 0x7c2   :  { %v3360_v9 = vsub.f32 1.0, %v3359_v58  ;;  %v8823_v23 = vadd.f32 1.0, %v6336_v28  ;;  %6343 = vpow2.f32 %v5681_v14  ;;  %v6338_v13 = vpop.eup %6337  ;;  %v3370_v58 = vor.u32 1.1754944e-38, %v3369_v1  ;;  %vm3403_vm5 = vmor %vm3401_vm14, %vm3402_vm0 }
 0x7c3   :  { %v3398_v36 = vsub.f32 1.0, %v3397_v2  ;;  %v3408_v28 = vor.u32 1.1754944e-38, %v3407_v35  ;;  %v3382_v1 = vand.u32 2147483647, %v8817_v45  ;;  %v3384_v16 = vand.u32 2147483648, %v8817_v45 }
 0x7c4   :  { %v3361_v50 = vmul.f32 %v6332_v24, %v3360_v9  ;;  %6345 = vrcp.f32 %v8823_v23  ;;  %v3447_v7 = vand.u32 2147483648, %v8815_v56  ;;  %vm3416_vm14 = vweird.f32 %v8823_v23 }
 0x7c5   :  { %v3399_v4 = vmul.f32 %v6334_v48, %v3398_v36  ;;  %6347 = vtanh.f32 %v3348_v38  ;;  %v8846_v36 = vpop.permute.xlu1 %5991  ;;  %v3385_v43 = vor.u32 1.1754944e-38, %v3384_v16  ;;  %vm3383_vm13 = vcmp.eq.f32.partialorder %v3382_v1, 8.507059e+37 }
 0x7c6   :  { %v8830_v41 = vpop.eup %6339  ;;  %v3362_v20 = vadd.f32 %v6332_v24, %v3361_v50  ;;  %v3445_v16 = vand.u32 2147483647, %v8815_v56 }
 0x7c7   :  { %v6342_v14 = vpop.eup %6341  ;;  %v3400_v2 = vadd.f32 %v6334_v48, %v3399_v4  ;;  %v3437_v17 = vmul.f32 %v8830_v41, %v8815_v56  ;;  %vm3442_vm10 = vweird.f32 %v8830_v41  ;;  %v5993_v56 = vunpack.i.l.bf16 %v8846_v36 }
 0x7c8   :  { %v3366_v35 = vsel %vm3365_vm3, %v6332_v24, %v3362_v20  ;;  %v3374_v9 = vmul.f32 %v6342_v14, %v8817_v45  ;;  %v6344_v38 = vpop.eup %6343  ;;  %vm3379_vm9 = vweird.f32 %v6342_v14  ;;  %vm8879_vm15 = vmor %vm3441_vm6, %vm3442_vm10 }
 0x7c9   :  { %v3371_v50 = vsel %vm8826_vm1, %v3370_v58, %v3366_v35  ;;  %v3404_v4 = vsel %vm3403_vm5, %v6334_v48, %v3400_v2  ;;  %v3438_v32 = vsub.f32 1.0, %v3437_v17  ;;  %v8853_v30 = vadd.f32 1.0, %v6344_v38  ;;  %vm3380_vm12 = vmor %vm3378_vm4, %vm3379_vm9 }
 0x7ca   :  { %v6346_v15 = vpop.eup %6345  ;;  %v3409_v24 = vsel %vm8832_vm2, %v3408_v28, %v3404_v4  ;;  %v3468_v20 = vmul.f32 %v6338_v13, %v3371_v50  ;;  %v3375_v27 = vsub.f32 1.0, %v3374_v9  ;;  %v3422_v58 = vand.u32 2147483648, %v8823_v23 }
 0x7cb   :  { %v3466_v54 = vmul.f32 %v3409_v24, %v8740_v60  ;;  %v3412_v26 = vmul.f32 %v6346_v15, %v8823_v23  ;;  %v3439_v12 = vmul.f32 %v8830_v41, %v3438_v32  ;;  %v6348_v48 = vpop.eup %6347  ;;  %6349 = vrcp.f32 %v8853_v30 }
 0x7cc   :  { %v3376_v2 = vmul.f32 %v6342_v14, %v3375_v27  ;;  %v10028_v35 = vmov 0.0   ;;  %vm3417_vm11 = vweird.f32 %v6346_v15  ;;  %v3448_v24 = vor.u32 1.1754944e-38, %v3447_v7 }
 0x7cd   :  { %v8861_v28 = vadd.f32 %v3468_v20, %v3466_v54  ;;  %v3413_v13 = vsub.f32 1.0, %v3412_v26  ;;  %v3440_v17 = vadd.f32 %v8830_v41, %v3439_v12  ;;  %v5694_v32 = vsel %vm5692_vm7, 1.0, %v10028_v35  ;;  %v5997_v50 = vpop.permute.xlu1 %5996  ;;  %vm3418_vm0 = vmor %vm3416_vm14, %vm3417_vm11 }
 0x7ce   :  { %v3377_v60 = vadd.f32 %v6342_v14, %v3376_v2  ;;  %v5695_v9 = vsel %vm5693_vm8, 1.0, %v10028_v35  ;;  %v3420_v26 = vand.u32 2147483647, %v8823_v23  ;;  %vm3446_vm2 = vcmp.eq.f32.partialorder %v3445_v16, 8.507059e+37 }
 0x7cf   :  { %6351 = vtanh.f32 %v8861_v28  ;;  %v3414_v27 = vmul.f32 %v6346_v15, %v3413_v13  ;;  %v6001_v12 = vpack.i.bf16 %v5695_v9, %v5694_v32  ;;  %v3444_v1 = vsel %vm8879_vm15, %v8830_v41, %v3440_v17 }
 0x7d0   :  { %v3381_v54 = vsel %vm3380_vm12, %v6342_v14, %v3377_v60  ;;  %v3423_v14 = vor.u32 1.1754944e-38, %v3422_v58  ;;  %vm3421_vm1 = vcmp.eq.f32.partialorder %v3420_v26, 8.507059e+37  ;;  %v5998_v13 = vunpack.i.l.bf16 %v5997_v50 }
 0x7d1   :  { %v3386_v34 = vsel %vm3383_vm13, %v3385_v43, %v3381_v54  ;;  %v3415_v38 = vadd.f32 %v6346_v15, %v3414_v27  ;;  %v6350_v45 = vpop.eup %6349  ;;  %6002 = vperm.xlu2 %6000, %v6001_v12   ;;  %v3449_v32 = vsel %vm3446_vm2, %v3448_v24, %v3444_v1  ;;  %v3273_v7 = vmul.f32 %v5993_v56, %v8763_v63  ;;  %v10037_v56 = vld [vmem:[#allocation67_spill] sm:$0xff] }
 0x7d2   :  { %v3469_v20 = vmul.f32 %v6348_v48, %v3386_v34  ;;  %v3452_v5 = vmul.f32 %v6350_v45, %v8853_v30  ;;  %vm3457_vm3 = vweird.f32 %v6350_v45  ;;  %v3462_v17 = vand.u32 2147483648, %v8853_v30 }
 0x7d3   :  { %v3419_v23 = vsel %vm3418_vm0, %v6346_v15, %v3415_v38  ;;  %vm3456_vm4 = vweird.f32 %v8853_v30  ;;  %v3460_v26 = vand.u32 2147483647, %v8853_v30  ;;  %v5994_v12 = vunpack.i.h.bf16 %v8846_v36  ;;  %v10031_v30 = vld [vmem:[#allocation11_spill] sm:$0xff]  ;;  %v10033_v36 = vld [vmem:[#allocation13_spill] sm:$0xff] }
 0x7d4   :  { %v3424_v2 = vsel %vm3421_vm1, %v3423_v14, %v3419_v23  ;;  %v3453_v58 = vsub.f32 1.0, %v3452_v5  ;;  %vm3458_vm5 = vmor %vm3456_vm4, %vm3457_vm3  ;;  %v3463_v16 = vor.u32 1.1754944e-38, %v3462_v17  ;;  %v5999_v34 = vunpack.i.h.bf16 %v5997_v50  ;;  %v10034_v50 = vld [vmem:[#allocation12_spill] sm:$0xff]  ;;  %v10041_v17 = vld [vmem:[#allocation33_spill] sm:$0xff] }
 0x7d5   :  { %v6352_v43 = vpop.eup %6351  ;;  %v3467_v60 = vmul.f32 %v3424_v2, %v8751_v10  ;;  %vm3461_vm6 = vcmp.eq.f32.partialorder %v3460_v26, 8.507059e+37  ;;  %v3274_v14 = vmul.f32 %v5994_v12, %v8765_v53  ;;  %v10032_v53 = vld [vmem:[#allocation17_spill] sm:$0xff] }
 0x7d6   :  { %v3474_v9 = vmul.f32 %v6352_v43, %v3449_v32  ;;  %v3454_v41 = vmul.f32 %v6350_v45, %v3453_v58  ;;  %v10038_v2 = vld [vmem:[#allocation29_spill] sm:$0xff] }
 0x7d7   :  { %v8889_v27 = vadd.f32 %v3469_v20, %v3467_v60  ;;  %v10036_v20 = vld [vmem:[#allocation19_spill] sm:$0xff] }
 0x7d8   :  { %v3495_v15 = vmul.f32 %v5998_v13, %v3474_v9  ;;  %v3455_v48 = vadd.f32 %v6350_v45, %v3454_v41  ;;  %v2665_v13 = vadd.f32 %v10038_v2, %v10037_v56 }
 0x7d9   :  { %6353 = vtanh.f32 %v8889_v27 }
 0x7da   :  { %v8896_v10 = vadd.f32 %v3495_v15, %v3273_v7  ;;  %v3459_v54 = vsel %vm3458_vm5, %v6350_v45, %v3455_v48  ;;  %v10035_v45 = vld [vmem:[#allocation66_spill] sm:$0xff]  ;;  %v10039_v7 = vld [vmem:[#allocation69_spill] sm:$0xff]  ;;  %v10040_v15 = vld [vmem:[#allocation23_spill] sm:$0xff] }
 0x7db   :  { %v3464_v38 = vsel %vm3461_vm6, %v3463_v16, %v3459_v54  ;;  %v2616_v5 = vadd.f32 %v10036_v20, %v10035_v45  ;;  %v2763_v48 = vadd.f32 %v10040_v15, %v10039_v7  ;;  %v2618_v26 = vadd.f32 %v10041_v17, %v10035_v45  ;;  %v10042_v54 = vld [vmem:[#allocation26_spill] sm:$0xff] }
 0x7dc   :  { %v2667_v16 = vadd.f32 %v10042_v54, %v10037_v56 }
 0x7df   :  { %v6354_v63 = vpop.eup %6353 }
 0x7e0   :  { %v3475_v4 = vmul.f32 %v6354_v63, %v3464_v38 }
 0x7e2   :  { %v3496_v1 = vmul.f32 %v5999_v34, %v3475_v4  ;;  %v3507_v24 = vpack.c.bf16 %v3475_v4, %v3474_v9 }
 0x7e4   :  { %v8900_v23 = vadd.f32 %v3496_v1, %v3274_v14  ;;  %3516 = vmatmul.bf16.vlgmr.msra.gmra.mxu0 %v3507_v24  ;;  %3530 = vmatmul.bf16.vlgmr.msra.gmra.mxu1 %v3507_v24 }
 0x7e5   :  { %3544 = vmatmul.bf16.vlgmr.msrb.gmra.mxu2 %v3507_v24  ;;  %3558 = vmatmul.bf16.vlgmr.msrb.gmra.mxu3 %v3507_v24 }
 0x7e6   :  { %3952 = vmatpush.bf16.msra.mxu0 %v8090_v49  ;;  %3966 = vmatpush.bf16.msra.mxu1 %v8095_v40 }
 0x7e7   :  { %3980 = vmatpush.bf16.msrb.mxu2 %v8119_v11  ;;  %3994 = vmatpush.bf16.msrb.mxu3 %v8108_v57 }
 0x7ea   :  { %3953 = vmatpush.bf16.msra.mxu0 %v8121_v62  ;;  %3967 = vmatpush.bf16.msra.mxu1 %v8130_v21 }
 0x7eb   :  { %3981 = vmatpush.bf16.msrb.mxu2 %v8155_v22  ;;  %3995 = vmatpush.bf16.msrb.mxu3 %v8144_v6 }
 0x7ee   :  { %3954 = vmatpush.bf16.msra.mxu0 %v8157_v8  ;;  %3968 = vmatpush.bf16.msra.mxu1 %v8166_v0 }
 0x7ef   :  { %3982 = vmatpush.bf16.msrb.mxu2 %v8185_v19  ;;  %3996 = vmatpush.bf16.msrb.mxu3 %v8180_v44 }
 0x7f2   :  { %3955 = vmatpush.bf16.msra.mxu0 %v8198_v61  ;;  %3969 = vmatpush.bf16.msra.mxu1 %v8209_v46 }
 0x7f3   :  { %3983 = vmatpush.bf16.msrb.mxu2 %v8279_v3  ;;  %3997 = vmatpush.bf16.msrb.mxu3 %v8211_v33 }
 0x7f6   :  { %3956 = vmatpush.bf16.msra.mxu0 %v8281_v31  ;;  %3970 = vmatpush.bf16.msra.mxu1 %v8303_v59 }
 0x7f7   :  { %3984 = vmatpush.bf16.msrb.mxu2 %v8363_v18  ;;  %3998 = vmatpush.bf16.msrb.mxu3 %v8317_v39 }
 0x7fa   :  { %3957 = vmatpush.bf16.msra.mxu0 %v8384_v37  ;;  %3971 = vmatpush.bf16.msra.mxu1 %v8395_v55 }
 0x7fb   :  { %3985 = vmatpush.bf16.msrb.mxu2 %v8424_v51  ;;  %3999 = vmatpush.bf16.msrb.mxu3 %v8397_v42 }
 0x7fe   :  { %3958 = vmatpush.bf16.msra.mxu0 %v8426_v25  ;;  %3972 = vmatpush.bf16.msra.mxu1 %v8438_v47 }
 0x7ff   :  { %3986 = vmatpush.bf16.msrb.mxu2 %v8452_v52  ;;  %4000 = vmatpush.bf16.msrb.mxu3 %v8450_v29 }
 0x802   :  { %3959 = vmatpush.bf16.msra.mxu0 %v10031_v30  ;;  %3973 = vmatpush.bf16.msra.mxu1 %v10032_v53 }
 0x803   :  { %3987 = vmatpush.bf16.msrb.mxu2 %v10033_v36  ;;  %4001 = vmatpush.bf16.msrb.mxu3 %v10034_v50 }
 0x861   :  { %v3517_v43 = vpop.f32.mrf.mxu0  ;;  %v3531_v60 = vpop.f32.mrf.mxu1 }
 0x862   :  { %v3564_v58 = vadd.f32 %v3517_v43, %v2616_v5  ;;  %v3565_v32 = vadd.f32 %v3531_v60, %v2665_v13 }
 0x864   :  { %v5686_v9 = vmul.f32 -1.442695, %v3564_v58  ;;  %v5688_v41 = vmul.f32 -1.442695, %v3565_v32  ;;  %v10043_v58 = vld [vmem:[#allocation71_spill] sm:$0xff]  ;;  %v10044_v32 = vld [vmem:[#allocation22_spill] sm:$0xff] }
 0x866   :  { %6355 = vpow2.f32 %v5686_v9  ;;  %v2714_v9 = vadd.f32 %v10044_v32, %v10043_v58 }
 0x867   :  { %6357 = vpow2.f32 %v5688_v41  ;;  %v10045_v41 = vld [vmem:[#allocation37_spill] sm:$0xff] }
 0x868   :  { %v3559_v12 = vpop.f32.mrf.mxu3  ;;  %v3545_v1 = vpop.f32.mrf.mxu2  ;;  %v2765_v15 = vadd.f32 %v10045_v41, %v10039_v7 }
 0x869   :  { %v3567_v34 = vadd.f32 %v3559_v12, %v2763_v48  ;;  %v3519_v63 = vpop.f32.mrf.mxu0  ;;  %v3533_v38 = vpop.f32.mrf.mxu1  ;;  %v3566_v17 = vadd.f32 %v3545_v1, %v2714_v9 }
 0x86a   :  { %v3568_v4 = vadd.f32 %v3519_v63, %v2618_v26  ;;  %v3569_v14 = vadd.f32 %v3533_v38, %v2667_v16 }
 0x86b   :  { %v5690_v24 = vmul.f32 -1.442695, %v3567_v34 }
 0x86c   :  { %v6356_v20 = vpop.eup %6355  ;;  %v5687_v5 = vmul.f32 -1.442695, %v3568_v4  ;;  %v5689_v43 = vmul.f32 -1.442695, %v3569_v14 }
 0x86d   :  { %v6358_v2 = vpop.eup %6357  ;;  %v3578_v13 = vadd.f32 1.0, %v6356_v20  ;;  %6359 = vpow2.f32 %v5690_v24  ;;  %v10046_v24 = vld [vmem:[#allocation27_spill] sm:$0xff] }
 0x86e   :  { %v3616_v60 = vadd.f32 1.0, %v6358_v2  ;;  %6361 = vpow2.f32 %v5687_v5  ;;  %v2716_v20 = vadd.f32 %v10046_v24, %v10043_v58 }
 0x86f   :  { %6363 = vrcp.f32 %v3578_v13  ;;  %v3589_v2 = vand.u32 2147483647, %v3578_v13  ;;  %v3591_v9 = vand.u32 2147483648, %v3578_v13  ;;  %vm3585_vm7 = vweird.f32 %v3578_v13 }
 0x870   :  { %6365 = vrcp.f32 %v3616_v60  ;;  %v3561_v48 = vpop.f32.mrf.mxu3  ;;  %v3547_v38 = vpop.f32.mrf.mxu2  ;;  %v3629_v32 = vand.u32 2147483648, %v3616_v60  ;;  %vm3623_vm8 = vweird.f32 %v3616_v60 }
 0x871   :  { %6367 = vpow2.f32 %v5689_v43  ;;  %v3571_v26 = vadd.f32 %v3561_v48, %v2765_v15  ;;  %v3627_v15 = vand.u32 2147483647, %v3616_v60  ;;  %vm8959_vm11 = vcmp.eq.f32.partialorder %v3589_v2, 8.507059e+37 }
 0x872   :  { %6369 = vtanh.f32 %v3566_v17  ;;  %v3570_v17 = vadd.f32 %v3547_v38, %v2716_v20 }
 0x873   :  { %v6360_v54 = vpop.eup %6359  ;;  %v5691_v4 = vmul.f32 -1.442695, %v3571_v26  ;;  %vm8965_vm12 = vcmp.eq.f32.partialorder %v3627_v15, 8.507059e+37 }
 0x874   :  { %v6362_v16 = vpop.eup %6361  ;;  %v8948_v12 = vadd.f32 1.0, %v6360_v54 }
 0x875   :  { %v6364_v34 = vpop.eup %6363  ;;  %v8950_v63 = vadd.f32 1.0, %v6362_v16 }
 0x876   :  { %v6366_v14 = vpop.eup %6365  ;;  %v3581_v5 = vmul.f32 %v6364_v34, %v3578_v13  ;;  %6371 = vrcp.f32 %v8948_v12  ;;  %vm3586_vm9 = vweird.f32 %v6364_v34  ;;  %vm3663_vm0 = vweird.f32 %v8948_v12 }
 0x877   :  { %v6368_v1 = vpop.eup %6367  ;;  %v3619_v43 = vmul.f32 %v6366_v14, %v3616_v60  ;;  %6373 = vrcp.f32 %v8950_v63  ;;  %vm3624_vm10 = vweird.f32 %v6366_v14  ;;  %vm3587_vm13 = vmor %vm3585_vm7, %vm3586_vm9  ;;  %vm3600_vm14 = vweird.f32 %v8950_v63  ;;  %v8984_v60 = vld [vmem:[%s9715_s1] sm:$0xff] }
 0x878   :  { %v3582_v41 = vsub.f32 1.0, %v3581_v5  ;;  %v8956_v48 = vadd.f32 1.0, %v6368_v1  ;;  %6375 = vpow2.f32 %v5691_v4  ;;  %v6370_v16 = vpop.eup %6369  ;;  %v3592_v5 = vor.u32 1.1754944e-38, %v3591_v9  ;;  %vm3625_vm15 = vmor %vm3623_vm8, %vm3624_vm10 }
 0x879   :  { %v3620_v26 = vsub.f32 1.0, %v3619_v43  ;;  %v3630_v1 = vor.u32 1.1754944e-38, %v3629_v32  ;;  %v3604_v9 = vand.u32 2147483647, %v8950_v63  ;;  %v3606_v15 = vand.u32 2147483648, %v8950_v63 }
 0x87a   :  { %v3583_v54 = vmul.f32 %v6364_v34, %v3582_v41  ;;  %6377 = vrcp.f32 %v8956_v48  ;;  %v3669_v13 = vand.u32 2147483648, %v8948_v12  ;;  %vm5702_vm1 = vcmp.gt.f32.partialorder %v8984_v60, 3.0 }
 0x87b   :  { %v3621_v24 = vmul.f32 %v6366_v14, %v3620_v26  ;;  %6379 = vtanh.f32 %v3570_v17  ;;  %vm3605_vm7 = vcmp.eq.f32.partialorder %v3604_v9, 8.507059e+37  ;;  %vm3638_vm8 = vweird.f32 %v8956_v48 }
 0x87c   :  { %v8963_v7 = vpop.eup %6371  ;;  %v3584_v38 = vadd.f32 %v6364_v34, %v3583_v54 }
 0x87d   :  { %v6374_v4 = vpop.eup %6373  ;;  %v3622_v43 = vadd.f32 %v6366_v14, %v3621_v24  ;;  %v3659_v2 = vmul.f32 %v8963_v7, %v8948_v12  ;;  %vm3664_vm4 = vweird.f32 %v8963_v7 }
 0x87e   :  { %v3588_v32 = vsel %vm3587_vm13, %v6364_v34, %v3584_v38  ;;  %v3596_v41 = vmul.f32 %v6374_v4, %v8950_v63  ;;  %v6376_v17 = vpop.eup %6375  ;;  %vm3601_vm3 = vweird.f32 %v6374_v4  ;;  %vm9020_vm9 = vmor %vm3663_vm0, %vm3664_vm4 }
 0x87f   :  { %v3593_v26 = vsel %vm8959_vm11, %v3592_v5, %v3588_v32  ;;  %v3626_v54 = vsel %vm3625_vm15, %v6366_v14, %v3622_v43  ;;  %v3660_v24 = vsub.f32 1.0, %v3659_v2  ;;  %v8989_v50 = vadd.f32 1.0, %v6376_v17  ;;  %v8997_v43 = vld [vmem:[%s9715_s1 + $0x8] sm:$0xff]  ;;  %vm3602_vm6 = vmor %vm3600_vm14, %vm3601_vm3 }
 0x880   :  { %v6378_v34 = vpop.eup %6377  ;;  %v3631_v38 = vsel %vm8965_vm12, %v3630_v1, %v3626_v54  ;;  %v3690_v56 = vmul.f32 %v6370_v16, %v3593_v26  ;;  %v3597_v45 = vsub.f32 1.0, %v3596_v41  ;;  %10051 = vst [vmem:[#allocation21_spill] sm:$0xff] %v8997_v43  ;;  %vm5703_vm2 = vcmp.gt.f32.partialorder %v8997_v43, 3.0 }
 0x881   :  { %v3688_v58 = vmul.f32 %v3631_v38, %v8861_v28  ;;  %v3634_v14 = vmul.f32 %v6378_v34, %v8956_v48  ;;  %v3661_v5 = vmul.f32 %v8963_v7, %v3660_v24  ;;  %v6380_v2 = vpop.eup %6379  ;;  %v3644_v1 = vand.u32 2147483648, %v8956_v48 }
 0x882   :  { %v3598_v16 = vmul.f32 %v6374_v4, %v3597_v45  ;;  %6381 = vrcp.f32 %v8989_v50  ;;  %v3607_v32 = vor.u32 1.1754944e-38, %v3606_v15  ;;  %v5704_v26 = vsel %vm5702_vm1, 1.0, %v10028_v35 }
 0x883   :  { %v9002_v20 = vadd.f32 %v3690_v56, %v3688_v58  ;;  %v3635_v28 = vsub.f32 1.0, %v3634_v14  ;;  %v3662_v17 = vadd.f32 %v8963_v7, %v3661_v5  ;;  %v5705_v54 = vsel %vm5703_vm2, 1.0, %v10028_v35  ;;  %v6003_v5 = vpop.permute.xlu2 %6002 }
 0x884   :  { %v3599_v41 = vadd.f32 %v6374_v4, %v3598_v16  ;;  %vm3639_vm5 = vweird.f32 %v6378_v34  ;;  %v3642_v56 = vand.u32 2147483647, %v8956_v48  ;;  %v3667_v24 = vand.u32 2147483647, %v8948_v12 }
 0x885   :  { %6383 = vtanh.f32 %v9002_v20  ;;  %v3636_v45 = vmul.f32 %v6378_v34, %v3635_v28  ;;  %v6006_v38 = vpack.i.bf16 %v5705_v54, %v5704_v26  ;;  %vm3640_vm10 = vmor %vm3638_vm8, %vm3639_vm5  ;;  %v3666_v9 = vsel %vm9020_vm9, %v8963_v7, %v3662_v17 }
 0x886   :  { %v3603_v15 = vsel %vm3602_vm6, %v6374_v4, %v3599_v41  ;;  %v3645_v4 = vor.u32 1.1754944e-38, %v3644_v1  ;;  %v3670_v28 = vor.u32 1.1754944e-38, %v3669_v13  ;;  %vm3643_vm11 = vcmp.eq.f32.partialorder %v3642_v56, 8.507059e+37 }
 0x887   :  { %v3608_v58 = vsel %vm3605_vm7, %v3607_v32, %v3603_v15  ;;  %v3637_v14 = vadd.f32 %v6378_v34, %v3636_v45  ;;  %6007 = vperm.xlu2 %6000, %v6006_v38   ;;  %v6004_v12 = vunpack.i.l.bf16 %v6003_v5  ;;  %vm3668_vm12 = vcmp.eq.f32.partialorder %v3667_v24, 8.507059e+37 }
 0x888   :  { %v6382_v63 = vpop.eup %6381  ;;  %v3691_v32 = vmul.f32 %v6380_v2, %v3608_v58  ;;  %v3671_v35 = vsel %vm3668_vm12, %v3670_v28, %v3666_v9  ;;  %vm3678_vm14 = vweird.f32 %v8989_v50  ;;  %v3682_v2 = vand.u32 2147483647, %v8989_v50  ;;  %v10058_v28 = vld [vmem:[#allocation36_spill] sm:$0xff] }
 0x889   :  { %v3641_v48 = vsel %vm3640_vm10, %v6378_v34, %v3637_v14  ;;  %v3674_v41 = vmul.f32 %v6382_v63, %v8989_v50  ;;  %vm3679_vm13 = vweird.f32 %v6382_v63  ;;  %v3684_v34 = vand.u32 2147483648, %v8989_v50  ;;  %v10056_v50 = vld [vmem:[#allocation32_spill] sm:$0xff] }
 0x88a   :  { %v3646_v26 = vsel %vm3643_vm11, %v3645_v4, %v3641_v48  ;;  %vm3680_vm15 = vmor %vm3678_vm14, %vm3679_vm13  ;;  %v6005_v56 = vunpack.i.h.bf16 %v6003_v5  ;;  %vm3683_vm0 = vcmp.eq.f32.partialorder %v3682_v2, 8.507059e+37  ;;  %vm5712_vm11 = vcmp.gt.f32.partialorder %v8984_v60, 4.0 }
 0x88b   :  { %v6384_v54 = vpop.eup %6383  ;;  %v3689_v45 = vmul.f32 %v3646_v26, %v8889_v27  ;;  %v3675_v15 = vsub.f32 1.0, %v3674_v41 }
 0x88c   :  { %v3696_v1 = vmul.f32 %v6384_v54, %v3671_v35  ;;  %v3685_v35 = vor.u32 1.1754944e-38, %v3684_v34  ;;  %v10062_v34 = vld [vmem:[#allocation34_spill] sm:$0xff] }
 0x88d   :  { %v9029_v43 = vadd.f32 %v3691_v32, %v3689_v45  ;;  %v3676_v16 = vmul.f32 %v6382_v63, %v3675_v15  ;;  %v10059_v15 = vld [vmem:[#allocation69_spill] sm:$0xff] }
 0x88e   :  { %v3717_v7 = vmul.f32 %v6004_v12, %v3696_v1 }
 0x88f   :  { %6385 = vtanh.f32 %v9029_v43  ;;  %v3677_v13 = vadd.f32 %v6382_v63, %v3676_v16 }
 0x890   :  { %v9036_v17 = vadd.f32 %v3717_v7, %v8896_v10  ;;  %v10054_v10 = vld [vmem:[#allocation12_spill] sm:$0xff]  ;;  %v10061_v7 = vld [vmem:[#allocation41_spill] sm:$0xff] }
 0x891   :  { %v3681_v27 = vsel %vm3680_vm15, %v6382_v63, %v3677_v13  ;;  %v10057_v63 = vld [vmem:[#allocation67_spill] sm:$0xff] }
 0x892   :  { %v3686_v38 = vsel %vm3683_vm0, %v3685_v35, %v3681_v27  ;;  %v2670_v48 = vadd.f32 %v10058_v28, %v10057_v63  ;;  %v2672_v2 = vadd.f32 %v10062_v34, %v10057_v63 }
 0x895   :  { %v6386_v24 = vpop.eup %6385 }
 0x896   :  { %v3697_v58 = vmul.f32 %v6386_v24, %v3686_v38 }
 0x898   :  { %v3718_v14 = vmul.f32 %v6005_v56, %v3697_v58  ;;  %v3729_v4 = vpack.c.bf16 %v3697_v58, %v3696_v1  ;;  %v10060_v1 = vld [vmem:[#allocation31_spill] sm:$0xff] }
 0x899   :  { %v2768_v16 = vadd.f32 %v10060_v1, %v10059_v15 }
 0x89a   :  { %v9039_v9 = vadd.f32 %v3718_v14, %v8900_v23  ;;  %3738 = vmatmul.bf16.vlgmr.msrb.gmra.mxu0 %v3729_v4  ;;  %3752 = vmatmul.bf16.vlgmr.msrb.gmra.mxu1 %v3729_v4  ;;  %v10055_v23 = vld [vmem:[#allocation66_spill] sm:$0xff] }
 0x89b   :  { %3766 = vmatmul.bf16.vlgmr.msra.gmra.mxu2 %v3729_v4  ;;  %3780 = vmatmul.bf16.vlgmr.msra.gmra.mxu3 %v3729_v4  ;;  %v2621_v5 = vadd.f32 %v10056_v50, %v10055_v23  ;;  %v2623_v13 = vadd.f32 %v10061_v7, %v10055_v23 }
 0x89c   :  { %4174 = vmatpush.bf16.msrb.mxu0 %v8090_v49  ;;  %4188 = vmatpush.bf16.msrb.mxu1 %v8095_v40 }
 0x89d   :  { %4202 = vmatpush.bf16.msra.mxu2 %v8119_v11  ;;  %4216 = vmatpush.bf16.msra.mxu3 %v8108_v57 }
 0x8a0   :  { %4175 = vmatpush.bf16.msrb.mxu0 %v8121_v62  ;;  %4189 = vmatpush.bf16.msrb.mxu1 %v8130_v21 }
 0x8a1   :  { %4203 = vmatpush.bf16.msra.mxu2 %v8155_v22  ;;  %4217 = vmatpush.bf16.msra.mxu3 %v8144_v6 }
 0x8a4   :  { %4176 = vmatpush.bf16.msrb.mxu0 %v8157_v8  ;;  %4190 = vmatpush.bf16.msrb.mxu1 %v8166_v0 }
 0x8a5   :  { %4204 = vmatpush.bf16.msra.mxu2 %v8185_v19  ;;  %4218 = vmatpush.bf16.msra.mxu3 %v8180_v44 }
 0x8a8   :  { %4177 = vmatpush.bf16.msrb.mxu0 %v8198_v61  ;;  %4191 = vmatpush.bf16.msrb.mxu1 %v8209_v46 }
 0x8a9   :  { %4205 = vmatpush.bf16.msra.mxu2 %v8279_v3  ;;  %4219 = vmatpush.bf16.msra.mxu3 %v8211_v33 }
 0x8ac   :  { %4178 = vmatpush.bf16.msrb.mxu0 %v8281_v31  ;;  %4192 = vmatpush.bf16.msrb.mxu1 %v8303_v59 }
 0x8ad   :  { %4206 = vmatpush.bf16.msra.mxu2 %v8363_v18  ;;  %4220 = vmatpush.bf16.msra.mxu3 %v8317_v39 }
 0x8b0   :  { %4179 = vmatpush.bf16.msrb.mxu0 %v8384_v37  ;;  %4193 = vmatpush.bf16.msrb.mxu1 %v8395_v55 }
 0x8b1   :  { %4207 = vmatpush.bf16.msra.mxu2 %v8424_v51  ;;  %4221 = vmatpush.bf16.msra.mxu3 %v8397_v42 }
 0x8b4   :  { %4180 = vmatpush.bf16.msrb.mxu0 %v8426_v25  ;;  %4194 = vmatpush.bf16.msrb.mxu1 %v8438_v47 }
 0x8b5   :  { %4208 = vmatpush.bf16.msra.mxu2 %v8452_v52  ;;  %4222 = vmatpush.bf16.msra.mxu3 %v8450_v29 }
 0x8b8   :  { %4181 = vmatpush.bf16.msrb.mxu0 %v10031_v30  ;;  %4195 = vmatpush.bf16.msrb.mxu1 %v10032_v53 }
 0x8b9   :  { %4209 = vmatpush.bf16.msra.mxu2 %v10033_v36  ;;  %4223 = vmatpush.bf16.msra.mxu3 %v10054_v10 }
 0x917   :  { %v3739_v32 = vpop.f32.mrf.mxu0  ;;  %v3753_v41 = vpop.f32.mrf.mxu1 }
 0x918   :  { %v3786_v26 = vadd.f32 %v3739_v32, %v2621_v5  ;;  %v3787_v12 = vadd.f32 %v3753_v41, %v2670_v48 }
 0x91a   :  { %v5696_v54 = vmul.f32 -1.442695, %v3786_v26  ;;  %v5698_v45 = vmul.f32 -1.442695, %v3787_v12  ;;  %v10063_v26 = vld [vmem:[#allocation71_spill] sm:$0xff]  ;;  %v10064_v12 = vld [vmem:[#allocation30_spill] sm:$0xff] }
 0x91c   :  { %6387 = vpow2.f32 %v5696_v54  ;;  %v2719_v54 = vadd.f32 %v10064_v12, %v10063_v26 }
 0x91d   :  { %6389 = vpow2.f32 %v5698_v45  ;;  %v10065_v45 = vld [vmem:[#allocation45_spill] sm:$0xff] }
 0x91e   :  { %v3781_v27 = vpop.f32.mrf.mxu3  ;;  %v3767_v14 = vpop.f32.mrf.mxu2  ;;  %v2770_v1 = vadd.f32 %v10065_v45, %v10059_v15 }
 0x91f   :  { %v3789_v35 = vadd.f32 %v3781_v27, %v2768_v16  ;;  %v3741_v56 = vpop.f32.mrf.mxu0  ;;  %v3755_v24 = vpop.f32.mrf.mxu1  ;;  %v3788_v7 = vadd.f32 %v3767_v14, %v2719_v54 }
 0x920   :  { %v3790_v38 = vadd.f32 %v3741_v56, %v2623_v13  ;;  %v3791_v58 = vadd.f32 %v3755_v24, %v2672_v2 }
 0x921   :  { %v5700_v4 = vmul.f32 -1.442695, %v3789_v35 }
 0x922   :  { %v6388_v50 = vpop.eup %6387  ;;  %v5697_v5 = vmul.f32 -1.442695, %v3790_v38  ;;  %v5699_v32 = vmul.f32 -1.442695, %v3791_v58 }
 0x923   :  { %v6390_v28 = vpop.eup %6389  ;;  %v3800_v48 = vadd.f32 1.0, %v6388_v50  ;;  %6391 = vpow2.f32 %v5700_v4  ;;  %v10066_v4 = vld [vmem:[#allocation35_spill] sm:$0xff] }
 0x924   :  { %v3838_v41 = vadd.f32 1.0, %v6390_v28  ;;  %6393 = vpow2.f32 %v5697_v5  ;;  %v2721_v50 = vadd.f32 %v10066_v4, %v10063_v26  ;;  %v10071_v26 = vld [vmem:[#allocation21_spill] sm:$0xff] }
 0x925   :  { %6395 = vrcp.f32 %v3800_v48  ;;  %v3811_v28 = vand.u32 2147483647, %v3800_v48  ;;  %v3813_v54 = vand.u32 2147483648, %v3800_v48  ;;  %vm3807_vm1 = vweird.f32 %v3800_v48 }
 0x926   :  { %6397 = vrcp.f32 %v3838_v41  ;;  %v3783_v16 = vpop.f32.mrf.mxu3  ;;  %v3769_v24 = vpop.f32.mrf.mxu2  ;;  %v3851_v12 = vand.u32 2147483648, %v3838_v41  ;;  %vm3845_vm2 = vweird.f32 %v3838_v41  ;;  %vm5713_vm12 = vcmp.gt.f32.partialorder %v10071_v26, 4.0 }
 0x927   :  { %6399 = vpow2.f32 %v5699_v32  ;;  %v3793_v13 = vadd.f32 %v3783_v16, %v2770_v1  ;;  %v3849_v1 = vand.u32 2147483647, %v3838_v41  ;;  %vm9098_vm5 = vcmp.eq.f32.partialorder %v3811_v28, 8.507059e+37 }
 0x928   :  { %6401 = vtanh.f32 %v3788_v7  ;;  %v3792_v7 = vadd.f32 %v3769_v24, %v2721_v50 }
 0x929   :  { %v6392_v34 = vpop.eup %6391  ;;  %v5701_v38 = vmul.f32 -1.442695, %v3793_v13  ;;  %vm9104_vm6 = vcmp.eq.f32.partialorder %v3849_v1, 8.507059e+37 }
 0x92a   :  { %v6394_v2 = vpop.eup %6393  ;;  %v9087_v27 = vadd.f32 1.0, %v6392_v34 }
 0x92b   :  { %v6396_v35 = vpop.eup %6395  ;;  %v9089_v56 = vadd.f32 1.0, %v6394_v2 }
 0x92c   :  { %v6398_v58 = vpop.eup %6397  ;;  %v3803_v5 = vmul.f32 %v6396_v35, %v3800_v48  ;;  %6403 = vrcp.f32 %v9087_v27  ;;  %vm3808_vm3 = vweird.f32 %v6396_v35  ;;  %vm3885_vm10 = vweird.f32 %v9087_v27 }
 0x92d   :  { %v6400_v14 = vpop.eup %6399  ;;  %v3841_v32 = vmul.f32 %v6398_v58, %v3838_v41  ;;  %6405 = vrcp.f32 %v9089_v56  ;;  %vm3846_vm4 = vweird.f32 %v6398_v58  ;;  %vm3809_vm7 = vmor %vm3807_vm1, %vm3808_vm3  ;;  %vm3822_vm8 = vweird.f32 %v9089_v56 }
 0x92e   :  { %v3804_v45 = vsub.f32 1.0, %v3803_v5  ;;  %v9095_v16 = vadd.f32 1.0, %v6400_v14  ;;  %6407 = vpow2.f32 %v5701_v38  ;;  %v6402_v2 = vpop.eup %6401  ;;  %v3814_v5 = vor.u32 1.1754944e-38, %v3813_v54  ;;  %vm3847_vm9 = vmor %vm3845_vm2, %vm3846_vm4 }
 0x92f   :  { %v3842_v13 = vsub.f32 1.0, %v3841_v32  ;;  %v3852_v14 = vor.u32 1.1754944e-38, %v3851_v12  ;;  %v3826_v54 = vand.u32 2147483647, %v9089_v56  ;;  %v3828_v1 = vand.u32 2147483648, %v9089_v56 }
 0x930   :  { %v3805_v34 = vmul.f32 %v6396_v35, %v3804_v45  ;;  %6409 = vrcp.f32 %v9095_v16  ;;  %v3891_v48 = vand.u32 2147483648, %v9087_v27  ;;  %vm3860_vm2 = vweird.f32 %v9095_v16 }
 0x931   :  { %v3843_v4 = vmul.f32 %v6398_v58, %v3842_v13  ;;  %6411 = vtanh.f32 %v3792_v7  ;;  %v3829_v50 = vor.u32 1.1754944e-38, %v3828_v1  ;;  %vm3827_vm1 = vcmp.eq.f32.partialorder %v3826_v54, 8.507059e+37 }
 0x932   :  { %v9102_v15 = vpop.eup %6403  ;;  %v3806_v24 = vadd.f32 %v6396_v35, %v3805_v34  ;;  %v3889_v1 = vand.u32 2147483647, %v9087_v27 }
 0x933   :  { %v6406_v38 = vpop.eup %6405  ;;  %v3844_v32 = vadd.f32 %v6398_v58, %v3843_v4  ;;  %v3881_v28 = vmul.f32 %v9102_v15, %v9087_v27  ;;  %vm3886_vm14 = vweird.f32 %v9102_v15 }
 0x934   :  { %v3810_v12 = vsel %vm3809_vm7, %v6396_v35, %v3806_v24  ;;  %v3818_v45 = vmul.f32 %v6406_v38, %v9089_v56  ;;  %v6408_v7 = vpop.eup %6407  ;;  %vm3823_vm13 = vweird.f32 %v6406_v38  ;;  %vm9149_vm3 = vmor %vm3885_vm10, %vm3886_vm14 }
 0x935   :  { %v3815_v13 = vsel %vm9098_vm5, %v3814_v5, %v3810_v12  ;;  %v3848_v34 = vsel %vm3847_vm9, %v6398_v58, %v3844_v32  ;;  %v3882_v4 = vsub.f32 1.0, %v3881_v28  ;;  %v9123_v23 = vadd.f32 1.0, %v6408_v7  ;;  %vm3824_vm0 = vmor %vm3822_vm8, %vm3823_vm13 }
 0x936   :  { %v6410_v63 = vpop.eup %6409  ;;  %v3853_v41 = vsel %vm9104_vm6, %v3852_v14, %v3848_v34  ;;  %v3912_v35 = vmul.f32 %v6402_v2, %v3815_v13  ;;  %v3819_v24 = vsub.f32 1.0, %v3818_v45  ;;  %v3866_v5 = vand.u32 2147483648, %v9095_v16 }
 0x937   :  { %v3910_v10 = vmul.f32 %v3853_v41, %v9002_v20  ;;  %v3856_v36 = vmul.f32 %v6410_v63, %v9095_v16  ;;  %v3883_v53 = vmul.f32 %v9102_v15, %v3882_v4  ;;  %v6412_v58 = vpop.eup %6411  ;;  %6413 = vrcp.f32 %v9123_v23  ;;  %v6008_v41 = vpop.permute.xlu2 %6007 }
 0x938   :  { %v3820_v32 = vmul.f32 %v6406_v38, %v3819_v24  ;;  %v10072_v12 = vmov 0.0   ;;  %vm3861_vm15 = vweird.f32 %v6410_v63  ;;  %v3892_v24 = vor.u32 1.1754944e-38, %v3891_v48 }
 0x939   :  { %v9131_v14 = vadd.f32 %v3912_v35, %v3910_v10  ;;  %v3857_v2 = vsub.f32 1.0, %v3856_v36  ;;  %v3884_v28 = vadd.f32 %v9102_v15, %v3883_v53  ;;  %v5714_v45 = vsel %vm5712_vm11, 1.0, %v10072_v12  ;;  %vm3862_vm4 = vmor %vm3860_vm2, %vm3861_vm15 }
 0x93a   :  { %v3821_v20 = vadd.f32 %v6406_v38, %v3820_v32  ;;  %v5715_v7 = vsel %vm5713_vm12, 1.0, %v10072_v12  ;;  %v3864_v36 = vand.u32 2147483647, %v9095_v16  ;;  %v6009_v27 = vunpack.i.l.bf16 %v6008_v41 }
 0x93b   :  { %6415 = vtanh.f32 %v9131_v14  ;;  %v3858_v13 = vmul.f32 %v6410_v63, %v3857_v2  ;;  %v6011_v53 = vpack.i.bf16 %v5715_v7, %v5714_v45  ;;  %v3888_v54 = vsel %vm9149_vm3, %v9102_v15, %v3884_v28 }
 0x93c   :  { %v3825_v10 = vsel %vm3824_vm0, %v6406_v38, %v3821_v20  ;;  %v3867_v38 = vor.u32 1.1754944e-38, %v3866_v5  ;;  %vm3865_vm5 = vcmp.eq.f32.partialorder %v3864_v36, 8.507059e+37  ;;  %vm3890_vm6 = vcmp.eq.f32.partialorder %v3889_v1, 8.507059e+37 }
 0x93d   :  { %v3830_v34 = vsel %vm3827_vm1, %v3829_v50, %v3825_v10  ;;  %v3859_v4 = vadd.f32 %v6410_v63, %v3858_v13  ;;  %v6414_v56 = vpop.eup %6413  ;;  %6012 = vperm.xlu0 %5988, %v6011_v53   ;;  %v3893_v13 = vsel %vm3890_vm6, %v3892_v24, %v3888_v54  ;;  %v3906_v48 = vand.u32 2147483648, %v9123_v23 }
 0x93e   :  { %v3913_v32 = vmul.f32 %v6412_v58, %v3830_v34  ;;  %v3896_v2 = vmul.f32 %v6414_v56, %v9123_v23  ;;  %vm3901_vm7 = vweird.f32 %v6414_v56  ;;  %vm3900_vm8 = vweird.f32 %v9123_v23 }
 0x93f   :  { %v3863_v16 = vsel %vm3862_vm4, %v6410_v63, %v3859_v4  ;;  %v3904_v58 = vand.u32 2147483647, %v9123_v23  ;;  %vm3902_vm9 = vmor %vm3900_vm8, %vm3901_vm7  ;;  %v3907_v36 = vor.u32 1.1754944e-38, %v3906_v48  ;;  %v6010_v1 = vunpack.i.h.bf16 %v6008_v41  ;;  %v10077_v23 = vld [vmem:[#allocation12_spill] sm:$0xff]  ;;  %v10078_v41 = vld [vmem:[#allocation66_spill] sm:$0xff] }
 0x940   :  { %v3868_v50 = vsel %vm3865_vm5, %v3867_v38, %v3863_v16  ;;  %v3897_v7 = vsub.f32 1.0, %v3896_v2  ;;  %v10081_v2 = vld [vmem:[#allocation40_spill] sm:$0xff]  ;;  %v10084_v48 = vld [vmem:[#allocation38_spill] sm:$0xff] }
 0x941   :  { %v6416_v20 = vpop.eup %6415  ;;  %v3911_v45 = vmul.f32 %v3868_v50, %v9029_v43  ;;  %vm3905_vm10 = vcmp.eq.f32.partialorder %v3904_v58, 8.507059e+37  ;;  %v2628_v58 = vadd.f32 %v10084_v48, %v10078_v41 }
 0x942   :  { %v3918_v5 = vmul.f32 %v6416_v20, %v3893_v13  ;;  %v3898_v35 = vmul.f32 %v6414_v56, %v3897_v7 }
 0x943   :  { %v9158_v10 = vadd.f32 %v3913_v32, %v3911_v45  ;;  %v10080_v32 = vld [vmem:[#allocation67_spill] sm:$0xff] }
 0x944   :  { %v3939_v15 = vmul.f32 %v6009_v27, %v3918_v5  ;;  %v3899_v63 = vadd.f32 %v6414_v56, %v3898_v35  ;;  %v2675_v50 = vadd.f32 %v10081_v2, %v10080_v32  ;;  %v10082_v35 = vld [vmem:[#allocation69_spill] sm:$0xff] }
 0x945   :  { %6417 = vtanh.f32 %v9158_v10 }
 0x946   :  { %v9165_v28 = vadd.f32 %v3939_v15, %v9036_v17  ;;  %v3903_v43 = vsel %vm3902_vm9, %v6414_v56, %v3899_v63  ;;  %v10075_v17 = vld [vmem:[#allocation17_spill] sm:$0xff]  ;;  %v10079_v56 = vld [vmem:[#allocation64_spill] sm:$0xff]  ;;  %vm5722_vm9 = vcmp.gt.f32.partialorder %v8984_v60, 5.0 }
 0x947   :  { %v3908_v34 = vsel %vm3905_vm10, %v3907_v36, %v3903_v43  ;;  %v2626_v16 = vadd.f32 %v10079_v56, %v10078_v41  ;;  %v10083_v15 = vld [vmem:[#allocation52_spill] sm:$0xff]  ;;  %v10085_v43 = vld [vmem:[#allocation53_spill] sm:$0xff] }
 0x948   :  { %v2773_v63 = vadd.f32 %v10083_v15, %v10082_v35  ;;  %v2677_v36 = vadd.f32 %v10085_v43, %v10080_v32 }
 0x94b   :  { %v6418_v53 = vpop.eup %6417 }
 0x94c   :  { %v3919_v4 = vmul.f32 %v6418_v53, %v3908_v34 }
 0x94e   :  { %v3940_v38 = vmul.f32 %v6010_v1, %v3919_v4  ;;  %v3951_v54 = vpack.c.bf16 %v3919_v4, %v3918_v5 }
 0x950   :  { %v9168_v24 = vadd.f32 %v3940_v38, %v9039_v9  ;;  %3960 = vmatmul.bf16.vlgmr.msra.gmra.mxu0 %v3951_v54  ;;  %3974 = vmatmul.bf16.vlgmr.msra.gmra.mxu1 %v3951_v54  ;;  %v10076_v9 = vld [vmem:[#allocation13_spill] sm:$0xff] }
 0x951   :  { %3988 = vmatmul.bf16.vlgmr.msrb.gmra.mxu2 %v3951_v54  ;;  %4002 = vmatmul.bf16.vlgmr.msrb.gmra.mxu3 %v3951_v54 }
 0x952   :  { %4396 = vmatpush.bf16.msra.mxu0 %v8090_v49  ;;  %4410 = vmatpush.bf16.msra.mxu1 %v8095_v40 }
 0x953   :  { %4424 = vmatpush.bf16.msrb.mxu2 %v8119_v11  ;;  %4438 = vmatpush.bf16.msrb.mxu3 %v8108_v57 }
 0x956   :  { %4397 = vmatpush.bf16.msra.mxu0 %v8121_v62  ;;  %4411 = vmatpush.bf16.msra.mxu1 %v8130_v21 }
 0x957   :  { %4425 = vmatpush.bf16.msrb.mxu2 %v8155_v22  ;;  %4439 = vmatpush.bf16.msrb.mxu3 %v8144_v6 }
 0x95a   :  { %4398 = vmatpush.bf16.msra.mxu0 %v8157_v8  ;;  %4412 = vmatpush.bf16.msra.mxu1 %v8166_v0 }
 0x95b   :  { %4426 = vmatpush.bf16.msrb.mxu2 %v8185_v19  ;;  %4440 = vmatpush.bf16.msrb.mxu3 %v8180_v44 }
 0x95e   :  { %4399 = vmatpush.bf16.msra.mxu0 %v8198_v61  ;;  %4413 = vmatpush.bf16.msra.mxu1 %v8209_v46 }
 0x95f   :  { %4427 = vmatpush.bf16.msrb.mxu2 %v8279_v3  ;;  %4441 = vmatpush.bf16.msrb.mxu3 %v8211_v33 }
 0x962   :  { %4400 = vmatpush.bf16.msra.mxu0 %v8281_v31  ;;  %4414 = vmatpush.bf16.msra.mxu1 %v8303_v59 }
 0x963   :  { %4428 = vmatpush.bf16.msrb.mxu2 %v8363_v18  ;;  %4442 = vmatpush.bf16.msrb.mxu3 %v8317_v39 }
 0x966   :  { %4401 = vmatpush.bf16.msra.mxu0 %v8384_v37  ;;  %4415 = vmatpush.bf16.msra.mxu1 %v8395_v55 }
 0x967   :  { %4429 = vmatpush.bf16.msrb.mxu2 %v8424_v51  ;;  %4443 = vmatpush.bf16.msrb.mxu3 %v8397_v42 }
 0x96a   :  { %4402 = vmatpush.bf16.msra.mxu0 %v8426_v25  ;;  %4416 = vmatpush.bf16.msra.mxu1 %v8438_v47 }
 0x96b   :  { %4430 = vmatpush.bf16.msrb.mxu2 %v8452_v52  ;;  %4444 = vmatpush.bf16.msrb.mxu3 %v8450_v29 }
 0x96e   :  { %4403 = vmatpush.bf16.msra.mxu0 %v10031_v30  ;;  %4417 = vmatpush.bf16.msra.mxu1 %v10075_v17 }
 0x96f   :  { %4431 = vmatpush.bf16.msrb.mxu2 %v10076_v9  ;;  %4445 = vmatpush.bf16.msrb.mxu3 %v10077_v23 }
 0x9cd   :  { %v3961_v27 = vpop.f32.mrf.mxu0  ;;  %v3975_v20 = vpop.f32.mrf.mxu1 }
 0x9ce   :  { %v4008_v45 = vadd.f32 %v3961_v27, %v2626_v16  ;;  %v4009_v7 = vadd.f32 %v3975_v20, %v2675_v50 }
 0x9d0   :  { %v5706_v13 = vmul.f32 -1.442695, %v4008_v45  ;;  %v5708_v5 = vmul.f32 -1.442695, %v4009_v7 }
 0x9d2   :  { %6419 = vpow2.f32 %v5706_v13  ;;  %v10086_v13 = vld [vmem:[#allocation71_spill] sm:$0xff] }
 0x9d3   :  { %6421 = vpow2.f32 %v5708_v5  ;;  %v10087_v5 = vld [vmem:[#allocation44_spill] sm:$0xff] }
 0x9d4   :  { %v4003_v1 = vpop.f32.mrf.mxu3  ;;  %v3989_v2 = vpop.f32.mrf.mxu2  ;;  %v2724_v15 = vadd.f32 %v10087_v5, %v10086_v13 }
 0x9d5   :  { %v4011_v53 = vadd.f32 %v4003_v1, %v2773_v63  ;;  %v3963_v34 = vpop.f32.mrf.mxu0  ;;  %v3977_v4 = vpop.f32.mrf.mxu1  ;;  %v10088_v63 = vld [vmem:[#allocation65_spill] sm:$0xff] }
 0x9d6   :  { %v4012_v38 = vadd.f32 %v3963_v34, %v2628_v58  ;;  %v4013_v54 = vadd.f32 %v3977_v4, %v2677_v36  ;;  %v2775_v48 = vadd.f32 %v10088_v63, %v10082_v35  ;;  %v4010_v43 = vadd.f32 %v3989_v2, %v2724_v15  ;;  %v10090_v2 = vld [vmem:[#allocation39_spill] sm:$0xff] }
 0x9d7   :  { %v5710_v56 = vmul.f32 -1.442695, %v4011_v53  ;;  %v9216_v53 = vpop.permute.xlu0 %4844 }
 0x9d8   :  { %v6420_v16 = vpop.eup %6419  ;;  %v5707_v50 = vmul.f32 -1.442695, %v4012_v38  ;;  %v5709_v45 = vmul.f32 -1.442695, %v4013_v54  ;;  %10089 = vst [vmem:[#allocation20_spill] sm:$0xff] %v9216_v53 }
 0x9d9   :  { %v6422_v27 = vpop.eup %6421  ;;  %v4022_v20 = vadd.f32 1.0, %v6420_v16  ;;  %6423 = vpow2.f32 %v5710_v56 }
 0x9da   :  { %v4060_v7 = vadd.f32 1.0, %v6422_v27  ;;  %6425 = vpow2.f32 %v5707_v50 }
 0x9db   :  { %6427 = vrcp.f32 %v4022_v20  ;;  %v4033_v63 = vand.u32 2147483647, %v4022_v20  ;;  %vm4029_vm14 = vweird.f32 %v4022_v20 }
 0x9dc   :  { %6429 = vrcp.f32 %v4060_v7  ;;  %v4005_v58 = vpop.f32.mrf.mxu3  ;;  %v3991_v27 = vpop.f32.mrf.mxu2  ;;  %vm4067_vm12 = vweird.f32 %v4060_v7 }
 0x9dd   :  { %6431 = vpow2.f32 %v5709_v45  ;;  %v4015_v36 = vadd.f32 %v4005_v58, %v2775_v48  ;;  %v2726_v45 = vadd.f32 %v10090_v2, %v10086_v13  ;;  %v4073_v58 = vand.u32 2147483648, %v4060_v7 }
 0x9de   :  { %6433 = vtanh.f32 %v4010_v43  ;;  %vm9231_vm15 = vcmp.eq.f32.partialorder %v4033_v63, 8.507059e+37 }
 0x9df   :  { %v6424_v1 = vpop.eup %6423  ;;  %v5711_v56 = vmul.f32 -1.442695, %v4015_v36  ;;  %v4071_v36 = vand.u32 2147483647, %v4060_v7  ;;  %v4014_v53 = vadd.f32 %v3991_v27, %v2726_v45 }
 0x9e0   :  { %v6426_v34 = vpop.eup %6425  ;;  %v9218_v4 = vadd.f32 1.0, %v6424_v1  ;;  %v4035_v1 = vand.u32 2147483648, %v4022_v20 }
 0x9e1   :  { %v6428_v38 = vpop.eup %6427  ;;  %v9220_v54 = vadd.f32 1.0, %v6426_v34  ;;  %vm9235_vm1 = vcmp.eq.f32.partialorder %v4071_v36, 8.507059e+37 }
 0x9e2   :  { %v6430_v16 = vpop.eup %6429  ;;  %v4025_v50 = vmul.f32 %v6428_v38, %v4022_v20  ;;  %6435 = vrcp.f32 %v9218_v4  ;;  %vm4030_vm11 = vweird.f32 %v6428_v38  ;;  %v9241_v20 = vpop.permute.xlu0 %4849  ;;  %vm4107_vm4 = vweird.f32 %v9218_v4 }
 0x9e3   :  { %v6432_v5 = vpop.eup %6431  ;;  %v4063_v15 = vmul.f32 %v6430_v16, %v4060_v7  ;;  %6437 = vrcp.f32 %v9220_v54  ;;  %vm4068_vm13 = vweird.f32 %v6430_v16  ;;  %vm4031_vm0 = vmor %vm4029_vm14, %vm4030_vm11  ;;  %10095 = vst [vmem:[#allocation14_spill] sm:$0xff] %v9241_v20  ;;  %vm4044_vm3 = vweird.f32 %v9220_v54 }
 0x9e4   :  { %v4026_v48 = vsub.f32 1.0, %v4025_v50  ;;  %v9226_v43 = vadd.f32 1.0, %v6432_v5  ;;  %6439 = vpow2.f32 %v5711_v56  ;;  %v6434_v32 = vpop.eup %6433  ;;  %v4074_v50 = vor.u32 1.1754944e-38, %v4073_v58  ;;  %vm4069_vm2 = vmor %vm4067_vm12, %vm4068_vm13 }
 0x9e5   :  { %v4064_v34 = vsub.f32 1.0, %v4063_v15  ;;  %v4036_v15 = vor.u32 1.1754944e-38, %v4035_v1  ;;  %v4048_v58 = vand.u32 2147483647, %v9220_v54  ;;  %v4111_v5 = vand.u32 2147483647, %v9218_v4 }
 0x9e6   :  { %v4027_v35 = vmul.f32 %v6428_v38, %v4026_v48  ;;  %6441 = vrcp.f32 %v9226_v43  ;;  %v4088_v30 = vand.u32 2147483648, %v9226_v43  ;;  %vm4082_vm10 = vweird.f32 %v9226_v43 }
 0x9e7   :  { %v4065_v41 = vmul.f32 %v6430_v16, %v4064_v34  ;;  %6443 = vtanh.f32 %v4014_v53  ;;  %v4050_v53 = vand.u32 2147483648, %v9220_v54  ;;  %vm4049_vm11 = vcmp.eq.f32.partialorder %v4048_v58, 8.507059e+37 }
 0x9e8   :  { %v9229_v2 = vpop.eup %6435  ;;  %v4028_v13 = vadd.f32 %v6428_v38, %v4027_v35  ;;  %vm5723_vm14 = vcmp.gt.f32.partialorder %v10071_v26, 5.0 }
 0x9e9   :  { %v6438_v27 = vpop.eup %6437  ;;  %v4066_v56 = vadd.f32 %v6430_v16, %v4065_v41  ;;  %v4103_v48 = vmul.f32 %v9229_v2, %v9218_v4  ;;  %v4051_v45 = vor.u32 1.1754944e-38, %v4050_v53  ;;  %vm4108_vm6 = vweird.f32 %v9229_v2 }
 0x9ea   :  { %v4032_v35 = vsel %vm4031_vm0, %v6428_v38, %v4028_v13  ;;  %v4040_v63 = vmul.f32 %v6438_v27, %v9220_v54  ;;  %v6440_v41 = vpop.eup %6439  ;;  %vm4045_vm5 = vweird.f32 %v6438_v27  ;;  %vm9277_vm13 = vmor %vm4107_vm4, %vm4108_vm6  ;;  %vm4112_vm0 = vcmp.eq.f32.partialorder %v4111_v5, 8.507059e+37 }
 0x9eb   :  { %v4037_v1 = vsel %vm9231_vm15, %v4036_v15, %v4032_v35  ;;  %v4070_v34 = vsel %vm4069_vm2, %v6430_v16, %v4066_v56  ;;  %v4104_v36 = vsub.f32 1.0, %v4103_v48  ;;  %v9253_v23 = vadd.f32 1.0, %v6440_v41  ;;  %vm4046_vm8 = vmor %vm4044_vm3, %vm4045_vm5 }
 0x9ec   :  { %v6442_v20 = vpop.eup %6441  ;;  %v4075_v7 = vsel %vm9235_vm1, %v4074_v50, %v4070_v34  ;;  %v4134_v13 = vmul.f32 %v6434_v32, %v4037_v1  ;;  %v4041_v38 = vsub.f32 1.0, %v4040_v63  ;;  %v4086_v48 = vand.u32 2147483647, %v9226_v43 }
 0x9ed   :  { %v4132_v9 = vmul.f32 %v4075_v7, %v9131_v14  ;;  %v4078_v17 = vmul.f32 %v6442_v20, %v9226_v43  ;;  %6445 = vrcp.f32 %v9253_v23  ;;  %v4105_v15 = vmul.f32 %v9229_v2, %v4104_v36  ;;  %v6444_v56 = vpop.eup %6443  ;;  %v6013_v36 = vpop.permute.xlu0 %6012 }
 0x9ee   :  { %v4042_v16 = vmul.f32 %v6438_v27, %v4041_v38  ;;  %v4113_v63 = vand.u32 2147483648, %v9218_v4  ;;  %vm4083_vm7 = vweird.f32 %v6442_v20  ;;  %vm4087_vm12 = vcmp.eq.f32.partialorder %v4086_v48, 8.507059e+37 }
 0x9ef   :  { %v9261_v50 = vadd.f32 %v4134_v13, %v4132_v9  ;;  %v4079_v32 = vsub.f32 1.0, %v4078_v17  ;;  %v4106_v35 = vadd.f32 %v9229_v2, %v4105_v15  ;;  %v4089_v17 = vor.u32 1.1754944e-38, %v4088_v30  ;;  %vm4084_vm15 = vmor %vm4082_vm10, %vm4083_vm7 }
 0x9f0   :  { %v4043_v14 = vadd.f32 %v6438_v27, %v4042_v16  ;;  %v4114_v54 = vor.u32 1.1754944e-38, %v4113_v63  ;;  %v5724_v43 = vsel %vm5722_vm9, 1.0, %v10072_v12  ;;  %v6014_v16 = vunpack.i.l.bf16 %v6013_v36 }
 0x9f1   :  { %6447 = vtanh.f32 %v9261_v50  ;;  %v4080_v41 = vmul.f32 %v6442_v20, %v4079_v32  ;;  %v4110_v30 = vsel %vm9277_vm13, %v9229_v2, %v4106_v35  ;;  %vm4122_vm2 = vweird.f32 %v9253_v23 }
 0x9f2   :  { %v4047_v9 = vsel %vm4046_vm8, %v6438_v27, %v4043_v14  ;;  %v5725_v27 = vsel %vm5723_vm14, 1.0, %v10072_v12  ;;  %v4126_v5 = vand.u32 2147483647, %v9253_v23 }
 0x9f3   :  { %v4052_v1 = vsel %vm4049_vm11, %v4051_v45, %v4047_v9  ;;  %v4081_v34 = vadd.f32 %v6442_v20, %v4080_v41  ;;  %v6446_v60 = vpop.eup %6445  ;;  %v6016_v13 = vpack.i.bf16 %v5725_v27, %v5724_v43  ;;  %v4115_v45 = vsel %vm4112_vm0, %v4114_v54, %v4110_v30 }
 0x9f4   :  { %v4135_v7 = vmul.f32 %v6444_v56, %v4052_v1  ;;  %v4118_v4 = vmul.f32 %v6446_v60, %v9253_v23  ;;  %vm4123_vm1 = vweird.f32 %v6446_v60  ;;  %v4128_v56 = vand.u32 2147483648, %v9253_v23 }
 0x9f5   :  { %v4085_v58 = vsel %vm4084_vm15, %v6442_v20, %v4081_v34  ;;  %6017 = vperm.xlu1 %5989, %v6016_v13   ;;  %vm4124_vm3 = vmor %vm4122_vm2, %vm4123_vm1  ;;  %vm4127_vm4 = vcmp.eq.f32.partialorder %v4126_v5, 8.507059e+37  ;;  %v10111_v13 = vld [vmem:[#allocation43_spill] sm:$0xff] }
 0x9f6   :  { %v4090_v38 = vsel %vm4087_vm12, %v4089_v17, %v4085_v58  ;;  %v4119_v32 = vsub.f32 1.0, %v4118_v4  ;;  %v4129_v41 = vor.u32 1.1754944e-38, %v4128_v56  ;;  %v6015_v17 = vunpack.i.h.bf16 %v6013_v36  ;;  %v10110_v4 = vld [vmem:[#allocation71_spill] sm:$0xff] }
 0x9f7   :  { %v6448_v26 = vpop.eup %6447  ;;  %v4133_v15 = vmul.f32 %v4090_v38, %v9158_v10  ;;  %v2729_v38 = vadd.f32 %v10111_v13, %v10110_v4 }
 0x9f8   :  { %v4140_v2 = vmul.f32 %v6448_v26, %v4115_v45  ;;  %v4120_v14 = vmul.f32 %v6446_v60, %v4119_v32 }
 0x9f9   :  { %v9289_v48 = vadd.f32 %v4135_v7, %v4133_v15 }
 0x9fa   :  { %v4161_v35 = vmul.f32 %v6014_v16, %v4140_v2  ;;  %v4121_v20 = vadd.f32 %v6446_v60, %v4120_v14  ;;  %v10112_v16 = vld [vmem:[#allocation47_spill] sm:$0xff] }
 0x9fb   :  { %6449 = vtanh.f32 %v9289_v48 }
 0x9fc   :  { %v9296_v10 = vadd.f32 %v4161_v35, %v9165_v28  ;;  %v4125_v63 = vsel %vm4124_vm3, %v6446_v60, %v4121_v20 }
 0x9fd   :  { %v4130_v1 = vsel %vm4127_vm4, %v4129_v41, %v4125_v63 }
 0xa01   :  { %v6450_v9 = vpop.eup %6449 }
 0xa02   :  { %v4141_v34 = vmul.f32 %v6450_v9, %v4130_v1 }
 0xa04   :  { %v4162_v53 = vmul.f32 %v6015_v17, %v4141_v34  ;;  %v4173_v30 = vpack.c.bf16 %v4141_v34, %v4140_v2  ;;  %v10113_v17 = vld [vmem:[#allocation46_spill] sm:$0xff] }
 0xa05   :  { %v2731_v9 = vadd.f32 %v10113_v17, %v10110_v4 }
 0xa06   :  { %v9299_v54 = vadd.f32 %v4162_v53, %v9168_v24  ;;  %4182 = vmatmul.bf16.vlgmr.msrb.gmra.mxu0 %v4173_v30  ;;  %4196 = vmatmul.bf16.vlgmr.msrb.gmra.mxu1 %v4173_v30 }
 0xa07   :  { %4210 = vmatmul.bf16.vlgmr.msra.gmra.mxu2 %v4173_v30  ;;  %4224 = vmatmul.bf16.vlgmr.msra.gmra.mxu3 %v4173_v30 }
 0xa08   :  { %4618 = vmatpush.bf16.msrb.mxu0 %v8090_v49  ;;  %4632 = vmatpush.bf16.msrb.mxu1 %v8095_v40  ;;  %v10098_v49 = vld [vmem:[#allocation11_spill] sm:$0xff]  ;;  %v10099_v40 = vld [vmem:[#allocation17_spill] sm:$0xff] }
 0xa09   :  { %4646 = vmatpush.bf16.msra.mxu2 %v8119_v11  ;;  %4660 = vmatpush.bf16.msra.mxu3 %v8108_v57  ;;  %v10100_v57 = vld [vmem:[#allocation13_spill] sm:$0xff]  ;;  %v10101_v11 = vld [vmem:[#allocation12_spill] sm:$0xff] }
 0xa0c   :  { %4619 = vmatpush.bf16.msrb.mxu0 %v8121_v62  ;;  %4633 = vmatpush.bf16.msrb.mxu1 %v8130_v21  ;;  %v10102_v62 = vld [vmem:[#allocation66_spill] sm:$0xff]  ;;  %v10103_v21 = vld [vmem:[#allocation49_spill] sm:$0xff] }
 0xa0d   :  { %4647 = vmatpush.bf16.msra.mxu2 %v8155_v22  ;;  %4661 = vmatpush.bf16.msra.mxu3 %v8144_v6  ;;  %v2631_v6 = vadd.f32 %v10103_v21, %v10102_v62  ;;  %v10104_v22 = vld [vmem:[#allocation67_spill] sm:$0xff] }
 0xa10   :  { %4620 = vmatpush.bf16.msrb.mxu0 %v8157_v8  ;;  %4634 = vmatpush.bf16.msrb.mxu1 %v8166_v0  ;;  %v10105_v8 = vld [vmem:[#allocation42_spill] sm:$0xff] }
 0xa11   :  { %4648 = vmatpush.bf16.msra.mxu2 %v8185_v19  ;;  %4662 = vmatpush.bf16.msra.mxu3 %v8180_v44  ;;  %v2680_v0 = vadd.f32 %v10105_v8, %v10104_v22 }
 0xa14   :  { %4621 = vmatpush.bf16.msrb.mxu0 %v8198_v61  ;;  %4635 = vmatpush.bf16.msrb.mxu1 %v8209_v46 }
 0xa15   :  { %4649 = vmatpush.bf16.msra.mxu2 %v8279_v3  ;;  %4663 = vmatpush.bf16.msra.mxu3 %v8211_v33 }
 0xa18   :  { %4622 = vmatpush.bf16.msrb.mxu0 %v8281_v31  ;;  %4636 = vmatpush.bf16.msrb.mxu1 %v8303_v59  ;;  %v10106_v31 = vld [vmem:[#allocation69_spill] sm:$0xff]  ;;  %v10107_v59 = vld [vmem:[#allocation55_spill] sm:$0xff] }
 0xa19   :  { %4650 = vmatpush.bf16.msra.mxu2 %v8363_v18  ;;  %4664 = vmatpush.bf16.msra.mxu3 %v8317_v39  ;;  %v2778_v39 = vadd.f32 %v10107_v59, %v10106_v31  ;;  %v10108_v18 = vld [vmem:[#allocation48_spill] sm:$0xff]  ;;  %v2780_v26 = vadd.f32 %v10112_v16, %v10106_v31 }
 0xa1c   :  { %4623 = vmatpush.bf16.msrb.mxu0 %v8384_v37  ;;  %4637 = vmatpush.bf16.msrb.mxu1 %v8395_v55  ;;  %v2633_v37 = vadd.f32 %v10108_v18, %v10102_v62  ;;  %v10109_v55 = vld [vmem:[#allocation54_spill] sm:$0xff] }
 0xa1d   :  { %4651 = vmatpush.bf16.msra.mxu2 %v8424_v51  ;;  %4665 = vmatpush.bf16.msra.mxu3 %v8397_v42  ;;  %v2682_v42 = vadd.f32 %v10109_v55, %v10104_v22 }
 0xa20   :  { %4624 = vmatpush.bf16.msrb.mxu0 %v8426_v25  ;;  %4638 = vmatpush.bf16.msrb.mxu1 %v8438_v47 }
 0xa21   :  { %4652 = vmatpush.bf16.msra.mxu2 %v8452_v52  ;;  %4666 = vmatpush.bf16.msra.mxu3 %v8450_v29 }
 0xa24   :  { %4625 = vmatpush.bf16.msrb.mxu0 %v10098_v49  ;;  %4639 = vmatpush.bf16.msrb.mxu1 %v10099_v40 }
 0xa25   :  { %4653 = vmatpush.bf16.msra.mxu2 %v10100_v57  ;;  %4667 = vmatpush.bf16.msra.mxu3 %v10101_v11 }
 0xa83   :  { %v4183_v44 = vpop.f32.mrf.mxu0  ;;  %v4197_v19 = vpop.f32.mrf.mxu1 }
 0xa84   :  { %v4230_v61 = vadd.f32 %v4183_v44, %v2631_v6  ;;  %v4231_v46 = vadd.f32 %v4197_v19, %v2680_v0 }
 0xa86   :  { %v5716_v33 = vmul.f32 -1.442695, %v4230_v61  ;;  %v5718_v3 = vmul.f32 -1.442695, %v4231_v46 }
 0xa88   :  { %6451 = vpow2.f32 %v5716_v33 }
 0xa89   :  { %6453 = vpow2.f32 %v5718_v3 }
 0xa8a   :  { %v4225_v51 = vpop.f32.mrf.mxu3  ;;  %v4211_v24 = vpop.f32.mrf.mxu2 }
 0xa8b   :  { %v4233_v25 = vadd.f32 %v4225_v51, %v2778_v39  ;;  %v4185_v47 = vpop.f32.mrf.mxu0  ;;  %v4199_v29 = vpop.f32.mrf.mxu1  ;;  %v4232_v32 = vadd.f32 %v4211_v24, %v2729_v38 }
 0xa8c   :  { %v4234_v52 = vadd.f32 %v4185_v47, %v2633_v37  ;;  %v4235_v28 = vadd.f32 %v4199_v29, %v2682_v42 }
 0xa8d   :  { %v5720_v23 = vmul.f32 -1.442695, %v4233_v25 }
 0xa8e   :  { %v6452_v36 = vpop.eup %6451  ;;  %v5717_v60 = vmul.f32 -1.442695, %v4234_v52  ;;  %v5719_v58 = vmul.f32 -1.442695, %v4235_v28 }
 0xa8f   :  { %v6454_v43 = vpop.eup %6453  ;;  %v4244_v27 = vadd.f32 1.0, %v6452_v36  ;;  %6455 = vpow2.f32 %v5720_v23  ;;  %v9383_v36 = vld [vmem:[%s9715_s1] sm:$0xff] }
 0xa90   :  { %v4282_v7 = vadd.f32 1.0, %v6454_v43  ;;  %6457 = vpow2.f32 %v5717_v60  ;;  %vm5732_vm15 = vcmp.gt.f32.partialorder %v9383_v36, 6.0 }
 0xa91   :  { %6459 = vrcp.f32 %v4244_v27  ;;  %v4255_v34 = vand.u32 2147483647, %v4244_v27  ;;  %v4257_v40 = vand.u32 2147483648, %v4244_v27  ;;  %vm4251_vm5 = vweird.f32 %v4244_v27 }
 0xa92   :  { %6461 = vrcp.f32 %v4282_v7  ;;  %v4227_v15 = vpop.f32.mrf.mxu3  ;;  %v4213_v5 = vpop.f32.mrf.mxu2  ;;  %v4295_v49 = vand.u32 2147483648, %v4282_v7  ;;  %v4293_v11 = vand.u32 2147483647, %v4282_v7  ;;  %vm4289_vm6 = vweird.f32 %v4282_v7 }
 0xa93   :  { %6463 = vpow2.f32 %v5719_v58  ;;  %v4237_v45 = vadd.f32 %v4227_v15, %v2780_v26  ;;  %v4236_v6 = vadd.f32 %v4213_v5, %v2731_v9  ;;  %vm9358_vm9 = vcmp.eq.f32.partialorder %v4255_v34, 8.507059e+37  ;;  %v9396_v26 = vld [vmem:[%s9715_s1 + $0x8] sm:$0xff] }
 0xa94   :  { %6465 = vtanh.f32 %v4232_v32  ;;  %v4258_v46 = vor.u32 1.1754944e-38, %v4257_v40  ;;  %v4296_v3 = vor.u32 1.1754944e-38, %v4295_v49  ;;  %vm9364_vm10 = vcmp.eq.f32.partialorder %v4293_v11, 8.507059e+37  ;;  %v6018_v40 = vpop.permute.xlu1 %6017 }
 0xa95   :  { %v6456_v2 = vpop.eup %6455  ;;  %v5721_v63 = vmul.f32 -1.442695, %v4237_v45  ;;  %vm5733_vm0 = vcmp.gt.f32.partialorder %v9396_v26, 6.0 }
 0xa96   :  { %v6458_v14 = vpop.eup %6457  ;;  %v9347_v35 = vadd.f32 1.0, %v6456_v2 }
 0xa97   :  { %v6460_v20 = vpop.eup %6459  ;;  %v9349_v56 = vadd.f32 1.0, %v6458_v14 }
 0xa98   :  { %v6462_v41 = vpop.eup %6461  ;;  %v4247_v1 = vmul.f32 %v6460_v20, %v4244_v27  ;;  %6467 = vrcp.f32 %v9347_v35  ;;  %vm4252_vm7 = vweird.f32 %v6460_v20  ;;  %vm4329_vm14 = vweird.f32 %v9347_v35 }
 0xa99   :  { %v6464_v53 = vpop.eup %6463  ;;  %v4285_v30 = vmul.f32 %v6462_v41, %v4282_v7  ;;  %6469 = vrcp.f32 %v9349_v56  ;;  %vm4290_vm8 = vweird.f32 %v6462_v41  ;;  %vm4253_vm11 = vmor %vm4251_vm5, %vm4252_vm7  ;;  %vm4266_vm12 = vweird.f32 %v9349_v56 }
 0xa9a   :  { %v4248_v57 = vsub.f32 1.0, %v4247_v1  ;;  %v9355_v21 = vadd.f32 1.0, %v6464_v53  ;;  %6471 = vpow2.f32 %v5721_v63  ;;  %v6466_v44 = vpop.eup %6465  ;;  %v4270_v42 = vand.u32 2147483647, %v9349_v56  ;;  %vm4291_vm13 = vmor %vm4289_vm6, %vm4290_vm8 }
 0xa9b   :  { %v4286_v8 = vsub.f32 1.0, %v4285_v30  ;;  %v4272_v47 = vand.u32 2147483648, %v9349_v56  ;;  %v4335_v29 = vand.u32 2147483648, %v9347_v35  ;;  %v5734_v63 = vsel %vm5732_vm15, 1.0, %v10072_v12 }
 0xa9c   :  { %v4249_v0 = vmul.f32 %v6460_v20, %v4248_v57  ;;  %6473 = vrcp.f32 %v9355_v21  ;;  %v4310_v32 = vand.u32 2147483648, %v9355_v21  ;;  %v4308_v9 = vand.u32 2147483647, %v9355_v21 }
 0xa9d   :  { %v4287_v19 = vmul.f32 %v6462_v41, %v4286_v8  ;;  %6475 = vtanh.f32 %v4236_v6  ;;  %v4273_v14 = vor.u32 1.1754944e-38, %v4272_v47  ;;  %vm4271_vm5 = vcmp.eq.f32.partialorder %v4270_v42, 8.507059e+37 }
 0xa9e   :  { %v9362_v33 = vpop.eup %6467  ;;  %v4250_v59 = vadd.f32 %v6460_v20, %v4249_v0  ;;  %v4333_v34 = vand.u32 2147483647, %v9347_v35  ;;  %vm4304_vm6 = vweird.f32 %v9355_v21  ;;  %v4311_v11 = vor.u32 1.1754944e-38, %v4310_v32 }
 0xa9f   :  { %v6470_v18 = vpop.eup %6469  ;;  %v4288_v37 = vadd.f32 %v6462_v41, %v4287_v19  ;;  %v4325_v55 = vmul.f32 %v9362_v33, %v9347_v35  ;;  %vm4330_vm2 = vweird.f32 %v9362_v33  ;;  %v6019_v35 = vunpack.i.l.bf16 %v6018_v40 }
 0xaa0   :  { %v4254_v51 = vsel %vm4253_vm11, %v6460_v20, %v4250_v59  ;;  %v4262_v25 = vmul.f32 %v6470_v18, %v9349_v56  ;;  %v6472_v52 = vpop.eup %6471  ;;  %vm4267_vm1 = vweird.f32 %v6470_v18  ;;  %vm9419_vm7 = vmor %vm4329_vm14, %vm4330_vm2 }
 0xaa1   :  { %v4259_v28 = vsel %vm9358_vm9, %v4258_v46, %v4254_v51  ;;  %v4292_v24 = vsel %vm4291_vm13, %v6462_v41, %v4288_v37  ;;  %v4326_v23 = vsub.f32 1.0, %v4325_v55  ;;  %v9388_v7 = vadd.f32 1.0, %v6472_v52  ;;  %vm4268_vm4 = vmor %vm4266_vm12, %vm4267_vm1 }
 0xaa2   :  { %v6474_v60 = vpop.eup %6473  ;;  %v4297_v43 = vsel %vm9364_vm10, %v4296_v3, %v4292_v24  ;;  %v4356_v27 = vmul.f32 %v6466_v44, %v4259_v28  ;;  %v4263_v58 = vsub.f32 1.0, %v4262_v25  ;;  %v5735_v41 = vsel %vm5733_vm0, 1.0, %v10072_v12 }
 0xaa3   :  { %v4354_v13 = vmul.f32 %v4297_v43, %v9261_v50  ;;  %v4300_v38 = vmul.f32 %v6474_v60, %v9355_v21  ;;  %v4327_v16 = vmul.f32 %v9362_v33, %v4326_v23  ;;  %v6476_v15 = vpop.eup %6475  ;;  %6477 = vrcp.f32 %v9388_v7 }
 0xaa4   :  { %v4264_v45 = vmul.f32 %v6470_v18, %v4263_v58  ;;  %vm4305_vm3 = vweird.f32 %v6474_v60  ;;  %v6021_v53 = vpack.i.bf16 %v5735_v41, %v5734_v63  ;;  %vm4309_vm9 = vcmp.eq.f32.partialorder %v4308_v9, 8.507059e+37  ;;  %v10121_v58 = vld [vmem:[#allocation50_spill] sm:$0xff] }
 0xaa5   :  { %v9401_v2 = vadd.f32 %v4356_v27, %v4354_v13  ;;  %v4301_v50 = vsub.f32 1.0, %v4300_v38  ;;  %v4328_v5 = vadd.f32 %v9362_v33, %v4327_v16  ;;  %vm4306_vm8 = vmor %vm4304_vm6, %vm4305_vm3  ;;  %v4336_v44 = vor.u32 1.1754944e-38, %v4335_v29 }
 0xaa6   :  { %v4265_v20 = vadd.f32 %v6470_v18, %v4264_v45  ;;  %6022 = vperm.xlu2 %6000, %v6021_v53   ;;  %vm4334_vm10 = vcmp.eq.f32.partialorder %v4333_v34, 8.507059e+37  ;;  %v4350_v42 = vand.u32 2147483648, %v9388_v7  ;;  %vm4344_vm12 = vweird.f32 %v9388_v7 }
 0xaa7   :  { %6479 = vtanh.f32 %v9401_v2  ;;  %v4302_v17 = vmul.f32 %v6474_v60, %v4301_v50  ;;  %v4332_v8 = vsel %vm9419_vm7, %v9362_v33, %v4328_v5  ;;  %v4348_v51 = vand.u32 2147483647, %v9388_v7  ;;  %v10124_v5 = vld [vmem:[#allocation58_spill] sm:$0xff] }
 0xaa8   :  { %v4269_v1 = vsel %vm4268_vm4, %v6470_v18, %v4265_v20  ;;  %v4337_v59 = vsel %vm4334_vm10, %v4336_v44, %v4332_v8  ;;  %v4351_v47 = vor.u32 1.1754944e-38, %v4350_v42  ;;  %v6020_v29 = vunpack.i.h.bf16 %v6018_v40  ;;  %v10126_v44 = vld [vmem:[#allocation8_spill] sm:$0xff] }
 0xaa9   :  { %v4274_v30 = vsel %vm4271_vm5, %v4273_v14, %v4269_v1  ;;  %v4303_v49 = vadd.f32 %v6474_v60, %v4302_v17  ;;  %v6478_v56 = vpop.eup %6477  ;;  %vm4349_vm14 = vcmp.eq.f32.partialorder %v4348_v51, 8.507059e+37  ;;  %v10123_v14 = vld [vmem:[#allocation59_spill] sm:$0xff]  ;;  %v2687_v63 = vadd.f32 %v10124_v5, %v10104_v22 }
 0xaaa   :  { %v4357_v6 = vmul.f32 %v6476_v15, %v4274_v30  ;;  %v4340_v0 = vmul.f32 %v6478_v56, %v9388_v7  ;;  %vm4345_vm11 = vweird.f32 %v6478_v56  ;;  %v2685_v7 = vadd.f32 %v10121_v58, %v10104_v22 }
 0xaab   :  { %v4307_v21 = vsel %vm4306_vm8, %v6474_v60, %v4303_v49  ;;  %vm4346_vm13 = vmor %vm4344_vm12, %vm4345_vm11  ;;  %v2638_v20 = vadd.f32 %v10123_v14, %v10102_v62  ;;  %vm5743_vm10 = vcmp.gt.f32.partialorder %v9396_v26, 7.0 }
 0xaac   :  { %v4312_v19 = vsel %vm4309_vm9, %v4311_v11, %v4307_v21  ;;  %v4341_v3 = vsub.f32 1.0, %v4340_v0  ;;  %v10125_v21 = vld [vmem:[#allocation51_spill] sm:$0xff]  ;;  %vm5742_vm9 = vcmp.gt.f32.partialorder %v9383_v36, 7.0 }
 0xaad   :  { %v6480_v61 = vpop.eup %6479  ;;  %v4355_v46 = vmul.f32 %v4312_v19, %v9289_v48  ;;  %v2734_v0 = vadd.f32 %v10125_v21, %v10110_v4  ;;  %v2785_v19 = vadd.f32 %v10126_v44, %v10106_v31  ;;  %v5744_v26 = vsel %vm5742_vm9, 1.0, %v10072_v12 }
 0xaae   :  { %v4362_v39 = vmul.f32 %v6480_v61, %v4337_v59  ;;  %v4342_v37 = vmul.f32 %v6478_v56, %v4341_v3 }
 0xaaf   :  { %v9428_v18 = vadd.f32 %v4357_v6, %v4355_v46 }
 0xab0   :  { %v4383_v33 = vmul.f32 %v6019_v35, %v4362_v39  ;;  %v4343_v55 = vadd.f32 %v6478_v56, %v4342_v37 }
 0xab1   :  { %6481 = vtanh.f32 %v9428_v18 }
 0xab2   :  { %v9435_v25 = vadd.f32 %v4383_v33, %v9296_v10  ;;  %v4347_v48 = vsel %vm4346_vm13, %v6478_v56, %v4343_v55  ;;  %v10120_v10 = vld [vmem:[#allocation57_spill] sm:$0xff] }
 0xab3   :  { %v4352_v28 = vsel %vm4349_vm14, %v4351_v47, %v4347_v48  ;;  %v2636_v27 = vadd.f32 %v10120_v10, %v10102_v62  ;;  %v10127_v48 = vld [vmem:[#allocation7_spill] sm:$0xff] }
 0xab4   :  { %v2736_v47 = vadd.f32 %v10127_v48, %v10110_v4 }
 0xab7   :  { %v6482_v52 = vpop.eup %6481 }
 0xab8   :  { %v4363_v24 = vmul.f32 %v6482_v52, %v4352_v28 }
 0xaba   :  { %v4384_v23 = vmul.f32 %v6020_v29, %v4363_v24  ;;  %v4395_v60 = vpack.c.bf16 %v4363_v24, %v4362_v39 }
 0xabc   :  { %v9438_v43 = vadd.f32 %v4384_v23, %v9299_v54  ;;  %4404 = vmatmul.bf16.vlgmr.msra.gmra.mxu0 %v4395_v60  ;;  %4418 = vmatmul.bf16.vlgmr.msra.gmra.mxu1 %v4395_v60  ;;  %v10122_v54 = vld [vmem:[#allocation56_spill] sm:$0xff] }
 0xabd   :  { %4432 = vmatmul.bf16.vlgmr.msrb.gmra.mxu2 %v4395_v60  ;;  %4446 = vmatmul.bf16.vlgmr.msrb.gmra.mxu3 %v4395_v60  ;;  %v2783_v50 = vadd.f32 %v10122_v54, %v10106_v31 }
 0xb39   :  { %v4405_v13 = vpop.f32.mrf.mxu0  ;;  %v4419_v38 = vpop.f32.mrf.mxu1 }
 0xb3a   :  { %v4452_v16 = vadd.f32 %v4405_v13, %v2636_v27  ;;  %v4453_v15 = vadd.f32 %v4419_v38, %v2685_v7 }
 0xb3c   :  { %v5726_v32 = vmul.f32 -1.442695, %v4452_v16  ;;  %v5728_v45 = vmul.f32 -1.442695, %v4453_v15 }
 0xb3e   :  { %6483 = vpow2.f32 %v5726_v32 }
 0xb3f   :  { %6485 = vpow2.f32 %v5728_v45 }
 0xb40   :  { %v4447_v41 = vpop.f32.mrf.mxu3  ;;  %v4433_v30 = vpop.f32.mrf.mxu2 }
 0xb41   :  { %v4455_v17 = vadd.f32 %v4447_v41, %v2783_v50  ;;  %v4407_v9 = vpop.f32.mrf.mxu0  ;;  %v4421_v1 = vpop.f32.mrf.mxu1  ;;  %v4454_v61 = vadd.f32 %v4433_v30, %v2734_v0 }
 0xb42   :  { %v4456_v34 = vadd.f32 %v4407_v9, %v2638_v20  ;;  %v4457_v53 = vadd.f32 %v4421_v1, %v2687_v63 }
 0xb43   :  { %v5730_v49 = vmul.f32 -1.442695, %v4455_v17 }
 0xb44   :  { %v6484_v40 = vpop.eup %6483  ;;  %v5727_v57 = vmul.f32 -1.442695, %v4456_v34  ;;  %v5729_v6 = vmul.f32 -1.442695, %v4457_v53 }
 0xb45   :  { %v6486_v56 = vpop.eup %6485  ;;  %v4466_v11 = vadd.f32 1.0, %v6484_v40  ;;  %6487 = vpow2.f32 %v5730_v49 }
 0xb46   :  { %v4504_v8 = vadd.f32 1.0, %v6486_v56  ;;  %6489 = vpow2.f32 %v5727_v57 }
 0xb47   :  { %6491 = vrcp.f32 %v4466_v11  ;;  %v4477_v52 = vand.u32 2147483647, %v4466_v11  ;;  %v4479_v60 = vand.u32 2147483648, %v4466_v11  ;;  %vm4473_vm15 = vweird.f32 %v4466_v11 }
 0xb48   :  { %6493 = vrcp.f32 %v4504_v8  ;;  %v4449_v35 = vpop.f32.mrf.mxu3  ;;  %v4435_v55 = vpop.f32.mrf.mxu2  ;;  %v4517_v23 = vand.u32 2147483648, %v4504_v8  ;;  %v4515_v27 = vand.u32 2147483647, %v4504_v8  ;;  %vm4511_vm0 = vweird.f32 %v4504_v8 }
 0xb49   :  { %6495 = vpow2.f32 %v5729_v6  ;;  %v4459_v46 = vadd.f32 %v4449_v35, %v2785_v19  ;;  %v4458_v7 = vadd.f32 %v4435_v55, %v2736_v47  ;;  %vm9465_vm3 = vcmp.eq.f32.partialorder %v4477_v52, 8.507059e+37 }
 0xb4a   :  { %6497 = vtanh.f32 %v4454_v61  ;;  %v4480_v45 = vor.u32 1.1754944e-38, %v4479_v60  ;;  %v4518_v50 = vor.u32 1.1754944e-38, %v4517_v23  ;;  %vm9471_vm4 = vcmp.eq.f32.partialorder %v4515_v27, 8.507059e+37 }
 0xb4b   :  { %v6488_v3 = vpop.eup %6487  ;;  %v5731_v42 = vmul.f32 -1.442695, %v4459_v46 }
 0xb4c   :  { %v6490_v59 = vpop.eup %6489  ;;  %v9454_v39 = vadd.f32 1.0, %v6488_v3 }
 0xb4d   :  { %v6492_v37 = vpop.eup %6491  ;;  %v9456_v33 = vadd.f32 1.0, %v6490_v59 }
 0xb4e   :  { %v6494_v51 = vpop.eup %6493  ;;  %v4469_v29 = vmul.f32 %v6492_v37, %v4466_v11  ;;  %6499 = vrcp.f32 %v9454_v39  ;;  %vm4474_vm1 = vweird.f32 %v6492_v37  ;;  %vm4551_vm8 = vweird.f32 %v9454_v39 }
 0xb4f   :  { %v6496_v28 = vpop.eup %6495  ;;  %v4507_v24 = vmul.f32 %v6494_v51, %v4504_v8  ;;  %6501 = vrcp.f32 %v9456_v33  ;;  %vm4512_vm2 = vweird.f32 %v6494_v51  ;;  %vm4475_vm5 = vmor %vm4473_vm15, %vm4474_vm1  ;;  %vm4488_vm6 = vweird.f32 %v9456_v33 }
 0xb50   :  { %v4470_v10 = vsub.f32 1.0, %v4469_v29  ;;  %v9462_v58 = vadd.f32 1.0, %v6496_v28  ;;  %6503 = vpow2.f32 %v5731_v42  ;;  %v6498_v16 = vpop.eup %6497  ;;  %v4492_v17 = vand.u32 2147483647, %v9456_v33  ;;  %vm4513_vm7 = vmor %vm4511_vm0, %vm4512_vm2 }
 0xb51   :  { %v4508_v13 = vsub.f32 1.0, %v4507_v24  ;;  %v4494_v34 = vand.u32 2147483648, %v9456_v33  ;;  %v4557_v53 = vand.u32 2147483648, %v9454_v39  ;;  %v5745_v42 = vsel %vm5743_vm10, 1.0, %v10072_v12  ;;  %v6023_v24 = vpop.permute.xlu2 %6022 }
 0xb52   :  { %v4471_v38 = vmul.f32 %v6492_v37, %v4470_v10  ;;  %6505 = vrcp.f32 %v9462_v58  ;;  %v4532_v61 = vand.u32 2147483648, %v9462_v58  ;;  %v4530_v48 = vand.u32 2147483647, %v9462_v58 }
 0xb53   :  { %v4509_v15 = vmul.f32 %v6494_v51, %v4508_v13  ;;  %6507 = vtanh.f32 %v4458_v7  ;;  %vm4493_vm15 = vcmp.eq.f32.partialorder %v4492_v17, 8.507059e+37  ;;  %v4555_v29 = vand.u32 2147483647, %v9454_v39 }
 0xb54   :  { %v9469_v54 = vpop.eup %6499  ;;  %v4472_v14 = vadd.f32 %v6492_v37, %v4471_v38  ;;  %v6026_v52 = vpack.i.bf16 %v5745_v42, %v5744_v26  ;;  %vm4526_vm0 = vweird.f32 %v9462_v58  ;;  %v4533_v60 = vor.u32 1.1754944e-38, %v4532_v61  ;;  %v10136_v61 = vld [vmem:[#allocation60_spill] sm:$0xff] }
 0xb55   :  { %v6502_v5 = vpop.eup %6501  ;;  %v4510_v63 = vadd.f32 %v6494_v51, %v4509_v15  ;;  %v4547_v41 = vmul.f32 %v9469_v54, %v9454_v39  ;;  %vm4552_vm12 = vweird.f32 %v9469_v54  ;;  %v4558_v27 = vor.u32 1.1754944e-38, %v4557_v53 }
 0xb56   :  { %v4476_v9 = vsel %vm4475_vm5, %v6492_v37, %v4472_v14  ;;  %v4484_v1 = vmul.f32 %v6502_v5, %v9456_v33  ;;  %v6504_v30 = vpop.eup %6503  ;;  %vm4489_vm11 = vweird.f32 %v6502_v5  ;;  %v4495_v37 = vor.u32 1.1754944e-38, %v4494_v34  ;;  %vm9516_vm1 = vmor %vm4551_vm8, %vm4552_vm12  ;;  %6027 = vperm.xlu0 %5988, %v6026_v52  }
 0xb57   :  { %v4481_v49 = vsel %vm9465_vm3, %v4480_v45, %v4476_v9  ;;  %v4514_v40 = vsel %vm4513_vm7, %v6494_v51, %v4510_v63  ;;  %v4548_v57 = vsub.f32 1.0, %v4547_v41  ;;  %v9490_v21 = vadd.f32 1.0, %v6504_v30  ;;  %vm4490_vm14 = vmor %vm4488_vm6, %vm4489_vm11 }
 0xb58   :  { %v6506_v56 = vpop.eup %6505  ;;  %v4519_v11 = vsel %vm9471_vm4, %v4518_v50, %v4514_v40  ;;  %v4578_v6 = vmul.f32 %v6498_v16, %v4481_v49  ;;  %v4485_v8 = vsub.f32 1.0, %v4484_v1  ;;  %vm4531_vm3 = vcmp.eq.f32.partialorder %v4530_v48, 8.507059e+37  ;;  %v10139_v48 = vld [vmem:[#allocation20_spill] sm:$0xff] }
 0xb59   :  { %v4576_v0 = vmul.f32 %v4519_v11, %v9401_v2  ;;  %v4522_v44 = vmul.f32 %v6506_v56, %v9462_v58  ;;  %v4549_v19 = vmul.f32 %v9469_v54, %v4548_v57  ;;  %v6508_v35 = vpop.eup %6507  ;;  %6509 = vrcp.f32 %v9490_v21  ;;  %v10135_v11 = vld [vmem:[#allocation9_spill] sm:$0xff] }
 0xb5a   :  { %v4486_v46 = vmul.f32 %v6502_v5, %v4485_v8  ;;  %vm4527_vm13 = vweird.f32 %v6506_v56  ;;  %v6024_v39 = vunpack.i.l.bf16 %v6023_v24  ;;  %vm4556_vm4 = vcmp.eq.f32.partialorder %v4555_v29, 8.507059e+37 }
 0xb5b   :  { %v9498_v3 = vadd.f32 %v4578_v6, %v4576_v0  ;;  %v4523_v59 = vsub.f32 1.0, %v4522_v44  ;;  %v4550_v55 = vadd.f32 %v9469_v54, %v4549_v19  ;;  %vm4528_vm2 = vmor %vm4526_vm0, %vm4527_vm13  ;;  %v4572_v63 = vand.u32 2147483648, %v9490_v21 }
 0xb5c   :  { %v4487_v2 = vadd.f32 %v6502_v5, %v4486_v46  ;;  %vm4566_vm6 = vweird.f32 %v9490_v21  ;;  %v4570_v41 = vand.u32 2147483647, %v9490_v21  ;;  %v6025_v1 = vunpack.i.h.bf16 %v6023_v24 }
 0xb5d   :  { %6511 = vtanh.f32 %v9498_v3  ;;  %v4524_v51 = vmul.f32 %v6506_v56, %v4523_v59  ;;  %v4554_v10 = vsel %vm9516_vm1, %v9469_v54, %v4550_v55  ;;  %v4573_v9 = vor.u32 1.1754944e-38, %v4572_v63 }
 0xb5e   :  { %v4491_v47 = vsel %vm4490_vm14, %v6502_v5, %v4487_v2  ;;  %v4559_v45 = vsel %vm4556_vm4, %v4558_v27, %v4554_v10  ;;  %vm4571_vm8 = vcmp.eq.f32.partialorder %v4570_v41, 8.507059e+37  ;;  %v2690_v6 = vadd.f32 %v10135_v11, %v10104_v22  ;;  %v10143_v41 = vld [vmem:[#allocation70_spill] sm:$0xff] }
 0xb5f   :  { %v4496_v36 = vsel %vm4493_vm15, %v4495_v37, %v4491_v47  ;;  %v4525_v28 = vadd.f32 %v6506_v56, %v4524_v51  ;;  %v6510_v33 = vpop.eup %6509  ;;  %v2788_v46 = vadd.f32 %v10136_v61, %v10106_v31  ;;  %v10138_v37 = vld [vmem:[#allocation62_spill] sm:$0xff]  ;;  %v4863_v61 = vand.u32 2147483648, %v10139_v48 }
 0xb60   :  { %v4579_v7 = vmul.f32 %v6508_v35, %v4496_v36  ;;  %v4562_v13 = vmul.f32 %v6510_v33, %v9490_v21  ;;  %vm4567_vm5 = vweird.f32 %v6510_v33  ;;  %v2692_v2 = vadd.f32 %v10138_v37, %v10104_v22  ;;  %v10141_v22 = vld [vmem:[#allocation10_spill] sm:$0xff] }
 0xb61   :  { %v4529_v58 = vsel %vm4528_vm2, %v6506_v56, %v4525_v28  ;;  %vm4568_vm7 = vmor %vm4566_vm6, %vm4567_vm5  ;;  %v10140_v28 = vld [vmem:[#allocation14_spill] sm:$0xff]  ;;  %v2739_v27 = vadd.f32 %v10141_v22, %v10110_v4 }
 0xb62   :  { %v4534_v38 = vsel %vm4531_vm3, %v4533_v60, %v4529_v58  ;;  %v4563_v32 = vsub.f32 1.0, %v4562_v13 }
 0xb63   :  { %v6512_v16 = vpop.eup %6511  ;;  %v4577_v15 = vmul.f32 %v4534_v38, %v9428_v18 }
 0xb64   :  { %v4584_v50 = vmul.f32 %v6512_v16, %v4559_v45  ;;  %v4564_v20 = vmul.f32 %v6510_v33, %v4563_v32 }
 0xb65   :  { %v9525_v14 = vadd.f32 %v4579_v7, %v4577_v15  ;;  %v10142_v7 = vld [vmem:[#allocation68_spill] sm:$0xff] }
 0xb66   :  { %v4605_v54 = vmul.f32 %v6024_v39, %v4584_v50  ;;  %v4565_v5 = vadd.f32 %v6510_v33, %v4564_v20  ;;  %v2790_v13 = vadd.f32 %v10142_v7, %v10106_v31 }
 0xb67   :  { %6513 = vtanh.f32 %v9525_v14 }
 0xb68   :  { %v9532_v17 = vadd.f32 %v4605_v54, %v9435_v25  ;;  %v4569_v18 = vsel %vm4568_vm7, %v6510_v33, %v4565_v5  ;;  %v10134_v25 = vld [vmem:[#allocation61_spill] sm:$0xff] }
 0xb69   :  { %v4574_v53 = vsel %vm4571_vm8, %v4573_v9, %v4569_v18  ;;  %v2641_v56 = vadd.f32 %v10134_v25, %v10102_v62  ;;  %v2741_v18 = vadd.f32 %v10143_v41, %v10110_v4 }
 0xb6d   :  { %v6514_v34 = vpop.eup %6513 }
 0xb6e   :  { %v4585_v30 = vmul.f32 %v6514_v34, %v4574_v53 }
 0xb70   :  { %v4606_v49 = vmul.f32 %v6025_v1, %v4585_v30  ;;  %v4617_v40 = vpack.c.bf16 %v4585_v30, %v4584_v50 }
 0xb72   :  { %4626 = vmatmul.bf16.vlgmr.msrb.gmra.mxu0 %v4617_v40  ;;  %4640 = vmatmul.bf16.vlgmr.msrb.gmra.mxu1 %v4617_v40  ;;  %v9535_v57 = vadd.f32 %v4606_v49, %v9438_v43  ;;  %v10137_v43 = vld [vmem:[#allocation63_spill] sm:$0xff] }
 0xb73   :  { %4654 = vmatmul.bf16.vlgmr.msra.gmra.mxu2 %v4617_v40  ;;  %4668 = vmatmul.bf16.vlgmr.msra.gmra.mxu3 %v4617_v40  ;;  %v2643_v59 = vadd.f32 %v10137_v43, %v10102_v62 }
 0xbef   :  { %v4627_v8 = vpop.f32.mrf.mxu0  ;;  %v4641_v21 = vpop.f32.mrf.mxu1 }
 0xbf0   :  { %v4674_v0 = vadd.f32 %v4627_v8, %v2641_v56  ;;  %v4675_v44 = vadd.f32 %v4641_v21, %v2690_v6 }
 0xbf2   :  { %v5736_v19 = vmul.f32 -1.442695, %v4674_v0  ;;  %v5738_v35 = vmul.f32 -1.442695, %v4675_v44 }
 0xbf4   :  { %6515 = vpow2.f32 %v5736_v19 }
 0xbf5   :  { %6517 = vpow2.f32 %v5738_v35 }
 0xbf6   :  { %v4669_v55 = vpop.f32.mrf.mxu3  ;;  %6519 = vrcp.f32 %v10139_v48  ;;  %v4655_v60 = vpop.f32.mrf.mxu2 }
 0xbf7   :  { %v4677_v26 = vadd.f32 %v4669_v55, %v2788_v46  ;;  %v4629_v42 = vpop.f32.mrf.mxu0  ;;  %v4643_v51 = vpop.f32.mrf.mxu1  ;;  %6521 = vrcp.f32 %v10140_v28  ;;  %v4676_v39 = vadd.f32 %v4655_v60, %v2739_v27 }
 0xbf8   :  { %v4678_v47 = vadd.f32 %v4629_v42, %v2643_v59  ;;  %v4679_v29 = vadd.f32 %v4643_v51, %v2692_v2 }
 0xbf9   :  { %v5740_v52 = vmul.f32 -1.442695, %v4677_v26 }
 0xbfa   :  { %v6516_v36 = vpop.eup %6515  ;;  %v5737_v24 = vmul.f32 -1.442695, %v4678_v47  ;;  %v5739_v62 = vmul.f32 -1.442695, %v4679_v29 }
 0xbfb   :  { %v6518_v23 = vpop.eup %6517  ;;  %v4688_v33 = vadd.f32 1.0, %v6516_v36  ;;  %6523 = vpow2.f32 %v5740_v52 }
 0xbfc   :  { %v4726_v10 = vadd.f32 1.0, %v6518_v23  ;;  %6525 = vpow2.f32 %v5737_v24  ;;  %v9551_v58 = vpop.eup %6519 }
 0xbfd   :  { %6527 = vrcp.f32 %v4688_v33  ;;  %v9555_v16 = vpop.eup %6521  ;;  %v4853_v45 = vmul.f32 %v9551_v58, %v10139_v48  ;;  %v4699_v25 = vand.u32 2147483647, %v4688_v33  ;;  %v4701_v56 = vand.u32 2147483648, %v4688_v33 }
 0xbfe   :  { %6529 = vrcp.f32 %v4726_v10  ;;  %v4671_v38 = vpop.f32.mrf.mxu3  ;;  %v9568_v53 = vmul.f32 %v9555_v16, %v10140_v28  ;;  %v4657_v49 = vpop.f32.mrf.mxu2  ;;  %v4739_v4 = vand.u32 2147483648, %v4726_v10  ;;  %v4737_v8 = vand.u32 2147483647, %v4726_v10 }
 0xbff   :  { %6531 = vpow2.f32 %v5739_v62  ;;  %v4681_v15 = vadd.f32 %v4671_v38, %v2790_v13  ;;  %v4854_v34 = vsub.f32 1.0, %v4853_v45  ;;  %v4680_v0 = vadd.f32 %v4657_v49, %v2741_v18 }
 0xc00   :  { %6533 = vtanh.f32 %v4676_v39  ;;  %vm4733_vm11 = vweird.f32 %v4726_v10  ;;  %vm4695_vm12 = vweird.f32 %v4688_v33  ;;  %vm4700_vm13 = vcmp.eq.f32.partialorder %v4699_v25, 8.507059e+37 }
 0xc01   :  { %v6524_v32 = vpop.eup %6523  ;;  %v5741_v63 = vmul.f32 -1.442695, %v4681_v15  ;;  %v9575_v19 = vmul.f32 %v9551_v58, %v4854_v34  ;;  %v4740_v37 = vor.u32 1.1754944e-38, %v4739_v4  ;;  %v4702_v2 = vor.u32 1.1754944e-38, %v4701_v56 }
 0xc02   :  { %v6526_v50 = vpop.eup %6525  ;;  %v9559_v20 = vadd.f32 1.0, %v6524_v32  ;;  %vm4738_vm0 = vcmp.eq.f32.partialorder %v4737_v8, 8.507059e+37 }
 0xc03   :  { %v6528_v54 = vpop.eup %6527  ;;  %v9561_v5 = vadd.f32 1.0, %v6526_v50  ;;  %v4856_v8 = vadd.f32 %v9551_v58, %v9575_v19  ;;  %v4864_v19 = vor.u32 1.1754944e-38, %v4863_v61 }
 0xc04   :  { %v6530_v31 = vpop.eup %6529  ;;  %v4691_v9 = vmul.f32 %v6528_v54, %v4688_v33  ;;  %6535 = vrcp.f32 %v9559_v20  ;;  %vm4696_vm9 = vweird.f32 %v6528_v54  ;;  %v4779_v45 = vand.u32 2147483648, %v9559_v20 }
 0xc05   :  { %v6532_v1 = vpop.eup %6531  ;;  %v4729_v30 = vmul.f32 %v6530_v31, %v4726_v10  ;;  %6537 = vrcp.f32 %v9561_v5  ;;  %vm4734_vm10 = vweird.f32 %v6530_v31  ;;  %vm4697_vm14 = vmor %vm4695_vm12, %vm4696_vm9  ;;  %v4716_v24 = vand.u32 2147483648, %v9561_v5 }
 0xc06   :  { %v4692_v40 = vsub.f32 1.0, %v4691_v9  ;;  %v9571_v11 = vadd.f32 1.0, %v6532_v1  ;;  %6539 = vpow2.f32 %v5741_v63  ;;  %v6534_v44 = vpop.eup %6533  ;;  %vm4735_vm15 = vmor %vm4733_vm11, %vm4734_vm10  ;;  %vm4710_vm1 = vweird.f32 %v9561_v5 }
 0xc07   :  { %v4730_v6 = vsub.f32 1.0, %v4729_v30  ;;  %v4714_v38 = vand.u32 2147483647, %v9561_v5  ;;  %vm4773_vm7 = vweird.f32 %v9559_v20  ;;  %v4777_v9 = vand.u32 2147483647, %v9559_v20  ;;  %v5930_v30 = vld [vmem:[%s9720_s10 + $0x18] sm:$0xff] }
 0xc08   :  { %v4693_v21 = vmul.f32 %v6528_v54, %v4692_v40  ;;  %6541 = vrcp.f32 %v9571_v11  ;;  %v4754_v32 = vand.u32 2147483648, %v9571_v11  ;;  %v4752_v41 = vand.u32 2147483647, %v9571_v11 }
 0xc09   :  { %v4731_v35 = vmul.f32 %v6530_v31, %v4730_v6  ;;  %6543 = vtanh.f32 %v4680_v0  ;;  %vm4715_vm6 = vcmp.eq.f32.partialorder %v4714_v38, 8.507059e+37  ;;  %vm4748_vm8 = vweird.f32 %v9571_v11 }
 0xc0a   :  { %v9578_v46 = vpop.eup %6535  ;;  %v4694_v43 = vadd.f32 %v6528_v54, %v4693_v21  ;;  %vm4857_vm10 = vweird.f32 %v10139_v48  ;;  %v4755_v49 = vor.u32 1.1754944e-38, %v4754_v32  ;;  %vm4858_vm12 = vweird.f32 %v9551_v58 }
 0xc0b   :  { %v6538_v59 = vpop.eup %6537  ;;  %v4732_v55 = vadd.f32 %v6530_v31, %v4731_v35  ;;  %v4769_v26 = vmul.f32 %v9578_v46, %v9559_v20  ;;  %vm4774_vm3 = vweird.f32 %v9578_v46  ;;  %v4780_v6 = vor.u32 1.1754944e-38, %v4779_v45 }
 0xc0c   :  { %v4698_v42 = vsel %vm4697_vm14, %v6528_v54, %v4694_v43  ;;  %v4706_v51 = vmul.f32 %v6538_v59, %v9561_v5  ;;  %v6540_v47 = vpop.eup %6539  ;;  %vm4711_vm2 = vweird.f32 %v6538_v59  ;;  %v4717_v54 = vor.u32 1.1754944e-38, %v4716_v24  ;;  %vm9604_vm9 = vmor %vm4773_vm7, %vm4774_vm3 }
 0xc0d   :  { %v4703_v29 = vsel %vm4700_vm13, %v4702_v2, %v4698_v42  ;;  %v4736_v52 = vsel %vm4735_vm15, %v6530_v31, %v4732_v55  ;;  %v4770_v36 = vsub.f32 1.0, %v4769_v26  ;;  %v9585_v10 = vadd.f32 1.0, %v6540_v47  ;;  %vm4712_vm5 = vmor %vm4710_vm1, %vm4711_vm2 }
 0xc0e   :  { %v6542_v23 = vpop.eup %6541  ;;  %v4741_v33 = vsel %vm4738_vm0, %v4740_v37, %v4736_v52  ;;  %v4800_v60 = vmul.f32 %v6534_v44, %v4703_v29  ;;  %v4707_v62 = vsub.f32 1.0, %v4706_v51  ;;  %vm4753_vm13 = vcmp.eq.f32.partialorder %v4752_v41, 8.507059e+37  ;;  %vm9620_vm15 = vmor %vm4857_vm10, %vm4858_vm12 }
 0xc0f   :  { %v4798_v22 = vmul.f32 %v4741_v33, %v9498_v3  ;;  %v4744_v27 = vmul.f32 %v6542_v23, %v9571_v11  ;;  %v4771_v7 = vmul.f32 %v9578_v46, %v4770_v36  ;;  %6545 = vrcp.f32 %v9585_v10  ;;  %v6544_v50 = vpop.eup %6543  ;;  %v6028_v11 = vpop.permute.xlu0 %6027 }
 0xc10   :  { %v4708_v13 = vmul.f32 %v6538_v59, %v4707_v62  ;;  %vm4749_vm4 = vweird.f32 %v6542_v23  ;;  %vm4778_vm14 = vcmp.eq.f32.partialorder %v4777_v9, 8.507059e+37  ;;  %v4861_v21 = vand.u32 2147483647, %v10139_v48 }
 0xc11   :  { %v4802_v39 = vadd.f32 %v4800_v60, %v4798_v22  ;;  %v4745_v15 = vsub.f32 1.0, %v4744_v27  ;;  %v4772_v63 = vadd.f32 %v9578_v46, %v4771_v7  ;;  %vm4750_vm11 = vmor %vm4748_vm8, %vm4749_vm4  ;;  %v6029_v37 = vunpack.i.l.bf16 %v6028_v11 }
 0xc12   :  { %v4709_v3 = vadd.f32 %v6538_v59, %v4708_v13  ;;  %vm4862_vm1 = vcmp.eq.f32.partialorder %v4861_v21, 8.507059e+37  ;;  %v4794_v47 = vand.u32 2147483648, %v9585_v10  ;;  %vm4788_vm2 = vweird.f32 %v9585_v10  ;;  %v5941_v21 = vld [vmem:[%s9721_s12 + $0x30] sm:$0xff] }
 0xc13   :  { %6547 = vtanh.f32 %v4802_v39  ;;  %v4746_v31 = vmul.f32 %v6542_v23, %v4745_v15  ;;  %v4776_v25 = vsel %vm9604_vm9, %v9578_v46, %v4772_v63  ;;  %v4792_v29 = vand.u32 2147483647, %v9585_v10 }
 0xc14   :  { %v4713_v18 = vsel %vm4712_vm5, %v6538_v59, %v4709_v3  ;;  %v4781_v46 = vsel %vm4778_vm14, %v4780_v6, %v4776_v25  ;;  %v4869_v59 = vsub.f32 1.0, %v9568_v53  ;;  %vm4872_vm4 = vweird.f32 %v10140_v28 }
 0xc15   :  { %v4718_v1 = vsel %vm4715_vm6, %v4717_v54, %v4713_v18  ;;  %v4747_v34 = vadd.f32 %v6542_v23, %v4746_v31  ;;  %v6546_v5 = vpop.eup %6545  ;;  %vm4873_vm5 = vweird.f32 %v9555_v16  ;;  %v4878_v24 = vand.u32 2147483648, %v10140_v28 }
 0xc16   :  { %v4801_v40 = vmul.f32 %v6544_v50, %v4718_v1  ;;  %v4784_v56 = vmul.f32 %v6546_v5, %v9585_v10  ;;  %vm4789_vm0 = vweird.f32 %v6546_v5  ;;  %v4870_v53 = vmul.f32 %v9555_v16, %v4869_v59  ;;  %vm4874_vm7 = vmor %vm4872_vm4, %vm4873_vm5  ;;  %v5933_v1 = vld [vmem:[%s9720_s10 + $0x30] sm:$0xff] }
 0xc17   :  { %v4751_v20 = vsel %vm4750_vm11, %v6542_v23, %v4747_v34  ;;  %vm4790_vm3 = vmor %vm4788_vm2, %vm4789_vm0  ;;  %vm4793_vm6 = vcmp.eq.f32.partialorder %v4792_v29, 8.507059e+37  ;;  %v4876_v33 = vand.u32 2147483647, %v10140_v28  ;;  %v4879_v22 = vor.u32 1.1754944e-38, %v4878_v24  ;;  %v5931_v34 = vld [vmem:[%s9720_s10 + $0x20] sm:$0xff] }
 0xc18   :  { %v4756_v4 = vsel %vm4753_vm13, %v4755_v49, %v4751_v20  ;;  %v4785_v35 = vsub.f32 1.0, %v4784_v56  ;;  %v4871_v23 = vadd.f32 %v9555_v16, %v4870_v53  ;;  %v4882_v15 = vlaneseq  ;;  %v5928_v20 = vld [vmem:[%s9720_s10 + $0x8] sm:$0xff]  ;;  %v5927_v56 = vld [vmem:[%s9720_s10] sm:$0xff] }
 0xc19   :  { %v6548_v0 = vpop.eup %6547  ;;  %v4799_v44 = vmul.f32 %v4756_v4, %v9525_v14  ;;  %v4860_v14 = vsel %vm9620_vm15, %v9551_v58, %v4856_v8  ;;  %v4795_v58 = vor.u32 1.1754944e-38, %v4794_v47  ;;  %vm4877_vm8 = vcmp.eq.f32.partialorder %v4876_v33, 8.507059e+37  ;;  %v6031_v47 = vld [vmem:[%s9717_s8] ss:$0 sm:$0xff] }
 0xc1a   :  { %v4806_v2 = vmul.f32 %v6548_v0, %v4781_v46  ;;  %v4786_v26 = vmul.f32 %v6546_v5, %v4785_v35  ;;  %v4865_v61 = vsel %vm4862_vm1, %v4864_v19, %v4860_v14  ;;  %v4875_v7 = vsel %vm4874_vm7, %v9555_v16, %v4871_v23  ;;  %v5940_v46 = vld [vmem:[%s9721_s12 + $0x28] sm:$0xff] }
 0xc1b   :  { %v4803_v55 = vadd.f32 %v4801_v40, %v4799_v44  ;;  %v4880_v38 = vsel %vm4877_vm8, %v4879_v22, %v4875_v7  ;;  %v4883_v32 = vand.u32 127, %v4882_v15 }
 0xc1c   :  { %v4827_v42 = vmul.f32 %v6029_v37, %v4806_v2  ;;  %v4787_v51 = vadd.f32 %v6546_v5, %v4786_v26  ;;  %v5939_v37 = vld [vmem:[%s9721_s12 + $0x20] sm:$0xff] }
 0xc1d   :  { %6549 = vtanh.f32 %v4803_v55  ;;  %vm4884_vm9 = vcmp.lt.s32.totalorder %v4883_v32, 32 }
 0xc1e   :  { %v4829_v48 = vadd.f32 %v4827_v42, %v9532_v17  ;;  %v4791_v52 = vsel %vm4790_vm3, %v6546_v5, %v4787_v51  ;;  %v6030_v17 = vunpack.i.h.bf16 %v6028_v11  ;;  %v5746_v50 = vsel %vm4884_vm9, 1.0, %v10072_v12  ;;  %v5932_v12 = vld [vmem:[%s9720_s10 + $0x28] sm:$0xff]  ;;  %v5929_v5 = vld [vmem:[%s9720_s10 + $0x10] sm:$0xff]  ;;  %v5942_v11 = vld [vmem:[%s9721_s12 + $0x38] sm:$0xff] }
 0xc1f   :  { %v4796_v62 = vsel %vm4793_vm6, %v4795_v58, %v4791_v52  ;;  %5095 = vmatpush.bf16.msra.mxu1 %v5942_v11 }
 0xc20   :  { %v4866_v36 = vmul.f32 %v4865_v61, %v4829_v48  ;;  %v6032_v61 = vld [vmem:[%s9718_s9] ss:$0 sm:$0xff] }
 0xc22   :  { %4887 = vadd.xlane.f32.xlu1 %v4866_v36 }
 0xc23   :  { %v6550_v60 = vpop.eup %6549  ;;  %5096 = vmatpush.bf16.msra.mxu1 %v5941_v21 }
 0xc24   :  { %v4807_v10 = vmul.f32 %v6550_v60, %v4796_v62  ;;  %v5938_v60 = vld [vmem:[%s9721_s12 + $0x18] sm:$0xff]  ;;  %v5937_v62 = vld [vmem:[%s9721_s12 + $0x10] sm:$0xff] }
 0xc26   :  { %v4828_v27 = vmul.f32 %v6030_v17, %v4807_v10  ;;  %v5936_v17 = vld [vmem:[%s9721_s12 + $0x8] sm:$0xff]  ;;  %v5935_v10 = vld [vmem:[%s9721_s12] sm:$0xff] }
 0xc27   :  { %5097 = vmatpush.bf16.msra.mxu1 %v5940_v46 }
 0xc28   :  { %v4830_v13 = vadd.f32 %v4828_v27, %v9535_v57  ;;  %v5934_v57 = vld [vmem:[%s9720_s10 + $0x38] sm:$0xff]  ;;  %v6033_v27 = vld [vmem:[%s9719_s11] ss:$0 sm:$0xff] }
 0xc29   :  { %5010 = vmatpush.bf16.msra.mxu0 %v5934_v57 }
 0xc2a   :  { %v4881_v39 = vmul.f32 %v4880_v38, %v4830_v13 }
 0xc2b   :  { %5098 = vmatpush.bf16.msra.mxu1 %v5939_v37 }
 0xc2c   :  { %4889 = vadd.xlane.f32.xlu2 %v4881_v39 }
 0xc2d   :  { %5011 = vmatpush.bf16.msra.mxu0 %v5933_v1 }
 0xc2f   :  { %5099 = vmatpush.bf16.msra.mxu1 %v5938_v60 }
 0xc31   :  { %5012 = vmatpush.bf16.msra.mxu0 %v5932_v12 }
 0xc33   :  { %5100 = vmatpush.bf16.msra.mxu1 %v5937_v62 }
 0xc35   :  { %5013 = vmatpush.bf16.msra.mxu0 %v5931_v34 }
 0xc37   :  { %5101 = vmatpush.bf16.msra.mxu1 %v5936_v17 }
 0xc39   :  { %5014 = vmatpush.bf16.msra.mxu0 %v5930_v30 }
 0xc3b   :  { %5102 = vmatpush.bf16.msra.mxu1 %v5935_v10 }
 0xc3d   :  { %5015 = vmatpush.bf16.msra.mxu0 %v5929_v5 }
 0xc41   :  { %5016 = vmatpush.bf16.msra.mxu0 %v5928_v20 }
 0xc45   :  { %5017 = vmatpush.bf16.msra.mxu0 %v5927_v56 }
 0xc95   :  { %v4888_v45 = vpop.xlane.xlu1 %4887 }
 0xc96   :  { %v4891_v28 = vmul.f32 0.03125, %v4888_v45  ;;  %v6034_v45 = vld [vmem:[%s9722_s13] ss:$0 sm:$0xff] }
 0xc98   :  { %v4893_v3 = vsub.f32 %v4866_v36, %v4891_v28 }
 0xc9a   :  { %v4895_v54 = vmul.f32 %v5746_v50, %v4893_v3 }
 0xc9c   :  { %v4897_v63 = vmul.f32 %v4895_v54, %v4895_v54 }
 0xc9e   :  { %4899 = vadd.xlane.f32.xlu0 %v4897_v63 }
 0xc9f   :  { %v4890_v31 = vpop.xlane.xlu2 %4889 }
 0xca0   :  { %v4892_v41 = vmul.f32 0.03125, %v4890_v31 }
 0xca2   :  { %v4894_v16 = vsub.f32 %v4881_v39, %v4892_v41 }
 0xca4   :  { %v4896_v18 = vmul.f32 %v5746_v50, %v4894_v16 }
 0xca6   :  { %v4898_v9 = vmul.f32 %v4896_v18, %v4896_v18 }
 0xca8   :  { %4901 = vadd.xlane.f32.xlu2 %v4898_v9 }
 0xd11   :  { %v4900_v49 = vpop.xlane.xlu0 %4899 }
 0xd12   :  { %v4903_v40 = vmul.f32 0.03125, %v4900_v49 }
 0xd14   :  { %v4905_v25 = vadd.f32 1e-05, %v4903_v40 }
 0xd16   :  { %6551 = vrsqrt.f32 %v4905_v25  ;;  %vm4913_vm11 = vweird.f32 %v4905_v25 }
 0xd1b   :  { %v4902_v6 = vpop.xlane.xlu2 %4901 }
 0xd1c   :  { %v6552_v4 = vpop.eup %6551  ;;  %v4904_v8 = vmul.f32 0.03125, %v4902_v6 }
 0xd1d   :  { %v4908_v0 = vmul.f32 %v6552_v4, %v4905_v25  ;;  %vm4914_vm10 = vweird.f32 %v6552_v4 }
 0xd1e   :  { %v4906_v44 = vadd.f32 1e-05, %v4904_v8  ;;  %vm4915_vm12 = vmor %vm4913_vm11, %vm4914_vm10 }
 0xd1f   :  { %v4909_v35 = vmul.f32 %v6552_v4, %v4908_v0 }
 0xd20   :  { %6553 = vrsqrt.f32 %v4906_v44  ;;  %vm4923_vm14 = vweird.f32 %v4906_v44 }
 0xd21   :  { %v4910_v43 = vmul.f32 0.5, %v4909_v35 }
 0xd23   :  { %v4911_v59 = vsub.f32 1.5, %v4910_v43 }
 0xd25   :  { %v4912_v55 = vmul.f32 %v6552_v4, %v4911_v59 }
 0xd26   :  { %v6554_v2 = vpop.eup %6553 }
 0xd27   :  { %v4918_v26 = vmul.f32 %v6554_v2, %v4906_v44  ;;  %v4916_v42 = vsel %vm4915_vm12, %v6552_v4, %v4912_v55  ;;  %vm4924_vm13 = vweird.f32 %v6554_v2 }
 0xd28   :  { %v4927_v53 = vmul.f32 %v4916_v42, %v4895_v54  ;;  %vm4925_vm15 = vmor %vm4923_vm14, %vm4924_vm13 }
 0xd29   :  { %v4919_v19 = vmul.f32 %v6554_v2, %v4918_v26 }
 0xd2a   :  { %v4933_v52 = vmul.f32 %v6031_v47, %v4927_v53 }
 0xd2b   :  { %v4920_v14 = vmul.f32 0.5, %v4919_v19 }
 0xd2c   :  { %v4939_v24 = vadd.f32 %v6032_v61, %v4933_v52 }
 0xd2d   :  { %v4921_v51 = vsub.f32 1.5, %v4920_v14 }
 0xd2f   :  { %v4922_v29 = vmul.f32 %v6554_v2, %v4921_v51 }
 0xd31   :  { %v4926_v48 = vsel %vm4925_vm15, %v6554_v2, %v4922_v29 }
 0xd32   :  { %v4928_v36 = vmul.f32 %v4926_v48, %v4896_v18 }
 0xd34   :  { %v4934_v58 = vmul.f32 %v6031_v47, %v4928_v36 }
 0xd36   :  { %v4940_v23 = vadd.f32 %v6032_v61, %v4934_v58 }
 0xd38   :  { %v4941_v33 = vpack.c.bf16 %v4940_v23, %v4939_v24 }
 0xd3a   :  { %5018 = vmatmul.bf16.vlgmr.msra.gmra.mxu0 %v4941_v33 }
 0xdb7   :  { %v5019_v22 = vpop.f32.mrf.mxu0 }
 0xdb8   :  { %v5020_v7 = vadd.f32 %v6033_v27, %v5019_v22 }
 0xdba   :  { %v5024_v39 = vmax.f32 %v5020_v7, 0.0 }
 0xdbf   :  { %v5021_v13 = vpop.f32.mrf.mxu0 }
 0xdc0   :  { %v5022_v38 = vadd.f32 %v6033_v27, %v5021_v13 }
 0xdc2   :  { %v5025_v15 = vmax.f32 %v5022_v38, 0.0 }
 0xdc4   :  { %v5026_v32 = vpack.c.bf16 %v5025_v15, %v5024_v39 }
 0xdc6   :  { %5103 = vmatmul.bf16.vlgmr.msra.gmra.mxu1 %v5026_v32 }
 0xe43   :  { %v5104_v28 = vpop.f32.mrf.mxu1 }
 0xe44   :  { %v5105_v50 = vadd.f32 %v6034_v45, %v5104_v28 }
 0xe46   :  { %5109 = vst [vmem:[%s9723_s14] sm:$0xff] %v5105_v50 }
 0xe4b   :  { %v5106_v3 = vpop.f32.mrf.mxu1 }
 0xe4c   :  { %v5107_v54 = vadd.f32 %v6034_v45, %v5106_v3 }
 0xe4e   :  { %5110 = vst [vmem:[%s9723_s14 + $0x8] sm:$0xff] %v5107_v54 }

</bundles_post_ra>
